<compile_context>
chip_gen: v7x
topology: tpu7x:2x2x1
jax: 0.10.0
libtpu: 0.0.40
codegen_flags: <defaults>
</compile_context>

<pallas_src>
import functools
import math

import jax
import jax.numpy as jnp
import numpy as np
from jax.experimental import pallas as pl
from jax.experimental.pallas import tpu as pltpu

NEG_INF = -1e9
_VMEM_LIMIT = 48 * 1024 * 1024   # safe on v5e/v6e (128 MiB) and v7x (64 MiB) per-TC VMEM


def _gelu(x):
    c = math.sqrt(2.0 / math.pi)
    return 0.5 * x * (1.0 + jnp.tanh(c * (x + 0.044715 * x * x * x)))


# ---------------------------------------------------------------------------
# Fused per-sub-layer kernel (one DecoderLayerBase per batch element)
# ---------------------------------------------------------------------------

def _sublayer_kernel(
        x_ref, enc_ref, tgtb_ref, srcb_ref,
        ln1_g, ln1_b, sa_wqkv, sa_bqkv, sa_wo, sa_bo,
        ln2_g, ln2_b, ca_wq, ca_bq, ca_wkv, ca_bkv, ca_wo, ca_bo,
        lnf_g, lnf_b, ff_w1, ff_b1, ff_w2, ff_b2,
        o_ref, *, num_head, eps):
    x = x_ref[0].astype(jnp.float32)        # (Lq, D)  decoder state
    enc = enc_ref[0].astype(jnp.float32)    # (Lk, D)  encoder output
    tgt_bias = tgtb_ref[0]                  # (Lq, Lq) additive attention bias
    src_bias = srcb_ref[0]                  # (Lq, Lk) additive attention bias

    def ln(v, g_ref, b_ref):
        mu = jnp.mean(v, axis=-1, keepdims=True)
        vc = v - mu
        var = jnp.mean(vc * vc, axis=-1, keepdims=True)
        return (vc * jax.lax.rsqrt(var + eps)) * g_ref[...] + b_ref[...]

    def mha(q, k, v, bias, wo_ref, bo_ref):
        lq, a = q.shape
        dh = a // num_head
        scale = 1.0 / math.sqrt(dh)
        out = jnp.zeros((lq, wo_ref.shape[1]), jnp.float32)
        for h in range(num_head):
            sl = slice(h * dh, (h + 1) * dh)
            qh, kh, vh = q[:, sl], k[:, sl], v[:, sl]
            s = jax.lax.dot_general(qh, kh, (((1,), (1,)), ((), ())),
                                    preferred_element_type=jnp.float32)
            s = s * scale + bias
            m = jnp.max(s, axis=-1, keepdims=True)
            p = jnp.exp(s - m)
            p = p * pl.reciprocal(jnp.sum(p, axis=-1, keepdims=True), approx=True)
            oh = jnp.dot(p, vh, preferred_element_type=jnp.float32)
            # fold the head-merge (concat) into the output projection
            out = out + jnp.dot(oh, wo_ref[sl, :], preferred_element_type=jnp.float32)
        return out + bo_ref[...]

    A = sa_wo.shape[0]

    # --- self-attention block (pre-norm) ---
    xn = ln(x, ln1_g, ln1_b)
    qkv = jnp.dot(xn, sa_wqkv[...], preferred_element_type=jnp.float32) + sa_bqkv[...]
    ctx = mha(qkv[:, :A], qkv[:, A:2 * A], qkv[:, 2 * A:], tgt_bias, sa_wo, sa_bo) + x

    # --- cross-attention block ---
    cn = ln(ctx, ln2_g, ln2_b)
    q = jnp.dot(cn, ca_wq[...], preferred_element_type=jnp.float32) + ca_bq[...]
    kv = jnp.dot(enc, ca_wkv[...], preferred_element_type=jnp.float32) + ca_bkv[...]
    ctx = mha(q, kv[:, :A], kv[:, A:], src_bias, ca_wo, ca_bo) + ctx

    # --- position-wise feed-forward block ---
    fn = ln(ctx, lnf_g, lnf_b)
    h1 = _gelu(jnp.dot(fn, ff_w1[...], preferred_element_type=jnp.float32) + ff_b1[...])
    ff = jnp.dot(h1, ff_w2[...], preferred_element_type=jnp.float32) + ff_b2[...]

    o_ref[0] = (ff + ctx).astype(o_ref.dtype)


def decoder_sublayer(inpute, inputo, sub, src_bias, tgt_bias, *, num_head, eps=1e-6):
    B, Lq, D = inputo.shape
    Lk = inpute.shape[1]
    A = sub["sa_wo"].shape[0]
    F = sub["ff_w1"].shape[1]

    def full(shape):
        return pl.BlockSpec(shape, lambda b: (0,) * len(shape))

    kernel = functools.partial(_sublayer_kernel, num_head=num_head, eps=eps)
    return pl.pallas_call(
        kernel,
        out_shape=jax.ShapeDtypeStruct((B, Lq, D), inputo.dtype),
        grid=(B,),
        in_specs=[
            pl.BlockSpec((1, Lq, D), lambda b: (b, 0, 0)),    # decoder state
            pl.BlockSpec((1, Lk, D), lambda b: (b, 0, 0)),    # encoder output
            pl.BlockSpec((1, Lq, Lq), lambda b: (b, 0, 0)),   # tgt bias (no H broadcast)
            pl.BlockSpec((1, Lq, Lk), lambda b: (b, 0, 0)),   # src bias (no H broadcast)
            full((1, D)), full((1, D)),                               # LN1
            full((D, 3 * A)), full((1, 3 * A)), full((A, D)), full((1, D)),  # self-attn
            full((1, D)), full((1, D)),                               # LN2
            full((D, A)), full((1, A)), full((D, 2 * A)), full((1, 2 * A)),  # cross q/kv
            full((A, D)), full((1, D)),                               # cross out-proj
            full((1, D)), full((1, D)),                               # LN_ff
            full((D, F)), full((1, F)), full((F, D)), full((1, D)),   # FFN
        ],
        out_specs=pl.BlockSpec((1, Lq, D), lambda b: (b, 0, 0)),
        compiler_params=pltpu.CompilerParams(
            dimension_semantics=("parallel",),
            vmem_limit_bytes=_VMEM_LIMIT),
    )(inputo, inpute, tgt_bias, src_bias,
      sub["ln1_g"], sub["ln1_b"],
      sub["sa_wqkv"], sub["sa_bqkv"], sub["sa_wo"], sub["sa_bo"],
      sub["ln2_g"], sub["ln2_b"],
      sub["ca_wq"], sub["ca_bq"], sub["ca_wkv"], sub["ca_bkv"],
      sub["ca_wo"], sub["ca_bo"],
      sub["lnf_g"], sub["lnf_b"],
      sub["ff_w1"], sub["ff_b1"], sub["ff_w2"], sub["ff_b2"])


# ---------------------------------------------------------------------------
# Fused ResidueCombiner kernel (concat-GEMM + GELU + GEMM + residual + LN)
# ---------------------------------------------------------------------------

def _combiner_kernel(*refs, num_sub, eps):
    xs = [refs[i][...].astype(jnp.float32) for i in range(num_sub)]   # each (TM, D)
    w1_ref, b1_ref, w2_ref, g_ref, b_ref, o_ref = refs[num_sub:]
    D = xs[0].shape[-1]
    F = w1_ref.shape[1]
    # cat(xs) @ W1 == sum_i xs[i] @ W1[i*D:(i+1)*D, :]  (avoids an in-kernel lane concat)
    acc = jnp.zeros((xs[0].shape[0], F), jnp.float32)
    for i, x in enumerate(xs):
        acc = acc + jnp.dot(x, w1_ref[i * D:(i + 1) * D, :],
                            preferred_element_type=jnp.float32)
    h = _gelu(acc + b1_ref[...])
    o = jnp.dot(h, w2_ref[...], preferred_element_type=jnp.float32)   # bias=False
    for x in xs:
        o = o + x
    mu = jnp.mean(o, axis=-1, keepdims=True)
    oc = o - mu
    var = jnp.mean(oc * oc, axis=-1, keepdims=True)
    o_ref[...] = ((oc * jax.lax.rsqrt(var + eps)) * g_ref[...] + b_ref[...]).astype(o_ref.dtype)


def _row_tile(m, target=512):
    """Largest row tile <= target that is a multiple of 8 and divides m (else full m)."""
    if m <= target:
        return m
    t = (target // 8) * 8
    while t >= 8:
        if m % t == 0:
            return t
        t -= 8
    return m


def residue_combiner(outs, comb, *, eps=1e-6):
    B, L, D = outs[0].shape
    num_sub = len(outs)
    M = B * L
    F = comb["w1"].shape[1]
    TM = _row_tile(M)
    flat = [o.reshape(M, D) for o in outs]

    def full(shape):
        return pl.BlockSpec(shape, lambda i: (0,) * len(shape))

    kernel = functools.partial(_combiner_kernel, num_sub=num_sub, eps=eps)
    out = pl.pallas_call(
        kernel,
        out_shape=jax.ShapeDtypeStruct((M, D), outs[0].dtype),
        grid=(M // TM,),
        in_specs=[pl.BlockSpec((TM, D), lambda i: (i, 0)) for _ in range(num_sub)]
                 + [full((num_sub * D, F)), full((1, F)), full((F, D)),
                    full((1, D)), full((1, D))],
        out_specs=pl.BlockSpec((TM, D), lambda i: (i, 0)),
        compiler_params=pltpu.CompilerParams(
            dimension_semantics=("parallel",),
            vmem_limit_bytes=_VMEM_LIMIT),
    )(*flat, comb["w1"], comb["b1"], comb["w2"], comb["ln_g"], comb["ln_b"])
    return out.reshape(B, L, D)


# ---------------------------------------------------------------------------
# Full DecoderLayer forward (3 pallas_calls total for num_sub=2)
# ---------------------------------------------------------------------------

def decoder_layer_forward(params, inpute, inputo, src_bias, tgt_bias, *, num_head=8):
    outs = []
    out = inputo
    for sub in params["nets"]:
        out = decoder_sublayer(inpute, out, sub, src_bias, tgt_bias, num_head=num_head)
        outs.append(out)
    return residue_combiner(outs, params["combiner"])


# ---------------------------------------------------------------------------
# Pure-JAX reference (same math / same parameter layout) for validation
# ---------------------------------------------------------------------------

def ref_forward(params, inpute, inputo, src_bias, tgt_bias, *, num_head=8, eps=1e-6):
    def ln(x, g, b):
        mu = jnp.mean(x, -1, keepdims=True)
        var = jnp.mean((x - mu) ** 2, -1, keepdims=True)
        return (x - mu) / jnp.sqrt(var + eps) * g + b

    def mha(q, k, v, bias, wo, bo):
        B, Lq, A = q.shape
        Lk = k.shape[1]
        Dh = A // num_head
        qh = q.reshape(B, Lq, num_head, Dh).transpose(0, 2, 1, 3)
        kh = k.reshape(B, Lk, num_head, Dh).transpose(0, 2, 1, 3)
        vh = v.reshape(B, Lk, num_head, Dh).transpose(0, 2, 1, 3)
        s = jnp.einsum("bhqd,bhkd->bhqk", qh, kh) / math.sqrt(Dh) + bias[:, None]
        a = jax.nn.softmax(s, axis=-1)
        ctx = jnp.einsum("bhqk,bhkd->bhqd", a, vh).transpose(0, 2, 1, 3).reshape(B, Lq, A)
        return ctx @ wo + bo

    outs = []
    out = inputo
    for sub in params["nets"]:
        A = sub["sa_wo"].shape[0]
        xn = ln(out, sub["ln1_g"], sub["ln1_b"])
        qkv = xn @ sub["sa_wqkv"] + sub["sa_bqkv"]
        ctx = mha(qkv[..., :A], qkv[..., A:2 * A], qkv[..., 2 * A:], tgt_bias,
                  sub["sa_wo"], sub["sa_bo"]) + out
        cn = ln(ctx, sub["ln2_g"], sub["ln2_b"])
        q = cn @ sub["ca_wq"] + sub["ca_bq"]
        kv = inpute @ sub["ca_wkv"] + sub["ca_bkv"]
        ctx = mha(q, kv[..., :A], kv[..., A:], src_bias, sub["ca_wo"], sub["ca_bo"]) + ctx
        fn = ln(ctx, sub["lnf_g"], sub["lnf_b"])
        ff = _gelu(fn @ sub["ff_w1"] + sub["ff_b1"]) @ sub["ff_w2"] + sub["ff_b2"]
        out = ff + ctx
        outs.append(out)

    c = params["combiner"]
    cat = jnp.concatenate(outs, -1)
    o = _gelu(cat @ c["w1"] + c["b1"]) @ c["w2"]
    for u in outs:
        o = o + u
    return ln(o, c["ln_g"], c["ln_b"])


# ---------------------------------------------------------------------------
# Deterministic parameter init (fused-weight layout)
# ---------------------------------------------------------------------------

def init_params(key, isize, fhsize, ahsize, num_sub):
    D, A, F = isize, ahsize, fhsize

    def lin_w(k, din, dout):
        return jax.random.normal(k, (din, dout), jnp.float32) / math.sqrt(din)

    def lin_b(k, dout, scale=0.02):
        return jax.random.normal(k, (1, dout), jnp.float32) * scale

    keys = jax.random.split(key, num_sub + 1)
    nets = []
    for s in range(num_sub):
        ks = jax.random.split(keys[s], 17)
        nets.append({
            "ln1_g": jnp.ones((1, D), jnp.float32), "ln1_b": jnp.zeros((1, D), jnp.float32),
            "ln2_g": jnp.ones((1, D), jnp.float32), "ln2_b": jnp.zeros((1, D), jnp.float32),
            "lnf_g": jnp.ones((1, D), jnp.float32), "lnf_b": jnp.zeros((1, D), jnp.float32),
            # fused QKV weights for self-attention
            "sa_wqkv": jnp.concatenate(
                [lin_w(ks[0], D, A), lin_w(ks[1], D, A), lin_w(ks[2], D, A)], axis=1),
            "sa_bqkv": lin_b(ks[3], 3 * A),
            "sa_wo": lin_w(ks[4], A, D), "sa_bo": lin_b(ks[5], D),
            # cross-attention: Q from decoder, fused KV from encoder
            "ca_wq": lin_w(ks[6], D, A), "ca_bq": lin_b(ks[7], A),
            "ca_wkv": jnp.concatenate([lin_w(ks[8], D, A), lin_w(ks[9], D, A)], axis=1),
            "ca_bkv": lin_b(ks[10], 2 * A),
            "ca_wo": lin_w(ks[11], A, D), "ca_bo": lin_b(ks[12], D),
            # FFN
            "ff_w1": lin_w(ks[13], D, F), "ff_b1": lin_b(ks[14], F),
            "ff_w2": lin_w(ks[15], F, D), "ff_b2": lin_b(ks[16], D),
        })
    kc = jax.random.split(keys[-1], 3)
    combiner = {
        "w1": lin_w(kc[0], D * num_sub, F), "b1": lin_b(kc[1], F),
        "w2": lin_w(kc[2], F, D),                 # bias=False in ResidueCombiner
        "ln_g": jnp.ones((1, D), jnp.float32), "ln_b": jnp.zeros((1, D), jnp.float32),
    }
    return {"nets": nets, "combiner": combiner}


# ---------------------------------------------------------------------------
# main
# ---------------------------------------------------------------------------

if __name__ == "__main__":
    B, Lq, Lk = 2, 8, 8
    isize, ahsize = 64, 64
    fhsize = ahsize * 4          # 256
    num_sub = 2
    num_head = 8

    key = jax.random.PRNGKey(0)
    kp, ke, ko = jax.random.split(key, 3)
    params = init_params(kp, isize, fhsize, ahsize, num_sub)

    inpute = jax.random.normal(ke, (B, Lk, isize), jnp.float32)   # encoder output
    inputo = jax.random.normal(ko, (B, Lq, isize), jnp.float32)   # decoder state

    # masks as additive biases: causal mask for self-attn, no source padding
    causal = jnp.where(jnp.tril(jnp.ones((Lq, Lq), jnp.bool_)), 0.0, NEG_INF).astype(jnp.float32)
    tgt_bias = jnp.broadcast_to(causal, (B, Lq, Lq))
    src_bias = jnp.zeros((B, Lq, Lk), jnp.float32)

    fwd = jax.jit(functools.partial(decoder_layer_forward, num_head=num_head))
    out = jax.block_until_ready(fwd(params, inpute, inputo, src_bias, tgt_bias))

    ref = ref_forward(params, inpute, inputo, src_bias, tgt_bias, num_head=num_head)
    np.testing.assert_allclose(np.asarray(out), np.asarray(ref), rtol=2e-2, atol=2e-2)

    print("KERNEL_OK")
</pallas_src>

<mosaic_0001>
module attributes {stable_mosaic.version = 11 : i64} {
  func.func @_combiner_kernel(%arg0: i32, %arg1: memref<16x64xf32, #tpu.memory_space<vmem>>, %arg2: memref<16x64xf32, #tpu.memory_space<vmem>>, %arg3: memref<128x256xf32, #tpu.memory_space<vmem>>, %arg4: memref<1x256xf32, #tpu.memory_space<vmem>>, %arg5: memref<256x64xf32, #tpu.memory_space<vmem>>, %arg6: memref<1x64xf32, #tpu.memory_space<vmem>>, %arg7: memref<1x64xf32, #tpu.memory_space<vmem>>, %arg8: memref<16x64xf32, #tpu.memory_space<vmem>>) attributes {dimension_semantics = [#tpu.dimension_semantics<parallel>], iteration_bounds = array<i64: 1>, scalar_prefetch = 0 : i64, scratch_operands = 0 : i64, tpu.core_type = #tpu.core_type<tc>, window_params = [{transform_indices = @transform_0, window_bounds = array<i64: 16, 64>}, {transform_indices = @transform_1, window_bounds = array<i64: 16, 64>}, {pipeline_mode = #tpu.pipeline_mode<synchronous>, transform_indices = @transform_2, window_bounds = array<i64: 128, 256>}, {pipeline_mode = #tpu.pipeline_mode<synchronous>, transform_indices = @transform_3, window_bounds = array<i64: 1, 256>}, {pipeline_mode = #tpu.pipeline_mode<synchronous>, transform_indices = @transform_4, window_bounds = array<i64: 256, 64>}, {pipeline_mode = #tpu.pipeline_mode<synchronous>, transform_indices = @transform_5, window_bounds = array<i64: 1, 64>}, {pipeline_mode = #tpu.pipeline_mode<synchronous>, transform_indices = @transform_6, window_bounds = array<i64: 1, 64>}, {transform_indices = @transform_7, window_bounds = array<i64: 16, 64>}]} {
    %c0 = arith.constant 0 : index
    %c0_0 = arith.constant 0 : index
    %0 = vector.load %arg1[%c0, %c0_0] : memref<16x64xf32, #tpu.memory_space<vmem>>, vector<16x64xf32>
    %c0_1 = arith.constant 0 : index
    %c0_2 = arith.constant 0 : index
    %1 = vector.load %arg2[%c0_1, %c0_2] : memref<16x64xf32, #tpu.memory_space<vmem>>, vector<16x64xf32>
    %cst = arith.constant 0.000000e+00 : f32
    %2 = vector.broadcast %cst : f32 to vector<16x256xf32>
    %c0_3 = arith.constant 0 : index
    %c0_4 = arith.constant 0 : index
    %3 = vector.load %arg3[%c0_3, %c0_4] : memref<128x256xf32, #tpu.memory_space<vmem>>, vector<64x256xf32>
    %cst_5 = arith.constant dense<0.000000e+00> : vector<16x256xf32>
    %4 = tpu.matmul %0, %3, %cst_5 {dimension_numbers = #tpu.dot_dimension_numbers<[1], [0], [0], [1], [0, 0, 1, 1], [], []>} : vector<16x64xf32>, vector<64x256xf32>, vector<16x256xf32> -> vector<16x256xf32>
    %5 = arith.addf %2, %4 : vector<16x256xf32>
    %c64 = arith.constant 64 : index
    %c0_6 = arith.constant 0 : index
    %6 = vector.load %arg3[%c64, %c0_6] : memref<128x256xf32, #tpu.memory_space<vmem>>, vector<64x256xf32>
    %cst_7 = arith.constant dense<0.000000e+00> : vector<16x256xf32>
    %7 = tpu.matmul %1, %6, %cst_7 {dimension_numbers = #tpu.dot_dimension_numbers<[1], [0], [0], [1], [0, 0, 1, 1], [], []>} : vector<16x64xf32>, vector<64x256xf32>, vector<16x256xf32> -> vector<16x256xf32>
    %8 = arith.addf %5, %7 : vector<16x256xf32>
    %c0_8 = arith.constant 0 : index
    %c0_9 = arith.constant 0 : index
    %9 = vector.load %arg4[%c0_8, %c0_9] : memref<1x256xf32, #tpu.memory_space<vmem>>, vector<1x256xf32>
    %10 = vector.broadcast %9 : vector<1x256xf32> to vector<16x256xf32>
    %11 = arith.addf %8, %10 : vector<16x256xf32>
    %cst_10 = arith.constant 5.000000e-01 : f32
    %12 = vector.broadcast %cst_10 : f32 to vector<16x256xf32>
    %13 = arith.mulf %12, %11 : vector<16x256xf32>
    %cst_11 = arith.constant 4.471500e-02 : f32
    %14 = vector.broadcast %cst_11 : f32 to vector<16x256xf32>
    %15 = arith.mulf %14, %11 : vector<16x256xf32>
    %16 = arith.mulf %15, %11 : vector<16x256xf32>
    %17 = arith.mulf %16, %11 : vector<16x256xf32>
    %18 = arith.addf %11, %17 : vector<16x256xf32>
    %cst_12 = arith.constant 0.797884583 : f32
    %19 = vector.broadcast %cst_12 : f32 to vector<16x256xf32>
    %20 = arith.mulf %19, %18 : vector<16x256xf32>
    %21 = math.tanh %20 : vector<16x256xf32>
    %cst_13 = arith.constant 1.000000e+00 : f32
    %22 = vector.broadcast %cst_13 : f32 to vector<16x256xf32>
    %23 = arith.addf %22, %21 : vector<16x256xf32>
    %24 = arith.mulf %13, %23 : vector<16x256xf32>
    %c0_14 = arith.constant 0 : index
    %c0_15 = arith.constant 0 : index
    %25 = vector.load %arg5[%c0_14, %c0_15] : memref<256x64xf32, #tpu.memory_space<vmem>>, vector<256x64xf32>
    %cst_16 = arith.constant dense<0.000000e+00> : vector<16x64xf32>
    %26 = tpu.matmul %24, %25, %cst_16 {dimension_numbers = #tpu.dot_dimension_numbers<[1], [0], [0], [1], [0, 0, 1, 1], [], []>} : vector<16x256xf32>, vector<256x64xf32>, vector<16x64xf32> -> vector<16x64xf32>
    %27 = arith.addf %26, %0 : vector<16x64xf32>
    %28 = arith.addf %27, %1 : vector<16x64xf32>
    %cst_17 = arith.constant dense<0.000000e+00> : vector<16xf32>
    %29 = vector.multi_reduction <add>, %28, %cst_17 [1] : vector<16x64xf32> to vector<16xf32>
    %30 = vector.shape_cast %29 : vector<16xf32> to vector<16x1xf32>
    %cst_18 = arith.constant 6.400000e+01 : f32
    %31 = vector.broadcast %cst_18 : f32 to vector<16x1xf32>
    %32 = arith.divf %30, %31 : vector<16x1xf32>
    %33 = vector.broadcast %32 : vector<16x1xf32> to vector<16x64xf32>
    %34 = arith.subf %28, %33 : vector<16x64xf32>
    %35 = arith.mulf %34, %34 : vector<16x64xf32>
    %cst_19 = arith.constant dense<0.000000e+00> : vector<16xf32>
    %36 = vector.multi_reduction <add>, %35, %cst_19 [1] : vector<16x64xf32> to vector<16xf32>
    %37 = vector.shape_cast %36 : vector<16xf32> to vector<16x1xf32>
    %cst_20 = arith.constant 6.400000e+01 : f32
    %38 = vector.broadcast %cst_20 : f32 to vector<16x1xf32>
    %39 = arith.divf %37, %38 : vector<16x1xf32>
    %cst_21 = arith.constant 9.99999997E-7 : f32
    %40 = vector.broadcast %cst_21 : f32 to vector<16x1xf32>
    %41 = arith.addf %39, %40 : vector<16x1xf32>
    %42 = math.rsqrt %41 : vector<16x1xf32>
    %43 = vector.broadcast %42 : vector<16x1xf32> to vector<16x64xf32>
    %44 = arith.mulf %34, %43 : vector<16x64xf32>
    %c0_22 = arith.constant 0 : index
    %c0_23 = arith.constant 0 : index
    %45 = vector.load %arg6[%c0_22, %c0_23] : memref<1x64xf32, #tpu.memory_space<vmem>>, vector<1x64xf32>
    %46 = vector.broadcast %45 : vector<1x64xf32> to vector<16x64xf32>
    %47 = arith.mulf %44, %46 : vector<16x64xf32>
    %c0_24 = arith.constant 0 : index
    %c0_25 = arith.constant 0 : index
    %48 = vector.load %arg7[%c0_24, %c0_25] : memref<1x64xf32, #tpu.memory_space<vmem>>, vector<1x64xf32>
    %49 = vector.broadcast %48 : vector<1x64xf32> to vector<16x64xf32>
    %50 = arith.addf %47, %49 : vector<16x64xf32>
    %c0_26 = arith.constant 0 : index
    %c0_27 = arith.constant 0 : index
    %51 = vector.load %arg8[%c0_26, %c0_27] : memref<16x64xf32, #tpu.memory_space<vmem>>, vector<16x64xf32>
    tpu.vector_store %arg8[%c0_26, %c0_27], %50 {strides = array<i32>} : memref<16x64xf32, #tpu.memory_space<vmem>>, vector<16x64xf32>,
    return
  }
  func.func @transform_0(%arg0: i32) -> (i32, i32) {
    %c0_i32 = arith.constant 0 : i32
    %c0_i32_0 = arith.constant 0 : i32
    return %arg0, %c0_i32 : i32, i32
  }
  func.func @transform_1(%arg0: i32) -> (i32, i32) {
    %c0_i32 = arith.constant 0 : i32
    %c0_i32_0 = arith.constant 0 : i32
    return %arg0, %c0_i32 : i32, i32
  }
  func.func @transform_2(%arg0: i32) -> (i32, i32) {
    %c0_i32 = arith.constant 0 : i32
    %c0_i32_0 = arith.constant 0 : i32
    %c0_i32_1 = arith.constant 0 : i32
    return %c0_i32, %c0_i32_0 : i32, i32
  }
  func.func @transform_3(%arg0: i32) -> (i32, i32) {
    %c0_i32 = arith.constant 0 : i32
    %c0_i32_0 = arith.constant 0 : i32
    %c0_i32_1 = arith.constant 0 : i32
    return %c0_i32, %c0_i32_0 : i32, i32
  }
  func.func @transform_4(%arg0: i32) -> (i32, i32) {
    %c0_i32 = arith.constant 0 : i32
    %c0_i32_0 = arith.constant 0 : i32
    %c0_i32_1 = arith.constant 0 : i32
    return %c0_i32, %c0_i32_0 : i32, i32
  }
  func.func @transform_5(%arg0: i32) -> (i32, i32) {
    %c0_i32 = arith.constant 0 : i32
    %c0_i32_0 = arith.constant 0 : i32
    %c0_i32_1 = arith.constant 0 : i32
    return %c0_i32, %c0_i32_0 : i32, i32
  }
  func.func @transform_6(%arg0: i32) -> (i32, i32) {
    %c0_i32 = arith.constant 0 : i32
    %c0_i32_0 = arith.constant 0 : i32
    %c0_i32_1 = arith.constant 0 : i32
    return %c0_i32, %c0_i32_0 : i32, i32
  }
  func.func @transform_7(%arg0: i32) -> (i32, i32) {
    %c0_i32 = arith.constant 0 : i32
    %c0_i32_0 = arith.constant 0 : i32
    return %arg0, %c0_i32 : i32, i32
  }
}

module attributes {stable_mosaic.version = 11 : i64} {
  func.func @_sublayer_kernel(%arg0: i32, %arg1: memref<1x8x64xf32, #tpu.memory_space<vmem>>, %arg2: memref<1x8x64xf32, #tpu.memory_space<vmem>>, %arg3: memref<1x8x8xf32, #tpu.memory_space<vmem>>, %arg4: memref<1x8x8xf32, #tpu.memory_space<vmem>>, %arg5: memref<1x64xf32, #tpu.memory_space<vmem>>, %arg6: memref<1x64xf32, #tpu.memory_space<vmem>>, %arg7: memref<64x192xf32, #tpu.memory_space<vmem>>, %arg8: memref<1x192xf32, #tpu.memory_space<vmem>>, %arg9: memref<64x64xf32, #tpu.memory_space<vmem>>, %arg10: memref<1x64xf32, #tpu.memory_space<vmem>>, %arg11: memref<1x64xf32, #tpu.memory_space<vmem>>, %arg12: memref<1x64xf32, #tpu.memory_space<vmem>>, %arg13: memref<64x64xf32, #tpu.memory_space<vmem>>, %arg14: memref<1x64xf32, #tpu.memory_space<vmem>>, %arg15: memref<64x128xf32, #tpu.memory_space<vmem>>, %arg16: memref<1x128xf32, #tpu.memory_space<vmem>>, %arg17: memref<64x64xf32, #tpu.memory_space<vmem>>, %arg18: memref<1x64xf32, #tpu.memory_space<vmem>>, %arg19: memref<1x64xf32, #tpu.memory_space<vmem>>, %arg20: memref<1x64xf32, #tpu.memory_space<vmem>>, %arg21: memref<64x256xf32, #tpu.memory_space<vmem>>, %arg22: memref<1x256xf32, #tpu.memory_space<vmem>>, %arg23: memref<256x64xf32, #tpu.memory_space<vmem>>, %arg24: memref<1x64xf32, #tpu.memory_space<vmem>>, %arg25: memref<1x8x64xf32, #tpu.memory_space<vmem>>) attributes {dimension_semantics = [#tpu.dimension_semantics<parallel>], iteration_bounds = array<i64: 2>, scalar_prefetch = 0 : i64, scratch_operands = 0 : i64, tpu.core_type = #tpu.core_type<tc>, window_params = [{transform_indices = @transform_0, window_bounds = array<i64: 1, 8, 64>}, {transform_indices = @transform_1, window_bounds = array<i64: 1, 8, 64>}, {transform_indices = @transform_2, window_bounds = array<i64: 1, 8, 8>}, {transform_indices = @transform_3, window_bounds = array<i64: 1, 8, 8>}, {pipeline_mode = #tpu.pipeline_mode<synchronous>, transform_indices = @transform_4, window_bounds = array<i64: 1, 64>}, {pipeline_mode = #tpu.pipeline_mode<synchronous>, transform_indices = @transform_5, window_bounds = array<i64: 1, 64>}, {pipeline_mode = #tpu.pipeline_mode<synchronous>, transform_indices = @transform_6, window_bounds = array<i64: 64, 192>}, {pipeline_mode = #tpu.pipeline_mode<synchronous>, transform_indices = @transform_7, window_bounds = array<i64: 1, 192>}, {pipeline_mode = #tpu.pipeline_mode<synchronous>, transform_indices = @transform_8, window_bounds = array<i64: 64, 64>}, {pipeline_mode = #tpu.pipeline_mode<synchronous>, transform_indices = @transform_9, window_bounds = array<i64: 1, 64>}, {pipeline_mode = #tpu.pipeline_mode<synchronous>, transform_indices = @transform_10, window_bounds = array<i64: 1, 64>}, {pipeline_mode = #tpu.pipeline_mode<synchronous>, transform_indices = @transform_11, window_bounds = array<i64: 1, 64>}, {pipeline_mode = #tpu.pipeline_mode<synchronous>, transform_indices = @transform_12, window_bounds = array<i64: 64, 64>}, {pipeline_mode = #tpu.pipeline_mode<synchronous>, transform_indices = @transform_13, window_bounds = array<i64: 1, 64>}, {pipeline_mode = #tpu.pipeline_mode<synchronous>, transform_indices = @transform_14, window_bounds = array<i64: 64, 128>}, {pipeline_mode = #tpu.pipeline_mode<synchronous>, transform_indices = @transform_15, window_bounds = array<i64: 1, 128>}, {pipeline_mode = #tpu.pipeline_mode<synchronous>, transform_indices = @transform_16, window_bounds = array<i64: 64, 64>}, {pipeline_mode = #tpu.pipeline_mode<synchronous>, transform_indices = @transform_17, window_bounds = array<i64: 1, 64>}, {pipeline_mode = #tpu.pipeline_mode<synchronous>, transform_indices = @transform_18, window_bounds = array<i64: 1, 64>}, {pipeline_mode = #tpu.pipeline_mode<synchronous>, transform_indices = @transform_19, window_bounds = array<i64: 1, 64>}, {pipeline_mode = #tpu.pipeline_mode<synchronous>, transform_indices = @transform_20, window_bounds = array<i64: 64, 256>}, {pipeline_mode = #tpu.pipeline_mode<synchronous>, transform_indices = @transform_21, window_bounds = array<i64: 1, 256>}, {pipeline_mode = #tpu.pipeline_mode<synchronous>, transform_indices = @transform_22, window_bounds = array<i64: 256, 64>}, {pipeline_mode = #tpu.pipeline_mode<synchronous>, transform_indices = @transform_23, window_bounds = array<i64: 1, 64>}, {transform_indices = @transform_24, window_bounds = array<i64: 1, 8, 64>}]} {
    %c0 = arith.constant 0 : index
    %c0_0 = arith.constant 0 : index
    %c0_1 = arith.constant 0 : index
    %0 = vector.load %arg1[%c0, %c0_0, %c0_1] : memref<1x8x64xf32, #tpu.memory_space<vmem>>, vector<1x8x64xf32>
    %1 = vector.shape_cast %0 : vector<1x8x64xf32> to vector<8x64xf32>
    %c0_2 = arith.constant 0 : index
    %c0_3 = arith.constant 0 : index
    %c0_4 = arith.constant 0 : index
    %2 = vector.load %arg2[%c0_2, %c0_3, %c0_4] : memref<1x8x64xf32, #tpu.memory_space<vmem>>, vector<1x8x64xf32>
    %3 = vector.shape_cast %2 : vector<1x8x64xf32> to vector<8x64xf32>
    %c0_5 = arith.constant 0 : index
    %c0_6 = arith.constant 0 : index
    %c0_7 = arith.constant 0 : index
    %4 = vector.load %arg3[%c0_5, %c0_6, %c0_7] : memref<1x8x8xf32, #tpu.memory_space<vmem>>, vector<1x8x8xf32>
    %5 = vector.shape_cast %4 : vector<1x8x8xf32> to vector<8x8xf32>
    %c0_8 = arith.constant 0 : index
    %c0_9 = arith.constant 0 : index
    %c0_10 = arith.constant 0 : index
    %6 = vector.load %arg4[%c0_8, %c0_9, %c0_10] : memref<1x8x8xf32, #tpu.memory_space<vmem>>, vector<1x8x8xf32>
    %7 = vector.shape_cast %6 : vector<1x8x8xf32> to vector<8x8xf32>
    %cst = arith.constant dense<0.000000e+00> : vector<8xf32>
    %8 = vector.multi_reduction <add>, %1, %cst [1] : vector<8x64xf32> to vector<8xf32>
    %9 = vector.shape_cast %8 : vector<8xf32> to vector<8x1xf32>
    %cst_11 = arith.constant 6.400000e+01 : f32
    %10 = vector.broadcast %cst_11 : f32 to vector<8x1xf32>
    %11 = arith.divf %9, %10 : vector<8x1xf32>
    %12 = vector.broadcast %11 : vector<8x1xf32> to vector<8x64xf32>
    %13 = arith.subf %1, %12 : vector<8x64xf32>
    %14 = arith.mulf %13, %13 : vector<8x64xf32>
    %cst_12 = arith.constant dense<0.000000e+00> : vector<8xf32>
    %15 = vector.multi_reduction <add>, %14, %cst_12 [1] : vector<8x64xf32> to vector<8xf32>
    %16 = vector.shape_cast %15 : vector<8xf32> to vector<8x1xf32>
    %cst_13 = arith.constant 6.400000e+01 : f32
    %17 = vector.broadcast %cst_13 : f32 to vector<8x1xf32>
    %18 = arith.divf %16, %17 : vector<8x1xf32>
    %cst_14 = arith.constant 9.99999997E-7 : f32
    %19 = vector.broadcast %cst_14 : f32 to vector<8x1xf32>
    %20 = arith.addf %18, %19 : vector<8x1xf32>
    %21 = math.rsqrt %20 : vector<8x1xf32>
    %22 = vector.broadcast %21 : vector<8x1xf32> to vector<8x64xf32>
    %23 = arith.mulf %13, %22 : vector<8x64xf32>
    %c0_15 = arith.constant 0 : index
    %c0_16 = arith.constant 0 : index
    %24 = vector.load %arg5[%c0_15, %c0_16] : memref<1x64xf32, #tpu.memory_space<vmem>>, vector<1x64xf32>
    %25 = vector.broadcast %24 : vector<1x64xf32> to vector<8x64xf32>
    %26 = arith.mulf %23, %25 : vector<8x64xf32>
    %c0_17 = arith.constant 0 : index
    %c0_18 = arith.constant 0 : index
    %27 = vector.load %arg6[%c0_17, %c0_18] : memref<1x64xf32, #tpu.memory_space<vmem>>, vector<1x64xf32>
    %28 = vector.broadcast %27 : vector<1x64xf32> to vector<8x64xf32>
    %29 = arith.addf %26, %28 : vector<8x64xf32>
    %c0_19 = arith.constant 0 : index
    %c0_20 = arith.constant 0 : index
    %30 = vector.load %arg7[%c0_19, %c0_20] : memref<64x192xf32, #tpu.memory_space<vmem>>, vector<64x192xf32>
    %cst_21 = arith.constant dense<0.000000e+00> : vector<8x192xf32>
    %31 = tpu.matmul %29, %30, %cst_21 {dimension_numbers = #tpu.dot_dimension_numbers<[1], [0], [0], [1], [0, 0, 1, 1], [], []>} : vector<8x64xf32>, vector<64x192xf32>, vector<8x192xf32> -> vector<8x192xf32>
    %c0_22 = arith.constant 0 : index
    %c0_23 = arith.constant 0 : index
    %32 = vector.load %arg8[%c0_22, %c0_23] : memref<1x192xf32, #tpu.memory_space<vmem>>, vector<1x192xf32>
    %33 = vector.broadcast %32 : vector<1x192xf32> to vector<8x192xf32>
    %34 = arith.addf %31, %33 : vector<8x192xf32>
    %35 = vector.extract_strided_slice %34 {offsets = [0, 0], sizes = [8, 64], strides = [1, 1]} : vector<8x192xf32> to vector<8x64xf32>
    %36 = vector.extract_strided_slice %34 {offsets = [0, 64], sizes = [8, 64], strides = [1, 1]} : vector<8x192xf32> to vector<8x64xf32>
    %37 = vector.extract_strided_slice %34 {offsets = [0, 128], sizes = [8, 64], strides = [1, 1]} : vector<8x192xf32> to vector<8x64xf32>
    %cst_24 = arith.constant 0.000000e+00 : f32
    %38 = vector.broadcast %cst_24 : f32 to vector<8x64xf32>
    %39 = vector.extract_strided_slice %35 {offsets = [0, 0], sizes = [8, 8], strides = [1, 1]} : vector<8x64xf32> to vector<8x8xf32>
    %40 = vector.extract_strided_slice %36 {offsets = [0, 0], sizes = [8, 8], strides = [1, 1]} : vector<8x64xf32> to vector<8x8xf32>
    %41 = vector.extract_strided_slice %37 {offsets = [0, 0], sizes = [8, 8], strides = [1, 1]} : vector<8x64xf32> to vector<8x8xf32>
    %cst_25 = arith.constant dense<0.000000e+00> : vector<8x8xf32>
    %42 = tpu.matmul %39, %40, %cst_25 {dimension_numbers = #tpu.dot_dimension_numbers<[1], [1], [0], [0], [0, 0, 1, 0], [], []>} : vector<8x8xf32>, vector<8x8xf32>, vector<8x8xf32> -> vector<8x8xf32>
    %cst_26 = arith.constant 0.353553385 : f32
    %43 = vector.broadcast %cst_26 : f32 to vector<8x8xf32>
    %44 = arith.mulf %42, %43 : vector<8x8xf32>
    %45 = arith.addf %44, %5 : vector<8x8xf32>
    %cst_27 = arith.constant dense<0xFF800000> : vector<8xf32>
    %46 = vector.multi_reduction <maximumf>, %45, %cst_27 [1] : vector<8x8xf32> to vector<8xf32>
    %47 = vector.shape_cast %46 : vector<8xf32> to vector<8x1xf32>
    %48 = vector.broadcast %47 : vector<8x1xf32> to vector<8x8xf32>
    %49 = arith.subf %45, %48 : vector<8x8xf32>
    %50 = math.exp %49 : vector<8x8xf32>
    %cst_28 = arith.constant dense<0.000000e+00> : vector<8xf32>
    %51 = vector.multi_reduction <add>, %50, %cst_28 [1] : vector<8x8xf32> to vector<8xf32>
    %52 = vector.shape_cast %51 : vector<8xf32> to vector<8x1xf32>
    %53 = tpu.reciprocal %52 {approx = true} : vector<8x1xf32> -> vector<8x1xf32>
    %54 = vector.broadcast %53 : vector<8x1xf32> to vector<8x8xf32>
    %55 = arith.mulf %50, %54 : vector<8x8xf32>
    %cst_29 = arith.constant dense<0.000000e+00> : vector<8x8xf32>
    %56 = tpu.matmul %55, %41, %cst_29 {dimension_numbers = #tpu.dot_dimension_numbers<[1], [0], [0], [1], [0, 0, 1, 1], [], []>} : vector<8x8xf32>, vector<8x8xf32>, vector<8x8xf32> -> vector<8x8xf32>
    %c0_30 = arith.constant 0 : index
    %c0_31 = arith.constant 0 : index
    %57 = vector.load %arg9[%c0_30, %c0_31] : memref<64x64xf32, #tpu.memory_space<vmem>>, vector<8x64xf32>
    %cst_32 = arith.constant dense<0.000000e+00> : vector<8x64xf32>
    %58 = tpu.matmul %56, %57, %cst_32 {dimension_numbers = #tpu.dot_dimension_numbers<[1], [0], [0], [1], [0, 0, 1, 1], [], []>} : vector<8x8xf32>, vector<8x64xf32>, vector<8x64xf32> -> vector<8x64xf32>
    %59 = arith.addf %38, %58 : vector<8x64xf32>
    %60 = vector.extract_strided_slice %35 {offsets = [0, 8], sizes = [8, 8], strides = [1, 1]} : vector<8x64xf32> to vector<8x8xf32>
    %61 = vector.extract_strided_slice %36 {offsets = [0, 8], sizes = [8, 8], strides = [1, 1]} : vector<8x64xf32> to vector<8x8xf32>
    %62 = vector.extract_strided_slice %37 {offsets = [0, 8], sizes = [8, 8], strides = [1, 1]} : vector<8x64xf32> to vector<8x8xf32>
    %cst_33 = arith.constant dense<0.000000e+00> : vector<8x8xf32>
    %63 = tpu.matmul %60, %61, %cst_33 {dimension_numbers = #tpu.dot_dimension_numbers<[1], [1], [0], [0], [0, 0, 1, 0], [], []>} : vector<8x8xf32>, vector<8x8xf32>, vector<8x8xf32> -> vector<8x8xf32>
    %cst_34 = arith.constant 0.353553385 : f32
    %64 = vector.broadcast %cst_34 : f32 to vector<8x8xf32>
    %65 = arith.mulf %63, %64 : vector<8x8xf32>
    %66 = arith.addf %65, %5 : vector<8x8xf32>
    %cst_35 = arith.constant dense<0xFF800000> : vector<8xf32>
    %67 = vector.multi_reduction <maximumf>, %66, %cst_35 [1] : vector<8x8xf32> to vector<8xf32>
    %68 = vector.shape_cast %67 : vector<8xf32> to vector<8x1xf32>
    %69 = vector.broadcast %68 : vector<8x1xf32> to vector<8x8xf32>
    %70 = arith.subf %66, %69 : vector<8x8xf32>
    %71 = math.exp %70 : vector<8x8xf32>
    %cst_36 = arith.constant dense<0.000000e+00> : vector<8xf32>
    %72 = vector.multi_reduction <add>, %71, %cst_36 [1] : vector<8x8xf32> to vector<8xf32>
    %73 = vector.shape_cast %72 : vector<8xf32> to vector<8x1xf32>
    %74 = tpu.reciprocal %73 {approx = true} : vector<8x1xf32> -> vector<8x1xf32>
    %75 = vector.broadcast %74 : vector<8x1xf32> to vector<8x8xf32>
    %76 = arith.mulf %71, %75 : vector<8x8xf32>
    %cst_37 = arith.constant dense<0.000000e+00> : vector<8x8xf32>
    %77 = tpu.matmul %76, %62, %cst_37 {dimension_numbers = #tpu.dot_dimension_numbers<[1], [0], [0], [1], [0, 0, 1, 1], [], []>} : vector<8x8xf32>, vector<8x8xf32>, vector<8x8xf32> -> vector<8x8xf32>
    %c8 = arith.constant 8 : index
    %c0_38 = arith.constant 0 : index
    %78 = vector.load %arg9[%c8, %c0_38] : memref<64x64xf32, #tpu.memory_space<vmem>>, vector<8x64xf32>
    %cst_39 = arith.constant dense<0.000000e+00> : vector<8x64xf32>
    %79 = tpu.matmul %77, %78, %cst_39 {dimension_numbers = #tpu.dot_dimension_numbers<[1], [0], [0], [1], [0, 0, 1, 1], [], []>} : vector<8x8xf32>, vector<8x64xf32>, vector<8x64xf32> -> vector<8x64xf32>
    %80 = arith.addf %59, %79 : vector<8x64xf32>
    %81 = vector.extract_strided_slice %35 {offsets = [0, 16], sizes = [8, 8], strides = [1, 1]} : vector<8x64xf32> to vector<8x8xf32>
    %82 = vector.extract_strided_slice %36 {offsets = [0, 16], sizes = [8, 8], strides = [1, 1]} : vector<8x64xf32> to vector<8x8xf32>
    %83 = vector.extract_strided_slice %37 {offsets = [0, 16], sizes = [8, 8], strides = [1, 1]} : vector<8x64xf32> to vector<8x8xf32>
    %cst_40 = arith.constant dense<0.000000e+00> : vector<8x8xf32>
    %84 = tpu.matmul %81, %82, %cst_40 {dimension_numbers = #tpu.dot_dimension_numbers<[1], [1], [0], [0], [0, 0, 1, 0], [], []>} : vector<8x8xf32>, vector<8x8xf32>, vector<8x8xf32> -> vector<8x8xf32>
    %cst_41 = arith.constant 0.353553385 : f32
    %85 = vector.broadcast %cst_41 : f32 to vector<8x8xf32>
    %86 = arith.mulf %84, %85 : vector<8x8xf32>
    %87 = arith.addf %86, %5 : vector<8x8xf32>
    %cst_42 = arith.constant dense<0xFF800000> : vector<8xf32>
    %88 = vector.multi_reduction <maximumf>, %87, %cst_42 [1] : vector<8x8xf32> to vector<8xf32>
    %89 = vector.shape_cast %88 : vector<8xf32> to vector<8x1xf32>
    %90 = vector.broadcast %89 : vector<8x1xf32> to vector<8x8xf32>
    %91 = arith.subf %87, %90 : vector<8x8xf32>
    %92 = math.exp %91 : vector<8x8xf32>
    %cst_43 = arith.constant dense<0.000000e+00> : vector<8xf32>
    %93 = vector.multi_reduction <add>, %92, %cst_43 [1] : vector<8x8xf32> to vector<8xf32>
    %94 = vector.shape_cast %93 : vector<8xf32> to vector<8x1xf32>
    %95 = tpu.reciprocal %94 {approx = true} : vector<8x1xf32> -> vector<8x1xf32>
    %96 = vector.broadcast %95 : vector<8x1xf32> to vector<8x8xf32>
    %97 = arith.mulf %92, %96 : vector<8x8xf32>
    %cst_44 = arith.constant dense<0.000000e+00> : vector<8x8xf32>
    %98 = tpu.matmul %97, %83, %cst_44 {dimension_numbers = #tpu.dot_dimension_numbers<[1], [0], [0], [1], [0, 0, 1, 1], [], []>} : vector<8x8xf32>, vector<8x8xf32>, vector<8x8xf32> -> vector<8x8xf32>
    %c16 = arith.constant 16 : index
    %c0_45 = arith.constant 0 : index
    %99 = vector.load %arg9[%c16, %c0_45] : memref<64x64xf32, #tpu.memory_space<vmem>>, vector<8x64xf32>
    %cst_46 = arith.constant dense<0.000000e+00> : vector<8x64xf32>
    %100 = tpu.matmul %98, %99, %cst_46 {dimension_numbers = #tpu.dot_dimension_numbers<[1], [0], [0], [1], [0, 0, 1, 1], [], []>} : vector<8x8xf32>, vector<8x64xf32>, vector<8x64xf32> -> vector<8x64xf32>
    %101 = arith.addf %80, %100 : vector<8x64xf32>
    %102 = vector.extract_strided_slice %35 {offsets = [0, 24], sizes = [8, 8], strides = [1, 1]} : vector<8x64xf32> to vector<8x8xf32>
    %103 = vector.extract_strided_slice %36 {offsets = [0, 24], sizes = [8, 8], strides = [1, 1]} : vector<8x64xf32> to vector<8x8xf32>
    %104 = vector.extract_strided_slice %37 {offsets = [0, 24], sizes = [8, 8], strides = [1, 1]} : vector<8x64xf32> to vector<8x8xf32>
    %cst_47 = arith.constant dense<0.000000e+00> : vector<8x8xf32>
    %105 = tpu.matmul %102, %103, %cst_47 {dimension_numbers = #tpu.dot_dimension_numbers<[1], [1], [0], [0], [0, 0, 1, 0], [], []>} : vector<8x8xf32>, vector<8x8xf32>, vector<8x8xf32> -> vector<8x8xf32>
    %cst_48 = arith.constant 0.353553385 : f32
    %106 = vector.broadcast %cst_48 : f32 to vector<8x8xf32>
    %107 = arith.mulf %105, %106 : vector<8x8xf32>
    %108 = arith.addf %107, %5 : vector<8x8xf32>
    %cst_49 = arith.constant dense<0xFF800000> : vector<8xf32>
    %109 = vector.multi_reduction <maximumf>, %108, %cst_49 [1] : vector<8x8xf32> to vector<8xf32>
    %110 = vector.shape_cast %109 : vector<8xf32> to vector<8x1xf32>
    %111 = vector.broadcast %110 : vector<8x1xf32> to vector<8x8xf32>
    %112 = arith.subf %108, %111 : vector<8x8xf32>
    %113 = math.exp %112 : vector<8x8xf32>
    %cst_50 = arith.constant dense<0.000000e+00> : vector<8xf32>
    %114 = vector.multi_reduction <add>, %113, %cst_50 [1] : vector<8x8xf32> to vector<8xf32>
    %115 = vector.shape_cast %114 : vector<8xf32> to vector<8x1xf32>
    %116 = tpu.reciprocal %115 {approx = true} : vector<8x1xf32> -> vector<8x1xf32>
    %117 = vector.broadcast %116 : vector<8x1xf32> to vector<8x8xf32>
    %118 = arith.mulf %113, %117 : vector<8x8xf32>
    %cst_51 = arith.constant dense<0.000000e+00> : vector<8x8xf32>
    %119 = tpu.matmul %118, %104, %cst_51 {dimension_numbers = #tpu.dot_dimension_numbers<[1], [0], [0], [1], [0, 0, 1, 1], [], []>} : vector<8x8xf32>, vector<8x8xf32>, vector<8x8xf32> -> vector<8x8xf32>
    %c24 = arith.constant 24 : index
    %c0_52 = arith.constant 0 : index
    %120 = vector.load %arg9[%c24, %c0_52] : memref<64x64xf32, #tpu.memory_space<vmem>>, vector<8x64xf32>
    %cst_53 = arith.constant dense<0.000000e+00> : vector<8x64xf32>
    %121 = tpu.matmul %119, %120, %cst_53 {dimension_numbers = #tpu.dot_dimension_numbers<[1], [0], [0], [1], [0, 0, 1, 1], [], []>} : vector<8x8xf32>, vector<8x64xf32>, vector<8x64xf32> -> vector<8x64xf32>
    %122 = arith.addf %101, %121 : vector<8x64xf32>
    %123 = vector.extract_strided_slice %35 {offsets = [0, 32], sizes = [8, 8], strides = [1, 1]} : vector<8x64xf32> to vector<8x8xf32>
    %124 = vector.extract_strided_slice %36 {offsets = [0, 32], sizes = [8, 8], strides = [1, 1]} : vector<8x64xf32> to vector<8x8xf32>
    %125 = vector.extract_strided_slice %37 {offsets = [0, 32], sizes = [8, 8], strides = [1, 1]} : vector<8x64xf32> to vector<8x8xf32>
    %cst_54 = arith.constant dense<0.000000e+00> : vector<8x8xf32>
    %126 = tpu.matmul %123, %124, %cst_54 {dimension_numbers = #tpu.dot_dimension_numbers<[1], [1], [0], [0], [0, 0, 1, 0], [], []>} : vector<8x8xf32>, vector<8x8xf32>, vector<8x8xf32> -> vector<8x8xf32>
    %cst_55 = arith.constant 0.353553385 : f32
    %127 = vector.broadcast %cst_55 : f32 to vector<8x8xf32>
    %128 = arith.mulf %126, %127 : vector<8x8xf32>
    %129 = arith.addf %128, %5 : vector<8x8xf32>
    %cst_56 = arith.constant dense<0xFF800000> : vector<8xf32>
    %130 = vector.multi_reduction <maximumf>, %129, %cst_56 [1] : vector<8x8xf32> to vector<8xf32>
    %131 = vector.shape_cast %130 : vector<8xf32> to vector<8x1xf32>
    %132 = vector.broadcast %131 : vector<8x1xf32> to vector<8x8xf32>
    %133 = arith.subf %129, %132 : vector<8x8xf32>
    %134 = math.exp %133 : vector<8x8xf32>
    %cst_57 = arith.constant dense<0.000000e+00> : vector<8xf32>
    %135 = vector.multi_reduction <add>, %134, %cst_57 [1] : vector<8x8xf32> to vector<8xf32>
    %136 = vector.shape_cast %135 : vector<8xf32> to vector<8x1xf32>
    %137 = tpu.reciprocal %136 {approx = true} : vector<8x1xf32> -> vector<8x1xf32>
    %138 = vector.broadcast %137 : vector<8x1xf32> to vector<8x8xf32>
    %139 = arith.mulf %134, %138 : vector<8x8xf32>
    %cst_58 = arith.constant dense<0.000000e+00> : vector<8x8xf32>
    %140 = tpu.matmul %139, %125, %cst_58 {dimension_numbers = #tpu.dot_dimension_numbers<[1], [0], [0], [1], [0, 0, 1, 1], [], []>} : vector<8x8xf32>, vector<8x8xf32>, vector<8x8xf32> -> vector<8x8xf32>
    %c32 = arith.constant 32 : index
    %c0_59 = arith.constant 0 : index
    %141 = vector.load %arg9[%c32, %c0_59] : memref<64x64xf32, #tpu.memory_space<vmem>>, vector<8x64xf32>
    %cst_60 = arith.constant dense<0.000000e+00> : vector<8x64xf32>
    %142 = tpu.matmul %140, %141, %cst_60 {dimension_numbers = #tpu.dot_dimension_numbers<[1], [0], [0], [1], [0, 0, 1, 1], [], []>} : vector<8x8xf32>, vector<8x64xf32>, vector<8x64xf32> -> vector<8x64xf32>
    %143 = arith.addf %122, %142 : vector<8x64xf32>
    %144 = vector.extract_strided_slice %35 {offsets = [0, 40], sizes = [8, 8], strides = [1, 1]} : vector<8x64xf32> to vector<8x8xf32>
    %145 = vector.extract_strided_slice %36 {offsets = [0, 40], sizes = [8, 8], strides = [1, 1]} : vector<8x64xf32> to vector<8x8xf32>
    %146 = vector.extract_strided_slice %37 {offsets = [0, 40], sizes = [8, 8], strides = [1, 1]} : vector<8x64xf32> to vector<8x8xf32>
    %cst_61 = arith.constant dense<0.000000e+00> : vector<8x8xf32>
    %147 = tpu.matmul %144, %145, %cst_61 {dimension_numbers = #tpu.dot_dimension_numbers<[1], [1], [0], [0], [0, 0, 1, 0], [], []>} : vector<8x8xf32>, vector<8x8xf32>, vector<8x8xf32> -> vector<8x8xf32>
    %cst_62 = arith.constant 0.353553385 : f32
    %148 = vector.broadcast %cst_62 : f32 to vector<8x8xf32>
    %149 = arith.mulf %147, %148 : vector<8x8xf32>
    %150 = arith.addf %149, %5 : vector<8x8xf32>
    %cst_63 = arith.constant dense<0xFF800000> : vector<8xf32>
    %151 = vector.multi_reduction <maximumf>, %150, %cst_63 [1] : vector<8x8xf32> to vector<8xf32>
    %152 = vector.shape_cast %151 : vector<8xf32> to vector<8x1xf32>
    %153 = vector.broadcast %152 : vector<8x1xf32> to vector<8x8xf32>
    %154 = arith.subf %150, %153 : vector<8x8xf32>
    %155 = math.exp %154 : vector<8x8xf32>
    %cst_64 = arith.constant dense<0.000000e+00> : vector<8xf32>
    %156 = vector.multi_reduction <add>, %155, %cst_64 [1] : vector<8x8xf32> to vector<8xf32>
    %157 = vector.shape_cast %156 : vector<8xf32> to vector<8x1xf32>
    %158 = tpu.reciprocal %157 {approx = true} : vector<8x1xf32> -> vector<8x1xf32>
    %159 = vector.broadcast %158 : vector<8x1xf32> to vector<8x8xf32>
    %160 = arith.mulf %155, %159 : vector<8x8xf32>
    %cst_65 = arith.constant dense<0.000000e+00> : vector<8x8xf32>
    %161 = tpu.matmul %160, %146, %cst_65 {dimension_numbers = #tpu.dot_dimension_numbers<[1], [0], [0], [1], [0, 0, 1, 1], [], []>} : vector<8x8xf32>, vector<8x8xf32>, vector<8x8xf32> -> vector<8x8xf32>
    %c40 = arith.constant 40 : index
    %c0_66 = arith.constant 0 : index
    %162 = vector.load %arg9[%c40, %c0_66] : memref<64x64xf32, #tpu.memory_space<vmem>>, vector<8x64xf32>
    %cst_67 = arith.constant dense<0.000000e+00> : vector<8x64xf32>
    %163 = tpu.matmul %161, %162, %cst_67 {dimension_numbers = #tpu.dot_dimension_numbers<[1], [0], [0], [1], [0, 0, 1, 1], [], []>} : vector<8x8xf32>, vector<8x64xf32>, vector<8x64xf32> -> vector<8x64xf32>
    %164 = arith.addf %143, %163 : vector<8x64xf32>
    %165 = vector.extract_strided_slice %35 {offsets = [0, 48], sizes = [8, 8], strides = [1, 1]} : vector<8x64xf32> to vector<8x8xf32>
    %166 = vector.extract_strided_slice %36 {offsets = [0, 48], sizes = [8, 8], strides = [1, 1]} : vector<8x64xf32> to vector<8x8xf32>
    %167 = vector.extract_strided_slice %37 {offsets = [0, 48], sizes = [8, 8], strides = [1, 1]} : vector<8x64xf32> to vector<8x8xf32>
    %cst_68 = arith.constant dense<0.000000e+00> : vector<8x8xf32>
    %168 = tpu.matmul %165, %166, %cst_68 {dimension_numbers = #tpu.dot_dimension_numbers<[1], [1], [0], [0], [0, 0, 1, 0], [], []>} : vector<8x8xf32>, vector<8x8xf32>, vector<8x8xf32> -> vector<8x8xf32>
    %cst_69 = arith.constant 0.353553385 : f32
    %169 = vector.broadcast %cst_69 : f32 to vector<8x8xf32>
    %170 = arith.mulf %168, %169 : vector<8x8xf32>
    %171 = arith.addf %170, %5 : vector<8x8xf32>
    %cst_70 = arith.constant dense<0xFF800000> : vector<8xf32>
    %172 = vector.multi_reduction <maximumf>, %171, %cst_70 [1] : vector<8x8xf32> to vector<8xf32>
    %173 = vector.shape_cast %172 : vector<8xf32> to vector<8x1xf32>
    %174 = vector.broadcast %173 : vector<8x1xf32> to vector<8x8xf32>
    %175 = arith.subf %171, %174 : vector<8x8xf32>
    %176 = math.exp %175 : vector<8x8xf32>
    %cst_71 = arith.constant dense<0.000000e+00> : vector<8xf32>
    %177 = vector.multi_reduction <add>, %176, %cst_71 [1] : vector<8x8xf32> to vector<8xf32>
    %178 = vector.shape_cast %177 : vector<8xf32> to vector<8x1xf32>
    %179 = tpu.reciprocal %178 {approx = true} : vector<8x1xf32> -> vector<8x1xf32>
    %180 = vector.broadcast %179 : vector<8x1xf32> to vector<8x8xf32>
    %181 = arith.mulf %176, %180 : vector<8x8xf32>
    %cst_72 = arith.constant dense<0.000000e+00> : vector<8x8xf32>
    %182 = tpu.matmul %181, %167, %cst_72 {dimension_numbers = #tpu.dot_dimension_numbers<[1], [0], [0], [1], [0, 0, 1, 1], [], []>} : vector<8x8xf32>, vector<8x8xf32>, vector<8x8xf32> -> vector<8x8xf32>
    %c48 = arith.constant 48 : index
    %c0_73 = arith.constant 0 : index
    %183 = vector.load %arg9[%c48, %c0_73] : memref<64x64xf32, #tpu.memory_space<vmem>>, vector<8x64xf32>
    %cst_74 = arith.constant dense<0.000000e+00> : vector<8x64xf32>
    %184 = tpu.matmul %182, %183, %cst_74 {dimension_numbers = #tpu.dot_dimension_numbers<[1], [0], [0], [1], [0, 0, 1, 1], [], []>} : vector<8x8xf32>, vector<8x64xf32>, vector<8x64xf32> -> vector<8x64xf32>
    %185 = arith.addf %164, %184 : vector<8x64xf32>
    %186 = vector.extract_strided_slice %35 {offsets = [0, 56], sizes = [8, 8], strides = [1, 1]} : vector<8x64xf32> to vector<8x8xf32>
    %187 = vector.extract_strided_slice %36 {offsets = [0, 56], sizes = [8, 8], strides = [1, 1]} : vector<8x64xf32> to vector<8x8xf32>
    %188 = vector.extract_strided_slice %37 {offsets = [0, 56], sizes = [8, 8], strides = [1, 1]} : vector<8x64xf32> to vector<8x8xf32>
    %cst_75 = arith.constant dense<0.000000e+00> : vector<8x8xf32>
    %189 = tpu.matmul %186, %187, %cst_75 {dimension_numbers = #tpu.dot_dimension_numbers<[1], [1], [0], [0], [0, 0, 1, 0], [], []>} : vector<8x8xf32>, vector<8x8xf32>, vector<8x8xf32> -> vector<8x8xf32>
    %cst_76 = arith.constant 0.353553385 : f32
    %190 = vector.broadcast %cst_76 : f32 to vector<8x8xf32>
    %191 = arith.mulf %189, %190 : vector<8x8xf32>
    %192 = arith.addf %191, %5 : vector<8x8xf32>
    %cst_77 = arith.constant dense<0xFF800000> : vector<8xf32>
    %193 = vector.multi_reduction <maximumf>, %192, %cst_77 [1] : vector<8x8xf32> to vector<8xf32>
    %194 = vector.shape_cast %193 : vector<8xf32> to vector<8x1xf32>
    %195 = vector.broadcast %194 : vector<8x1xf32> to vector<8x8xf32>
    %196 = arith.subf %192, %195 : vector<8x8xf32>
    %197 = math.exp %196 : vector<8x8xf32>
    %cst_78 = arith.constant dense<0.000000e+00> : vector<8xf32>
    %198 = vector.multi_reduction <add>, %197, %cst_78 [1] : vector<8x8xf32> to vector<8xf32>
    %199 = vector.shape_cast %198 : vector<8xf32> to vector<8x1xf32>
    %200 = tpu.reciprocal %199 {approx = true} : vector<8x1xf32> -> vector<8x1xf32>
    %201 = vector.broadcast %200 : vector<8x1xf32> to vector<8x8xf32>
    %202 = arith.mulf %197, %201 : vector<8x8xf32>
    %cst_79 = arith.constant dense<0.000000e+00> : vector<8x8xf32>
    %203 = tpu.matmul %202, %188, %cst_79 {dimension_numbers = #tpu.dot_dimension_numbers<[1], [0], [0], [1], [0, 0, 1, 1], [], []>} : vector<8x8xf32>, vector<8x8xf32>, vector<8x8xf32> -> vector<8x8xf32>
    %c56 = arith.constant 56 : index
    %c0_80 = arith.constant 0 : index
    %204 = vector.load %arg9[%c56, %c0_80] : memref<64x64xf32, #tpu.memory_space<vmem>>, vector<8x64xf32>
    %cst_81 = arith.constant dense<0.000000e+00> : vector<8x64xf32>
    %205 = tpu.matmul %203, %204, %cst_81 {dimension_numbers = #tpu.dot_dimension_numbers<[1], [0], [0], [1], [0, 0, 1, 1], [], []>} : vector<8x8xf32>, vector<8x64xf32>, vector<8x64xf32> -> vector<8x64xf32>
    %206 = arith.addf %185, %205 : vector<8x64xf32>
    %c0_82 = arith.constant 0 : index
    %c0_83 = arith.constant 0 : index
    %207 = vector.load %arg10[%c0_82, %c0_83] : memref<1x64xf32, #tpu.memory_space<vmem>>, vector<1x64xf32>
    %208 = vector.broadcast %207 : vector<1x64xf32> to vector<8x64xf32>
    %209 = arith.addf %206, %208 : vector<8x64xf32>
    %210 = arith.addf %209, %1 : vector<8x64xf32>
    %cst_84 = arith.constant dense<0.000000e+00> : vector<8xf32>
    %211 = vector.multi_reduction <add>, %210, %cst_84 [1] : vector<8x64xf32> to vector<8xf32>
    %212 = vector.shape_cast %211 : vector<8xf32> to vector<8x1xf32>
    %cst_85 = arith.constant 6.400000e+01 : f32
    %213 = vector.broadcast %cst_85 : f32 to vector<8x1xf32>
    %214 = arith.divf %212, %213 : vector<8x1xf32>
    %215 = vector.broadcast %214 : vector<8x1xf32> to vector<8x64xf32>
    %216 = arith.subf %210, %215 : vector<8x64xf32>
    %217 = arith.mulf %216, %216 : vector<8x64xf32>
    %cst_86 = arith.constant dense<0.000000e+00> : vector<8xf32>
    %218 = vector.multi_reduction <add>, %217, %cst_86 [1] : vector<8x64xf32> to vector<8xf32>
    %219 = vector.shape_cast %218 : vector<8xf32> to vector<8x1xf32>
    %cst_87 = arith.constant 6.400000e+01 : f32
    %220 = vector.broadcast %cst_87 : f32 to vector<8x1xf32>
    %221 = arith.divf %219, %220 : vector<8x1xf32>
    %cst_88 = arith.constant 9.99999997E-7 : f32
    %222 = vector.broadcast %cst_88 : f32 to vector<8x1xf32>
    %223 = arith.addf %221, %222 : vector<8x1xf32>
    %224 = math.rsqrt %223 : vector<8x1xf32>
    %225 = vector.broadcast %224 : vector<8x1xf32> to vector<8x64xf32>
    %226 = arith.mulf %216, %225 : vector<8x64xf32>
    %c0_89 = arith.constant 0 : index
    %c0_90 = arith.constant 0 : index
    %227 = vector.load %arg11[%c0_89, %c0_90] : memref<1x64xf32, #tpu.memory_space<vmem>>, vector<1x64xf32>
    %228 = vector.broadcast %227 : vector<1x64xf32> to vector<8x64xf32>
    %229 = arith.mulf %226, %228 : vector<8x64xf32>
    %c0_91 = arith.constant 0 : index
    %c0_92 = arith.constant 0 : index
    %230 = vector.load %arg12[%c0_91, %c0_92] : memref<1x64xf32, #tpu.memory_space<vmem>>, vector<1x64xf32>
    %231 = vector.broadcast %230 : vector<1x64xf32> to vector<8x64xf32>
    %232 = arith.addf %229, %231 : vector<8x64xf32>
    %c0_93 = arith.constant 0 : index
    %c0_94 = arith.constant 0 : index
    %233 = vector.load %arg13[%c0_93, %c0_94] : memref<64x64xf32, #tpu.memory_space<vmem>>, vector<64x64xf32>
    %cst_95 = arith.constant dense<0.000000e+00> : vector<8x64xf32>
    %234 = tpu.matmul %232, %233, %cst_95 {dimension_numbers = #tpu.dot_dimension_numbers<[1], [0], [0], [1], [0, 0, 1, 1], [], []>} : vector<8x64xf32>, vector<64x64xf32>, vector<8x64xf32> -> vector<8x64xf32>
    %c0_96 = arith.constant 0 : index
    %c0_97 = arith.constant 0 : index
    %235 = vector.load %arg14[%c0_96, %c0_97] : memref<1x64xf32, #tpu.memory_space<vmem>>, vector<1x64xf32>
    %236 = vector.broadcast %235 : vector<1x64xf32> to vector<8x64xf32>
    %237 = arith.addf %234, %236 : vector<8x64xf32>
    %c0_98 = arith.constant 0 : index
    %c0_99 = arith.constant 0 : index
    %238 = vector.load %arg15[%c0_98, %c0_99] : memref<64x128xf32, #tpu.memory_space<vmem>>, vector<64x128xf32>
    %cst_100 = arith.constant dense<0.000000e+00> : vector<8x128xf32>
    %239 = tpu.matmul %3, %238, %cst_100 {dimension_numbers = #tpu.dot_dimension_numbers<[1], [0], [0], [1], [0, 0, 1, 1], [], []>} : vector<8x64xf32>, vector<64x128xf32>, vector<8x128xf32> -> vector<8x128xf32>
    %c0_101 = arith.constant 0 : index
    %c0_102 = arith.constant 0 : index
    %240 = vector.load %arg16[%c0_101, %c0_102] : memref<1x128xf32, #tpu.memory_space<vmem>>, vector<1x128xf32>
    %241 = vector.broadcast %240 : vector<1x128xf32> to vector<8x128xf32>
    %242 = arith.addf %239, %241 : vector<8x128xf32>
    %243 = vector.extract_strided_slice %242 {offsets = [0, 0], sizes = [8, 64], strides = [1, 1]} : vector<8x128xf32> to vector<8x64xf32>
    %244 = vector.extract_strided_slice %242 {offsets = [0, 64], sizes = [8, 64], strides = [1, 1]} : vector<8x128xf32> to vector<8x64xf32>
    %cst_103 = arith.constant 0.000000e+00 : f32
    %245 = vector.broadcast %cst_103 : f32 to vector<8x64xf32>
    %246 = vector.extract_strided_slice %237 {offsets = [0, 0], sizes = [8, 8], strides = [1, 1]} : vector<8x64xf32> to vector<8x8xf32>
    %247 = vector.extract_strided_slice %243 {offsets = [0, 0], sizes = [8, 8], strides = [1, 1]} : vector<8x64xf32> to vector<8x8xf32>
    %248 = vector.extract_strided_slice %244 {offsets = [0, 0], sizes = [8, 8], strides = [1, 1]} : vector<8x64xf32> to vector<8x8xf32>
    %cst_104 = arith.constant dense<0.000000e+00> : vector<8x8xf32>
    %249 = tpu.matmul %246, %247, %cst_104 {dimension_numbers = #tpu.dot_dimension_numbers<[1], [1], [0], [0], [0, 0, 1, 0], [], []>} : vector<8x8xf32>, vector<8x8xf32>, vector<8x8xf32> -> vector<8x8xf32>
    %cst_105 = arith.constant 0.353553385 : f32
    %250 = vector.broadcast %cst_105 : f32 to vector<8x8xf32>
    %251 = arith.mulf %249, %250 : vector<8x8xf32>
    %252 = arith.addf %251, %7 : vector<8x8xf32>
    %cst_106 = arith.constant dense<0xFF800000> : vector<8xf32>
    %253 = vector.multi_reduction <maximumf>, %252, %cst_106 [1] : vector<8x8xf32> to vector<8xf32>
    %254 = vector.shape_cast %253 : vector<8xf32> to vector<8x1xf32>
    %255 = vector.broadcast %254 : vector<8x1xf32> to vector<8x8xf32>
    %256 = arith.subf %252, %255 : vector<8x8xf32>
    %257 = math.exp %256 : vector<8x8xf32>
    %cst_107 = arith.constant dense<0.000000e+00> : vector<8xf32>
    %258 = vector.multi_reduction <add>, %257, %cst_107 [1] : vector<8x8xf32> to vector<8xf32>
    %259 = vector.shape_cast %258 : vector<8xf32> to vector<8x1xf32>
    %260 = tpu.reciprocal %259 {approx = true} : vector<8x1xf32> -> vector<8x1xf32>
    %261 = vector.broadcast %260 : vector<8x1xf32> to vector<8x8xf32>
    %262 = arith.mulf %257, %261 : vector<8x8xf32>
    %cst_108 = arith.constant dense<0.000000e+00> : vector<8x8xf32>
    %263 = tpu.matmul %262, %248, %cst_108 {dimension_numbers = #tpu.dot_dimension_numbers<[1], [0], [0], [1], [0, 0, 1, 1], [], []>} : vector<8x8xf32>, vector<8x8xf32>, vector<8x8xf32> -> vector<8x8xf32>
    %c0_109 = arith.constant 0 : index
    %c0_110 = arith.constant 0 : index
    %264 = vector.load %arg17[%c0_109, %c0_110] : memref<64x64xf32, #tpu.memory_space<vmem>>, vector<8x64xf32>
    %cst_111 = arith.constant dense<0.000000e+00> : vector<8x64xf32>
    %265 = tpu.matmul %263, %264, %cst_111 {dimension_numbers = #tpu.dot_dimension_numbers<[1], [0], [0], [1], [0, 0, 1, 1], [], []>} : vector<8x8xf32>, vector<8x64xf32>, vector<8x64xf32> -> vector<8x64xf32>
    %266 = arith.addf %245, %265 : vector<8x64xf32>
    %267 = vector.extract_strided_slice %237 {offsets = [0, 8], sizes = [8, 8], strides = [1, 1]} : vector<8x64xf32> to vector<8x8xf32>
    %268 = vector.extract_strided_slice %243 {offsets = [0, 8], sizes = [8, 8], strides = [1, 1]} : vector<8x64xf32> to vector<8x8xf32>
    %269 = vector.extract_strided_slice %244 {offsets = [0, 8], sizes = [8, 8], strides = [1, 1]} : vector<8x64xf32> to vector<8x8xf32>
    %cst_112 = arith.constant dense<0.000000e+00> : vector<8x8xf32>
    %270 = tpu.matmul %267, %268, %cst_112 {dimension_numbers = #tpu.dot_dimension_numbers<[1], [1], [0], [0], [0, 0, 1, 0], [], []>} : vector<8x8xf32>, vector<8x8xf32>, vector<8x8xf32> -> vector<8x8xf32>
    %cst_113 = arith.constant 0.353553385 : f32
    %271 = vector.broadcast %cst_113 : f32 to vector<8x8xf32>
    %272 = arith.mulf %270, %271 : vector<8x8xf32>
    %273 = arith.addf %272, %7 : vector<8x8xf32>
    %cst_114 = arith.constant dense<0xFF800000> : vector<8xf32>
    %274 = vector.multi_reduction <maximumf>, %273, %cst_114 [1] : vector<8x8xf32> to vector<8xf32>
    %275 = vector.shape_cast %274 : vector<8xf32> to vector<8x1xf32>
    %276 = vector.broadcast %275 : vector<8x1xf32> to vector<8x8xf32>
    %277 = arith.subf %273, %276 : vector<8x8xf32>
    %278 = math.exp %277 : vector<8x8xf32>
    %cst_115 = arith.constant dense<0.000000e+00> : vector<8xf32>
    %279 = vector.multi_reduction <add>, %278, %cst_115 [1] : vector<8x8xf32> to vector<8xf32>
    %280 = vector.shape_cast %279 : vector<8xf32> to vector<8x1xf32>
    %281 = tpu.reciprocal %280 {approx = true} : vector<8x1xf32> -> vector<8x1xf32>
    %282 = vector.broadcast %281 : vector<8x1xf32> to vector<8x8xf32>
    %283 = arith.mulf %278, %282 : vector<8x8xf32>
    %cst_116 = arith.constant dense<0.000000e+00> : vector<8x8xf32>
    %284 = tpu.matmul %283, %269, %cst_116 {dimension_numbers = #tpu.dot_dimension_numbers<[1], [0], [0], [1], [0, 0, 1, 1], [], []>} : vector<8x8xf32>, vector<8x8xf32>, vector<8x8xf32> -> vector<8x8xf32>
    %c8_117 = arith.constant 8 : index
    %c0_118 = arith.constant 0 : index
    %285 = vector.load %arg17[%c8_117, %c0_118] : memref<64x64xf32, #tpu.memory_space<vmem>>, vector<8x64xf32>
    %cst_119 = arith.constant dense<0.000000e+00> : vector<8x64xf32>
    %286 = tpu.matmul %284, %285, %cst_119 {dimension_numbers = #tpu.dot_dimension_numbers<[1], [0], [0], [1], [0, 0, 1, 1], [], []>} : vector<8x8xf32>, vector<8x64xf32>, vector<8x64xf32> -> vector<8x64xf32>
    %287 = arith.addf %266, %286 : vector<8x64xf32>
    %288 = vector.extract_strided_slice %237 {offsets = [0, 16], sizes = [8, 8], strides = [1, 1]} : vector<8x64xf32> to vector<8x8xf32>
    %289 = vector.extract_strided_slice %243 {offsets = [0, 16], sizes = [8, 8], strides = [1, 1]} : vector<8x64xf32> to vector<8x8xf32>
    %290 = vector.extract_strided_slice %244 {offsets = [0, 16], sizes = [8, 8], strides = [1, 1]} : vector<8x64xf32> to vector<8x8xf32>
    %cst_120 = arith.constant dense<0.000000e+00> : vector<8x8xf32>
    %291 = tpu.matmul %288, %289, %cst_120 {dimension_numbers = #tpu.dot_dimension_numbers<[1], [1], [0], [0], [0, 0, 1, 0], [], []>} : vector<8x8xf32>, vector<8x8xf32>, vector<8x8xf32> -> vector<8x8xf32>
    %cst_121 = arith.constant 0.353553385 : f32
    %292 = vector.broadcast %cst_121 : f32 to vector<8x8xf32>
    %293 = arith.mulf %291, %292 : vector<8x8xf32>
    %294 = arith.addf %293, %7 : vector<8x8xf32>
    %cst_122 = arith.constant dense<0xFF800000> : vector<8xf32>
    %295 = vector.multi_reduction <maximumf>, %294, %cst_122 [1] : vector<8x8xf32> to vector<8xf32>
    %296 = vector.shape_cast %295 : vector<8xf32> to vector<8x1xf32>
    %297 = vector.broadcast %296 : vector<8x1xf32> to vector<8x8xf32>
    %298 = arith.subf %294, %297 : vector<8x8xf32>
    %299 = math.exp %298 : vector<8x8xf32>
    %cst_123 = arith.constant dense<0.000000e+00> : vector<8xf32>
    %300 = vector.multi_reduction <add>, %299, %cst_123 [1] : vector<8x8xf32> to vector<8xf32>
    %301 = vector.shape_cast %300 : vector<8xf32> to vector<8x1xf32>
    %302 = tpu.reciprocal %301 {approx = true} : vector<8x1xf32> -> vector<8x1xf32>
    %303 = vector.broadcast %302 : vector<8x1xf32> to vector<8x8xf32>
    %304 = arith.mulf %299, %303 : vector<8x8xf32>
    %cst_124 = arith.constant dense<0.000000e+00> : vector<8x8xf32>
    %305 = tpu.matmul %304, %290, %cst_124 {dimension_numbers = #tpu.dot_dimension_numbers<[1], [0], [0], [1], [0, 0, 1, 1], [], []>} : vector<8x8xf32>, vector<8x8xf32>, vector<8x8xf32> -> vector<8x8xf32>
    %c16_125 = arith.constant 16 : index
    %c0_126 = arith.constant 0 : index
    %306 = vector.load %arg17[%c16_125, %c0_126] : memref<64x64xf32, #tpu.memory_space<vmem>>, vector<8x64xf32>
    %cst_127 = arith.constant dense<0.000000e+00> : vector<8x64xf32>
    %307 = tpu.matmul %305, %306, %cst_127 {dimension_numbers = #tpu.dot_dimension_numbers<[1], [0], [0], [1], [0, 0, 1, 1], [], []>} : vector<8x8xf32>, vector<8x64xf32>, vector<8x64xf32> -> vector<8x64xf32>
    %308 = arith.addf %287, %307 : vector<8x64xf32>
    %309 = vector.extract_strided_slice %237 {offsets = [0, 24], sizes = [8, 8], strides = [1, 1]} : vector<8x64xf32> to vector<8x8xf32>
    %310 = vector.extract_strided_slice %243 {offsets = [0, 24], sizes = [8, 8], strides = [1, 1]} : vector<8x64xf32> to vector<8x8xf32>
    %311 = vector.extract_strided_slice %244 {offsets = [0, 24], sizes = [8, 8], strides = [1, 1]} : vector<8x64xf32> to vector<8x8xf32>
    %cst_128 = arith.constant dense<0.000000e+00> : vector<8x8xf32>
    %312 = tpu.matmul %309, %310, %cst_128 {dimension_numbers = #tpu.dot_dimension_numbers<[1], [1], [0], [0], [0, 0, 1, 0], [], []>} : vector<8x8xf32>, vector<8x8xf32>, vector<8x8xf32> -> vector<8x8xf32>
    %cst_129 = arith.constant 0.353553385 : f32
    %313 = vector.broadcast %cst_129 : f32 to vector<8x8xf32>
    %314 = arith.mulf %312, %313 : vector<8x8xf32>
    %315 = arith.addf %314, %7 : vector<8x8xf32>
    %cst_130 = arith.constant dense<0xFF800000> : vector<8xf32>
    %316 = vector.multi_reduction <maximumf>, %315, %cst_130 [1] : vector<8x8xf32> to vector<8xf32>
    %317 = vector.shape_cast %316 : vector<8xf32> to vector<8x1xf32>
    %318 = vector.broadcast %317 : vector<8x1xf32> to vector<8x8xf32>
    %319 = arith.subf %315, %318 : vector<8x8xf32>
    %320 = math.exp %319 : vector<8x8xf32>
    %cst_131 = arith.constant dense<0.000000e+00> : vector<8xf32>
    %321 = vector.multi_reduction <add>, %320, %cst_131 [1] : vector<8x8xf32> to vector<8xf32>
    %322 = vector.shape_cast %321 : vector<8xf32> to vector<8x1xf32>
    %323 = tpu.reciprocal %322 {approx = true} : vector<8x1xf32> -> vector<8x1xf32>
    %324 = vector.broadcast %323 : vector<8x1xf32> to vector<8x8xf32>
    %325 = arith.mulf %320, %324 : vector<8x8xf32>
    %cst_132 = arith.constant dense<0.000000e+00> : vector<8x8xf32>
    %326 = tpu.matmul %325, %311, %cst_132 {dimension_numbers = #tpu.dot_dimension_numbers<[1], [0], [0], [1], [0, 0, 1, 1], [], []>} : vector<8x8xf32>, vector<8x8xf32>, vector<8x8xf32> -> vector<8x8xf32>
    %c24_133 = arith.constant 24 : index
    %c0_134 = arith.constant 0 : index
    %327 = vector.load %arg17[%c24_133, %c0_134] : memref<64x64xf32, #tpu.memory_space<vmem>>, vector<8x64xf32>
    %cst_135 = arith.constant dense<0.000000e+00> : vector<8x64xf32>
    %328 = tpu.matmul %326, %327, %cst_135 {dimension_numbers = #tpu.dot_dimension_numbers<[1], [0], [0], [1], [0, 0, 1, 1], [], []>} : vector<8x8xf32>, vector<8x64xf32>, vector<8x64xf32> -> vector<8x64xf32>
    %329 = arith.addf %308, %328 : vector<8x64xf32>
    %330 = vector.extract_strided_slice %237 {offsets = [0, 32], sizes = [8, 8], strides = [1, 1]} : vector<8x64xf32> to vector<8x8xf32>
    %331 = vector.extract_strided_slice %243 {offsets = [0, 32], sizes = [8, 8], strides = [1, 1]} : vector<8x64xf32> to vector<8x8xf32>
    %332 = vector.extract_strided_slice %244 {offsets = [0, 32], sizes = [8, 8], strides = [1, 1]} : vector<8x64xf32> to vector<8x8xf32>
    %cst_136 = arith.constant dense<0.000000e+00> : vector<8x8xf32>
    %333 = tpu.matmul %330, %331, %cst_136 {dimension_numbers = #tpu.dot_dimension_numbers<[1], [1], [0], [0], [0, 0, 1, 0], [], []>} : vector<8x8xf32>, vector<8x8xf32>, vector<8x8xf32> -> vector<8x8xf32>
    %cst_137 = arith.constant 0.353553385 : f32
    %334 = vector.broadcast %cst_137 : f32 to vector<8x8xf32>
    %335 = arith.mulf %333, %334 : vector<8x8xf32>
    %336 = arith.addf %335, %7 : vector<8x8xf32>
    %cst_138 = arith.constant dense<0xFF800000> : vector<8xf32>
    %337 = vector.multi_reduction <maximumf>, %336, %cst_138 [1] : vector<8x8xf32> to vector<8xf32>
    %338 = vector.shape_cast %337 : vector<8xf32> to vector<8x1xf32>
    %339 = vector.broadcast %338 : vector<8x1xf32> to vector<8x8xf32>
    %340 = arith.subf %336, %339 : vector<8x8xf32>
    %341 = math.exp %340 : vector<8x8xf32>
    %cst_139 = arith.constant dense<0.000000e+00> : vector<8xf32>
    %342 = vector.multi_reduction <add>, %341, %cst_139 [1] : vector<8x8xf32> to vector<8xf32>
    %343 = vector.shape_cast %342 : vector<8xf32> to vector<8x1xf32>
    %344 = tpu.reciprocal %343 {approx = true} : vector<8x1xf32> -> vector<8x1xf32>
    %345 = vector.broadcast %344 : vector<8x1xf32> to vector<8x8xf32>
    %346 = arith.mulf %341, %345 : vector<8x8xf32>
    %cst_140 = arith.constant dense<0.000000e+00> : vector<8x8xf32>
    %347 = tpu.matmul %346, %332, %cst_140 {dimension_numbers = #tpu.dot_dimension_numbers<[1], [0], [0], [1], [0, 0, 1, 1], [], []>} : vector<8x8xf32>, vector<8x8xf32>, vector<8x8xf32> -> vector<8x8xf32>
    %c32_141 = arith.constant 32 : index
    %c0_142 = arith.constant 0 : index
    %348 = vector.load %arg17[%c32_141, %c0_142] : memref<64x64xf32, #tpu.memory_space<vmem>>, vector<8x64xf32>
    %cst_143 = arith.constant dense<0.000000e+00> : vector<8x64xf32>
    %349 = tpu.matmul %347, %348, %cst_143 {dimension_numbers = #tpu.dot_dimension_numbers<[1], [0], [0], [1], [0, 0, 1, 1], [], []>} : vector<8x8xf32>, vector<8x64xf32>, vector<8x64xf32> -> vector<8x64xf32>
    %350 = arith.addf %329, %349 : vector<8x64xf32>
    %351 = vector.extract_strided_slice %237 {offsets = [0, 40], sizes = [8, 8], strides = [1, 1]} : vector<8x64xf32> to vector<8x8xf32>
    %352 = vector.extract_strided_slice %243 {offsets = [0, 40], sizes = [8, 8], strides = [1, 1]} : vector<8x64xf32> to vector<8x8xf32>
    %353 = vector.extract_strided_slice %244 {offsets = [0, 40], sizes = [8, 8], strides = [1, 1]} : vector<8x64xf32> to vector<8x8xf32>
    %cst_144 = arith.constant dense<0.000000e+00> : vector<8x8xf32>
    %354 = tpu.matmul %351, %352, %cst_144 {dimension_numbers = #tpu.dot_dimension_numbers<[1], [1], [0], [0], [0, 0, 1, 0], [], []>} : vector<8x8xf32>, vector<8x8xf32>, vector<8x8xf32> -> vector<8x8xf32>
    %cst_145 = arith.constant 0.353553385 : f32
    %355 = vector.broadcast %cst_145 : f32 to vector<8x8xf32>
    %356 = arith.mulf %354, %355 : vector<8x8xf32>
    %357 = arith.addf %356, %7 : vector<8x8xf32>
    %cst_146 = arith.constant dense<0xFF800000> : vector<8xf32>
    %358 = vector.multi_reduction <maximumf>, %357, %cst_146 [1] : vector<8x8xf32> to vector<8xf32>
    %359 = vector.shape_cast %358 : vector<8xf32> to vector<8x1xf32>
    %360 = vector.broadcast %359 : vector<8x1xf32> to vector<8x8xf32>
    %361 = arith.subf %357, %360 : vector<8x8xf32>
    %362 = math.exp %361 : vector<8x8xf32>
    %cst_147 = arith.constant dense<0.000000e+00> : vector<8xf32>
    %363 = vector.multi_reduction <add>, %362, %cst_147 [1] : vector<8x8xf32> to vector<8xf32>
    %364 = vector.shape_cast %363 : vector<8xf32> to vector<8x1xf32>
    %365 = tpu.reciprocal %364 {approx = true} : vector<8x1xf32> -> vector<8x1xf32>
    %366 = vector.broadcast %365 : vector<8x1xf32> to vector<8x8xf32>
    %367 = arith.mulf %362, %366 : vector<8x8xf32>
    %cst_148 = arith.constant dense<0.000000e+00> : vector<8x8xf32>
    %368 = tpu.matmul %367, %353, %cst_148 {dimension_numbers = #tpu.dot_dimension_numbers<[1], [0], [0], [1], [0, 0, 1, 1], [], []>} : vector<8x8xf32>, vector<8x8xf32>, vector<8x8xf32> -> vector<8x8xf32>
    %c40_149 = arith.constant 40 : index
    %c0_150 = arith.constant 0 : index
    %369 = vector.load %arg17[%c40_149, %c0_150] : memref<64x64xf32, #tpu.memory_space<vmem>>, vector<8x64xf32>
    %cst_151 = arith.constant dense<0.000000e+00> : vector<8x64xf32>
    %370 = tpu.matmul %368, %369, %cst_151 {dimension_numbers = #tpu.dot_dimension_numbers<[1], [0], [0], [1], [0, 0, 1, 1], [], []>} : vector<8x8xf32>, vector<8x64xf32>, vector<8x64xf32> -> vector<8x64xf32>
    %371 = arith.addf %350, %370 : vector<8x64xf32>
    %372 = vector.extract_strided_slice %237 {offsets = [0, 48], sizes = [8, 8], strides = [1, 1]} : vector<8x64xf32> to vector<8x8xf32>
    %373 = vector.extract_strided_slice %243 {offsets = [0, 48], sizes = [8, 8], strides = [1, 1]} : vector<8x64xf32> to vector<8x8xf32>
    %374 = vector.extract_strided_slice %244 {offsets = [0, 48], sizes = [8, 8], strides = [1, 1]} : vector<8x64xf32> to vector<8x8xf32>
    %cst_152 = arith.constant dense<0.000000e+00> : vector<8x8xf32>
    %375 = tpu.matmul %372, %373, %cst_152 {dimension_numbers = #tpu.dot_dimension_numbers<[1], [1], [0], [0], [0, 0, 1, 0], [], []>} : vector<8x8xf32>, vector<8x8xf32>, vector<8x8xf32> -> vector<8x8xf32>
    %cst_153 = arith.constant 0.353553385 : f32
    %376 = vector.broadcast %cst_153 : f32 to vector<8x8xf32>
    %377 = arith.mulf %375, %376 : vector<8x8xf32>
    %378 = arith.addf %377, %7 : vector<8x8xf32>
    %cst_154 = arith.constant dense<0xFF800000> : vector<8xf32>
    %379 = vector.multi_reduction <maximumf>, %378, %cst_154 [1] : vector<8x8xf32> to vector<8xf32>
    %380 = vector.shape_cast %379 : vector<8xf32> to vector<8x1xf32>
    %381 = vector.broadcast %380 : vector<8x1xf32> to vector<8x8xf32>
    %382 = arith.subf %378, %381 : vector<8x8xf32>
    %383 = math.exp %382 : vector<8x8xf32>
    %cst_155 = arith.constant dense<0.000000e+00> : vector<8xf32>
    %384 = vector.multi_reduction <add>, %383, %cst_155 [1] : vector<8x8xf32> to vector<8xf32>
    %385 = vector.shape_cast %384 : vector<8xf32> to vector<8x1xf32>
    %386 = tpu.reciprocal %385 {approx = true} : vector<8x1xf32> -> vector<8x1xf32>
    %387 = vector.broadcast %386 : vector<8x1xf32> to vector<8x8xf32>
    %388 = arith.mulf %383, %387 : vector<8x8xf32>
    %cst_156 = arith.constant dense<0.000000e+00> : vector<8x8xf32>
    %389 = tpu.matmul %388, %374, %cst_156 {dimension_numbers = #tpu.dot_dimension_numbers<[1], [0], [0], [1], [0, 0, 1, 1], [], []>} : vector<8x8xf32>, vector<8x8xf32>, vector<8x8xf32> -> vector<8x8xf32>
    %c48_157 = arith.constant 48 : index
    %c0_158 = arith.constant 0 : index
    %390 = vector.load %arg17[%c48_157, %c0_158] : memref<64x64xf32, #tpu.memory_space<vmem>>, vector<8x64xf32>
    %cst_159 = arith.constant dense<0.000000e+00> : vector<8x64xf32>
    %391 = tpu.matmul %389, %390, %cst_159 {dimension_numbers = #tpu.dot_dimension_numbers<[1], [0], [0], [1], [0, 0, 1, 1], [], []>} : vector<8x8xf32>, vector<8x64xf32>, vector<8x64xf32> -> vector<8x64xf32>
    %392 = arith.addf %371, %391 : vector<8x64xf32>
    %393 = vector.extract_strided_slice %237 {offsets = [0, 56], sizes = [8, 8], strides = [1, 1]} : vector<8x64xf32> to vector<8x8xf32>
    %394 = vector.extract_strided_slice %243 {offsets = [0, 56], sizes = [8, 8], strides = [1, 1]} : vector<8x64xf32> to vector<8x8xf32>
    %395 = vector.extract_strided_slice %244 {offsets = [0, 56], sizes = [8, 8], strides = [1, 1]} : vector<8x64xf32> to vector<8x8xf32>
    %cst_160 = arith.constant dense<0.000000e+00> : vector<8x8xf32>
    %396 = tpu.matmul %393, %394, %cst_160 {dimension_numbers = #tpu.dot_dimension_numbers<[1], [1], [0], [0], [0, 0, 1, 0], [], []>} : vector<8x8xf32>, vector<8x8xf32>, vector<8x8xf32> -> vector<8x8xf32>
    %cst_161 = arith.constant 0.353553385 : f32
    %397 = vector.broadcast %cst_161 : f32 to vector<8x8xf32>
    %398 = arith.mulf %396, %397 : vector<8x8xf32>
    %399 = arith.addf %398, %7 : vector<8x8xf32>
    %cst_162 = arith.constant dense<0xFF800000> : vector<8xf32>
    %400 = vector.multi_reduction <maximumf>, %399, %cst_162 [1] : vector<8x8xf32> to vector<8xf32>
    %401 = vector.shape_cast %400 : vector<8xf32> to vector<8x1xf32>
    %402 = vector.broadcast %401 : vector<8x1xf32> to vector<8x8xf32>
    %403 = arith.subf %399, %402 : vector<8x8xf32>
    %404 = math.exp %403 : vector<8x8xf32>
    %cst_163 = arith.constant dense<0.000000e+00> : vector<8xf32>
    %405 = vector.multi_reduction <add>, %404, %cst_163 [1] : vector<8x8xf32> to vector<8xf32>
    %406 = vector.shape_cast %405 : vector<8xf32> to vector<8x1xf32>
    %407 = tpu.reciprocal %406 {approx = true} : vector<8x1xf32> -> vector<8x1xf32>
    %408 = vector.broadcast %407 : vector<8x1xf32> to vector<8x8xf32>
    %409 = arith.mulf %404, %408 : vector<8x8xf32>
    %cst_164 = arith.constant dense<0.000000e+00> : vector<8x8xf32>
    %410 = tpu.matmul %409, %395, %cst_164 {dimension_numbers = #tpu.dot_dimension_numbers<[1], [0], [0], [1], [0, 0, 1, 1], [], []>} : vector<8x8xf32>, vector<8x8xf32>, vector<8x8xf32> -> vector<8x8xf32>
    %c56_165 = arith.constant 56 : index
    %c0_166 = arith.constant 0 : index
    %411 = vector.load %arg17[%c56_165, %c0_166] : memref<64x64xf32, #tpu.memory_space<vmem>>, vector<8x64xf32>
    %cst_167 = arith.constant dense<0.000000e+00> : vector<8x64xf32>
    %412 = tpu.matmul %410, %411, %cst_167 {dimension_numbers = #tpu.dot_dimension_numbers<[1], [0], [0], [1], [0, 0, 1, 1], [], []>} : vector<8x8xf32>, vector<8x64xf32>, vector<8x64xf32> -> vector<8x64xf32>
    %413 = arith.addf %392, %412 : vector<8x64xf32>
    %c0_168 = arith.constant 0 : index
    %c0_169 = arith.constant 0 : index
    %414 = vector.load %arg18[%c0_168, %c0_169] : memref<1x64xf32, #tpu.memory_space<vmem>>, vector<1x64xf32>
    %415 = vector.broadcast %414 : vector<1x64xf32> to vector<8x64xf32>
    %416 = arith.addf %413, %415 : vector<8x64xf32>
    %417 = arith.addf %416, %210 : vector<8x64xf32>
    %cst_170 = arith.constant dense<0.000000e+00> : vector<8xf32>
    %418 = vector.multi_reduction <add>, %417, %cst_170 [1] : vector<8x64xf32> to vector<8xf32>
    %419 = vector.shape_cast %418 : vector<8xf32> to vector<8x1xf32>
    %cst_171 = arith.constant 6.400000e+01 : f32
    %420 = vector.broadcast %cst_171 : f32 to vector<8x1xf32>
    %421 = arith.divf %419, %420 : vector<8x1xf32>
    %422 = vector.broadcast %421 : vector<8x1xf32> to vector<8x64xf32>
    %423 = arith.subf %417, %422 : vector<8x64xf32>
    %424 = arith.mulf %423, %423 : vector<8x64xf32>
    %cst_172 = arith.constant dense<0.000000e+00> : vector<8xf32>
    %425 = vector.multi_reduction <add>, %424, %cst_172 [1] : vector<8x64xf32> to vector<8xf32>
    %426 = vector.shape_cast %425 : vector<8xf32> to vector<8x1xf32>
    %cst_173 = arith.constant 6.400000e+01 : f32
    %427 = vector.broadcast %cst_173 : f32 to vector<8x1xf32>
    %428 = arith.divf %426, %427 : vector<8x1xf32>
    %cst_174 = arith.constant 9.99999997E-7 : f32
    %429 = vector.broadcast %cst_174 : f32 to vector<8x1xf32>
    %430 = arith.addf %428, %429 : vector<8x1xf32>
    %431 = math.rsqrt %430 : vector<8x1xf32>
    %432 = vector.broadcast %431 : vector<8x1xf32> to vector<8x64xf32>
    %433 = arith.mulf %423, %432 : vector<8x64xf32>
    %c0_175 = arith.constant 0 : index
    %c0_176 = arith.constant 0 : index
    %434 = vector.load %arg19[%c0_175, %c0_176] : memref<1x64xf32, #tpu.memory_space<vmem>>, vector<1x64xf32>
    %435 = vector.broadcast %434 : vector<1x64xf32> to vector<8x64xf32>
    %436 = arith.mulf %433, %435 : vector<8x64xf32>
    %c0_177 = arith.constant 0 : index
    %c0_178 = arith.constant 0 : index
    %437 = vector.load %arg20[%c0_177, %c0_178] : memref<1x64xf32, #tpu.memory_space<vmem>>, vector<1x64xf32>
    %438 = vector.broadcast %437 : vector<1x64xf32> to vector<8x64xf32>
    %439 = arith.addf %436, %438 : vector<8x64xf32>
    %c0_179 = arith.constant 0 : index
    %c0_180 = arith.constant 0 : index
    %440 = vector.load %arg21[%c0_179, %c0_180] : memref<64x256xf32, #tpu.memory_space<vmem>>, vector<64x256xf32>
    %cst_181 = arith.constant dense<0.000000e+00> : vector<8x256xf32>
    %441 = tpu.matmul %439, %440, %cst_181 {dimension_numbers = #tpu.dot_dimension_numbers<[1], [0], [0], [1], [0, 0, 1, 1], [], []>} : vector<8x64xf32>, vector<64x256xf32>, vector<8x256xf32> -> vector<8x256xf32>
    %c0_182 = arith.constant 0 : index
    %c0_183 = arith.constant 0 : index
    %442 = vector.load %arg22[%c0_182, %c0_183] : memref<1x256xf32, #tpu.memory_space<vmem>>, vector<1x256xf32>
    %443 = vector.broadcast %442 : vector<1x256xf32> to vector<8x256xf32>
    %444 = arith.addf %441, %443 : vector<8x256xf32>
    %cst_184 = arith.constant 5.000000e-01 : f32
    %445 = vector.broadcast %cst_184 : f32 to vector<8x256xf32>
    %446 = arith.mulf %445, %444 : vector<8x256xf32>
    %cst_185 = arith.constant 4.471500e-02 : f32
    %447 = vector.broadcast %cst_185 : f32 to vector<8x256xf32>
    %448 = arith.mulf %447, %444 : vector<8x256xf32>
    %449 = arith.mulf %448, %444 : vector<8x256xf32>
    %450 = arith.mulf %449, %444 : vector<8x256xf32>
    %451 = arith.addf %444, %450 : vector<8x256xf32>
    %cst_186 = arith.constant 0.797884583 : f32
    %452 = vector.broadcast %cst_186 : f32 to vector<8x256xf32>
    %453 = arith.mulf %452, %451 : vector<8x256xf32>
    %454 = math.tanh %453 : vector<8x256xf32>
    %cst_187 = arith.constant 1.000000e+00 : f32
    %455 = vector.broadcast %cst_187 : f32 to vector<8x256xf32>
    %456 = arith.addf %455, %454 : vector<8x256xf32>
    %457 = arith.mulf %446, %456 : vector<8x256xf32>
    %c0_188 = arith.constant 0 : index
    %c0_189 = arith.constant 0 : index
    %458 = vector.load %arg23[%c0_188, %c0_189] : memref<256x64xf32, #tpu.memory_space<vmem>>, vector<256x64xf32>
    %cst_190 = arith.constant dense<0.000000e+00> : vector<8x64xf32>
    %459 = tpu.matmul %457, %458, %cst_190 {dimension_numbers = #tpu.dot_dimension_numbers<[1], [0], [0], [1], [0, 0, 1, 1], [], []>} : vector<8x256xf32>, vector<256x64xf32>, vector<8x64xf32> -> vector<8x64xf32>
    %c0_191 = arith.constant 0 : index
    %c0_192 = arith.constant 0 : index
    %460 = vector.load %arg24[%c0_191, %c0_192] : memref<1x64xf32, #tpu.memory_space<vmem>>, vector<1x64xf32>
    %461 = vector.broadcast %460 : vector<1x64xf32> to vector<8x64xf32>
    %462 = arith.addf %459, %461 : vector<8x64xf32>
    %463 = arith.addf %462, %417 : vector<8x64xf32>
    %c0_193 = arith.constant 0 : index
    %c0_194 = arith.constant 0 : index
    %c0_195 = arith.constant 0 : index
    %464 = vector.load %arg25[%c0_193, %c0_194, %c0_195] : memref<1x8x64xf32, #tpu.memory_space<vmem>>, vector<1x8x64xf32>
    %465 = vector.shape_cast %464 : vector<1x8x64xf32> to vector<8x64xf32>
    %466 = vector.shape_cast %463 : vector<8x64xf32> to vector<1x8x64xf32>
    tpu.vector_store %arg25[%c0_193, %c0_194, %c0_195], %466 {strides = array<i32>} : memref<1x8x64xf32, #tpu.memory_space<vmem>>, vector<1x8x64xf32>,
    return
  }
  func.func @transform_0(%arg0: i32) -> (i32, i32, i32) {
    %c0_i32 = arith.constant 0 : i32
    %c0_i32_0 = arith.constant 0 : i32
    %c0_i32_1 = arith.constant 0 : i32
    return %arg0, %c0_i32, %c0_i32_0 : i32, i32, i32
  }
  func.func @transform_1(%arg0: i32) -> (i32, i32, i32) {
    %c0_i32 = arith.constant 0 : i32
    %c0_i32_0 = arith.constant 0 : i32
    %c0_i32_1 = arith.constant 0 : i32
    return %arg0, %c0_i32, %c0_i32_0 : i32, i32, i32
  }
  func.func @transform_2(%arg0: i32) -> (i32, i32, i32) {
    %c0_i32 = arith.constant 0 : i32
    %c0_i32_0 = arith.constant 0 : i32
    %c0_i32_1 = arith.constant 0 : i32
    return %arg0, %c0_i32, %c0_i32_0 : i32, i32, i32
  }
  func.func @transform_3(%arg0: i32) -> (i32, i32, i32) {
    %c0_i32 = arith.constant 0 : i32
    %c0_i32_0 = arith.constant 0 : i32
    %c0_i32_1 = arith.constant 0 : i32
    return %arg0, %c0_i32, %c0_i32_0 : i32, i32, i32
  }
  func.func @transform_4(%arg0: i32) -> (i32, i32) {
    %c0_i32 = arith.constant 0 : i32
    %c0_i32_0 = arith.constant 0 : i32
    %c0_i32_1 = arith.constant 0 : i32
    return %c0_i32, %c0_i32_0 : i32, i32
  }
  func.func @transform_5(%arg0: i32) -> (i32, i32) {
    %c0_i32 = arith.constant 0 : i32
    %c0_i32_0 = arith.constant 0 : i32
    %c0_i32_1 = arith.constant 0 : i32
    return %c0_i32, %c0_i32_0 : i32, i32
  }
  func.func @transform_6(%arg0: i32) -> (i32, i32) {
    %c0_i32 = arith.constant 0 : i32
    %c0_i32_0 = arith.constant 0 : i32
    %c0_i32_1 = arith.constant 0 : i32
    return %c0_i32, %c0_i32_0 : i32, i32
  }
  func.func @transform_7(%arg0: i32) -> (i32, i32) {
    %c0_i32 = arith.constant 0 : i32
    %c0_i32_0 = arith.constant 0 : i32
    %c0_i32_1 = arith.constant 0 : i32
    return %c0_i32, %c0_i32_0 : i32, i32
  }
  func.func @transform_8(%arg0: i32) -> (i32, i32) {
    %c0_i32 = arith.constant 0 : i32
    %c0_i32_0 = arith.constant 0 : i32
    %c0_i32_1 = arith.constant 0 : i32
    return %c0_i32, %c0_i32_0 : i32, i32
  }
  func.func @transform_9(%arg0: i32) -> (i32, i32) {
    %c0_i32 = arith.constant 0 : i32
    %c0_i32_0 = arith.constant 0 : i32
    %c0_i32_1 = arith.constant 0 : i32
    return %c0_i32, %c0_i32_0 : i32, i32
  }
  func.func @transform_10(%arg0: i32) -> (i32, i32) {
    %c0_i32 = arith.constant 0 : i32
    %c0_i32_0 = arith.constant 0 : i32
    %c0_i32_1 = arith.constant 0 : i32
    return %c0_i32, %c0_i32_0 : i32, i32
  }
  func.func @transform_11(%arg0: i32) -> (i32, i32) {
    %c0_i32 = arith.constant 0 : i32
    %c0_i32_0 = arith.constant 0 : i32
    %c0_i32_1 = arith.constant 0 : i32
    return %c0_i32, %c0_i32_0 : i32, i32
  }
  func.func @transform_12(%arg0: i32) -> (i32, i32) {
    %c0_i32 = arith.constant 0 : i32
    %c0_i32_0 = arith.constant 0 : i32
    %c0_i32_1 = arith.constant 0 : i32
    return %c0_i32, %c0_i32_0 : i32, i32
  }
  func.func @transform_13(%arg0: i32) -> (i32, i32) {
    %c0_i32 = arith.constant 0 : i32
    %c0_i32_0 = arith.constant 0 : i32
    %c0_i32_1 = arith.constant 0 : i32
    return %c0_i32, %c0_i32_0 : i32, i32
  }
  func.func @transform_14(%arg0: i32) -> (i32, i32) {
    %c0_i32 = arith.constant 0 : i32
    %c0_i32_0 = arith.constant 0 : i32
    %c0_i32_1 = arith.constant 0 : i32
    return %c0_i32, %c0_i32_0 : i32, i32
  }
  func.func @transform_15(%arg0: i32) -> (i32, i32) {
    %c0_i32 = arith.constant 0 : i32
    %c0_i32_0 = arith.constant 0 : i32
    %c0_i32_1 = arith.constant 0 : i32
    return %c0_i32, %c0_i32_0 : i32, i32
  }
  func.func @transform_16(%arg0: i32) -> (i32, i32) {
    %c0_i32 = arith.constant 0 : i32
    %c0_i32_0 = arith.constant 0 : i32
    %c0_i32_1 = arith.constant 0 : i32
    return %c0_i32, %c0_i32_0 : i32, i32
  }
  func.func @transform_17(%arg0: i32) -> (i32, i32) {
    %c0_i32 = arith.constant 0 : i32
    %c0_i32_0 = arith.constant 0 : i32
    %c0_i32_1 = arith.constant 0 : i32
    return %c0_i32, %c0_i32_0 : i32, i32
  }
  func.func @transform_18(%arg0: i32) -> (i32, i32) {
    %c0_i32 = arith.constant 0 : i32
    %c0_i32_0 = arith.constant 0 : i32
    %c0_i32_1 = arith.constant 0 : i32
    return %c0_i32, %c0_i32_0 : i32, i32
  }
  func.func @transform_19(%arg0: i32) -> (i32, i32) {
    %c0_i32 = arith.constant 0 : i32
    %c0_i32_0 = arith.constant 0 : i32
    %c0_i32_1 = arith.constant 0 : i32
    return %c0_i32, %c0_i32_0 : i32, i32
  }
  func.func @transform_20(%arg0: i32) -> (i32, i32) {
    %c0_i32 = arith.constant 0 : i32
    %c0_i32_0 = arith.constant 0 : i32
    %c0_i32_1 = arith.constant 0 : i32
    return %c0_i32, %c0_i32_0 : i32, i32
  }
  func.func @transform_21(%arg0: i32) -> (i32, i32) {
    %c0_i32 = arith.constant 0 : i32
    %c0_i32_0 = arith.constant 0 : i32
    %c0_i32_1 = arith.constant 0 : i32
    return %c0_i32, %c0_i32_0 : i32, i32
  }
  func.func @transform_22(%arg0: i32) -> (i32, i32) {
    %c0_i32 = arith.constant 0 : i32
    %c0_i32_0 = arith.constant 0 : i32
    %c0_i32_1 = arith.constant 0 : i32
    return %c0_i32, %c0_i32_0 : i32, i32
  }
  func.func @transform_23(%arg0: i32) -> (i32, i32) {
    %c0_i32 = arith.constant 0 : i32
    %c0_i32_0 = arith.constant 0 : i32
    %c0_i32_1 = arith.constant 0 : i32
    return %c0_i32, %c0_i32_0 : i32, i32
  }
  func.func @transform_24(%arg0: i32) -> (i32, i32, i32) {
    %c0_i32 = arith.constant 0 : i32
    %c0_i32_0 = arith.constant 0 : i32
    %c0_i32_1 = arith.constant 0 : i32
    return %arg0, %c0_i32, %c0_i32_0 : i32, i32, i32
  }
}

module attributes {stable_mosaic.version = 11 : i64} {
  func.func @_sublayer_kernel(%arg0: i32, %arg1: memref<1x8x64xf32, #tpu.memory_space<vmem>>, %arg2: memref<1x8x64xf32, #tpu.memory_space<vmem>>, %arg3: memref<1x8x8xf32, #tpu.memory_space<vmem>>, %arg4: memref<1x8x8xf32, #tpu.memory_space<vmem>>, %arg5: memref<1x64xf32, #tpu.memory_space<vmem>>, %arg6: memref<1x64xf32, #tpu.memory_space<vmem>>, %arg7: memref<64x192xf32, #tpu.memory_space<vmem>>, %arg8: memref<1x192xf32, #tpu.memory_space<vmem>>, %arg9: memref<64x64xf32, #tpu.memory_space<vmem>>, %arg10: memref<1x64xf32, #tpu.memory_space<vmem>>, %arg11: memref<1x64xf32, #tpu.memory_space<vmem>>, %arg12: memref<1x64xf32, #tpu.memory_space<vmem>>, %arg13: memref<64x64xf32, #tpu.memory_space<vmem>>, %arg14: memref<1x64xf32, #tpu.memory_space<vmem>>, %arg15: memref<64x128xf32, #tpu.memory_space<vmem>>, %arg16: memref<1x128xf32, #tpu.memory_space<vmem>>, %arg17: memref<64x64xf32, #tpu.memory_space<vmem>>, %arg18: memref<1x64xf32, #tpu.memory_space<vmem>>, %arg19: memref<1x64xf32, #tpu.memory_space<vmem>>, %arg20: memref<1x64xf32, #tpu.memory_space<vmem>>, %arg21: memref<64x256xf32, #tpu.memory_space<vmem>>, %arg22: memref<1x256xf32, #tpu.memory_space<vmem>>, %arg23: memref<256x64xf32, #tpu.memory_space<vmem>>, %arg24: memref<1x64xf32, #tpu.memory_space<vmem>>, %arg25: memref<1x8x64xf32, #tpu.memory_space<vmem>>) attributes {dimension_semantics = [#tpu.dimension_semantics<parallel>], iteration_bounds = array<i64: 2>, scalar_prefetch = 0 : i64, scratch_operands = 0 : i64, tpu.core_type = #tpu.core_type<tc>, window_params = [{transform_indices = @transform_0, window_bounds = array<i64: 1, 8, 64>}, {transform_indices = @transform_1, window_bounds = array<i64: 1, 8, 64>}, {transform_indices = @transform_2, window_bounds = array<i64: 1, 8, 8>}, {transform_indices = @transform_3, window_bounds = array<i64: 1, 8, 8>}, {pipeline_mode = #tpu.pipeline_mode<synchronous>, transform_indices = @transform_4, window_bounds = array<i64: 1, 64>}, {pipeline_mode = #tpu.pipeline_mode<synchronous>, transform_indices = @transform_5, window_bounds = array<i64: 1, 64>}, {pipeline_mode = #tpu.pipeline_mode<synchronous>, transform_indices = @transform_6, window_bounds = array<i64: 64, 192>}, {pipeline_mode = #tpu.pipeline_mode<synchronous>, transform_indices = @transform_7, window_bounds = array<i64: 1, 192>}, {pipeline_mode = #tpu.pipeline_mode<synchronous>, transform_indices = @transform_8, window_bounds = array<i64: 64, 64>}, {pipeline_mode = #tpu.pipeline_mode<synchronous>, transform_indices = @transform_9, window_bounds = array<i64: 1, 64>}, {pipeline_mode = #tpu.pipeline_mode<synchronous>, transform_indices = @transform_10, window_bounds = array<i64: 1, 64>}, {pipeline_mode = #tpu.pipeline_mode<synchronous>, transform_indices = @transform_11, window_bounds = array<i64: 1, 64>}, {pipeline_mode = #tpu.pipeline_mode<synchronous>, transform_indices = @transform_12, window_bounds = array<i64: 64, 64>}, {pipeline_mode = #tpu.pipeline_mode<synchronous>, transform_indices = @transform_13, window_bounds = array<i64: 1, 64>}, {pipeline_mode = #tpu.pipeline_mode<synchronous>, transform_indices = @transform_14, window_bounds = array<i64: 64, 128>}, {pipeline_mode = #tpu.pipeline_mode<synchronous>, transform_indices = @transform_15, window_bounds = array<i64: 1, 128>}, {pipeline_mode = #tpu.pipeline_mode<synchronous>, transform_indices = @transform_16, window_bounds = array<i64: 64, 64>}, {pipeline_mode = #tpu.pipeline_mode<synchronous>, transform_indices = @transform_17, window_bounds = array<i64: 1, 64>}, {pipeline_mode = #tpu.pipeline_mode<synchronous>, transform_indices = @transform_18, window_bounds = array<i64: 1, 64>}, {pipeline_mode = #tpu.pipeline_mode<synchronous>, transform_indices = @transform_19, window_bounds = array<i64: 1, 64>}, {pipeline_mode = #tpu.pipeline_mode<synchronous>, transform_indices = @transform_20, window_bounds = array<i64: 64, 256>}, {pipeline_mode = #tpu.pipeline_mode<synchronous>, transform_indices = @transform_21, window_bounds = array<i64: 1, 256>}, {pipeline_mode = #tpu.pipeline_mode<synchronous>, transform_indices = @transform_22, window_bounds = array<i64: 256, 64>}, {pipeline_mode = #tpu.pipeline_mode<synchronous>, transform_indices = @transform_23, window_bounds = array<i64: 1, 64>}, {transform_indices = @transform_24, window_bounds = array<i64: 1, 8, 64>}]} {
    %c0 = arith.constant 0 : index
    %c0_0 = arith.constant 0 : index
    %c0_1 = arith.constant 0 : index
    %0 = vector.load %arg1[%c0, %c0_0, %c0_1] : memref<1x8x64xf32, #tpu.memory_space<vmem>>, vector<1x8x64xf32>
    %1 = vector.shape_cast %0 : vector<1x8x64xf32> to vector<8x64xf32>
    %c0_2 = arith.constant 0 : index
    %c0_3 = arith.constant 0 : index
    %c0_4 = arith.constant 0 : index
    %2 = vector.load %arg2[%c0_2, %c0_3, %c0_4] : memref<1x8x64xf32, #tpu.memory_space<vmem>>, vector<1x8x64xf32>
    %3 = vector.shape_cast %2 : vector<1x8x64xf32> to vector<8x64xf32>
    %c0_5 = arith.constant 0 : index
    %c0_6 = arith.constant 0 : index
    %c0_7 = arith.constant 0 : index
    %4 = vector.load %arg3[%c0_5, %c0_6, %c0_7] : memref<1x8x8xf32, #tpu.memory_space<vmem>>, vector<1x8x8xf32>
    %5 = vector.shape_cast %4 : vector<1x8x8xf32> to vector<8x8xf32>
    %c0_8 = arith.constant 0 : index
    %c0_9 = arith.constant 0 : index
    %c0_10 = arith.constant 0 : index
    %6 = vector.load %arg4[%c0_8, %c0_9, %c0_10] : memref<1x8x8xf32, #tpu.memory_space<vmem>>, vector<1x8x8xf32>
    %7 = vector.shape_cast %6 : vector<1x8x8xf32> to vector<8x8xf32>
    %cst = arith.constant dense<0.000000e+00> : vector<8xf32>
    %8 = vector.multi_reduction <add>, %1, %cst [1] : vector<8x64xf32> to vector<8xf32>
    %9 = vector.shape_cast %8 : vector<8xf32> to vector<8x1xf32>
    %cst_11 = arith.constant 6.400000e+01 : f32
    %10 = vector.broadcast %cst_11 : f32 to vector<8x1xf32>
    %11 = arith.divf %9, %10 : vector<8x1xf32>
    %12 = vector.broadcast %11 : vector<8x1xf32> to vector<8x64xf32>
    %13 = arith.subf %1, %12 : vector<8x64xf32>
    %14 = arith.mulf %13, %13 : vector<8x64xf32>
    %cst_12 = arith.constant dense<0.000000e+00> : vector<8xf32>
    %15 = vector.multi_reduction <add>, %14, %cst_12 [1] : vector<8x64xf32> to vector<8xf32>
    %16 = vector.shape_cast %15 : vector<8xf32> to vector<8x1xf32>
    %cst_13 = arith.constant 6.400000e+01 : f32
    %17 = vector.broadcast %cst_13 : f32 to vector<8x1xf32>
    %18 = arith.divf %16, %17 : vector<8x1xf32>
    %cst_14 = arith.constant 9.99999997E-7 : f32
    %19 = vector.broadcast %cst_14 : f32 to vector<8x1xf32>
    %20 = arith.addf %18, %19 : vector<8x1xf32>
    %21 = math.rsqrt %20 : vector<8x1xf32>
    %22 = vector.broadcast %21 : vector<8x1xf32> to vector<8x64xf32>
    %23 = arith.mulf %13, %22 : vector<8x64xf32>
    %c0_15 = arith.constant 0 : index
    %c0_16 = arith.constant 0 : index
    %24 = vector.load %arg5[%c0_15, %c0_16] : memref<1x64xf32, #tpu.memory_space<vmem>>, vector<1x64xf32>
    %25 = vector.broadcast %24 : vector<1x64xf32> to vector<8x64xf32>
    %26 = arith.mulf %23, %25 : vector<8x64xf32>
    %c0_17 = arith.constant 0 : index
    %c0_18 = arith.constant 0 : index
    %27 = vector.load %arg6[%c0_17, %c0_18] : memref<1x64xf32, #tpu.memory_space<vmem>>, vector<1x64xf32>
    %28 = vector.broadcast %27 : vector<1x64xf32> to vector<8x64xf32>
    %29 = arith.addf %26, %28 : vector<8x64xf32>
    %c0_19 = arith.constant 0 : index
    %c0_20 = arith.constant 0 : index
    %30 = vector.load %arg7[%c0_19, %c0_20] : memref<64x192xf32, #tpu.memory_space<vmem>>, vector<64x192xf32>
    %cst_21 = arith.constant dense<0.000000e+00> : vector<8x192xf32>
    %31 = tpu.matmul %29, %30, %cst_21 {dimension_numbers = #tpu.dot_dimension_numbers<[1], [0], [0], [1], [0, 0, 1, 1], [], []>} : vector<8x64xf32>, vector<64x192xf32>, vector<8x192xf32> -> vector<8x192xf32>
    %c0_22 = arith.constant 0 : index
    %c0_23 = arith.constant 0 : index
    %32 = vector.load %arg8[%c0_22, %c0_23] : memref<1x192xf32, #tpu.memory_space<vmem>>, vector<1x192xf32>
    %33 = vector.broadcast %32 : vector<1x192xf32> to vector<8x192xf32>
    %34 = arith.addf %31, %33 : vector<8x192xf32>
    %35 = vector.extract_strided_slice %34 {offsets = [0, 0], sizes = [8, 64], strides = [1, 1]} : vector<8x192xf32> to vector<8x64xf32>
    %36 = vector.extract_strided_slice %34 {offsets = [0, 64], sizes = [8, 64], strides = [1, 1]} : vector<8x192xf32> to vector<8x64xf32>
    %37 = vector.extract_strided_slice %34 {offsets = [0, 128], sizes = [8, 64], strides = [1, 1]} : vector<8x192xf32> to vector<8x64xf32>
    %cst_24 = arith.constant 0.000000e+00 : f32
    %38 = vector.broadcast %cst_24 : f32 to vector<8x64xf32>
    %39 = vector.extract_strided_slice %35 {offsets = [0, 0], sizes = [8, 8], strides = [1, 1]} : vector<8x64xf32> to vector<8x8xf32>
    %40 = vector.extract_strided_slice %36 {offsets = [0, 0], sizes = [8, 8], strides = [1, 1]} : vector<8x64xf32> to vector<8x8xf32>
    %41 = vector.extract_strided_slice %37 {offsets = [0, 0], sizes = [8, 8], strides = [1, 1]} : vector<8x64xf32> to vector<8x8xf32>
    %cst_25 = arith.constant dense<0.000000e+00> : vector<8x8xf32>
    %42 = tpu.matmul %39, %40, %cst_25 {dimension_numbers = #tpu.dot_dimension_numbers<[1], [1], [0], [0], [0, 0, 1, 0], [], []>} : vector<8x8xf32>, vector<8x8xf32>, vector<8x8xf32> -> vector<8x8xf32>
    %cst_26 = arith.constant 0.353553385 : f32
    %43 = vector.broadcast %cst_26 : f32 to vector<8x8xf32>
    %44 = arith.mulf %42, %43 : vector<8x8xf32>
    %45 = arith.addf %44, %5 : vector<8x8xf32>
    %cst_27 = arith.constant dense<0xFF800000> : vector<8xf32>
    %46 = vector.multi_reduction <maximumf>, %45, %cst_27 [1] : vector<8x8xf32> to vector<8xf32>
    %47 = vector.shape_cast %46 : vector<8xf32> to vector<8x1xf32>
    %48 = vector.broadcast %47 : vector<8x1xf32> to vector<8x8xf32>
    %49 = arith.subf %45, %48 : vector<8x8xf32>
    %50 = math.exp %49 : vector<8x8xf32>
    %cst_28 = arith.constant dense<0.000000e+00> : vector<8xf32>
    %51 = vector.multi_reduction <add>, %50, %cst_28 [1] : vector<8x8xf32> to vector<8xf32>
    %52 = vector.shape_cast %51 : vector<8xf32> to vector<8x1xf32>
    %53 = tpu.reciprocal %52 {approx = true} : vector<8x1xf32> -> vector<8x1xf32>
    %54 = vector.broadcast %53 : vector<8x1xf32> to vector<8x8xf32>
    %55 = arith.mulf %50, %54 : vector<8x8xf32>
    %cst_29 = arith.constant dense<0.000000e+00> : vector<8x8xf32>
    %56 = tpu.matmul %55, %41, %cst_29 {dimension_numbers = #tpu.dot_dimension_numbers<[1], [0], [0], [1], [0, 0, 1, 1], [], []>} : vector<8x8xf32>, vector<8x8xf32>, vector<8x8xf32> -> vector<8x8xf32>
    %c0_30 = arith.constant 0 : index
    %c0_31 = arith.constant 0 : index
    %57 = vector.load %arg9[%c0_30, %c0_31] : memref<64x64xf32, #tpu.memory_space<vmem>>, vector<8x64xf32>
    %cst_32 = arith.constant dense<0.000000e+00> : vector<8x64xf32>
    %58 = tpu.matmul %56, %57, %cst_32 {dimension_numbers = #tpu.dot_dimension_numbers<[1], [0], [0], [1], [0, 0, 1, 1], [], []>} : vector<8x8xf32>, vector<8x64xf32>, vector<8x64xf32> -> vector<8x64xf32>
    %59 = arith.addf %38, %58 : vector<8x64xf32>
    %60 = vector.extract_strided_slice %35 {offsets = [0, 8], sizes = [8, 8], strides = [1, 1]} : vector<8x64xf32> to vector<8x8xf32>
    %61 = vector.extract_strided_slice %36 {offsets = [0, 8], sizes = [8, 8], strides = [1, 1]} : vector<8x64xf32> to vector<8x8xf32>
    %62 = vector.extract_strided_slice %37 {offsets = [0, 8], sizes = [8, 8], strides = [1, 1]} : vector<8x64xf32> to vector<8x8xf32>
    %cst_33 = arith.constant dense<0.000000e+00> : vector<8x8xf32>
    %63 = tpu.matmul %60, %61, %cst_33 {dimension_numbers = #tpu.dot_dimension_numbers<[1], [1], [0], [0], [0, 0, 1, 0], [], []>} : vector<8x8xf32>, vector<8x8xf32>, vector<8x8xf32> -> vector<8x8xf32>
    %cst_34 = arith.constant 0.353553385 : f32
    %64 = vector.broadcast %cst_34 : f32 to vector<8x8xf32>
    %65 = arith.mulf %63, %64 : vector<8x8xf32>
    %66 = arith.addf %65, %5 : vector<8x8xf32>
    %cst_35 = arith.constant dense<0xFF800000> : vector<8xf32>
    %67 = vector.multi_reduction <maximumf>, %66, %cst_35 [1] : vector<8x8xf32> to vector<8xf32>
    %68 = vector.shape_cast %67 : vector<8xf32> to vector<8x1xf32>
    %69 = vector.broadcast %68 : vector<8x1xf32> to vector<8x8xf32>
    %70 = arith.subf %66, %69 : vector<8x8xf32>
    %71 = math.exp %70 : vector<8x8xf32>
    %cst_36 = arith.constant dense<0.000000e+00> : vector<8xf32>
    %72 = vector.multi_reduction <add>, %71, %cst_36 [1] : vector<8x8xf32> to vector<8xf32>
    %73 = vector.shape_cast %72 : vector<8xf32> to vector<8x1xf32>
    %74 = tpu.reciprocal %73 {approx = true} : vector<8x1xf32> -> vector<8x1xf32>
    %75 = vector.broadcast %74 : vector<8x1xf32> to vector<8x8xf32>
    %76 = arith.mulf %71, %75 : vector<8x8xf32>
    %cst_37 = arith.constant dense<0.000000e+00> : vector<8x8xf32>
    %77 = tpu.matmul %76, %62, %cst_37 {dimension_numbers = #tpu.dot_dimension_numbers<[1], [0], [0], [1], [0, 0, 1, 1], [], []>} : vector<8x8xf32>, vector<8x8xf32>, vector<8x8xf32> -> vector<8x8xf32>
    %c8 = arith.constant 8 : index
    %c0_38 = arith.constant 0 : index
    %78 = vector.load %arg9[%c8, %c0_38] : memref<64x64xf32, #tpu.memory_space<vmem>>, vector<8x64xf32>
    %cst_39 = arith.constant dense<0.000000e+00> : vector<8x64xf32>
    %79 = tpu.matmul %77, %78, %cst_39 {dimension_numbers = #tpu.dot_dimension_numbers<[1], [0], [0], [1], [0, 0, 1, 1], [], []>} : vector<8x8xf32>, vector<8x64xf32>, vector<8x64xf32> -> vector<8x64xf32>
    %80 = arith.addf %59, %79 : vector<8x64xf32>
    %81 = vector.extract_strided_slice %35 {offsets = [0, 16], sizes = [8, 8], strides = [1, 1]} : vector<8x64xf32> to vector<8x8xf32>
    %82 = vector.extract_strided_slice %36 {offsets = [0, 16], sizes = [8, 8], strides = [1, 1]} : vector<8x64xf32> to vector<8x8xf32>
    %83 = vector.extract_strided_slice %37 {offsets = [0, 16], sizes = [8, 8], strides = [1, 1]} : vector<8x64xf32> to vector<8x8xf32>
    %cst_40 = arith.constant dense<0.000000e+00> : vector<8x8xf32>
    %84 = tpu.matmul %81, %82, %cst_40 {dimension_numbers = #tpu.dot_dimension_numbers<[1], [1], [0], [0], [0, 0, 1, 0], [], []>} : vector<8x8xf32>, vector<8x8xf32>, vector<8x8xf32> -> vector<8x8xf32>
    %cst_41 = arith.constant 0.353553385 : f32
    %85 = vector.broadcast %cst_41 : f32 to vector<8x8xf32>
    %86 = arith.mulf %84, %85 : vector<8x8xf32>
    %87 = arith.addf %86, %5 : vector<8x8xf32>
    %cst_42 = arith.constant dense<0xFF800000> : vector<8xf32>
    %88 = vector.multi_reduction <maximumf>, %87, %cst_42 [1] : vector<8x8xf32> to vector<8xf32>
    %89 = vector.shape_cast %88 : vector<8xf32> to vector<8x1xf32>
    %90 = vector.broadcast %89 : vector<8x1xf32> to vector<8x8xf32>
    %91 = arith.subf %87, %90 : vector<8x8xf32>
    %92 = math.exp %91 : vector<8x8xf32>
    %cst_43 = arith.constant dense<0.000000e+00> : vector<8xf32>
    %93 = vector.multi_reduction <add>, %92, %cst_43 [1] : vector<8x8xf32> to vector<8xf32>
    %94 = vector.shape_cast %93 : vector<8xf32> to vector<8x1xf32>
    %95 = tpu.reciprocal %94 {approx = true} : vector<8x1xf32> -> vector<8x1xf32>
    %96 = vector.broadcast %95 : vector<8x1xf32> to vector<8x8xf32>
    %97 = arith.mulf %92, %96 : vector<8x8xf32>
    %cst_44 = arith.constant dense<0.000000e+00> : vector<8x8xf32>
    %98 = tpu.matmul %97, %83, %cst_44 {dimension_numbers = #tpu.dot_dimension_numbers<[1], [0], [0], [1], [0, 0, 1, 1], [], []>} : vector<8x8xf32>, vector<8x8xf32>, vector<8x8xf32> -> vector<8x8xf32>
    %c16 = arith.constant 16 : index
    %c0_45 = arith.constant 0 : index
    %99 = vector.load %arg9[%c16, %c0_45] : memref<64x64xf32, #tpu.memory_space<vmem>>, vector<8x64xf32>
    %cst_46 = arith.constant dense<0.000000e+00> : vector<8x64xf32>
    %100 = tpu.matmul %98, %99, %cst_46 {dimension_numbers = #tpu.dot_dimension_numbers<[1], [0], [0], [1], [0, 0, 1, 1], [], []>} : vector<8x8xf32>, vector<8x64xf32>, vector<8x64xf32> -> vector<8x64xf32>
    %101 = arith.addf %80, %100 : vector<8x64xf32>
    %102 = vector.extract_strided_slice %35 {offsets = [0, 24], sizes = [8, 8], strides = [1, 1]} : vector<8x64xf32> to vector<8x8xf32>
    %103 = vector.extract_strided_slice %36 {offsets = [0, 24], sizes = [8, 8], strides = [1, 1]} : vector<8x64xf32> to vector<8x8xf32>
    %104 = vector.extract_strided_slice %37 {offsets = [0, 24], sizes = [8, 8], strides = [1, 1]} : vector<8x64xf32> to vector<8x8xf32>
    %cst_47 = arith.constant dense<0.000000e+00> : vector<8x8xf32>
    %105 = tpu.matmul %102, %103, %cst_47 {dimension_numbers = #tpu.dot_dimension_numbers<[1], [1], [0], [0], [0, 0, 1, 0], [], []>} : vector<8x8xf32>, vector<8x8xf32>, vector<8x8xf32> -> vector<8x8xf32>
    %cst_48 = arith.constant 0.353553385 : f32
    %106 = vector.broadcast %cst_48 : f32 to vector<8x8xf32>
    %107 = arith.mulf %105, %106 : vector<8x8xf32>
    %108 = arith.addf %107, %5 : vector<8x8xf32>
    %cst_49 = arith.constant dense<0xFF800000> : vector<8xf32>
    %109 = vector.multi_reduction <maximumf>, %108, %cst_49 [1] : vector<8x8xf32> to vector<8xf32>
    %110 = vector.shape_cast %109 : vector<8xf32> to vector<8x1xf32>
    %111 = vector.broadcast %110 : vector<8x1xf32> to vector<8x8xf32>
    %112 = arith.subf %108, %111 : vector<8x8xf32>
    %113 = math.exp %112 : vector<8x8xf32>
    %cst_50 = arith.constant dense<0.000000e+00> : vector<8xf32>
    %114 = vector.multi_reduction <add>, %113, %cst_50 [1] : vector<8x8xf32> to vector<8xf32>
    %115 = vector.shape_cast %114 : vector<8xf32> to vector<8x1xf32>
    %116 = tpu.reciprocal %115 {approx = true} : vector<8x1xf32> -> vector<8x1xf32>
    %117 = vector.broadcast %116 : vector<8x1xf32> to vector<8x8xf32>
    %118 = arith.mulf %113, %117 : vector<8x8xf32>
    %cst_51 = arith.constant dense<0.000000e+00> : vector<8x8xf32>
    %119 = tpu.matmul %118, %104, %cst_51 {dimension_numbers = #tpu.dot_dimension_numbers<[1], [0], [0], [1], [0, 0, 1, 1], [], []>} : vector<8x8xf32>, vector<8x8xf32>, vector<8x8xf32> -> vector<8x8xf32>
    %c24 = arith.constant 24 : index
    %c0_52 = arith.constant 0 : index
    %120 = vector.load %arg9[%c24, %c0_52] : memref<64x64xf32, #tpu.memory_space<vmem>>, vector<8x64xf32>
    %cst_53 = arith.constant dense<0.000000e+00> : vector<8x64xf32>
    %121 = tpu.matmul %119, %120, %cst_53 {dimension_numbers = #tpu.dot_dimension_numbers<[1], [0], [0], [1], [0, 0, 1, 1], [], []>} : vector<8x8xf32>, vector<8x64xf32>, vector<8x64xf32> -> vector<8x64xf32>
    %122 = arith.addf %101, %121 : vector<8x64xf32>
    %123 = vector.extract_strided_slice %35 {offsets = [0, 32], sizes = [8, 8], strides = [1, 1]} : vector<8x64xf32> to vector<8x8xf32>
    %124 = vector.extract_strided_slice %36 {offsets = [0, 32], sizes = [8, 8], strides = [1, 1]} : vector<8x64xf32> to vector<8x8xf32>
    %125 = vector.extract_strided_slice %37 {offsets = [0, 32], sizes = [8, 8], strides = [1, 1]} : vector<8x64xf32> to vector<8x8xf32>
    %cst_54 = arith.constant dense<0.000000e+00> : vector<8x8xf32>
    %126 = tpu.matmul %123, %124, %cst_54 {dimension_numbers = #tpu.dot_dimension_numbers<[1], [1], [0], [0], [0, 0, 1, 0], [], []>} : vector<8x8xf32>, vector<8x8xf32>, vector<8x8xf32> -> vector<8x8xf32>
    %cst_55 = arith.constant 0.353553385 : f32
    %127 = vector.broadcast %cst_55 : f32 to vector<8x8xf32>
    %128 = arith.mulf %126, %127 : vector<8x8xf32>
    %129 = arith.addf %128, %5 : vector<8x8xf32>
    %cst_56 = arith.constant dense<0xFF800000> : vector<8xf32>
    %130 = vector.multi_reduction <maximumf>, %129, %cst_56 [1] : vector<8x8xf32> to vector<8xf32>
    %131 = vector.shape_cast %130 : vector<8xf32> to vector<8x1xf32>
    %132 = vector.broadcast %131 : vector<8x1xf32> to vector<8x8xf32>
    %133 = arith.subf %129, %132 : vector<8x8xf32>
    %134 = math.exp %133 : vector<8x8xf32>
    %cst_57 = arith.constant dense<0.000000e+00> : vector<8xf32>
    %135 = vector.multi_reduction <add>, %134, %cst_57 [1] : vector<8x8xf32> to vector<8xf32>
    %136 = vector.shape_cast %135 : vector<8xf32> to vector<8x1xf32>
    %137 = tpu.reciprocal %136 {approx = true} : vector<8x1xf32> -> vector<8x1xf32>
    %138 = vector.broadcast %137 : vector<8x1xf32> to vector<8x8xf32>
    %139 = arith.mulf %134, %138 : vector<8x8xf32>
    %cst_58 = arith.constant dense<0.000000e+00> : vector<8x8xf32>
    %140 = tpu.matmul %139, %125, %cst_58 {dimension_numbers = #tpu.dot_dimension_numbers<[1], [0], [0], [1], [0, 0, 1, 1], [], []>} : vector<8x8xf32>, vector<8x8xf32>, vector<8x8xf32> -> vector<8x8xf32>
    %c32 = arith.constant 32 : index
    %c0_59 = arith.constant 0 : index
    %141 = vector.load %arg9[%c32, %c0_59] : memref<64x64xf32, #tpu.memory_space<vmem>>, vector<8x64xf32>
    %cst_60 = arith.constant dense<0.000000e+00> : vector<8x64xf32>
    %142 = tpu.matmul %140, %141, %cst_60 {dimension_numbers = #tpu.dot_dimension_numbers<[1], [0], [0], [1], [0, 0, 1, 1], [], []>} : vector<8x8xf32>, vector<8x64xf32>, vector<8x64xf32> -> vector<8x64xf32>
    %143 = arith.addf %122, %142 : vector<8x64xf32>
    %144 = vector.extract_strided_slice %35 {offsets = [0, 40], sizes = [8, 8], strides = [1, 1]} : vector<8x64xf32> to vector<8x8xf32>
    %145 = vector.extract_strided_slice %36 {offsets = [0, 40], sizes = [8, 8], strides = [1, 1]} : vector<8x64xf32> to vector<8x8xf32>
    %146 = vector.extract_strided_slice %37 {offsets = [0, 40], sizes = [8, 8], strides = [1, 1]} : vector<8x64xf32> to vector<8x8xf32>
    %cst_61 = arith.constant dense<0.000000e+00> : vector<8x8xf32>
    %147 = tpu.matmul %144, %145, %cst_61 {dimension_numbers = #tpu.dot_dimension_numbers<[1], [1], [0], [0], [0, 0, 1, 0], [], []>} : vector<8x8xf32>, vector<8x8xf32>, vector<8x8xf32> -> vector<8x8xf32>
    %cst_62 = arith.constant 0.353553385 : f32
    %148 = vector.broadcast %cst_62 : f32 to vector<8x8xf32>
    %149 = arith.mulf %147, %148 : vector<8x8xf32>
    %150 = arith.addf %149, %5 : vector<8x8xf32>
    %cst_63 = arith.constant dense<0xFF800000> : vector<8xf32>
    %151 = vector.multi_reduction <maximumf>, %150, %cst_63 [1] : vector<8x8xf32> to vector<8xf32>
    %152 = vector.shape_cast %151 : vector<8xf32> to vector<8x1xf32>
    %153 = vector.broadcast %152 : vector<8x1xf32> to vector<8x8xf32>
    %154 = arith.subf %150, %153 : vector<8x8xf32>
    %155 = math.exp %154 : vector<8x8xf32>
    %cst_64 = arith.constant dense<0.000000e+00> : vector<8xf32>
    %156 = vector.multi_reduction <add>, %155, %cst_64 [1] : vector<8x8xf32> to vector<8xf32>
    %157 = vector.shape_cast %156 : vector<8xf32> to vector<8x1xf32>
    %158 = tpu.reciprocal %157 {approx = true} : vector<8x1xf32> -> vector<8x1xf32>
    %159 = vector.broadcast %158 : vector<8x1xf32> to vector<8x8xf32>
    %160 = arith.mulf %155, %159 : vector<8x8xf32>
    %cst_65 = arith.constant dense<0.000000e+00> : vector<8x8xf32>
    %161 = tpu.matmul %160, %146, %cst_65 {dimension_numbers = #tpu.dot_dimension_numbers<[1], [0], [0], [1], [0, 0, 1, 1], [], []>} : vector<8x8xf32>, vector<8x8xf32>, vector<8x8xf32> -> vector<8x8xf32>
    %c40 = arith.constant 40 : index
    %c0_66 = arith.constant 0 : index
    %162 = vector.load %arg9[%c40, %c0_66] : memref<64x64xf32, #tpu.memory_space<vmem>>, vector<8x64xf32>
    %cst_67 = arith.constant dense<0.000000e+00> : vector<8x64xf32>
    %163 = tpu.matmul %161, %162, %cst_67 {dimension_numbers = #tpu.dot_dimension_numbers<[1], [0], [0], [1], [0, 0, 1, 1], [], []>} : vector<8x8xf32>, vector<8x64xf32>, vector<8x64xf32> -> vector<8x64xf32>
    %164 = arith.addf %143, %163 : vector<8x64xf32>
    %165 = vector.extract_strided_slice %35 {offsets = [0, 48], sizes = [8, 8], strides = [1, 1]} : vector<8x64xf32> to vector<8x8xf32>
    %166 = vector.extract_strided_slice %36 {offsets = [0, 48], sizes = [8, 8], strides = [1, 1]} : vector<8x64xf32> to vector<8x8xf32>
    %167 = vector.extract_strided_slice %37 {offsets = [0, 48], sizes = [8, 8], strides = [1, 1]} : vector<8x64xf32> to vector<8x8xf32>
    %cst_68 = arith.constant dense<0.000000e+00> : vector<8x8xf32>
    %168 = tpu.matmul %165, %166, %cst_68 {dimension_numbers = #tpu.dot_dimension_numbers<[1], [1], [0], [0], [0, 0, 1, 0], [], []>} : vector<8x8xf32>, vector<8x8xf32>, vector<8x8xf32> -> vector<8x8xf32>
    %cst_69 = arith.constant 0.353553385 : f32
    %169 = vector.broadcast %cst_69 : f32 to vector<8x8xf32>
    %170 = arith.mulf %168, %169 : vector<8x8xf32>
    %171 = arith.addf %170, %5 : vector<8x8xf32>
    %cst_70 = arith.constant dense<0xFF800000> : vector<8xf32>
    %172 = vector.multi_reduction <maximumf>, %171, %cst_70 [1] : vector<8x8xf32> to vector<8xf32>
    %173 = vector.shape_cast %172 : vector<8xf32> to vector<8x1xf32>
    %174 = vector.broadcast %173 : vector<8x1xf32> to vector<8x8xf32>
    %175 = arith.subf %171, %174 : vector<8x8xf32>
    %176 = math.exp %175 : vector<8x8xf32>
    %cst_71 = arith.constant dense<0.000000e+00> : vector<8xf32>
    %177 = vector.multi_reduction <add>, %176, %cst_71 [1] : vector<8x8xf32> to vector<8xf32>
    %178 = vector.shape_cast %177 : vector<8xf32> to vector<8x1xf32>
    %179 = tpu.reciprocal %178 {approx = true} : vector<8x1xf32> -> vector<8x1xf32>
    %180 = vector.broadcast %179 : vector<8x1xf32> to vector<8x8xf32>
    %181 = arith.mulf %176, %180 : vector<8x8xf32>
    %cst_72 = arith.constant dense<0.000000e+00> : vector<8x8xf32>
    %182 = tpu.matmul %181, %167, %cst_72 {dimension_numbers = #tpu.dot_dimension_numbers<[1], [0], [0], [1], [0, 0, 1, 1], [], []>} : vector<8x8xf32>, vector<8x8xf32>, vector<8x8xf32> -> vector<8x8xf32>
    %c48 = arith.constant 48 : index
    %c0_73 = arith.constant 0 : index
    %183 = vector.load %arg9[%c48, %c0_73] : memref<64x64xf32, #tpu.memory_space<vmem>>, vector<8x64xf32>
    %cst_74 = arith.constant dense<0.000000e+00> : vector<8x64xf32>
    %184 = tpu.matmul %182, %183, %cst_74 {dimension_numbers = #tpu.dot_dimension_numbers<[1], [0], [0], [1], [0, 0, 1, 1], [], []>} : vector<8x8xf32>, vector<8x64xf32>, vector<8x64xf32> -> vector<8x64xf32>
    %185 = arith.addf %164, %184 : vector<8x64xf32>
    %186 = vector.extract_strided_slice %35 {offsets = [0, 56], sizes = [8, 8], strides = [1, 1]} : vector<8x64xf32> to vector<8x8xf32>
    %187 = vector.extract_strided_slice %36 {offsets = [0, 56], sizes = [8, 8], strides = [1, 1]} : vector<8x64xf32> to vector<8x8xf32>
    %188 = vector.extract_strided_slice %37 {offsets = [0, 56], sizes = [8, 8], strides = [1, 1]} : vector<8x64xf32> to vector<8x8xf32>
    %cst_75 = arith.constant dense<0.000000e+00> : vector<8x8xf32>
    %189 = tpu.matmul %186, %187, %cst_75 {dimension_numbers = #tpu.dot_dimension_numbers<[1], [1], [0], [0], [0, 0, 1, 0], [], []>} : vector<8x8xf32>, vector<8x8xf32>, vector<8x8xf32> -> vector<8x8xf32>
    %cst_76 = arith.constant 0.353553385 : f32
    %190 = vector.broadcast %cst_76 : f32 to vector<8x8xf32>
    %191 = arith.mulf %189, %190 : vector<8x8xf32>
    %192 = arith.addf %191, %5 : vector<8x8xf32>
    %cst_77 = arith.constant dense<0xFF800000> : vector<8xf32>
    %193 = vector.multi_reduction <maximumf>, %192, %cst_77 [1] : vector<8x8xf32> to vector<8xf32>
    %194 = vector.shape_cast %193 : vector<8xf32> to vector<8x1xf32>
    %195 = vector.broadcast %194 : vector<8x1xf32> to vector<8x8xf32>
    %196 = arith.subf %192, %195 : vector<8x8xf32>
    %197 = math.exp %196 : vector<8x8xf32>
    %cst_78 = arith.constant dense<0.000000e+00> : vector<8xf32>
    %198 = vector.multi_reduction <add>, %197, %cst_78 [1] : vector<8x8xf32> to vector<8xf32>
    %199 = vector.shape_cast %198 : vector<8xf32> to vector<8x1xf32>
    %200 = tpu.reciprocal %199 {approx = true} : vector<8x1xf32> -> vector<8x1xf32>
    %201 = vector.broadcast %200 : vector<8x1xf32> to vector<8x8xf32>
    %202 = arith.mulf %197, %201 : vector<8x8xf32>
    %cst_79 = arith.constant dense<0.000000e+00> : vector<8x8xf32>
    %203 = tpu.matmul %202, %188, %cst_79 {dimension_numbers = #tpu.dot_dimension_numbers<[1], [0], [0], [1], [0, 0, 1, 1], [], []>} : vector<8x8xf32>, vector<8x8xf32>, vector<8x8xf32> -> vector<8x8xf32>
    %c56 = arith.constant 56 : index
    %c0_80 = arith.constant 0 : index
    %204 = vector.load %arg9[%c56, %c0_80] : memref<64x64xf32, #tpu.memory_space<vmem>>, vector<8x64xf32>
    %cst_81 = arith.constant dense<0.000000e+00> : vector<8x64xf32>
    %205 = tpu.matmul %203, %204, %cst_81 {dimension_numbers = #tpu.dot_dimension_numbers<[1], [0], [0], [1], [0, 0, 1, 1], [], []>} : vector<8x8xf32>, vector<8x64xf32>, vector<8x64xf32> -> vector<8x64xf32>
    %206 = arith.addf %185, %205 : vector<8x64xf32>
    %c0_82 = arith.constant 0 : index
    %c0_83 = arith.constant 0 : index
    %207 = vector.load %arg10[%c0_82, %c0_83] : memref<1x64xf32, #tpu.memory_space<vmem>>, vector<1x64xf32>
    %208 = vector.broadcast %207 : vector<1x64xf32> to vector<8x64xf32>
    %209 = arith.addf %206, %208 : vector<8x64xf32>
    %210 = arith.addf %209, %1 : vector<8x64xf32>
    %cst_84 = arith.constant dense<0.000000e+00> : vector<8xf32>
    %211 = vector.multi_reduction <add>, %210, %cst_84 [1] : vector<8x64xf32> to vector<8xf32>
    %212 = vector.shape_cast %211 : vector<8xf32> to vector<8x1xf32>
    %cst_85 = arith.constant 6.400000e+01 : f32
    %213 = vector.broadcast %cst_85 : f32 to vector<8x1xf32>
    %214 = arith.divf %212, %213 : vector<8x1xf32>
    %215 = vector.broadcast %214 : vector<8x1xf32> to vector<8x64xf32>
    %216 = arith.subf %210, %215 : vector<8x64xf32>
    %217 = arith.mulf %216, %216 : vector<8x64xf32>
    %cst_86 = arith.constant dense<0.000000e+00> : vector<8xf32>
    %218 = vector.multi_reduction <add>, %217, %cst_86 [1] : vector<8x64xf32> to vector<8xf32>
    %219 = vector.shape_cast %218 : vector<8xf32> to vector<8x1xf32>
    %cst_87 = arith.constant 6.400000e+01 : f32
    %220 = vector.broadcast %cst_87 : f32 to vector<8x1xf32>
    %221 = arith.divf %219, %220 : vector<8x1xf32>
    %cst_88 = arith.constant 9.99999997E-7 : f32
    %222 = vector.broadcast %cst_88 : f32 to vector<8x1xf32>
    %223 = arith.addf %221, %222 : vector<8x1xf32>
    %224 = math.rsqrt %223 : vector<8x1xf32>
    %225 = vector.broadcast %224 : vector<8x1xf32> to vector<8x64xf32>
    %226 = arith.mulf %216, %225 : vector<8x64xf32>
    %c0_89 = arith.constant 0 : index
    %c0_90 = arith.constant 0 : index
    %227 = vector.load %arg11[%c0_89, %c0_90] : memref<1x64xf32, #tpu.memory_space<vmem>>, vector<1x64xf32>
    %228 = vector.broadcast %227 : vector<1x64xf32> to vector<8x64xf32>
    %229 = arith.mulf %226, %228 : vector<8x64xf32>
    %c0_91 = arith.constant 0 : index
    %c0_92 = arith.constant 0 : index
    %230 = vector.load %arg12[%c0_91, %c0_92] : memref<1x64xf32, #tpu.memory_space<vmem>>, vector<1x64xf32>
    %231 = vector.broadcast %230 : vector<1x64xf32> to vector<8x64xf32>
    %232 = arith.addf %229, %231 : vector<8x64xf32>
    %c0_93 = arith.constant 0 : index
    %c0_94 = arith.constant 0 : index
    %233 = vector.load %arg13[%c0_93, %c0_94] : memref<64x64xf32, #tpu.memory_space<vmem>>, vector<64x64xf32>
    %cst_95 = arith.constant dense<0.000000e+00> : vector<8x64xf32>
    %234 = tpu.matmul %232, %233, %cst_95 {dimension_numbers = #tpu.dot_dimension_numbers<[1], [0], [0], [1], [0, 0, 1, 1], [], []>} : vector<8x64xf32>, vector<64x64xf32>, vector<8x64xf32> -> vector<8x64xf32>
    %c0_96 = arith.constant 0 : index
    %c0_97 = arith.constant 0 : index
    %235 = vector.load %arg14[%c0_96, %c0_97] : memref<1x64xf32, #tpu.memory_space<vmem>>, vector<1x64xf32>
    %236 = vector.broadcast %235 : vector<1x64xf32> to vector<8x64xf32>
    %237 = arith.addf %234, %236 : vector<8x64xf32>
    %c0_98 = arith.constant 0 : index
    %c0_99 = arith.constant 0 : index
    %238 = vector.load %arg15[%c0_98, %c0_99] : memref<64x128xf32, #tpu.memory_space<vmem>>, vector<64x128xf32>
    %cst_100 = arith.constant dense<0.000000e+00> : vector<8x128xf32>
    %239 = tpu.matmul %3, %238, %cst_100 {dimension_numbers = #tpu.dot_dimension_numbers<[1], [0], [0], [1], [0, 0, 1, 1], [], []>} : vector<8x64xf32>, vector<64x128xf32>, vector<8x128xf32> -> vector<8x128xf32>
    %c0_101 = arith.constant 0 : index
    %c0_102 = arith.constant 0 : index
    %240 = vector.load %arg16[%c0_101, %c0_102] : memref<1x128xf32, #tpu.memory_space<vmem>>, vector<1x128xf32>
    %241 = vector.broadcast %240 : vector<1x128xf32> to vector<8x128xf32>
    %242 = arith.addf %239, %241 : vector<8x128xf32>
    %243 = vector.extract_strided_slice %242 {offsets = [0, 0], sizes = [8, 64], strides = [1, 1]} : vector<8x128xf32> to vector<8x64xf32>
    %244 = vector.extract_strided_slice %242 {offsets = [0, 64], sizes = [8, 64], strides = [1, 1]} : vector<8x128xf32> to vector<8x64xf32>
    %cst_103 = arith.constant 0.000000e+00 : f32
    %245 = vector.broadcast %cst_103 : f32 to vector<8x64xf32>
    %246 = vector.extract_strided_slice %237 {offsets = [0, 0], sizes = [8, 8], strides = [1, 1]} : vector<8x64xf32> to vector<8x8xf32>
    %247 = vector.extract_strided_slice %243 {offsets = [0, 0], sizes = [8, 8], strides = [1, 1]} : vector<8x64xf32> to vector<8x8xf32>
    %248 = vector.extract_strided_slice %244 {offsets = [0, 0], sizes = [8, 8], strides = [1, 1]} : vector<8x64xf32> to vector<8x8xf32>
    %cst_104 = arith.constant dense<0.000000e+00> : vector<8x8xf32>
    %249 = tpu.matmul %246, %247, %cst_104 {dimension_numbers = #tpu.dot_dimension_numbers<[1], [1], [0], [0], [0, 0, 1, 0], [], []>} : vector<8x8xf32>, vector<8x8xf32>, vector<8x8xf32> -> vector<8x8xf32>
    %cst_105 = arith.constant 0.353553385 : f32
    %250 = vector.broadcast %cst_105 : f32 to vector<8x8xf32>
    %251 = arith.mulf %249, %250 : vector<8x8xf32>
    %252 = arith.addf %251, %7 : vector<8x8xf32>
    %cst_106 = arith.constant dense<0xFF800000> : vector<8xf32>
    %253 = vector.multi_reduction <maximumf>, %252, %cst_106 [1] : vector<8x8xf32> to vector<8xf32>
    %254 = vector.shape_cast %253 : vector<8xf32> to vector<8x1xf32>
    %255 = vector.broadcast %254 : vector<8x1xf32> to vector<8x8xf32>
    %256 = arith.subf %252, %255 : vector<8x8xf32>
    %257 = math.exp %256 : vector<8x8xf32>
    %cst_107 = arith.constant dense<0.000000e+00> : vector<8xf32>
    %258 = vector.multi_reduction <add>, %257, %cst_107 [1] : vector<8x8xf32> to vector<8xf32>
    %259 = vector.shape_cast %258 : vector<8xf32> to vector<8x1xf32>
    %260 = tpu.reciprocal %259 {approx = true} : vector<8x1xf32> -> vector<8x1xf32>
    %261 = vector.broadcast %260 : vector<8x1xf32> to vector<8x8xf32>
    %262 = arith.mulf %257, %261 : vector<8x8xf32>
    %cst_108 = arith.constant dense<0.000000e+00> : vector<8x8xf32>
    %263 = tpu.matmul %262, %248, %cst_108 {dimension_numbers = #tpu.dot_dimension_numbers<[1], [0], [0], [1], [0, 0, 1, 1], [], []>} : vector<8x8xf32>, vector<8x8xf32>, vector<8x8xf32> -> vector<8x8xf32>
    %c0_109 = arith.constant 0 : index
    %c0_110 = arith.constant 0 : index
    %264 = vector.load %arg17[%c0_109, %c0_110] : memref<64x64xf32, #tpu.memory_space<vmem>>, vector<8x64xf32>
    %cst_111 = arith.constant dense<0.000000e+00> : vector<8x64xf32>
    %265 = tpu.matmul %263, %264, %cst_111 {dimension_numbers = #tpu.dot_dimension_numbers<[1], [0], [0], [1], [0, 0, 1, 1], [], []>} : vector<8x8xf32>, vector<8x64xf32>, vector<8x64xf32> -> vector<8x64xf32>
    %266 = arith.addf %245, %265 : vector<8x64xf32>
    %267 = vector.extract_strided_slice %237 {offsets = [0, 8], sizes = [8, 8], strides = [1, 1]} : vector<8x64xf32> to vector<8x8xf32>
    %268 = vector.extract_strided_slice %243 {offsets = [0, 8], sizes = [8, 8], strides = [1, 1]} : vector<8x64xf32> to vector<8x8xf32>
    %269 = vector.extract_strided_slice %244 {offsets = [0, 8], sizes = [8, 8], strides = [1, 1]} : vector<8x64xf32> to vector<8x8xf32>
    %cst_112 = arith.constant dense<0.000000e+00> : vector<8x8xf32>
    %270 = tpu.matmul %267, %268, %cst_112 {dimension_numbers = #tpu.dot_dimension_numbers<[1], [1], [0], [0], [0, 0, 1, 0], [], []>} : vector<8x8xf32>, vector<8x8xf32>, vector<8x8xf32> -> vector<8x8xf32>
    %cst_113 = arith.constant 0.353553385 : f32
    %271 = vector.broadcast %cst_113 : f32 to vector<8x8xf32>
    %272 = arith.mulf %270, %271 : vector<8x8xf32>
    %273 = arith.addf %272, %7 : vector<8x8xf32>
    %cst_114 = arith.constant dense<0xFF800000> : vector<8xf32>
    %274 = vector.multi_reduction <maximumf>, %273, %cst_114 [1] : vector<8x8xf32> to vector<8xf32>
    %275 = vector.shape_cast %274 : vector<8xf32> to vector<8x1xf32>
    %276 = vector.broadcast %275 : vector<8x1xf32> to vector<8x8xf32>
    %277 = arith.subf %273, %276 : vector<8x8xf32>
    %278 = math.exp %277 : vector<8x8xf32>
    %cst_115 = arith.constant dense<0.000000e+00> : vector<8xf32>
    %279 = vector.multi_reduction <add>, %278, %cst_115 [1] : vector<8x8xf32> to vector<8xf32>
    %280 = vector.shape_cast %279 : vector<8xf32> to vector<8x1xf32>
    %281 = tpu.reciprocal %280 {approx = true} : vector<8x1xf32> -> vector<8x1xf32>
    %282 = vector.broadcast %281 : vector<8x1xf32> to vector<8x8xf32>
    %283 = arith.mulf %278, %282 : vector<8x8xf32>
    %cst_116 = arith.constant dense<0.000000e+00> : vector<8x8xf32>
    %284 = tpu.matmul %283, %269, %cst_116 {dimension_numbers = #tpu.dot_dimension_numbers<[1], [0], [0], [1], [0, 0, 1, 1], [], []>} : vector<8x8xf32>, vector<8x8xf32>, vector<8x8xf32> -> vector<8x8xf32>
    %c8_117 = arith.constant 8 : index
    %c0_118 = arith.constant 0 : index
    %285 = vector.load %arg17[%c8_117, %c0_118] : memref<64x64xf32, #tpu.memory_space<vmem>>, vector<8x64xf32>
    %cst_119 = arith.constant dense<0.000000e+00> : vector<8x64xf32>
    %286 = tpu.matmul %284, %285, %cst_119 {dimension_numbers = #tpu.dot_dimension_numbers<[1], [0], [0], [1], [0, 0, 1, 1], [], []>} : vector<8x8xf32>, vector<8x64xf32>, vector<8x64xf32> -> vector<8x64xf32>
    %287 = arith.addf %266, %286 : vector<8x64xf32>
    %288 = vector.extract_strided_slice %237 {offsets = [0, 16], sizes = [8, 8], strides = [1, 1]} : vector<8x64xf32> to vector<8x8xf32>
    %289 = vector.extract_strided_slice %243 {offsets = [0, 16], sizes = [8, 8], strides = [1, 1]} : vector<8x64xf32> to vector<8x8xf32>
    %290 = vector.extract_strided_slice %244 {offsets = [0, 16], sizes = [8, 8], strides = [1, 1]} : vector<8x64xf32> to vector<8x8xf32>
    %cst_120 = arith.constant dense<0.000000e+00> : vector<8x8xf32>
    %291 = tpu.matmul %288, %289, %cst_120 {dimension_numbers = #tpu.dot_dimension_numbers<[1], [1], [0], [0], [0, 0, 1, 0], [], []>} : vector<8x8xf32>, vector<8x8xf32>, vector<8x8xf32> -> vector<8x8xf32>
    %cst_121 = arith.constant 0.353553385 : f32
    %292 = vector.broadcast %cst_121 : f32 to vector<8x8xf32>
    %293 = arith.mulf %291, %292 : vector<8x8xf32>
    %294 = arith.addf %293, %7 : vector<8x8xf32>
    %cst_122 = arith.constant dense<0xFF800000> : vector<8xf32>
    %295 = vector.multi_reduction <maximumf>, %294, %cst_122 [1] : vector<8x8xf32> to vector<8xf32>
    %296 = vector.shape_cast %295 : vector<8xf32> to vector<8x1xf32>
    %297 = vector.broadcast %296 : vector<8x1xf32> to vector<8x8xf32>
    %298 = arith.subf %294, %297 : vector<8x8xf32>
    %299 = math.exp %298 : vector<8x8xf32>
    %cst_123 = arith.constant dense<0.000000e+00> : vector<8xf32>
    %300 = vector.multi_reduction <add>, %299, %cst_123 [1] : vector<8x8xf32> to vector<8xf32>
    %301 = vector.shape_cast %300 : vector<8xf32> to vector<8x1xf32>
    %302 = tpu.reciprocal %301 {approx = true} : vector<8x1xf32> -> vector<8x1xf32>
    %303 = vector.broadcast %302 : vector<8x1xf32> to vector<8x8xf32>
    %304 = arith.mulf %299, %303 : vector<8x8xf32>
    %cst_124 = arith.constant dense<0.000000e+00> : vector<8x8xf32>
    %305 = tpu.matmul %304, %290, %cst_124 {dimension_numbers = #tpu.dot_dimension_numbers<[1], [0], [0], [1], [0, 0, 1, 1], [], []>} : vector<8x8xf32>, vector<8x8xf32>, vector<8x8xf32> -> vector<8x8xf32>
    %c16_125 = arith.constant 16 : index
    %c0_126 = arith.constant 0 : index
    %306 = vector.load %arg17[%c16_125, %c0_126] : memref<64x64xf32, #tpu.memory_space<vmem>>, vector<8x64xf32>
    %cst_127 = arith.constant dense<0.000000e+00> : vector<8x64xf32>
    %307 = tpu.matmul %305, %306, %cst_127 {dimension_numbers = #tpu.dot_dimension_numbers<[1], [0], [0], [1], [0, 0, 1, 1], [], []>} : vector<8x8xf32>, vector<8x64xf32>, vector<8x64xf32> -> vector<8x64xf32>
    %308 = arith.addf %287, %307 : vector<8x64xf32>
    %309 = vector.extract_strided_slice %237 {offsets = [0, 24], sizes = [8, 8], strides = [1, 1]} : vector<8x64xf32> to vector<8x8xf32>
    %310 = vector.extract_strided_slice %243 {offsets = [0, 24], sizes = [8, 8], strides = [1, 1]} : vector<8x64xf32> to vector<8x8xf32>
    %311 = vector.extract_strided_slice %244 {offsets = [0, 24], sizes = [8, 8], strides = [1, 1]} : vector<8x64xf32> to vector<8x8xf32>
    %cst_128 = arith.constant dense<0.000000e+00> : vector<8x8xf32>
    %312 = tpu.matmul %309, %310, %cst_128 {dimension_numbers = #tpu.dot_dimension_numbers<[1], [1], [0], [0], [0, 0, 1, 0], [], []>} : vector<8x8xf32>, vector<8x8xf32>, vector<8x8xf32> -> vector<8x8xf32>
    %cst_129 = arith.constant 0.353553385 : f32
    %313 = vector.broadcast %cst_129 : f32 to vector<8x8xf32>
    %314 = arith.mulf %312, %313 : vector<8x8xf32>
    %315 = arith.addf %314, %7 : vector<8x8xf32>
    %cst_130 = arith.constant dense<0xFF800000> : vector<8xf32>
    %316 = vector.multi_reduction <maximumf>, %315, %cst_130 [1] : vector<8x8xf32> to vector<8xf32>
    %317 = vector.shape_cast %316 : vector<8xf32> to vector<8x1xf32>
    %318 = vector.broadcast %317 : vector<8x1xf32> to vector<8x8xf32>
    %319 = arith.subf %315, %318 : vector<8x8xf32>
    %320 = math.exp %319 : vector<8x8xf32>
    %cst_131 = arith.constant dense<0.000000e+00> : vector<8xf32>
    %321 = vector.multi_reduction <add>, %320, %cst_131 [1] : vector<8x8xf32> to vector<8xf32>
    %322 = vector.shape_cast %321 : vector<8xf32> to vector<8x1xf32>
    %323 = tpu.reciprocal %322 {approx = true} : vector<8x1xf32> -> vector<8x1xf32>
    %324 = vector.broadcast %323 : vector<8x1xf32> to vector<8x8xf32>
    %325 = arith.mulf %320, %324 : vector<8x8xf32>
    %cst_132 = arith.constant dense<0.000000e+00> : vector<8x8xf32>
    %326 = tpu.matmul %325, %311, %cst_132 {dimension_numbers = #tpu.dot_dimension_numbers<[1], [0], [0], [1], [0, 0, 1, 1], [], []>} : vector<8x8xf32>, vector<8x8xf32>, vector<8x8xf32> -> vector<8x8xf32>
    %c24_133 = arith.constant 24 : index
    %c0_134 = arith.constant 0 : index
    %327 = vector.load %arg17[%c24_133, %c0_134] : memref<64x64xf32, #tpu.memory_space<vmem>>, vector<8x64xf32>
    %cst_135 = arith.constant dense<0.000000e+00> : vector<8x64xf32>
    %328 = tpu.matmul %326, %327, %cst_135 {dimension_numbers = #tpu.dot_dimension_numbers<[1], [0], [0], [1], [0, 0, 1, 1], [], []>} : vector<8x8xf32>, vector<8x64xf32>, vector<8x64xf32> -> vector<8x64xf32>
    %329 = arith.addf %308, %328 : vector<8x64xf32>
    %330 = vector.extract_strided_slice %237 {offsets = [0, 32], sizes = [8, 8], strides = [1, 1]} : vector<8x64xf32> to vector<8x8xf32>
    %331 = vector.extract_strided_slice %243 {offsets = [0, 32], sizes = [8, 8], strides = [1, 1]} : vector<8x64xf32> to vector<8x8xf32>
    %332 = vector.extract_strided_slice %244 {offsets = [0, 32], sizes = [8, 8], strides = [1, 1]} : vector<8x64xf32> to vector<8x8xf32>
    %cst_136 = arith.constant dense<0.000000e+00> : vector<8x8xf32>
    %333 = tpu.matmul %330, %331, %cst_136 {dimension_numbers = #tpu.dot_dimension_numbers<[1], [1], [0], [0], [0, 0, 1, 0], [], []>} : vector<8x8xf32>, vector<8x8xf32>, vector<8x8xf32> -> vector<8x8xf32>
    %cst_137 = arith.constant 0.353553385 : f32
    %334 = vector.broadcast %cst_137 : f32 to vector<8x8xf32>
    %335 = arith.mulf %333, %334 : vector<8x8xf32>
    %336 = arith.addf %335, %7 : vector<8x8xf32>
    %cst_138 = arith.constant dense<0xFF800000> : vector<8xf32>
    %337 = vector.multi_reduction <maximumf>, %336, %cst_138 [1] : vector<8x8xf32> to vector<8xf32>
    %338 = vector.shape_cast %337 : vector<8xf32> to vector<8x1xf32>
    %339 = vector.broadcast %338 : vector<8x1xf32> to vector<8x8xf32>
    %340 = arith.subf %336, %339 : vector<8x8xf32>
    %341 = math.exp %340 : vector<8x8xf32>
    %cst_139 = arith.constant dense<0.000000e+00> : vector<8xf32>
    %342 = vector.multi_reduction <add>, %341, %cst_139 [1] : vector<8x8xf32> to vector<8xf32>
    %343 = vector.shape_cast %342 : vector<8xf32> to vector<8x1xf32>
    %344 = tpu.reciprocal %343 {approx = true} : vector<8x1xf32> -> vector<8x1xf32>
    %345 = vector.broadcast %344 : vector<8x1xf32> to vector<8x8xf32>
    %346 = arith.mulf %341, %345 : vector<8x8xf32>
    %cst_140 = arith.constant dense<0.000000e+00> : vector<8x8xf32>
    %347 = tpu.matmul %346, %332, %cst_140 {dimension_numbers = #tpu.dot_dimension_numbers<[1], [0], [0], [1], [0, 0, 1, 1], [], []>} : vector<8x8xf32>, vector<8x8xf32>, vector<8x8xf32> -> vector<8x8xf32>
    %c32_141 = arith.constant 32 : index
    %c0_142 = arith.constant 0 : index
    %348 = vector.load %arg17[%c32_141, %c0_142] : memref<64x64xf32, #tpu.memory_space<vmem>>, vector<8x64xf32>
    %cst_143 = arith.constant dense<0.000000e+00> : vector<8x64xf32>
    %349 = tpu.matmul %347, %348, %cst_143 {dimension_numbers = #tpu.dot_dimension_numbers<[1], [0], [0], [1], [0, 0, 1, 1], [], []>} : vector<8x8xf32>, vector<8x64xf32>, vector<8x64xf32> -> vector<8x64xf32>
    %350 = arith.addf %329, %349 : vector<8x64xf32>
    %351 = vector.extract_strided_slice %237 {offsets = [0, 40], sizes = [8, 8], strides = [1, 1]} : vector<8x64xf32> to vector<8x8xf32>
    %352 = vector.extract_strided_slice %243 {offsets = [0, 40], sizes = [8, 8], strides = [1, 1]} : vector<8x64xf32> to vector<8x8xf32>
    %353 = vector.extract_strided_slice %244 {offsets = [0, 40], sizes = [8, 8], strides = [1, 1]} : vector<8x64xf32> to vector<8x8xf32>
    %cst_144 = arith.constant dense<0.000000e+00> : vector<8x8xf32>
    %354 = tpu.matmul %351, %352, %cst_144 {dimension_numbers = #tpu.dot_dimension_numbers<[1], [1], [0], [0], [0, 0, 1, 0], [], []>} : vector<8x8xf32>, vector<8x8xf32>, vector<8x8xf32> -> vector<8x8xf32>
    %cst_145 = arith.constant 0.353553385 : f32
    %355 = vector.broadcast %cst_145 : f32 to vector<8x8xf32>
    %356 = arith.mulf %354, %355 : vector<8x8xf32>
    %357 = arith.addf %356, %7 : vector<8x8xf32>
    %cst_146 = arith.constant dense<0xFF800000> : vector<8xf32>
    %358 = vector.multi_reduction <maximumf>, %357, %cst_146 [1] : vector<8x8xf32> to vector<8xf32>
    %359 = vector.shape_cast %358 : vector<8xf32> to vector<8x1xf32>
    %360 = vector.broadcast %359 : vector<8x1xf32> to vector<8x8xf32>
    %361 = arith.subf %357, %360 : vector<8x8xf32>
    %362 = math.exp %361 : vector<8x8xf32>
    %cst_147 = arith.constant dense<0.000000e+00> : vector<8xf32>
    %363 = vector.multi_reduction <add>, %362, %cst_147 [1] : vector<8x8xf32> to vector<8xf32>
    %364 = vector.shape_cast %363 : vector<8xf32> to vector<8x1xf32>
    %365 = tpu.reciprocal %364 {approx = true} : vector<8x1xf32> -> vector<8x1xf32>
    %366 = vector.broadcast %365 : vector<8x1xf32> to vector<8x8xf32>
    %367 = arith.mulf %362, %366 : vector<8x8xf32>
    %cst_148 = arith.constant dense<0.000000e+00> : vector<8x8xf32>
    %368 = tpu.matmul %367, %353, %cst_148 {dimension_numbers = #tpu.dot_dimension_numbers<[1], [0], [0], [1], [0, 0, 1, 1], [], []>} : vector<8x8xf32>, vector<8x8xf32>, vector<8x8xf32> -> vector<8x8xf32>
    %c40_149 = arith.constant 40 : index
    %c0_150 = arith.constant 0 : index
    %369 = vector.load %arg17[%c40_149, %c0_150] : memref<64x64xf32, #tpu.memory_space<vmem>>, vector<8x64xf32>
    %cst_151 = arith.constant dense<0.000000e+00> : vector<8x64xf32>
    %370 = tpu.matmul %368, %369, %cst_151 {dimension_numbers = #tpu.dot_dimension_numbers<[1], [0], [0], [1], [0, 0, 1, 1], [], []>} : vector<8x8xf32>, vector<8x64xf32>, vector<8x64xf32> -> vector<8x64xf32>
    %371 = arith.addf %350, %370 : vector<8x64xf32>
    %372 = vector.extract_strided_slice %237 {offsets = [0, 48], sizes = [8, 8], strides = [1, 1]} : vector<8x64xf32> to vector<8x8xf32>
    %373 = vector.extract_strided_slice %243 {offsets = [0, 48], sizes = [8, 8], strides = [1, 1]} : vector<8x64xf32> to vector<8x8xf32>
    %374 = vector.extract_strided_slice %244 {offsets = [0, 48], sizes = [8, 8], strides = [1, 1]} : vector<8x64xf32> to vector<8x8xf32>
    %cst_152 = arith.constant dense<0.000000e+00> : vector<8x8xf32>
    %375 = tpu.matmul %372, %373, %cst_152 {dimension_numbers = #tpu.dot_dimension_numbers<[1], [1], [0], [0], [0, 0, 1, 0], [], []>} : vector<8x8xf32>, vector<8x8xf32>, vector<8x8xf32> -> vector<8x8xf32>
    %cst_153 = arith.constant 0.353553385 : f32
    %376 = vector.broadcast %cst_153 : f32 to vector<8x8xf32>
    %377 = arith.mulf %375, %376 : vector<8x8xf32>
    %378 = arith.addf %377, %7 : vector<8x8xf32>
    %cst_154 = arith.constant dense<0xFF800000> : vector<8xf32>
    %379 = vector.multi_reduction <maximumf>, %378, %cst_154 [1] : vector<8x8xf32> to vector<8xf32>
    %380 = vector.shape_cast %379 : vector<8xf32> to vector<8x1xf32>
    %381 = vector.broadcast %380 : vector<8x1xf32> to vector<8x8xf32>
    %382 = arith.subf %378, %381 : vector<8x8xf32>
    %383 = math.exp %382 : vector<8x8xf32>
    %cst_155 = arith.constant dense<0.000000e+00> : vector<8xf32>
    %384 = vector.multi_reduction <add>, %383, %cst_155 [1] : vector<8x8xf32> to vector<8xf32>
    %385 = vector.shape_cast %384 : vector<8xf32> to vector<8x1xf32>
    %386 = tpu.reciprocal %385 {approx = true} : vector<8x1xf32> -> vector<8x1xf32>
    %387 = vector.broadcast %386 : vector<8x1xf32> to vector<8x8xf32>
    %388 = arith.mulf %383, %387 : vector<8x8xf32>
    %cst_156 = arith.constant dense<0.000000e+00> : vector<8x8xf32>
    %389 = tpu.matmul %388, %374, %cst_156 {dimension_numbers = #tpu.dot_dimension_numbers<[1], [0], [0], [1], [0, 0, 1, 1], [], []>} : vector<8x8xf32>, vector<8x8xf32>, vector<8x8xf32> -> vector<8x8xf32>
    %c48_157 = arith.constant 48 : index
    %c0_158 = arith.constant 0 : index
    %390 = vector.load %arg17[%c48_157, %c0_158] : memref<64x64xf32, #tpu.memory_space<vmem>>, vector<8x64xf32>
    %cst_159 = arith.constant dense<0.000000e+00> : vector<8x64xf32>
    %391 = tpu.matmul %389, %390, %cst_159 {dimension_numbers = #tpu.dot_dimension_numbers<[1], [0], [0], [1], [0, 0, 1, 1], [], []>} : vector<8x8xf32>, vector<8x64xf32>, vector<8x64xf32> -> vector<8x64xf32>
    %392 = arith.addf %371, %391 : vector<8x64xf32>
    %393 = vector.extract_strided_slice %237 {offsets = [0, 56], sizes = [8, 8], strides = [1, 1]} : vector<8x64xf32> to vector<8x8xf32>
    %394 = vector.extract_strided_slice %243 {offsets = [0, 56], sizes = [8, 8], strides = [1, 1]} : vector<8x64xf32> to vector<8x8xf32>
    %395 = vector.extract_strided_slice %244 {offsets = [0, 56], sizes = [8, 8], strides = [1, 1]} : vector<8x64xf32> to vector<8x8xf32>
    %cst_160 = arith.constant dense<0.000000e+00> : vector<8x8xf32>
    %396 = tpu.matmul %393, %394, %cst_160 {dimension_numbers = #tpu.dot_dimension_numbers<[1], [1], [0], [0], [0, 0, 1, 0], [], []>} : vector<8x8xf32>, vector<8x8xf32>, vector<8x8xf32> -> vector<8x8xf32>
    %cst_161 = arith.constant 0.353553385 : f32
    %397 = vector.broadcast %cst_161 : f32 to vector<8x8xf32>
    %398 = arith.mulf %396, %397 : vector<8x8xf32>
    %399 = arith.addf %398, %7 : vector<8x8xf32>
    %cst_162 = arith.constant dense<0xFF800000> : vector<8xf32>
    %400 = vector.multi_reduction <maximumf>, %399, %cst_162 [1] : vector<8x8xf32> to vector<8xf32>
    %401 = vector.shape_cast %400 : vector<8xf32> to vector<8x1xf32>
    %402 = vector.broadcast %401 : vector<8x1xf32> to vector<8x8xf32>
    %403 = arith.subf %399, %402 : vector<8x8xf32>
    %404 = math.exp %403 : vector<8x8xf32>
    %cst_163 = arith.constant dense<0.000000e+00> : vector<8xf32>
    %405 = vector.multi_reduction <add>, %404, %cst_163 [1] : vector<8x8xf32> to vector<8xf32>
    %406 = vector.shape_cast %405 : vector<8xf32> to vector<8x1xf32>
    %407 = tpu.reciprocal %406 {approx = true} : vector<8x1xf32> -> vector<8x1xf32>
    %408 = vector.broadcast %407 : vector<8x1xf32> to vector<8x8xf32>
    %409 = arith.mulf %404, %408 : vector<8x8xf32>
    %cst_164 = arith.constant dense<0.000000e+00> : vector<8x8xf32>
    %410 = tpu.matmul %409, %395, %cst_164 {dimension_numbers = #tpu.dot_dimension_numbers<[1], [0], [0], [1], [0, 0, 1, 1], [], []>} : vector<8x8xf32>, vector<8x8xf32>, vector<8x8xf32> -> vector<8x8xf32>
    %c56_165 = arith.constant 56 : index
    %c0_166 = arith.constant 0 : index
    %411 = vector.load %arg17[%c56_165, %c0_166] : memref<64x64xf32, #tpu.memory_space<vmem>>, vector<8x64xf32>
    %cst_167 = arith.constant dense<0.000000e+00> : vector<8x64xf32>
    %412 = tpu.matmul %410, %411, %cst_167 {dimension_numbers = #tpu.dot_dimension_numbers<[1], [0], [0], [1], [0, 0, 1, 1], [], []>} : vector<8x8xf32>, vector<8x64xf32>, vector<8x64xf32> -> vector<8x64xf32>
    %413 = arith.addf %392, %412 : vector<8x64xf32>
    %c0_168 = arith.constant 0 : index
    %c0_169 = arith.constant 0 : index
    %414 = vector.load %arg18[%c0_168, %c0_169] : memref<1x64xf32, #tpu.memory_space<vmem>>, vector<1x64xf32>
    %415 = vector.broadcast %414 : vector<1x64xf32> to vector<8x64xf32>
    %416 = arith.addf %413, %415 : vector<8x64xf32>
    %417 = arith.addf %416, %210 : vector<8x64xf32>
    %cst_170 = arith.constant dense<0.000000e+00> : vector<8xf32>
    %418 = vector.multi_reduction <add>, %417, %cst_170 [1] : vector<8x64xf32> to vector<8xf32>
    %419 = vector.shape_cast %418 : vector<8xf32> to vector<8x1xf32>
    %cst_171 = arith.constant 6.400000e+01 : f32
    %420 = vector.broadcast %cst_171 : f32 to vector<8x1xf32>
    %421 = arith.divf %419, %420 : vector<8x1xf32>
    %422 = vector.broadcast %421 : vector<8x1xf32> to vector<8x64xf32>
    %423 = arith.subf %417, %422 : vector<8x64xf32>
    %424 = arith.mulf %423, %423 : vector<8x64xf32>
    %cst_172 = arith.constant dense<0.000000e+00> : vector<8xf32>
    %425 = vector.multi_reduction <add>, %424, %cst_172 [1] : vector<8x64xf32> to vector<8xf32>
    %426 = vector.shape_cast %425 : vector<8xf32> to vector<8x1xf32>
    %cst_173 = arith.constant 6.400000e+01 : f32
    %427 = vector.broadcast %cst_173 : f32 to vector<8x1xf32>
    %428 = arith.divf %426, %427 : vector<8x1xf32>
    %cst_174 = arith.constant 9.99999997E-7 : f32
    %429 = vector.broadcast %cst_174 : f32 to vector<8x1xf32>
    %430 = arith.addf %428, %429 : vector<8x1xf32>
    %431 = math.rsqrt %430 : vector<8x1xf32>
    %432 = vector.broadcast %431 : vector<8x1xf32> to vector<8x64xf32>
    %433 = arith.mulf %423, %432 : vector<8x64xf32>
    %c0_175 = arith.constant 0 : index
    %c0_176 = arith.constant 0 : index
    %434 = vector.load %arg19[%c0_175, %c0_176] : memref<1x64xf32, #tpu.memory_space<vmem>>, vector<1x64xf32>
    %435 = vector.broadcast %434 : vector<1x64xf32> to vector<8x64xf32>
    %436 = arith.mulf %433, %435 : vector<8x64xf32>
    %c0_177 = arith.constant 0 : index
    %c0_178 = arith.constant 0 : index
    %437 = vector.load %arg20[%c0_177, %c0_178] : memref<1x64xf32, #tpu.memory_space<vmem>>, vector<1x64xf32>
    %438 = vector.broadcast %437 : vector<1x64xf32> to vector<8x64xf32>
    %439 = arith.addf %436, %438 : vector<8x64xf32>
    %c0_179 = arith.constant 0 : index
    %c0_180 = arith.constant 0 : index
    %440 = vector.load %arg21[%c0_179, %c0_180] : memref<64x256xf32, #tpu.memory_space<vmem>>, vector<64x256xf32>
    %cst_181 = arith.constant dense<0.000000e+00> : vector<8x256xf32>
    %441 = tpu.matmul %439, %440, %cst_181 {dimension_numbers = #tpu.dot_dimension_numbers<[1], [0], [0], [1], [0, 0, 1, 1], [], []>} : vector<8x64xf32>, vector<64x256xf32>, vector<8x256xf32> -> vector<8x256xf32>
    %c0_182 = arith.constant 0 : index
    %c0_183 = arith.constant 0 : index
    %442 = vector.load %arg22[%c0_182, %c0_183] : memref<1x256xf32, #tpu.memory_space<vmem>>, vector<1x256xf32>
    %443 = vector.broadcast %442 : vector<1x256xf32> to vector<8x256xf32>
    %444 = arith.addf %441, %443 : vector<8x256xf32>
    %cst_184 = arith.constant 5.000000e-01 : f32
    %445 = vector.broadcast %cst_184 : f32 to vector<8x256xf32>
    %446 = arith.mulf %445, %444 : vector<8x256xf32>
    %cst_185 = arith.constant 4.471500e-02 : f32
    %447 = vector.broadcast %cst_185 : f32 to vector<8x256xf32>
    %448 = arith.mulf %447, %444 : vector<8x256xf32>
    %449 = arith.mulf %448, %444 : vector<8x256xf32>
    %450 = arith.mulf %449, %444 : vector<8x256xf32>
    %451 = arith.addf %444, %450 : vector<8x256xf32>
    %cst_186 = arith.constant 0.797884583 : f32
    %452 = vector.broadcast %cst_186 : f32 to vector<8x256xf32>
    %453 = arith.mulf %452, %451 : vector<8x256xf32>
    %454 = math.tanh %453 : vector<8x256xf32>
    %cst_187 = arith.constant 1.000000e+00 : f32
    %455 = vector.broadcast %cst_187 : f32 to vector<8x256xf32>
    %456 = arith.addf %455, %454 : vector<8x256xf32>
    %457 = arith.mulf %446, %456 : vector<8x256xf32>
    %c0_188 = arith.constant 0 : index
    %c0_189 = arith.constant 0 : index
    %458 = vector.load %arg23[%c0_188, %c0_189] : memref<256x64xf32, #tpu.memory_space<vmem>>, vector<256x64xf32>
    %cst_190 = arith.constant dense<0.000000e+00> : vector<8x64xf32>
    %459 = tpu.matmul %457, %458, %cst_190 {dimension_numbers = #tpu.dot_dimension_numbers<[1], [0], [0], [1], [0, 0, 1, 1], [], []>} : vector<8x256xf32>, vector<256x64xf32>, vector<8x64xf32> -> vector<8x64xf32>
    %c0_191 = arith.constant 0 : index
    %c0_192 = arith.constant 0 : index
    %460 = vector.load %arg24[%c0_191, %c0_192] : memref<1x64xf32, #tpu.memory_space<vmem>>, vector<1x64xf32>
    %461 = vector.broadcast %460 : vector<1x64xf32> to vector<8x64xf32>
    %462 = arith.addf %459, %461 : vector<8x64xf32>
    %463 = arith.addf %462, %417 : vector<8x64xf32>
    %c0_193 = arith.constant 0 : index
    %c0_194 = arith.constant 0 : index
    %c0_195 = arith.constant 0 : index
    %464 = vector.load %arg25[%c0_193, %c0_194, %c0_195] : memref<1x8x64xf32, #tpu.memory_space<vmem>>, vector<1x8x64xf32>
    %465 = vector.shape_cast %464 : vector<1x8x64xf32> to vector<8x64xf32>
    %466 = vector.shape_cast %463 : vector<8x64xf32> to vector<1x8x64xf32>
    tpu.vector_store %arg25[%c0_193, %c0_194, %c0_195], %466 {strides = array<i32>} : memref<1x8x64xf32, #tpu.memory_space<vmem>>, vector<1x8x64xf32>,
    return
  }
  func.func @transform_0(%arg0: i32) -> (i32, i32, i32) {
    %c0_i32 = arith.constant 0 : i32
    %c0_i32_0 = arith.constant 0 : i32
    %c0_i32_1 = arith.constant 0 : i32
    return %arg0, %c0_i32, %c0_i32_0 : i32, i32, i32
  }
  func.func @transform_1(%arg0: i32) -> (i32, i32, i32) {
    %c0_i32 = arith.constant 0 : i32
    %c0_i32_0 = arith.constant 0 : i32
    %c0_i32_1 = arith.constant 0 : i32
    return %arg0, %c0_i32, %c0_i32_0 : i32, i32, i32
  }
  func.func @transform_2(%arg0: i32) -> (i32, i32, i32) {
    %c0_i32 = arith.constant 0 : i32
    %c0_i32_0 = arith.constant 0 : i32
    %c0_i32_1 = arith.constant 0 : i32
    return %arg0, %c0_i32, %c0_i32_0 : i32, i32, i32
  }
  func.func @transform_3(%arg0: i32) -> (i32, i32, i32) {
    %c0_i32 = arith.constant 0 : i32
    %c0_i32_0 = arith.constant 0 : i32
    %c0_i32_1 = arith.constant 0 : i32
    return %arg0, %c0_i32, %c0_i32_0 : i32, i32, i32
  }
  func.func @transform_4(%arg0: i32) -> (i32, i32) {
    %c0_i32 = arith.constant 0 : i32
    %c0_i32_0 = arith.constant 0 : i32
    %c0_i32_1 = arith.constant 0 : i32
    return %c0_i32, %c0_i32_0 : i32, i32
  }
  func.func @transform_5(%arg0: i32) -> (i32, i32) {
    %c0_i32 = arith.constant 0 : i32
    %c0_i32_0 = arith.constant 0 : i32
    %c0_i32_1 = arith.constant 0 : i32
    return %c0_i32, %c0_i32_0 : i32, i32
  }
  func.func @transform_6(%arg0: i32) -> (i32, i32) {
    %c0_i32 = arith.constant 0 : i32
    %c0_i32_0 = arith.constant 0 : i32
    %c0_i32_1 = arith.constant 0 : i32
    return %c0_i32, %c0_i32_0 : i32, i32
  }
  func.func @transform_7(%arg0: i32) -> (i32, i32) {
    %c0_i32 = arith.constant 0 : i32
    %c0_i32_0 = arith.constant 0 : i32
    %c0_i32_1 = arith.constant 0 : i32
    return %c0_i32, %c0_i32_0 : i32, i32
  }
  func.func @transform_8(%arg0: i32) -> (i32, i32) {
    %c0_i32 = arith.constant 0 : i32
    %c0_i32_0 = arith.constant 0 : i32
    %c0_i32_1 = arith.constant 0 : i32
    return %c0_i32, %c0_i32_0 : i32, i32
  }
  func.func @transform_9(%arg0: i32) -> (i32, i32) {
    %c0_i32 = arith.constant 0 : i32
    %c0_i32_0 = arith.constant 0 : i32
    %c0_i32_1 = arith.constant 0 : i32
    return %c0_i32, %c0_i32_0 : i32, i32
  }
  func.func @transform_10(%arg0: i32) -> (i32, i32) {
    %c0_i32 = arith.constant 0 : i32
    %c0_i32_0 = arith.constant 0 : i32
    %c0_i32_1 = arith.constant 0 : i32
    return %c0_i32, %c0_i32_0 : i32, i32
  }
  func.func @transform_11(%arg0: i32) -> (i32, i32) {
    %c0_i32 = arith.constant 0 : i32
    %c0_i32_0 = arith.constant 0 : i32
    %c0_i32_1 = arith.constant 0 : i32
    return %c0_i32, %c0_i32_0 : i32, i32
  }
  func.func @transform_12(%arg0: i32) -> (i32, i32) {
    %c0_i32 = arith.constant 0 : i32
    %c0_i32_0 = arith.constant 0 : i32
    %c0_i32_1 = arith.constant 0 : i32
    return %c0_i32, %c0_i32_0 : i32, i32
  }
  func.func @transform_13(%arg0: i32) -> (i32, i32) {
    %c0_i32 = arith.constant 0 : i32
    %c0_i32_0 = arith.constant 0 : i32
    %c0_i32_1 = arith.constant 0 : i32
    return %c0_i32, %c0_i32_0 : i32, i32
  }
  func.func @transform_14(%arg0: i32) -> (i32, i32) {
    %c0_i32 = arith.constant 0 : i32
    %c0_i32_0 = arith.constant 0 : i32
    %c0_i32_1 = arith.constant 0 : i32
    return %c0_i32, %c0_i32_0 : i32, i32
  }
  func.func @transform_15(%arg0: i32) -> (i32, i32) {
    %c0_i32 = arith.constant 0 : i32
    %c0_i32_0 = arith.constant 0 : i32
    %c0_i32_1 = arith.constant 0 : i32
    return %c0_i32, %c0_i32_0 : i32, i32
  }
  func.func @transform_16(%arg0: i32) -> (i32, i32) {
    %c0_i32 = arith.constant 0 : i32
    %c0_i32_0 = arith.constant 0 : i32
    %c0_i32_1 = arith.constant 0 : i32
    return %c0_i32, %c0_i32_0 : i32, i32
  }
  func.func @transform_17(%arg0: i32) -> (i32, i32) {
    %c0_i32 = arith.constant 0 : i32
    %c0_i32_0 = arith.constant 0 : i32
    %c0_i32_1 = arith.constant 0 : i32
    return %c0_i32, %c0_i32_0 : i32, i32
  }
  func.func @transform_18(%arg0: i32) -> (i32, i32) {
    %c0_i32 = arith.constant 0 : i32
    %c0_i32_0 = arith.constant 0 : i32
    %c0_i32_1 = arith.constant 0 : i32
    return %c0_i32, %c0_i32_0 : i32, i32
  }
  func.func @transform_19(%arg0: i32) -> (i32, i32) {
    %c0_i32 = arith.constant 0 : i32
    %c0_i32_0 = arith.constant 0 : i32
    %c0_i32_1 = arith.constant 0 : i32
    return %c0_i32, %c0_i32_0 : i32, i32
  }
  func.func @transform_20(%arg0: i32) -> (i32, i32) {
    %c0_i32 = arith.constant 0 : i32
    %c0_i32_0 = arith.constant 0 : i32
    %c0_i32_1 = arith.constant 0 : i32
    return %c0_i32, %c0_i32_0 : i32, i32
  }
  func.func @transform_21(%arg0: i32) -> (i32, i32) {
    %c0_i32 = arith.constant 0 : i32
    %c0_i32_0 = arith.constant 0 : i32
    %c0_i32_1 = arith.constant 0 : i32
    return %c0_i32, %c0_i32_0 : i32, i32
  }
  func.func @transform_22(%arg0: i32) -> (i32, i32) {
    %c0_i32 = arith.constant 0 : i32
    %c0_i32_0 = arith.constant 0 : i32
    %c0_i32_1 = arith.constant 0 : i32
    return %c0_i32, %c0_i32_0 : i32, i32
  }
  func.func @transform_23(%arg0: i32) -> (i32, i32) {
    %c0_i32 = arith.constant 0 : i32
    %c0_i32_0 = arith.constant 0 : i32
    %c0_i32_1 = arith.constant 0 : i32
    return %c0_i32, %c0_i32_0 : i32, i32
  }
  func.func @transform_24(%arg0: i32) -> (i32, i32, i32) {
    %c0_i32 = arith.constant 0 : i32
    %c0_i32_0 = arith.constant 0 : i32
    %c0_i32_1 = arith.constant 0 : i32
    return %arg0, %c0_i32, %c0_i32_0 : i32, i32, i32
  }
}

</mosaic_0001>

<bundles_post_ra>
// kernel: decoder_layer_forward.5
= control target key start
LH: loop header
LB: loop body
LE: loop exit
PB: predicated region body
PF: predicated region fallthrough
CT: control target
= control target key end

     0   :  { %v606_v7 = vmov 0.0   ;;  %s905_s0 = inlined_call_operand.vmem [shape: f32[16,64], index: 0, kind: input, shape index: {}]   ;;  %s906_s1 = inlined_call_operand.vmem [shape: f32[16,64], index: 1, kind: input, shape index: {}]   ;;  %s907_s2 = inlined_call_operand.vmem [shape: f32[128,256], index: 2, kind: input, shape index: {}]   ;;  %s908_s3 = inlined_call_operand.vmem [shape: f32[1,256], index: 3, kind: input, shape index: {}]   ;;  %s909_s4 = inlined_call_operand.vmem [shape: f32[256,64], index: 4, kind: input, shape index: {}]   ;;  %s910_s5 = inlined_call_operand.vmem [shape: f32[1,64], index: 5, kind: input, shape index: {}]   ;;  %s911_s6 = inlined_call_operand.vmem [shape: f32[1,64], index: 6, kind: input, shape index: {}]   ;;  %s912_s7 = inlined_call_operand.hbm [shape: f32[16,64], index: 7, kind: output, shape index: {}]  }
   0x1   :  { %v48_v0 = vld [vmem:[%s907_s2 + $0x88] sm:$0xff]  ;;  %v50_v1 = vld [vmem:[%s907_s2 + $0x98] sm:$0xff]  ;;  %v47_v2 = vld [vmem:[%s907_s2 + $0x80] sm:$0xff]  ;;  %134 = vmatprep.mubr.f32.mxu0 %v606_v7 }
   0x2   :  { %v498_v3 = vpack.c.bf16 %v50_v1, %v48_v0  ;;  %v49_v4 = vld [vmem:[%s907_s2 + $0x90] sm:$0xff]  ;;  %v52_v5 = vld [vmem:[%s907_s2 + $0xa8] sm:$0xff]  ;;  %v54_v6 = vld [vmem:[%s907_s2 + $0xb8] sm:$0xff] }
   0x3   :  { %v500_v8 = vpack.c.bf16 %v49_v4, %v47_v2  ;;  %v502_v9 = vpack.c.bf16 %v54_v6, %v52_v5  ;;  %v51_v10 = vld [vmem:[%s907_s2 + $0xa0] sm:$0xff]  ;;  %v53_v11 = vld [vmem:[%s907_s2 + $0xb0] sm:$0xff]  ;;  %v56_v12 = vld [vmem:[%s907_s2 + $0xc8] sm:$0xff] }
   0x4   :  { %499 = vmatprep.subr.bf16.mxu0 %v498_v3  ;;  %v58_v13 = vld [vmem:[%s907_s2 + $0xd8] sm:$0xff]  ;;  %v504_v14 = vpack.c.bf16 %v53_v11, %v51_v10  ;;  %v55_v16 = vld [vmem:[%s907_s2 + $0xc0] sm:$0xff]  ;;  %v57_v17 = vld [vmem:[%s907_s2 + $0xd0] sm:$0xff] }
   0x5   :  { %501 = vmatpush1.bf16.msra.mxu0 %v500_v8  ;;  %v506_v15 = vpack.c.bf16 %v58_v13, %v56_v12  ;;  %v60_v18 = vld [vmem:[%s907_s2 + $0xe8] sm:$0xff]  ;;  %v62_v19 = vld [vmem:[%s907_s2 + $0xf8] sm:$0xff]  ;;  %v508_v20 = vpack.c.bf16 %v57_v17, %v55_v16  ;;  %v59_v22 = vld [vmem:[%s907_s2 + $0xe0] sm:$0xff] }
   0x6   :  { %503 = vmatprep.subr.bf16.mxu0 %v502_v9  ;;  %v510_v21 = vpack.c.bf16 %v62_v19, %v60_v18  ;;  %v61_v23 = vld [vmem:[%s907_s2 + $0xf0] sm:$0xff]  ;;  %v32_v24 = vld [vmem:[%s907_s2 + $0x8] sm:$0xff]  ;;  %v34_v25 = vld [vmem:[%s907_s2 + $0x18] sm:$0xff] }
   0x7   :  { %v31_v26 = vld [vmem:[%s907_s2] sm:$0xff]  ;;  %v512_v27 = vpack.c.bf16 %v61_v23, %v59_v22  ;;  %v299_v29 = vld [vmem:[%s909_s4 + $0x88] sm:$0xff]  ;;  %v514_v31 = vpack.c.bf16 %v34_v25, %v32_v24  ;;  %v33_v32 = vld [vmem:[%s907_s2 + $0x10] sm:$0xff] }
   0x8   :  { %v298_v28 = vld [vmem:[%s909_s4 + $0x80] sm:$0xff]  ;;  %v283_v34 = vld [vmem:[%s909_s4 + $0x8] sm:$0xff] }
   0x9   :  { %505 = vmatpush1.bf16.msra.mxu0 %v504_v14  ;;  %v282_v30 = vld [vmem:[%s909_s4] sm:$0xff]  ;;  %v530_v33 = vpack.c.bf16 %v299_v29, %v298_v28 }
   0xa   :  { %507 = vmatprep.subr.bf16.mxu0 %v506_v15 }
   0xd   :  { %509 = vmatpush1.bf16.msra.mxu0 %v508_v20 }
   0xe   :  { %511 = vmatprep.subr.bf16.mxu0 %v510_v21 }
   0xf   :  { %12 = vsyncpa [#allocation3], 0  ;;  %v36_v35 = vld [vmem:[%s907_s2 + $0x28] sm:$0xff]  ;;  %v38_v36 = vld [vmem:[%s907_s2 + $0x38] sm:$0xff]  ;;  %v532_v37 = vpack.c.bf16 %v283_v34, %v282_v30  ;;  %531 = vmatprep.subr.bf16.mxu1 %v530_v33  ;;  %vm63_vm0 = vcmask 523264   ;;  %v516_v39 = vpack.c.bf16 %v33_v32, %v31_v26 }
  0x10   :  { %v732_v38 = vld [vmem:[%s906_s1] sm:$0xff]  ;;  %v518_v40 = vpack.c.bf16 %v38_v36, %v36_v35  ;;  %v37_v42 = vld [vmem:[%s907_s2 + $0x30] sm:$0xff]  ;;  %v40_v43 = vld [vmem:[%s907_s2 + $0x48] sm:$0xff] }
  0x11   :  { %513 = vmatpush1.bf16.msra.mxu0 %v512_v27  ;;  %533 = vmatpush3.bf16.msra.mxu1 %v532_v37  ;;  %v35_v41 = vld [vmem:[%s907_s2 + $0x20] sm:$0xff]  ;;  %v42_v44 = vld [vmem:[%s907_s2 + $0x58] sm:$0xff]  ;;  %v752_v46 = vld [vmem:[%s906_s1 + $0x8] sm:$0xff]  ;;  %v232_v37 = vlaneseq }
  0x12   :  { %515 = vmatprep.subr.bf16.mxu0 %v514_v31  ;;  %v520_v45 = vpack.c.bf16 %v37_v42, %v35_v41  ;;  %v522_v47 = vpack.c.bf16 %v42_v44, %v40_v43  ;;  %v39_v48 = vld [vmem:[%s907_s2 + $0x40] sm:$0xff]  ;;  %v41_v49 = vld [vmem:[%s907_s2 + $0x50] sm:$0xff]  ;;  %v44_v50 = vld [vmem:[%s907_s2 + $0x68] sm:$0xff] }
  0x13   :  { %v46_v51 = vld [vmem:[%s907_s2 + $0x78] sm:$0xff]  ;;  %v524_v52 = vpack.c.bf16 %v41_v49, %v39_v48  ;;  %v43_v54 = vld [vmem:[%s907_s2 + $0x60] sm:$0xff]  ;;  %v45_v55 = vld [vmem:[%s907_s2 + $0x70] sm:$0xff] }
  0x14   :  { %454 = vmatmul.mubr.msk.f32.vlgmr.msra.gmra.mrb[0].mxu0 %vm63_vm0, %v732_v38  ;;  %v526_v53 = vpack.c.bf16 %v46_v51, %v44_v50  ;;  %v528_v56 = vpack.c.bf16 %v45_v55, %v43_v54  ;;  %v778_v57 = vld [vmem:[%s905_s0] sm:$0xff]  ;;  %v786_v58 = vld [vmem:[%s905_s0 + $0x8] sm:$0xff]  ;;  %v300_v59 = vld [vmem:[%s909_s4 + $0x90] sm:$0xff]  ;;  %s607_s0 = smov [#allocation2]  }
  0x15   :  { %517 = vmatpush1.bf16.msra.mxu0 %v516_v39  ;;  %140 = vmatprep.mubr.f32.mxu0 %v606_v7  ;;  %v301_v60 = vld [vmem:[%s909_s4 + $0x98] sm:$0xff]  ;;  %v284_v62 = vld [vmem:[%s909_s4 + $0x10] sm:$0xff]  ;;  %v302_v1 = vld [vmem:[%s909_s4 + $0xa0] sm:$0xff]  ;;  %v233_v39 = vshrl.u32 %v232_v37, 7  ;;  %s443_s18 = sshll.u32 %s607_s0, 4  ;;  %s444_s18 = int_to_ptr.vmem [resolvable:$true] %s443_s18 }
  0x16   :  { %519 = vmatprep.subr.bf16.mxu0 %v518_v40  ;;  %v534_v61 = vpack.c.bf16 %v301_v60, %v300_v59  ;;  %v285_v63 = vld [vmem:[%s909_s4 + $0x18] sm:$0xff]  ;;  %v303_v2 = vld [vmem:[%s909_s4 + $0xa8] sm:$0xff]  ;;  %v286_v4 = vld [vmem:[%s909_s4 + $0x20] sm:$0xff]  ;;  %s582_s19 = scalar_lea.vmem %s444_s18, 256  ;;  %p587_p1 = scmp.lt.s32.totalorder %s444_s18, %s444_s18 }
  0x17   :  { %v536_v0 = vpack.c.bf16 %v285_v63, %v284_v62  ;;  %v538_v3 = vpack.c.bf16 %v303_v2, %v302_v1  ;;  %v287_v5 = vld [vmem:[%s909_s4 + $0x28] sm:$0xff]  ;;  %v305_v8 = vld [vmem:[%s909_s4 + $0xb8] sm:$0xff]  ;;  %v288_v10 = vld [vmem:[%s909_s4 + $0x30] sm:$0xff]  ;;  %v234_v40 = vsub.s32 0, %v233_v39  ;;  %v238_v42 = vsub.s32 1, %v233_v39  ;;  %p583_p0 = scmp.ne.s32.totalorder %s444_s18, %s582_s19  ;;  %p588_p2 = scmp.lt.s32.totalorder %s582_s19, %s582_s19 }
  0x18   :  { %455 = vmatmul.mubr.msk.f32.gmra.mrb[2].mxu0 %vm63_vm0, %v752_v46  ;;  %535 = vmatprep.subr.bf16.mxu1 %v534_v61  ;;  %v540_v6 = vpack.c.bf16 %v287_v5, %v286_v4  ;;  %v289_v11 = vld [vmem:[%s909_s4 + $0x38] sm:$0xff]  ;;  %v306_v13 = vld [vmem:[%s909_s4 + $0xc0] sm:$0xff]  ;;  %v307_v14 = vld [vmem:[%s909_s4 + $0xc8] sm:$0xff] }
  0x19   :  { %521 = vmatpush1.bf16.msra.mxu0 %v520_v45  ;;  %217 = vmatprep.mubr.f32.mxu0 %v606_v7  ;;  %v544_v12 = vpack.c.bf16 %v289_v11, %v288_v10  ;;  %v290_v15 = vld [vmem:[%s909_s4 + $0x40] sm:$0xff]  ;;  %v546_v16 = vpack.c.bf16 %v307_v14, %v306_v13  ;;  %v291_v17 = vld [vmem:[%s909_s4 + $0x48] sm:$0xff]  ;;  %v308_v18 = vld [vmem:[%s909_s4 + $0xd0] sm:$0xff]  ;;  %p589_p3 = por %p588_p2, %p587_p1 }
  0x1a   :  { %523 = vmatprep.subr.bf16.mxu0 %v522_v47  ;;  %537 = vmatpush3.bf16.msra.mxu1 %v536_v0  ;;  %v309_v19 = vld [vmem:[%s909_s4 + $0xd8] sm:$0xff]  ;;  %v548_v20 = vpack.c.bf16 %v291_v17, %v290_v15  ;;  %v292_v22 = vld [vmem:[%s909_s4 + $0x50] sm:$0xff]  ;;  %v310_v24 = vld [vmem:[%s909_s4 + $0xe0] sm:$0xff] }
  0x1b   :  { %539 = vmatprep.subr.bf16.mxu1 %v538_v3  ;;  %v550_v21 = vpack.c.bf16 %v309_v19, %v308_v18  ;;  %v293_v23 = vld [vmem:[%s909_s4 + $0x58] sm:$0xff]  ;;  %v311_v25 = vld [vmem:[%s909_s4 + $0xe8] sm:$0xff]  ;;  %v294_v28 = vld [vmem:[%s909_s4 + $0x60] sm:$0xff]  ;;  %p590_p4 = pnand %p589_p3, %p583_p0 }
  0x1c   :  { %v552_v26 = vpack.c.bf16 %v293_v23, %v292_v22  ;;  %v554_v27 = vpack.c.bf16 %v311_v25, %v310_v24  ;;  %v295_v29 = vld [vmem:[%s909_s4 + $0x68] sm:$0xff]  ;;  %v312_v30 = vld [vmem:[%s909_s4 + $0xf0] sm:$0xff]  ;;  %v313_v31 = vld [vmem:[%s909_s4 + $0xf8] sm:$0xff] }
  0x1d   :  { %525 = vmatpush1.bf16.msra.mxu0 %v524_v52  ;;  %v556_v32 = vpack.c.bf16 %v295_v29, %v294_v28  ;;  %v558_v33 = vpack.c.bf16 %v313_v31, %v312_v30  ;;  %v296_v34 = vld [vmem:[%s909_s4 + $0x70] sm:$0xff]  ;;  %v297_v35 = vld [vmem:[%s909_s4 + $0x78] sm:$0xff]  ;;  %v230_v41 = vld [vmem:[%s908_s3] sm:$0x3] }
  0x1e   :  { %527 = vmatprep.subr.bf16.mxu0 %v526_v53  ;;  %541 = vmatpush3.bf16.msra.mxu1 %v540_v6  ;;  %v560_v36 = vpack.c.bf16 %v297_v35, %v296_v34  ;;  %v235_v43 = vrot.slane %v230_v41, %v234_v40  ;;  %v239_v44 = vrot.slane %v230_v41, %v238_v42 }
  0x21   :  { %529 = vmatpush1.bf16.msra.mxu0 %v528_v56 }
  0x24   :  { %456 = vmatmul.mubr.msk.f32.vlgmr.msra.gmra.mrb[0].mxu0 %vm63_vm0, %v778_v57 }
  0x25   :  { %223 = vmatprep.mubr.f32.mxu0 %v606_v7  ;;  %v304_v7 = vld [vmem:[%s909_s4 + $0xb0] sm:$0xff] }
  0x26   :  { %v542_v9 = vpack.c.bf16 %v305_v8, %v304_v7 }
  0x28   :  { %457 = vmatmul.mubr.msk.f32.gmra.mrb[2].mxu0 %vm63_vm0, %v786_v58  ;;  %543 = vmatprep.subr.bf16.mxu1 %v542_v9 }
  0x29   :  { %545 = vmatpush3.bf16.msra.mxu1 %v544_v12 }
  0x2a   :  { %547 = vmatprep.subr.bf16.mxu1 %v546_v16 }
  0x2d   :  { %549 = vmatpush3.bf16.msra.mxu1 %v548_v20 }
  0x2e   :  { %551 = vmatprep.subr.bf16.mxu1 %v550_v21 }
  0x31   :  { %553 = vmatpush3.bf16.msra.mxu1 %v552_v26 }
  0x32   :  { %555 = vmatprep.subr.bf16.mxu1 %v554_v27 }
  0x35   :  { %557 = vmatpush3.bf16.msra.mxu1 %v556_v32 }
  0x36   :  { %559 = vmatprep.subr.bf16.mxu1 %v558_v33 }
  0x39   :  { %561 = vmatpush3.bf16.msra.mxu1 %v560_v36 }
  0xf7   :  { %v219_v45 = vpop.f32.mrb[0].mxu0 }
  0xf8   :  { %v242_v47 = vadd.f32 %v235_v43, %v219_v45  ;;  %v221_v48 = vpop.f32.mrb[1].mxu0 }
  0xf9   :  { %v243_v49 = vadd.f32 %v239_v44, %v221_v48 }
  0xfa   :  { %v250_v50 = vmul.f32 0.044715, %v242_v47  ;;  %v246_v17 = vmul.f32 0.5, %v242_v47 }
  0xfb   :  { %v225_v51 = vpop.f32.mrb[2].mxu0  ;;  %v251_v52 = vmul.f32 0.044715, %v243_v49  ;;  %v247_v15 = vmul.f32 0.5, %v243_v49 }
  0xfc   :  { %v254_v53 = vmul.f32 %v250_v50, %v242_v47  ;;  %v244_v54 = vadd.f32 %v235_v43, %v225_v51  ;;  %v227_v55 = vpop.f32.mrb[3].mxu0 }
  0xfd   :  { %v245_v56 = vadd.f32 %v239_v44, %v227_v55  ;;  %v255_v59 = vmul.f32 %v251_v52, %v243_v49  ;;  %v458_v55 = vld [vmem:[%s910_s5] ss:$0 sm:$0xff] }
  0xfe   :  { %v252_v60 = vmul.f32 0.044715, %v244_v54  ;;  %v258_v61 = vmul.f32 %v254_v53, %v242_v47  ;;  %v248_v25 = vmul.f32 0.5, %v244_v54 }
  0xff   :  { %v253_v62 = vmul.f32 0.044715, %v245_v56  ;;  %v259_v63 = vmul.f32 %v255_v59, %v243_v49  ;;  %v249_v23 = vmul.f32 0.5, %v245_v56  ;;  %v459_v59 = vld [vmem:[%s911_s6] ss:$0 sm:$0xff] }
 0x100   :  { %v256_v0 = vmul.f32 %v252_v60, %v244_v54  ;;  %v262_v1 = vadd.f32 %v258_v61, %v242_v47 }
 0x101   :  { %v257_v2 = vmul.f32 %v253_v62, %v245_v56  ;;  %v263_v3 = vadd.f32 %v259_v63, %v243_v49 }
 0x102   :  { %v266_v4 = vmul.f32 0.7978846, %v262_v1  ;;  %v260_v5 = vmul.f32 %v256_v0, %v244_v54 }
 0x103   :  { %v267_v6 = vmul.f32 0.7978846, %v263_v3  ;;  %v261_v7 = vmul.f32 %v257_v2, %v245_v56 }
 0x104   :  { %570 = vtanh.f32 %v266_v4  ;;  %v264_v8 = vadd.f32 %v260_v5, %v244_v54 }
 0x105   :  { %572 = vtanh.f32 %v267_v6  ;;  %v265_v9 = vadd.f32 %v261_v7, %v245_v56 }
 0x106   :  { %v268_v10 = vmul.f32 0.7978846, %v264_v8 }
 0x107   :  { %v269_v11 = vmul.f32 0.7978846, %v265_v9 }
 0x108   :  { %574 = vtanh.f32 %v268_v10 }
 0x109   :  { %576 = vtanh.f32 %v269_v11 }
 0x10e   :  { %v571_v12 = vpop.eup %570 }
 0x10f   :  { %v573_v13 = vpop.eup %572  ;;  %v274_v14 = vadd.f32 1.0, %v571_v12 }
 0x110   :  { %v275_v16 = vadd.f32 1.0, %v573_v13 }
 0x111   :  { %v278_v21 = vmul.f32 %v274_v14, %v246_v17 }
 0x112   :  { %v575_v18 = vpop.eup %574  ;;  %v279_v19 = vmul.f32 %v275_v16, %v247_v15 }
 0x113   :  { %v577_v20 = vpop.eup %576  ;;  %v276_v22 = vadd.f32 1.0, %v575_v18 }
 0x114   :  { %378 = vmatprep.mubr.f32.mxu1 %v279_v19  ;;  %v277_v24 = vadd.f32 1.0, %v577_v20 }
 0x115   :  { %379 = vmatmul.mubr.f32.vlgmr.msra.gmra.mrb[0].mxu1 %v278_v21  ;;  %v280_v27 = vmul.f32 %v276_v22, %v248_v25 }
 0x116   :  { %v281_v26 = vmul.f32 %v277_v24, %v249_v23 }
 0x118   :  { %383 = vmatprep.mubr.f32.mxu1 %v281_v26 }
 0x119   :  { %384 = vmatmul.mubr.f32.gmra.mrb[2].mxu1 %v280_v27 }
 0x1e8   :  { %v492_v28 = vpop.f32.mrb[0].mxu1 }
 0x1e9   :  { %v493_v29 = vpop.f32.mrb[1].mxu1 }
 0x1ea   :  { %v494_v30 = vadd.f32 %v493_v29, %v492_v28 }
 0x1ec   :  { %v381_v31 = vadd.f32 %v494_v30, %v778_v57  ;;  %v495_v32 = vpop.f32.mrb[2].mxu1 }
 0x1ed   :  { %v496_v33 = vpop.f32.mrb[3].mxu1 }
 0x1ee   :  { %v497_v34 = vadd.f32 %v496_v33, %v495_v32  ;;  %v389_v35 = vadd.f32 %v381_v31, %v732_v38 }
 0x1f0   :  { %v386_v36 = vadd.f32 %v497_v34, %v786_v58  ;;  %v391_v37 = vsel %vm63_vm0, %v389_v35, 0.0 }
 0x1f1   :  { %392 = vadd.xlane.f32.xlu0 %v391_v37 }
 0x1f2   :  { %v390_v39 = vadd.f32 %v386_v36, %v752_v46 }
 0x1f4   :  { %v394_v40 = vsel %vm63_vm0, %v390_v39, 0.0 }
 0x1f5   :  { %395 = vadd.xlane.f32.xlu0 %v394_v40 }
 0x27e   :  { %v393_v41 = vpop.xlane.xlu0 %392 }
 0x27f   :  { %v398_v42 = vmul.f32 0.015625, %v393_v41 }
 0x281   :  { %v400_v43 = vsub.f32 %v389_v35, %v398_v42 }
 0x282   :  { %v396_v44 = vpop.xlane.xlu0 %395 }
 0x283   :  { %v399_v57 = vmul.f32 0.015625, %v396_v44  ;;  %v402_v45 = vmul.f32 %v400_v43, %v400_v43 }
 0x285   :  { %v401_v47 = vsub.f32 %v390_v39, %v399_v57  ;;  %v404_v48 = vsel %vm63_vm0, %v402_v45, 0.0 }
 0x286   :  { %405 = vadd.xlane.f32.xlu1 %v404_v48 }
 0x287   :  { %v403_v38 = vmul.f32 %v401_v47, %v401_v47 }
 0x289   :  { %v407_v58 = vsel %vm63_vm0, %v403_v38, 0.0 }
 0x28a   :  { %408 = vadd.xlane.f32.xlu1 %v407_v58 }
 0x313   :  { %v406_v49 = vpop.xlane.xlu1 %405 }
 0x314   :  { %v410_v50 = vmul.f32 0.015625, %v406_v49 }
 0x316   :  { %v412_v46 = vadd.f32 1e-06, %v410_v50 }
 0x317   :  { %v409_v51 = vpop.xlane.xlu1 %408 }
 0x318   :  { %578 = vrsqrt.f32 %v412_v46  ;;  %v411_v52 = vmul.f32 0.015625, %v409_v51 }
 0x31a   :  { %v413_v53 = vadd.f32 1e-06, %v411_v52 }
 0x31c   :  { %580 = vrsqrt.f32 %v413_v53 }
 0x322   :  { %v579_v54 = vpop.eup %578 }
 0x323   :  { %v416_v56 = vmul.f32 %v579_v54, %v400_v43 }
 0x325   :  { %v425_v60 = vmul.f32 %v458_v55, %v416_v56 }
 0x326   :  { %v581_v61 = vpop.eup %580 }
 0x327   :  { %v417_v62 = vmul.f32 %v581_v61, %v401_v47  ;;  %v434_v63 = vadd.f32 %v459_v59, %v425_v60 }
 0x329   :  { %v426_v0 = vmul.f32 %v458_v55, %v417_v62  ;;  %436 = vst.msk [vmem:[#allocation2] sm:$0xff] %vm63_vm0, %v434_v63 }
 0x32b   :  { %v435_v1 = vadd.f32 %v459_v59, %v426_v0 }
 0x32d   :  { %437 = vst.msk [vmem:[#allocation2 + $0x8] sm:$0xff] %vm63_vm0, %v435_v1 }
 0x32e   :  { %593 = shalt.err (!%p590_p4)
}
 0x32f   :  { %s594_s20 = scalar_lea.hbm %s912_s7, 256 }
 0x330   :  { %p595_p5 = scmp.ne.s32.totalorder %s912_s7, %s594_s20  ;;  %p598_p6 = scmp.lt.u32.totalorder %s594_s20, %s912_s7 }
 0x332   :  { %p600_p7 = pnand %p598_p6, %p595_p5 }
 0x334   :  { %603 = shalt.err (!%p600_p7)
}
 0x335   :  { %s608_s25 = smov 128   ;;  %s609_s26 = smov 8  }
 0x336   :  { %449 = dma.vmem_to_hbm [thread:$0]  %s444_s18, 256, %s912_s7, [#allocation3], %s608_s25, %s608_s25, %s609_s26  }
 0x337   :  { %604 = dma.done.wait [#allocation3], 256  }
 0x338   :  { %605 = vsyncadd [#allocation3], 4294967040 }
 0x339   :  { %453 = vsyncpa [#allocation3], 1 }

// kernel: decoder_layer_forward.4
= control target key start
LH: loop header
LB: loop body
LE: loop exit
PB: predicated region body
PF: predicated region fallthrough
CT: control target
= control target key end

     0   :  { %s6978_s0 = inlined_call_operand.vmem [shape: f32[2,8,64], index: 0, kind: input, shape index: {}]   ;;  %s6979_s1 = inlined_call_operand.vmem [shape: f32[2,8,64], index: 1, kind: input, shape index: {}]   ;;  %s6980_s2 = inlined_call_operand.vmem [shape: f32[2,8,8], index: 2, kind: input, shape index: {}]   ;;  %s6981_s3 = inlined_call_operand.vmem [shape: f32[2,8,8], index: 3, kind: input, shape index: {}]   ;;  %s6982_s4 = inlined_call_operand.vmem [shape: f32[1,64], index: 4, kind: input, shape index: {}]   ;;  %s6983_s5 = inlined_call_operand.vmem [shape: f32[1,64], index: 5, kind: input, shape index: {}]   ;;  %s6984_s6 = inlined_call_operand.vmem [shape: f32[64,192], index: 6, kind: input, shape index: {}]   ;;  %s6985_s7 = inlined_call_operand.vmem [shape: f32[1,192], index: 7, kind: input, shape index: {}]   ;;  %s6986_s8 = inlined_call_operand.vmem [shape: f32[64,64], index: 8, kind: input, shape index: {}]   ;;  %s6987_s9 = inlined_call_operand.vmem [shape: f32[1,64], index: 9, kind: input, shape index: {}]   ;;  %s6988_s10 = inlined_call_operand.vmem [shape: f32[1,64], index: 10, kind: input, shape index: {}]   ;;  %s6989_s11 = inlined_call_operand.vmem [shape: f32[1,64], index: 11, kind: input, shape index: {}]   ;;  %s6990_s12 = inlined_call_operand.vmem [shape: f32[64,64], index: 12, kind: input, shape index: {}]   ;;  %s6991_s13 = inlined_call_operand.vmem [shape: f32[1,64], index: 13, kind: input, shape index: {}]   ;;  %s6992_s14 = inlined_call_operand.vmem [shape: f32[64,128], index: 14, kind: input, shape index: {}]   ;;  %s6993_s15 = inlined_call_operand.vmem [shape: f32[1,128], index: 15, kind: input, shape index: {}]   ;;  %s6994_s16 = inlined_call_operand.vmem [shape: f32[64,64], index: 16, kind: input, shape index: {}]   ;;  %s6995_s17 = inlined_call_operand.vmem [shape: f32[1,64], index: 17, kind: input, shape index: {}]   ;;  %s6996_s18 = inlined_call_operand.vmem [shape: f32[1,64], index: 18, kind: input, shape index: {}]   ;;  %s6997_s19 = inlined_call_operand.vmem [shape: f32[1,64], index: 19, kind: input, shape index: {}]   ;;  %s6998_s20 = inlined_call_operand.vmem [shape: f32[64,256], index: 20, kind: input, shape index: {}]   ;;  %s6999_s21 = inlined_call_operand.vmem [shape: f32[1,256], index: 21, kind: input, shape index: {}]   ;;  %s7000_s22 = inlined_call_operand.vmem [shape: f32[256,64], index: 22, kind: input, shape index: {}]   ;;  %s7001_s23 = inlined_call_operand.vmem [shape: f32[1,64], index: 23, kind: input, shape index: {}]   ;;  %s7002_s24 = inlined_call_operand.vmem [shape: f32[2,8,64], index: 24, kind: output, shape index: {}]  }
   0x1   :  { %7028 = sst [smem:[#allocation2_spill]] %s6978_s0 }
   0x2   :  { %7029 = sst [smem:[#allocation3_spill]] %s6979_s1 }
   0x3   :  { %7030 = sst [smem:[#allocation4_spill]] %s6980_s2 }
   0x4   :  { %7031 = sst [smem:[#allocation5_spill]] %s6981_s3 }
   0x5   :  { %7032 = sst [smem:[#allocation6_spill]] %s6982_s4 }
   0x6   :  { %7033 = sst [smem:[#allocation7_spill]] %s6983_s5  ;;  %s6214_s5 = smov 0  }
   0x7   :  { %7034 = sst [smem:[#allocation8_spill]] %s6984_s6 }
   0x8   :  { %7035 = sst [smem:[#allocation9_spill]] %s6985_s7 }
   0x9   :  { %7036 = sst [smem:[#allocation10_spill]] %s6986_s8 }
   0xa LB: > { %s5357_s26 = sadd.s32 4294967295, %s6069_s5   ;;  %p5361_p0 = scmp.ge.s32.totalorder %s6069_s5, 1  ;;  %s6069_s5 = sphi %s6214_s5, %s34_s5  }
   0xb   : > { %p688_p1 = scmp.lt.s32.totalorder %s6069_s5, 3 }
   0xd   : > { %p689_p2 = pnand %p5361_p0, %p688_p1 }
   0xe   : > { %p764_p3 = scmp.lt.s32.totalorder (!%p689_p2), %s5357_s26, 1  ;;  %vm788_vm0 = vcmask (!%p689_p2), 523264   ;;  %s7037_s2 = sld [smem:[#allocation2_spill]] (!%p689_p2)  ;;  %v6071_v20 = vmov (!%p689_p2), 0.0   ;;  %v837_v41 = vlaneseq (!%p689_p2)  ;;  %vm6072_vm1 = vmmov (!%p689_p2), 0  }
   0xf   : > { %692 = sbr.rel (%p689_p2) target bundleno = 10840 (0x2a58), region = 116  ;;  %s7038_s30 = sld [smem:[#allocation8_spill]] (!%p689_p2)  ;;  %914 = vmatprep.mubr.f32.mxu0 (!%p689_p2), %v6071_v20  ;;  %5607 = vmatprep.subr.mxu1 (!%p689_p2), %v6071_v20  ;;  %vm924_vm2 = vcmask (!%p689_p2), 64512  }
  0x10   : > { %s7040_s7 = sld [smem:[#allocation7_spill]] (!%p689_p2)  ;;  %v6292_v42 = vshrl.u32 (!%p689_p2), %v837_v41, 7  ;;  %5609 = vmatprep.mubr.msk.f32.mxu1 (!%p689_p2), %vm6072_vm1, %v6071_v20  ;;  %s7041_s8 = sld [smem:[#allocation9_spill]] (!%p689_p2) }
  0x11   : > { %s7024_s4 = smov (!%p689_p2), 64   ;;  %s7021_s1 = smov (!%p689_p2), 56  }
  0x12   : > { %v839_v43 = vsub.s32 (!%p689_p2), 0, %v6292_v42  ;;  %v843_v49 = vsub.s32 (!%p689_p2), 1, %v6292_v42  ;;  %s7018_s0 = smov (!%p689_p2), 48   ;;  %s7015_s28 = smov (!%p689_p2), 96  }
  0x13   : > { %s7006_s6 = smov (!%p689_p2), 32   ;;  %s7008_s3 = smov (!%p689_p2), 88  }
  0x14   : > { %s7005_s25 = smov (!%p689_p2), 24  }
  0x15   : > { %v820_v7 = vld [vmem:[%s7038_s30 + $0x8] sm:$0xff] (!%p689_p2)  ;;  %v822_v8 = vld [vmem:[%s7038_s30 + $0x18] sm:$0xff] (!%p689_p2)  ;;  %v819_v10 = vld [vmem:[%s7038_s30] sm:$0xff] (!%p689_p2) }
  0x16   : > { %s7062_s26 = smov (!%p764_p3, %s5357_s26), 1  ;;  %v5875_v9 = vpack.c.bf16 %v822_v8, %v820_v7  ;;  %v821_v11 = vld [vmem:[%s7038_s30 + $0x10] sm:$0xff]  ;;  %v824_v13 = vld [vmem:[%s7038_s30 + $0x28] sm:$0xff]  ;;  %v826_v14 = vld [vmem:[%s7038_s30 + $0x38] sm:$0xff] }
  0x17   : > { %s6222_s27 = sshll.u32 %s7062_s26, 3  ;;  %v5877_v12 = vpack.c.bf16 %v821_v11, %v819_v10  ;;  %v823_v15 = vld [vmem:[%s7038_s30 + $0x20] sm:$0xff]  ;;  %v5879_v16 = vpack.c.bf16 %v826_v14, %v824_v13  ;;  %v825_v17 = vld [vmem:[%s7038_s30 + $0x30] sm:$0xff]  ;;  %v828_v18 = vld [vmem:[%s7038_s30 + $0x48] sm:$0xff]  ;;  %s7025_s26 = smov 120  }
  0x18   : > { %s767_s29 = scalar_lea.vmem %s7037_s2, %s6222_s27  ;;  %5876 = vmatprep.subr.bf16.mxu0 %v5875_v9  ;;  %v830_v19 = vld [vmem:[%s7038_s30 + $0x58] sm:$0xff]  ;;  %v5881_v21 = vpack.c.bf16 %v825_v17, %v823_v15  ;;  %v827_v23 = vld [vmem:[%s7038_s30 + $0x40] sm:$0xff]  ;;  %v829_v24 = vld [vmem:[%s7038_s30 + $0x50] sm:$0xff]  ;;  %s7039_s2 = sld [smem:[#allocation6_spill]] }
  0x19   : > { %v6228_v0 = vld [vmem:[%s767_s29] sm:$0xff]  ;;  %5878 = vmatpush1.bf16.msra.mxu0 %v5877_v12  ;;  %v5883_v22 = vpack.c.bf16 %v830_v19, %v828_v18  ;;  %v832_v25 = vld [vmem:[%s7038_s30 + $0x68] sm:$0xff]  ;;  %v834_v26 = vld [vmem:[%s7038_s30 + $0x78] sm:$0xff]  ;;  %v5885_v27 = vpack.c.bf16 %v829_v24, %v827_v23 }
  0x1a   : > { %v789_v1 = vsel %vm788_vm0, %v6228_v0, 0.0  ;;  %5880 = vmatprep.subr.bf16.mxu0 %v5879_v16  ;;  %v5887_v28 = vpack.c.bf16 %v834_v26, %v832_v25  ;;  %v831_v29 = vld [vmem:[%s7038_s30 + $0x60] sm:$0xff]  ;;  %v833_v30 = vld [vmem:[%s7038_s30 + $0x70] sm:$0xff] }
  0x1b   : > { %790 = vadd.xlane.f32.xlu0 %v789_v1  ;;  %v5889_v31 = vpack.c.bf16 %v833_v30, %v831_v29  ;;  %v5368_v38 = vld [vmem:[%s7040_s7] ss:$0 sm:$0xff]  ;;  %s7022_s7 = smov 112  }
  0x1c   : > { %v835_v44 = vld [vmem:[%s7041_s8] sm:$0x3]  ;;  %s7043_s8 = sld [smem:[#allocation10_spill]] }
  0x1d   : > { %5882 = vmatpush1.bf16.msra.mxu0 %v5881_v21  ;;  %v840_v45 = vrot.slane %v835_v44, %v839_v43  ;;  %v844_v50 = vrot.slane %v835_v44, %v843_v49 }
  0x1e   : > { %5884 = vmatprep.subr.bf16.mxu0 %v5883_v22  ;;  %v5367_v36 = vld [vmem:[%s7039_s2] ss:$0 sm:$0xff]  ;;  %s7042_s2 = sld [smem:[#allocation4_spill]] }
  0x21   : > { %5886 = vmatpush1.bf16.msra.mxu0 %v5885_v27 }
  0x22   : > { %5888 = vmatprep.subr.bf16.mxu0 %v5887_v28  ;;  %v1085_v17 = vld [vmem:[%s7043_s8] sm:$0xff]  ;;  %v1254_v22 = vld [vmem:[%s7043_s8 + $0x8] sm:$0xff] }
  0x24   : > { %s775_s29 = scalar_lea.vmem %s7042_s2, %s6222_s27  ;;  %s7019_s2 = smov 104  }
  0x25   : > { %5890 = vmatpush1.bf16.msra.mxu0 %v5889_v31  ;;  %v6334_v56 = vld [vmem:[%s775_s29] sm:$0xff]  ;;  %s7017_s29 = smov 40  }
  0x26   : > { %5597 = vmatprep.subr.mxu0 %v6071_v20 }
  0xa8   : > { %v791_v2 = vpop.xlane.xlu0 %790 }
  0xa9   : > { %v793_v3 = vmul.f32 0.015625, %v791_v2 }
  0xab   : > { %v794_v4 = vsub.f32 %v6228_v0, %v793_v3 }
  0xad   : > { %v795_v5 = vmul.f32 %v794_v4, %v794_v4 }
  0xaf   : > { %v796_v6 = vsel %vm788_vm0, %v795_v5, 0.0 }
  0xb0   : > { %797 = vadd.xlane.f32.xlu0 %v796_v6 }
 0x13d   : > { %v798_v32 = vpop.xlane.xlu0 %797 }
 0x13e   : > { %v799_v33 = vmul.f32 0.015625, %v798_v32 }
 0x140   : > { %v800_v34 = vadd.f32 1e-06, %v799_v33 }
 0x142   : > { %5989 = vrsqrt.f32 %v800_v34 }
 0x14c   : > { %v5990_v35 = vpop.eup %5989 }
 0x14d   : > { %v802_v37 = vmul.f32 %v5990_v35, %v794_v4 }
 0x14f   : > { %v810_v39 = vmul.f32 %v5367_v36, %v802_v37 }
 0x151   : > { %v818_v40 = vadd.f32 %v5368_v38, %v810_v39 }
 0x153   : > { %5369 = vmatmul.mubr.msk.f32.vlgmr.msra.gmra.mrb[0].mxu0 %vm788_vm0, %v818_v40 }
 0x154   : > { %5599 = vmatprep.mubr.msk.f32.mxu0 %vm6072_vm1, %v6071_v20 }
 0x226   : > { %v916_v46 = vpop.f32.mrb[0].mxu0 }
 0x227   : > { %v6304_v47 = vadd.f32 %v916_v46, %v840_v45  ;;  %v918_v48 = vpop.f32.mrb[1].mxu0 }
 0x228   : > { %v6319_v53 = vadd.f32 %v918_v48, %v844_v50 }
 0x229   : > { %922 = vrot.lane.b32.xlu0 %v6304_v47, %s7024_s4  ;;  %1088 = vrot.lane.b32.xlu1 %v6304_v47, %s7021_s1  ;;  %s7049_s1 = smov 56  }
 0x22d   : > { %1086 = vrot.lane.b32.xlu1 %v6304_v47, %s7025_s26 }
 0x29b   : > { %v923_v51 = vpop.permute.xlu0 %922  ;;  %v1089_v52 = vpop.permute.xlu1 %1088 }
 0x29c   : > { %5598 = vmatpush3.xpose.msk.msra.mxu0 %vm924_vm2, %v923_v51  ;;  %5608 = vmatpush3.xpose.msk.msra.mxu1 %vm924_vm2, %v1089_v52 }
 0x29d   : > { %5602 = vmatprep.subr.mxu0 %v6071_v20  ;;  %5612 = vmatprep.subr.mxu1 %v6071_v20 }
 0x29f   : > { %5600 = vmatmul.mubr.msk.f32.vlgmr.msra.gmra.mrb[2].mxu0 %vm924_vm2, %v6304_v47  ;;  %v1087_v54 = vpop.permute.xlu1 %1086 }
 0x2a0   : > { %5603 = vmatpush3.msra.mxu0 %v6319_v53  ;;  %5610 = vmatmul.mubr.msk.f32.vlgmr.msra.gmra.mrb[0].mxu1 %vm924_vm2, %v1087_v54 }
 0x2a1   : > { %5614 = vmatprep.mubr.msk.f32.mxu1 %vm6072_vm1, %v6071_v20  ;;  %5604 = vmatprep.mubr.msk.f32.mxu0 %vm6072_vm1, %v6071_v20 }
 0x2a2   : > { %5617 = vmatprep.subr.mxu0 %v6071_v20 }
 0x372   : > { %v995_v55 = vpop.f32.mrb[2].mxu0 }
 0x373   : > { %v5601_v57 = vpop.f32.mrb[3].mxu0  ;;  %v1160_v58 = vpop.f32.mrb[0].mxu1  ;;  %v999_v4 = vmul.f32 0.35355338, %v995_v55  ;;  %v1568_v55 = vld [vmem:[%s7043_s8 + $0x10] sm:$0xff] }
 0x374   : > { %v1164_v59 = vmul.f32 0.35355338, %v1160_v58  ;;  %v5611_v60 = vpop.f32.mrb[1].mxu1 }
 0x375   : > { %v1000_v7 = vadd.f32 %v999_v4, %v6334_v56 }
 0x376   : > { %v1165_v61 = vadd.f32 %v1164_v59, %v6334_v56 }
 0x377   : > { %v1001_v8 = vsel %vm924_vm2, %v1000_v7, -inf }
 0x378   : > { %v1166_v62 = vsel %vm924_vm2, %v1165_v61, -inf }
 0x379   : > { %1167 = vmax.xlane.f32.xlu1 %v1166_v62 }
 0x38a   : > { %1178 = vrot.lane.b32.xlu1 %v6319_v53, %s7025_s26  ;;  %s7047_s26 = smov 64  }
 0x406   : > { %v1168_v63 = vpop.xlane.xlu1 %1167 }
 0x407   : > { %v1169_v1 = vsub.f32 %v1165_v61, %v1168_v63 }
 0x409   : > { %v1170_v2 = vmul.f32 1.442695, %v1169_v1 }
 0x40a   : > { %v1179_v3 = vpop.permute.xlu1 %1178 }
 0x40b   : > { %5991 = vpow2.f32 %v1170_v2  ;;  %5613 = vmatpush3.msra.mxu1 %v1179_v3 }
 0x40c   : > { %5622 = vmatprep.subr.mxu1 %v6071_v20 }
 0x415   : > { %v5992_v5 = vpop.eup %5991 }
 0x416   : > { %v1172_v6 = vsel %vm924_vm2, %v5992_v5, 0.0 }
 0x417   : > { %1173 = vadd.xlane.f32.xlu0 %v1172_v6 }
 0x41b   : > { %1002 = vmax.xlane.f32.xlu0 %v1001_v8 }
 0x431   : > { %1403 = vrot.lane.b32.xlu0 %v6304_v47, %s7018_s0 }
 0x435   : > { %1401 = vrot.lane.b32.xlu0 %v6304_v47, %s7022_s7 }
 0x4a4   : > { %v1174_v9 = vpop.xlane.xlu0 %1173 }
 0x4a5   : > { %5993 = vrcp.f32 %v1174_v9 }
 0x4a8   : > { %v1003_v10 = vpop.xlane.xlu0 %1002 }
 0x4a9   : > { %v1004_v11 = vsub.f32 %v1000_v7, %v1003_v10 }
 0x4ab   : > { %v1005_v12 = vmul.f32 1.442695, %v1004_v11 }
 0x4ac   : > { %v1404_v23 = vpop.permute.xlu0 %1403 }
 0x4ad   : > { %5995 = vpow2.f32 %v1005_v12 }
 0x4af   : > { %v5994_v13 = vpop.eup %5993 }
 0x4b0   : > { %v1176_v14 = vmul.f32 %v5994_v13, %v5992_v5  ;;  %v1402_v26 = vpop.permute.xlu0 %1401 }
 0x4b2   : > { %5615 = vmatmul.mubr.msk.f32.vlgmr.msra.gmra.mrb[2].mxu1 %vm924_vm2, %v1176_v14 }
 0x4b3   : > { %5624 = vmatprep.mubr.msk.f32.mxu1 %vm6072_vm1, %v6071_v20  ;;  %5623 = vmatpush3.msra.mxu1 %v1085_v17 }
 0x4b4   : > { %5632 = vmatprep.subr.mxu1 %v6071_v20 }
 0x4b7   : > { %v5996_v15 = vpop.eup %5995 }
 0x4b8   : > { %v1007_v16 = vsel %vm924_vm2, %v5996_v15, 0.0 }
 0x4b9   : > { %1008 = vadd.xlane.f32.xlu1 %v1007_v16 }
 0x4ca   : > { %1492 = vrot.lane.b32.xlu1 %v6319_v53, %s7022_s7  ;;  %s7044_s7 = sld [smem:[#allocation3_spill]] }
 0x546   : > { %v1009_v18 = vpop.xlane.xlu1 %1008 }
 0x547   : > { %5997 = vrcp.f32 %v1009_v18 }
 0x54a   : > { %v1493_v28 = vpop.permute.xlu1 %1492 }
 0x551   : > { %v5998_v19 = vpop.eup %5997 }
 0x552   : > { %v1011_v21 = vmul.f32 %v5998_v19, %v5996_v15  ;;  %v1810_v15 = vld [vmem:[%s7043_s8 + $0x18] sm:$0xff] }
 0x554   : > { %5605 = vmatmul.mubr.msk.f32.vlgmr.msra.gmra.mrb[4].mxu0 %vm924_vm2, %v1011_v21 }
 0x555   : > { %5618 = vmatpush3.msra.mxu0 %v1254_v22  ;;  %5619 = vmatprep.mubr.msk.f32.mxu0 %vm6072_vm1, %v6071_v20 }
 0x556   : > { %5627 = vmatprep.subr.mxu0 %v6071_v20 }
 0x585   : > { %v1250_v24 = vpop.f32.mrb[2].mxu1 }
 0x586   : > { %v5616_v25 = vpop.f32.mrb[3].mxu1  ;;  %5620 = vmatmul.mubr.msk.f32.vlgmr.msra.gmra.mrb[6].mxu0 %vm924_vm2, %v1250_v24 }
 0x587   : > { %5628 = vmatpush3.xpose.msk.msra.mxu0 %vm924_vm2, %v1404_v23  ;;  %5629 = vmatprep.mubr.msk.f32.mxu0 %vm6072_vm1, %v6071_v20 }
 0x588   : > { %5637 = vmatprep.subr.mxu0 %v6071_v20 }
 0x58a   : > { %5630 = vmatmul.mubr.msk.f32.vlgmr.msra.gmra.mrb[8].mxu0 %vm924_vm2, %v1402_v26 }
 0x58b   : > { %5639 = vmatprep.mubr.msk.f32.mxu0 %vm6072_vm1, %v6071_v20  ;;  %5638 = vmatpush3.msra.mxu0 %v1568_v55 }
 0x58c   : > { %5647 = vmatprep.subr.mxu0 %v6071_v20 }
 0x627   : > { %v1081_v27 = vpop.f32.mrb[4].mxu0 }
 0x628   : > { %v5606_v29 = vpop.f32.mrb[5].mxu0  ;;  %5625 = vmatmul.mubr.msk.f32.vlgmr.msra.gmra.mrb[4].mxu1 %vm924_vm2, %v1081_v27 }
 0x629   : > { %5633 = vmatpush3.msra.mxu1 %v1493_v28  ;;  %5634 = vmatprep.mubr.msk.f32.mxu1 %vm6072_vm1, %v6071_v20 }
 0x62a   : > { %5642 = vmatprep.subr.mxu1 %v6071_v20 }
 0x659   : > { %v1324_v30 = vpop.f32.mrb[6].mxu0 }
 0x65a   : > { %v5621_v31 = vpop.f32.mrb[7].mxu0 }
 0x65d   : > { %v1475_v32 = vpop.f32.mrb[8].mxu0 }
 0x65e   : > { %v1479_v33 = vmul.f32 0.35355338, %v1475_v32  ;;  %v5631_v34 = vpop.f32.mrb[9].mxu0 }
 0x660   : > { %v1480_v35 = vadd.f32 %v1479_v33, %v6334_v56 }
 0x662   : > { %v1481_v36 = vsel %vm924_vm2, %v1480_v35, -inf }
 0x663   : > { %1482 = vmax.xlane.f32.xlu0 %v1481_v36 }
 0x679   : > { %1643 = vrot.lane.b32.xlu0 %v6304_v47, %s7019_s2 }
 0x6f0   : > { %v1483_v37 = vpop.xlane.xlu0 %1482 }
 0x6f1   : > { %v1484_v38 = vsub.f32 %v1480_v35, %v1483_v37 }
 0x6f3   : > { %v1485_v39 = vmul.f32 1.442695, %v1484_v38  ;;  %v2052_v38 = vld [vmem:[%s7043_s8 + $0x20] sm:$0xff] }
 0x6f4   : > { %v1644_v54 = vpop.permute.xlu0 %1643 }
 0x6f5   : > { %5999 = vpow2.f32 %v1485_v39 }
 0x6fb   : > { %v1397_v40 = vpop.f32.mrb[4].mxu1 }
 0x6fc   : > { %v1398_v41 = vadd.f32 %v1397_v40, %v1324_v30  ;;  %v5626_v44 = vpop.f32.mrb[5].mxu1 }
 0x6ff   : > { %v6000_v45 = vpop.eup %5999 }
 0x700   : > { %v1487_v46 = vsel %vm924_vm2, %v6000_v45, 0.0 }
 0x701   : > { %1488 = vadd.xlane.f32.xlu1 %v1487_v46 }
 0x712   : > { %1645 = vrot.lane.b32.xlu1 %v6304_v47, %s7017_s29  ;;  %s7046_s29 = sld [smem:[#allocation5_spill]] }
 0x718   : > { %s779_s4 = scalar_lea.vmem %s7046_s29, %s6222_s27 }
 0x78e   : > { %v1489_v48 = vpop.xlane.xlu1 %1488 }
 0x78f   : > { %6001 = vrcp.f32 %v1489_v48 }
 0x792   : > { %v1646_v52 = vpop.permute.xlu1 %1645 }
 0x799   : > { %v6002_v50 = vpop.eup %6001 }
 0x79a   : > { %v1491_v51 = vmul.f32 %v6002_v50, %v6000_v45 }
 0x79c   : > { %5635 = vmatmul.mubr.msk.f32.vlgmr.msra.gmra.mrb[6].mxu1 %vm924_vm2, %v1491_v51 }
 0x79d   : > { %5643 = vmatpush3.xpose.msk.msra.mxu1 %vm924_vm2, %v1646_v52  ;;  %5644 = vmatprep.mubr.msk.f32.mxu1 %vm6072_vm1, %v6071_v20 }
 0x79e   : > { %5652 = vmatprep.subr.mxu1 %v6071_v20 }
 0x7a0   : > { %5645 = vmatmul.mubr.msk.f32.vlgmr.msra.gmra.mrb[8].mxu1 %vm924_vm2, %v1644_v54 }
 0x7a1   : > { %5654 = vmatprep.mubr.msk.f32.mxu1 %vm6072_vm1, %v6071_v20  ;;  %5653 = vmatpush3.msra.mxu1 %v1810_v15 }
 0x7a2   : > { %5662 = vmatprep.subr.mxu1 %v6071_v20 }
 0x86f   : > { %v1564_v57 = vpop.f32.mrb[6].mxu1 }
 0x870   : > { %v5636_v58 = vpop.f32.mrb[7].mxu1  ;;  %5640 = vmatmul.mubr.msk.f32.vlgmr.msra.gmra.mrb[10].mxu0 %vm924_vm2, %v1564_v57 }
 0x871   : > { %5649 = vmatprep.mubr.msk.f32.mxu0 %vm6072_vm1, %v6071_v20 }
 0x873   : > { %v1717_v59 = vpop.f32.mrb[8].mxu1 }
 0x874   : > { %v1721_v60 = vmul.f32 0.35355338, %v1717_v59  ;;  %v5646_v61 = vpop.f32.mrb[9].mxu1 }
 0x876   : > { %v1722_v62 = vadd.f32 %v1721_v60, %v6334_v56 }
 0x878   : > { %v1723_v63 = vsel %vm924_vm2, %v1722_v62, -inf }
 0x879   : > { %1724 = vmax.xlane.f32.xlu1 %v1723_v63 }
 0x88a   : > { %1734 = vrot.lane.b32.xlu1 %v6319_v53, %s7019_s2  ;;  %s7054_s2 = smov 88  }
 0x88e   : > { %1885 = vrot.lane.b32.xlu1 %v6304_v47, %s7015_s28 }
 0x906   : > { %v1725_v1 = vpop.xlane.xlu1 %1724 }
 0x907   : > { %v1726_v2 = vsub.f32 %v1722_v62, %v1725_v1 }
 0x909   : > { %v1727_v3 = vmul.f32 1.442695, %v1726_v2 }
 0x90a   : > { %v1735_v4 = vpop.permute.xlu1 %1734 }
 0x90b   : > { %6003 = vpow2.f32 %v1727_v3  ;;  %5648 = vmatpush3.msra.mxu0 %v1735_v4  ;;  %v2294_v3 = vld [vmem:[%s7043_s8 + $0x28] sm:$0xff] }
 0x90c   : > { %5657 = vmatprep.subr.mxu0 %v6071_v20 }
 0x90e   : > { %v1886_v14 = vpop.permute.xlu1 %1885 }
 0x915   : > { %v6004_v5 = vpop.eup %6003 }
 0x916   : > { %v1729_v6 = vsel %vm924_vm2, %v6004_v5, 0.0 }
 0x917   : > { %1730 = vadd.xlane.f32.xlu0 %v1729_v6 }
 0x92d   : > { %1887 = vrot.lane.b32.xlu0 %v6304_v47, %s7006_s6  ;;  %s7011_s6 = smov 80  }
 0x943   : > { %v1638_v7 = vpop.f32.mrb[10].mxu0 }
 0x944   : > { %v1642_v8 = vadd.f32 %v1638_v7, %v1398_v41  ;;  %v5641_v9 = vpop.f32.mrb[11].mxu0 }
 0x9a4   : > { %v1731_v10 = vpop.xlane.xlu0 %1730 }
 0x9a5   : > { %6005 = vrcp.f32 %v1731_v10 }
 0x9a8   : > { %v1888_v13 = vpop.permute.xlu0 %1887 }
 0x9af   : > { %v6006_v11 = vpop.eup %6005 }
 0x9b0   : > { %v1733_v12 = vmul.f32 %v6006_v11, %v6004_v5 }
 0x9b2   : > { %5650 = vmatmul.mubr.msk.f32.vlgmr.msra.gmra.mrb[12].mxu0 %vm924_vm2, %v1733_v12 }
 0x9b3   : > { %5658 = vmatpush3.xpose.msk.msra.mxu0 %vm924_vm2, %v1888_v13  ;;  %5659 = vmatprep.mubr.msk.f32.mxu0 %vm6072_vm1, %v6071_v20 }
 0x9b4   : > { %5667 = vmatprep.subr.mxu0 %v6071_v20 }
 0x9b6   : > { %5660 = vmatmul.mubr.msk.f32.vlgmr.msra.gmra.mrb[14].mxu0 %vm924_vm2, %v1886_v14 }
 0x9b7   : > { %5669 = vmatprep.mubr.msk.f32.mxu0 %vm6072_vm1, %v6071_v20  ;;  %5668 = vmatpush3.msra.mxu0 %v2052_v38 }
 0x9b8   : > { %5677 = vmatprep.subr.mxu0 %v6071_v20 }
 0xa85   : > { %v1806_v16 = vpop.f32.mrb[12].mxu0 }
 0xa86   : > { %v5651_v17 = vpop.f32.mrb[13].mxu0  ;;  %5655 = vmatmul.mubr.msk.f32.vlgmr.msra.gmra.mrb[10].mxu1 %vm924_vm2, %v1806_v16 }
 0xa87   : > { %5664 = vmatprep.mubr.msk.f32.mxu1 %vm6072_vm1, %v6071_v20 }
 0xa89   : > { %v1959_v18 = vpop.f32.mrb[14].mxu0 }
 0xa8a   : > { %v1963_v19 = vmul.f32 0.35355338, %v1959_v18  ;;  %v5661_v21 = vpop.f32.mrb[15].mxu0 }
 0xa8c   : > { %v1964_v22 = vadd.f32 %v1963_v19, %v6334_v56 }
 0xa8e   : > { %v1965_v23 = vsel %vm924_vm2, %v1964_v22, -inf }
 0xa8f   : > { %1966 = vmax.xlane.f32.xlu1 %v1965_v23 }
 0xaa0   : > { %1976 = vrot.lane.b32.xlu1 %v6319_v53, %s7015_s28  ;;  %s783_s28 = scalar_lea.vmem %s7002_s24, %s6222_s27 }
 0xaa4   : > { %2127 = vrot.lane.b32.xlu1 %v6304_v47, %s7008_s3 }
 0xb1c   : > { %v1967_v24 = vpop.xlane.xlu1 %1966 }
 0xb1d   : > { %v1968_v25 = vsub.f32 %v1964_v22, %v1967_v24 }
 0xb1f   : > { %v1969_v26 = vmul.f32 1.442695, %v1968_v25 }
 0xb20   : > { %v1977_v27 = vpop.permute.xlu1 %1976 }
 0xb21   : > { %6007 = vpow2.f32 %v1969_v26  ;;  %5663 = vmatpush3.msra.mxu1 %v1977_v27 }
 0xb22   : > { %5672 = vmatprep.subr.mxu1 %v6071_v20 }
 0xb24   : > { %v2128_v37 = vpop.permute.xlu1 %2127 }
 0xb2b   : > { %v6008_v28 = vpop.eup %6007 }
 0xb2c   : > { %v1971_v29 = vsel %vm924_vm2, %v6008_v28, 0.0 }
 0xb2d   : > { %1972 = vadd.xlane.f32.xlu0 %v1971_v29 }
 0xb43   : > { %2129 = vrot.lane.b32.xlu0 %v6304_v47, %s7005_s25  ;;  %s7007_s25 = smov 16  }
 0xb59   : > { %v1880_v30 = vpop.f32.mrb[10].mxu1 }
 0xb5a   : > { %v1884_v31 = vadd.f32 %v1880_v30, %v1642_v8  ;;  %v5656_v32 = vpop.f32.mrb[11].mxu1 }
 0xbba   : > { %v1973_v33 = vpop.xlane.xlu0 %1972 }
 0xbbb   : > { %6009 = vrcp.f32 %v1973_v33 }
 0xbbe   : > { %v2130_v36 = vpop.permute.xlu0 %2129 }
 0xbc5   : > { %v6010_v34 = vpop.eup %6009 }
 0xbc6   : > { %v1975_v35 = vmul.f32 %v6010_v34, %v6008_v28 }
 0xbc8   : > { %5665 = vmatmul.mubr.msk.f32.vlgmr.msra.gmra.mrb[12].mxu1 %vm924_vm2, %v1975_v35 }
 0xbc9   : > { %5673 = vmatpush3.xpose.msk.msra.mxu1 %vm924_vm2, %v2130_v36  ;;  %5674 = vmatprep.mubr.msk.f32.mxu1 %vm6072_vm1, %v6071_v20 }
 0xbca   : > { %5682 = vmatprep.subr.mxu1 %v6071_v20 }
 0xbcc   : > { %5675 = vmatmul.mubr.msk.f32.vlgmr.msra.gmra.mrb[14].mxu1 %vm924_vm2, %v2128_v37 }
 0xbcd   : > { %5684 = vmatprep.mubr.msk.f32.mxu1 %vm6072_vm1, %v6071_v20  ;;  %5683 = vmatpush3.msra.mxu1 %v2294_v3  ;;  %v6088_v3 = vmov 0.0|0.0  }
 0xbce   : > { %5692 = vmatprep.subr.mxu1 %v6071_v20 }
 0xc9b   : > { %v2048_v39 = vpop.f32.mrb[12].mxu1 }
 0xc9c   : > { %v5666_v40 = vpop.f32.mrb[13].mxu1  ;;  %5670 = vmatmul.mubr.msk.f32.vlgmr.msra.gmra.mrb[16].mxu0 %vm924_vm2, %v2048_v39 }
 0xc9d   : > { %5679 = vmatprep.mubr.msk.f32.mxu0 %vm6072_vm1, %v6071_v20 }
 0xc9f   : > { %v2201_v41 = vpop.f32.mrb[14].mxu1 }
 0xca0   : > { %v2205_v44 = vmul.f32 0.35355338, %v2201_v41  ;;  %v5676_v45 = vpop.f32.mrb[15].mxu1 }
 0xca2   : > { %v2206_v46 = vadd.f32 %v2205_v44, %v6334_v56 }
 0xca4   : > { %v2207_v48 = vsel %vm924_vm2, %v2206_v46, -inf }
 0xca5   : > { %2208 = vmax.xlane.f32.xlu1 %v2207_v48 }
 0xcb6   : > { %2218 = vrot.lane.b32.xlu1 %v6319_v53, %s7008_s3  ;;  %s7013_s3 = smov 72  }
 0xcba   : > { %2369 = vrot.lane.b32.xlu1 %v6304_v47, %s7011_s6 }
 0xd32   : > { %v2209_v50 = vpop.xlane.xlu1 %2208 }
 0xd33   : > { %v2210_v51 = vsub.f32 %v2206_v46, %v2209_v50 }
 0xd35   : > { %v2211_v52 = vmul.f32 1.442695, %v2210_v51  ;;  %v5402_v51 = vld [vmem:[%s6987_s9] ss:$0 sm:$0xff] }
 0xd36   : > { %v2219_v54 = vpop.permute.xlu1 %2218 }
 0xd37   : > { %6011 = vpow2.f32 %v2211_v52  ;;  %5678 = vmatpush3.msra.mxu0 %v2219_v54 }
 0xd38   : > { %5687 = vmatprep.subr.mxu0 %v6071_v20 }
 0xd3a   : > { %v2370_v2 = vpop.permute.xlu1 %2369 }
 0xd41   : > { %v6012_v55 = vpop.eup %6011 }
 0xd42   : > { %v2213_v57 = vsel %vm924_vm2, %v6012_v55, 0.0 }
 0xd43   : > { %2214 = vadd.xlane.f32.xlu0 %v2213_v57 }
 0xd59   : > { %2371 = vrot.lane.b32.xlu0 %v6304_v47, %s7007_s25  ;;  %s7010_s25 = smov 8  }
 0xd6f   : > { %v2122_v58 = vpop.f32.mrb[16].mxu0 }
 0xd70   : > { %v2126_v59 = vadd.f32 %v2122_v58, %v1884_v31  ;;  %v5671_v60 = vpop.f32.mrb[17].mxu0 }
 0xdd0   : > { %v2215_v61 = vpop.xlane.xlu0 %2214 }
 0xdd1   : > { %6013 = vrcp.f32 %v2215_v61 }
 0xdd4   : > { %v2372_v1 = vpop.permute.xlu0 %2371 }
 0xddb   : > { %v6014_v62 = vpop.eup %6013 }
 0xddc   : > { %v2217_v63 = vmul.f32 %v6014_v62, %v6012_v55 }
 0xdde   : > { %5680 = vmatmul.mubr.msk.f32.vlgmr.msra.gmra.mrb[18].mxu0 %vm924_vm2, %v2217_v63 }
 0xddf   : > { %5688 = vmatpush3.xpose.msk.msra.mxu0 %vm924_vm2, %v2372_v1  ;;  %5689 = vmatprep.mubr.msk.f32.mxu0 %vm6072_vm1, %v6071_v20  ;;  %v2979_v1 = vld [vmem:[%s6992_s14] sm:$0xff] }
 0xde0   : > { %5697 = vmatprep.subr.mxu0 %v6071_v20 }
 0xde2   : > { %5690 = vmatmul.mubr.msk.f32.vlgmr.msra.gmra.mrb[20].mxu0 %vm924_vm2, %v2370_v2 }
 0xde3   : > { %5699 = vmatprep.mubr.msk.f32.mxu0 %vm6072_vm1, %v6071_v20 }
 0xeb1   : > { %v2290_v4 = vpop.f32.mrb[18].mxu0 }
 0xeb2   : > { %v5681_v5 = vpop.f32.mrb[19].mxu0  ;;  %5685 = vmatmul.mubr.msk.f32.vlgmr.msra.gmra.mrb[16].mxu1 %vm924_vm2, %v2290_v4  ;;  %v2981_v4 = vld [vmem:[%s6992_s14 + $0x10] sm:$0xff] }
 0xeb3   : > { %5694 = vmatprep.mubr.msk.f32.mxu1 %vm6072_vm1, %v6071_v20  ;;  %v2982_v5 = vld [vmem:[%s6992_s14 + $0x18] sm:$0xff] }
 0xeb5   : > { %v2443_v6 = vpop.f32.mrb[20].mxu0 }
 0xeb6   : > { %v2447_v7 = vmul.f32 0.35355338, %v2443_v6  ;;  %v5691_v8 = vpop.f32.mrb[21].mxu0  ;;  %v2891_v6 = vld [vmem:[%s6990_s12] sm:$0xff] }
 0xeb7   : > { %v2892_v8 = vld [vmem:[%s6990_s12 + $0x8] sm:$0xff] }
 0xeb8   : > { %v2448_v9 = vadd.f32 %v2447_v7, %v6334_v56  ;;  %v5907_v7 = vpack.c.bf16 %v2982_v5, %v2981_v4 }
 0xeba   : > { %v2449_v10 = vsel %vm924_vm2, %v2448_v9, -inf }
 0xebb   : > { %2450 = vmax.xlane.f32.xlu1 %v2449_v10  ;;  %v2983_v10 = vld [vmem:[%s6992_s14 + $0x20] sm:$0xff] }
 0xecc   : > { %2460 = vrot.lane.b32.xlu1 %v6319_v53, %s7011_s6  ;;  %s7055_s6 = smov 32  }
 0xed0   : > { %2611 = vrot.lane.b32.xlu1 %v6304_v47, %s7013_s3 }
 0xf48   : > { %v2451_v11 = vpop.xlane.xlu1 %2450 }
 0xf49   : > { %v2452_v12 = vsub.f32 %v2448_v9, %v2451_v11  ;;  %v5892_v9 = vpack.c.bf16 %v2892_v8, %v2891_v6  ;;  %v2984_v11 = vld [vmem:[%s6992_s14 + $0x28] sm:$0xff] }
 0xf4b   : > { %v2453_v13 = vmul.f32 1.442695, %v2452_v12  ;;  %v2893_v12 = vld [vmem:[%s6990_s12 + $0x10] sm:$0xff] }
 0xf4c   : > { %v2461_v14 = vpop.permute.xlu1 %2460 }
 0xf4d   : > { %6015 = vpow2.f32 %v2453_v13  ;;  %5693 = vmatpush3.msra.mxu1 %v2461_v14  ;;  %v5910_v13 = vpack.c.bf16 %v2984_v11, %v2983_v10  ;;  %v2894_v14 = vld [vmem:[%s6990_s12 + $0x18] sm:$0xff]  ;;  %v3400_v11 = vld [vmem:[%s6994_s16 + $0x8] sm:$0xff] }
 0xf4e   : > { %5702 = vmatprep.subr.mxu1 %v6071_v20 }
 0xf50   : > { %v2612_v25 = vpop.permute.xlu1 %2611 }
 0xf57   : > { %v6016_v15 = vpop.eup %6015 }
 0xf58   : > { %v2455_v16 = vsel %vm924_vm2, %v6016_v15, 0.0 }
 0xf59   : > { %2456 = vadd.xlane.f32.xlu0 %v2455_v16  ;;  %v2985_v16 = vld [vmem:[%s6992_s14 + $0x30] sm:$0xff] }
 0xf6f   : > { %2613 = vrot.lane.b32.xlu0 %v6304_v47, %s7010_s25  ;;  %v2536_v47 = vld [vmem:[%s7043_s8 + $0x30] sm:$0xff]  ;;  %s7045_s25 = smov 120  }
 0xf70   : > { %5698 = vmatpush3.msra.mxu0 %v2536_v47 }
 0xf71   : > { %5707 = vmatprep.subr.mxu0 %v6071_v20 }
 0xf85   : > { %v2364_v17 = vpop.f32.mrb[16].mxu1 }
 0xf86   : > { %v2368_v18 = vadd.f32 %v2364_v17, %v2126_v59  ;;  %v5686_v19 = vpop.f32.mrb[17].mxu1  ;;  %v2986_v17 = vld [vmem:[%s6992_s14 + $0x38] sm:$0xff] }
 0xf87   : > { %v5913_v19 = vpack.c.bf16 %v2986_v17, %v2985_v16  ;;  %v3232_v16 = vld [vmem:[%s6994_s16] sm:$0xff] }
 0xfe6   : > { %v2457_v21 = vpop.xlane.xlu0 %2456 }
 0xfe7   : > { %6017 = vrcp.f32 %v2457_v21  ;;  %v2896_v21 = vld [vmem:[%s6990_s12 + $0x28] sm:$0xff] }
 0xfea   : > { %v2614_v24 = vpop.permute.xlu0 %2613 }
 0xff1   : > { %v6018_v22 = vpop.eup %6017 }
 0xff2   : > { %v2459_v23 = vmul.f32 %v6018_v22, %v6016_v15  ;;  %v5895_v15 = vpack.c.bf16 %v2894_v14, %v2893_v12 }
 0xff4   : > { %5695 = vmatmul.mubr.msk.f32.vlgmr.msra.gmra.mrb[18].mxu1 %vm924_vm2, %v2459_v23  ;;  %v2897_v23 = vld [vmem:[%s6990_s12 + $0x30] sm:$0xff] }
 0xff5   : > { %5703 = vmatpush3.xpose.msk.msra.mxu1 %vm924_vm2, %v2614_v24  ;;  %5704 = vmatprep.mubr.msk.f32.mxu1 %vm6072_vm1, %v6071_v20  ;;  %v2898_v24 = vld [vmem:[%s6990_s12 + $0x38] sm:$0xff] }
 0xff6   : > { %5712 = vmatprep.subr.mxu1 %v6071_v20  ;;  %v5901_v47 = vpack.c.bf16 %v2898_v24, %v2897_v23 }
 0xff8   : > { %5705 = vmatmul.mubr.msk.f32.vlgmr.msra.gmra.mrb[20].mxu1 %vm924_vm2, %v2612_v25 }
 0xff9   : > { %5714 = vmatprep.mubr.msk.f32.mxu1 %vm6072_vm1, %v6071_v20 }
0x10c7   : > { %v2532_v26 = vpop.f32.mrb[18].mxu1 }
0x10c8   : > { %v5696_v27 = vpop.f32.mrb[19].mxu1  ;;  %5700 = vmatmul.mubr.msk.f32.vlgmr.msra.gmra.mrb[22].mxu0 %vm924_vm2, %v2532_v26 }
0x10c9   : > { %5709 = vmatprep.mubr.msk.f32.mxu0 %vm6072_vm1, %v6071_v20 }
0x10cb   : > { %v2685_v28 = vpop.f32.mrb[20].mxu1 }
0x10cc   : > { %v2689_v29 = vmul.f32 0.35355338, %v2685_v28  ;;  %v5706_v30 = vpop.f32.mrb[21].mxu1 }
0x10cd   : > { %v5403_v30 = vld [vmem:[%s6988_s10] ss:$0 sm:$0xff] }
0x10ce   : > { %v2690_v31 = vadd.f32 %v2689_v29, %v6334_v56  ;;  %v2778_v56 = vld [vmem:[%s7043_s8 + $0x38] sm:$0xff]  ;;  %s7048_s8 = smov 112  }
0x10cf   : > { %5713 = vmatpush3.msra.mxu1 %v2778_v56  ;;  %v5405_v56 = vld [vmem:[%s6991_s13] ss:$0 sm:$0xff] }
0x10d0   : > { %v2691_v32 = vsel %vm924_vm2, %v2690_v31, -inf  ;;  %5903 = vmatprep.subr.bf16.mxu1 %v6088_v3 }
0x10d1   : > { %2692 = vmax.xlane.f32.xlu1 %v2691_v32  ;;  %v5404_v32 = vld [vmem:[%s6989_s11] ss:$0 sm:$0xff] }
0x10e2   : > { %2702 = vrot.lane.b32.xlu1 %v6319_v53, %s7013_s3  ;;  %s771_s3 = scalar_lea.vmem %s7044_s7, %s6222_s27  ;;  %s7050_s7 = smov 104  }
0x10e3   : > { %v785_v25 = vld [vmem:[%s771_s3] sm:$0xff]  ;;  %s7051_s3 = smov 48  }
0x115e   : > { %v2693_v33 = vpop.xlane.xlu1 %2692 }
0x115f   : > { %v2694_v34 = vsub.f32 %v2690_v31, %v2693_v33 }
0x1161   : > { %v2695_v35 = vmul.f32 1.442695, %v2694_v34 }
0x1162   : > { %v2703_v36 = vpop.permute.xlu1 %2702 }
0x1163   : > { %6019 = vpow2.f32 %v2695_v35  ;;  %5708 = vmatpush3.msra.mxu0 %v2703_v36  ;;  %v5407_v35 = vld [vmem:[%s6993_s15] ss:$0 sm:$0xff] }
0x1164   : > { %5891 = vmatprep.subr.bf16.mxu0 %v6088_v3 }
0x116d   : > { %v6020_v37 = vpop.eup %6019 }
0x116e   : > { %v2697_v38 = vsel %vm924_vm2, %v6020_v37, 0.0 }
0x116f   : > { %2698 = vadd.xlane.f32.xlu0 %v2697_v38 }
0x119b   : > { %v2606_v39 = vpop.f32.mrb[22].mxu0 }
0x119c   : > { %v2610_v40 = vadd.f32 %v2606_v39, %v2368_v18  ;;  %v5701_v41 = vpop.f32.mrb[23].mxu0  ;;  %v2895_v18 = vld [vmem:[%s6990_s12 + $0x20] sm:$0xff] }
0x119d   : > { %v5898_v22 = vpack.c.bf16 %v2896_v21, %v2895_v18 }
0x11fc   : > { %v2699_v44 = vpop.xlane.xlu0 %2698 }
0x11fd   : > { %6021 = vrcp.f32 %v2699_v44 }
0x1207   : > { %v6022_v53 = vpop.eup %6021 }
0x1208   : > { %v2701_v45 = vmul.f32 %v6022_v53, %v6020_v37 }
0x120a   : > { %5710 = vmatmul.mubr.msk.f32.vlgmr.msra.gmra.mrb[24].mxu0 %vm924_vm2, %v2701_v45  ;;  %v6619_v45 = vld [vmem:[%s779_s4] sm:$0xff]  ;;  %s7052_s4 = smov 40  }
0x120b   : > { %5733 = vmatprep.mubr.msk.f32.mxu0 %vm6072_vm1, %v6071_v20  ;;  %5893 = vmatpush3.bf16.msra.mxu0 %v5892_v9 }
0x120c   : > { %5894 = vmatprep.subr.bf16.mxu0 %v6088_v3 }
0x120f   : > { %5896 = vmatpush3.bf16.msra.mxu0 %v5895_v15 }
0x1210   : > { %5897 = vmatprep.subr.bf16.mxu0 %v6088_v3 }
0x1213   : > { %5899 = vmatpush3.bf16.msra.mxu0 %v5898_v22 }
0x1214   : > { %5900 = vmatprep.subr.bf16.mxu0 %v6088_v3 }
0x1217   : > { %5902 = vmatpush3.bf16.msra.mxu0 %v5901_v47 }
0x1218   : > { %5755 = vmatprep.subr.mxu0 %v6071_v20 }
0x12dd   : > { %v2774_v46 = vpop.f32.mrb[24].mxu0 }
0x12de   : > { %v5711_v48 = vpop.f32.mrb[25].mxu0  ;;  %5715 = vmatmul.mubr.msk.f32.vlgmr.msra.gmra.mrb[22].mxu1 %vm924_vm2, %v2774_v46 }
0x12df   : > { %5752 = vmatprep.mubr.msk.f32.mxu1 %vm6072_vm1, %v6071_v20 }
0x13b1   : > { %v2848_v50 = vpop.f32.mrb[22].mxu1 }
0x13b2   : > { %v2852_v52 = vadd.f32 %v2848_v50, %v2610_v40  ;;  %v5716_v54 = vpop.f32.mrb[23].mxu1 }
0x13b4   : > { %v2860_v55 = vadd.f32 %v5402_v51, %v2852_v52 }
0x13b6   : > { %v6517_v57 = vadd.f32 %v2860_v55, %v6228_v0  ;;  %v2980_v0 = vld [vmem:[%s6992_s14 + $0x8] sm:$0xff] }
0x13b7   : > { %v5904_v2 = vpack.c.bf16 %v2980_v0, %v2979_v1 }
0x13b8   : > { %v2862_v58 = vsel %vm788_vm0, %v6517_v57, 0.0 }
0x13b9   : > { %2863 = vadd.xlane.f32.xlu0 %v2862_v58  ;;  %5905 = vmatpush3.bf16.msra.mxu1 %v5904_v2 }
0x13ba   : > { %5906 = vmatprep.subr.bf16.mxu1 %v6088_v3 }
0x13bd   : > { %5908 = vmatpush3.bf16.msra.mxu1 %v5907_v7 }
0x13be   : > { %5909 = vmatprep.subr.bf16.mxu1 %v6088_v3 }
0x13c1   : > { %5911 = vmatpush3.bf16.msra.mxu1 %v5910_v13 }
0x13c2   : > { %5912 = vmatprep.subr.bf16.mxu1 %v6088_v3 }
0x13c5   : > { %5914 = vmatpush3.bf16.msra.mxu1 %v5913_v19 }
0x13c6   : > { %5760 = vmatprep.subr.mxu1 %v6071_v20 }
0x13c8   : > { %5753 = vmatmul.mubr.msk.f32.vlgmr.msra.gmra.mrb[24].mxu1 %vm788_vm0, %v785_v25 }
0x13c9   : > { %5762 = vmatprep.mubr.msk.f32.mxu1 %vm6072_vm1, %v6071_v20 }
0x1446   : > { %v2864_v59 = vpop.xlane.xlu0 %2863 }
0x1447   : > { %v2865_v60 = vmul.f32 0.015625, %v2864_v59 }
0x1449   : > { %v2866_v61 = vsub.f32 %v6517_v57, %v2865_v60 }
0x144b   : > { %v2867_v62 = vmul.f32 %v2866_v61, %v2866_v61 }
0x144d   : > { %v2868_v63 = vsel %vm788_vm0, %v2867_v62, 0.0 }
0x144e   : > { %2869 = vadd.xlane.f32.xlu0 %v2868_v63 }
0x149b   : > { %v3063_v36 = vpop.f32.mrb[24].mxu1 }
0x149c   : > { %v6592_v37 = vadd.f32 %v5407_v35, %v3063_v36  ;;  %v5754_v38 = vpop.f32.mrb[25].mxu1 }
0x149e   : > { %3235 = vrot.lane.b32.xlu0 %v6592_v37, %s7045_s25 }
0x14db   : > { %v2870_v26 = vpop.xlane.xlu0 %2869 }
0x14dc   : > { %v2871_v27 = vmul.f32 0.015625, %v2870_v26 }
0x14de   : > { %v2872_v28 = vadd.f32 1e-06, %v2871_v27 }
0x14e0   : > { %6023 = vrsqrt.f32 %v2872_v28 }
0x14ea   : > { %v6024_v29 = vpop.eup %6023 }
0x14eb   : > { %v2874_v31 = vmul.f32 %v6024_v29, %v2866_v61 }
0x14ed   : > { %v2882_v33 = vmul.f32 %v5403_v30, %v2874_v31 }
0x14ef   : > { %v2890_v34 = vadd.f32 %v5404_v32, %v2882_v33 }
0x14f1   : > { %5734 = vmatmul.mubr.msk.f32.vlgmr.msra.gmra.mrb[26].mxu0 %vm788_vm0, %v2890_v34 }
0x14f2   : > { %5757 = vmatprep.mubr.msk.f32.mxu0 %vm6072_vm1, %v6071_v20  ;;  %5756 = vmatpush3.xpose.msk.msra.mxu0 %vm924_vm2, %v6592_v37 }
0x14f3   : > { %5765 = vmatprep.subr.mxu0 %v6071_v20 }
0x1510   : > { %v3236_v44 = vpop.permute.xlu0 %3235 }
0x15c4   : > { %v2975_v39 = vpop.f32.mrb[26].mxu0 }
0x15c5   : > { %v6602_v40 = vadd.f32 %v5405_v56, %v2975_v39  ;;  %v5735_v41 = vpop.f32.mrb[27].mxu0 }
0x15c7   : > { %3233 = vrot.lane.b32.xlu1 %v6602_v40, %s7045_s25  ;;  %5758 = vmatmul.mubr.msk.f32.vlgmr.msra.gmra.mrb[28].mxu0 %vm924_vm2, %v6602_v40 }
0x15c8   : > { %5766 = vmatpush3.xpose.msk.msra.mxu0 %vm924_vm2, %v3236_v44  ;;  %5767 = vmatprep.mubr.msk.f32.mxu0 %vm6072_vm1, %v6071_v20 }
0x15c9   : > { %5775 = vmatprep.subr.mxu0 %v6071_v20 }
0x1639   : > { %v3234_v53 = vpop.permute.xlu1 %3233 }
0x163a   : > { %5768 = vmatmul.mubr.msk.f32.vlgmr.msra.gmra.mrb[30].mxu0 %vm924_vm2, %v3234_v53 }
0x163b   : > { %5777 = vmatprep.mubr.msk.f32.mxu0 %vm6072_vm1, %v6071_v20  ;;  %5776 = vmatpush3.msra.mxu0 %v3400_v11 }
0x163c   : > { %5785 = vmatprep.subr.mxu0 %v6071_v20 }
0x169a   : > { %v3139_v46 = vpop.f32.mrb[28].mxu0 }
0x169b   : > { %v3143_v48 = vmul.f32 0.35355338, %v3139_v46  ;;  %v5759_v50 = vpop.f32.mrb[29].mxu0 }
0x169d   : > { %v3144_v51 = vadd.f32 %v3143_v48, %v6619_v45  ;;  %v3714_v48 = vld [vmem:[%s6994_s16 + $0x10] sm:$0xff] }
0x169f   : > { %v3145_v52 = vsel %vm924_vm2, %v3144_v51, -inf }
0x16a0   : > { %3146 = vmax.xlane.f32.xlu1 %v3145_v52 }
0x170d   : > { %v3307_v54 = vpop.f32.mrb[30].mxu0 }
0x170e   : > { %v3311_v55 = vmul.f32 0.35355338, %v3307_v54  ;;  %v5769_v58 = vpop.f32.mrb[31].mxu0 }
0x1710   : > { %v3312_v59 = vadd.f32 %v3311_v55, %v6619_v45 }
0x1712   : > { %v3313_v60 = vsel %vm924_vm2, %v3312_v59, -inf }
0x1713   : > { %3314 = vmax.xlane.f32.xlu0 %v3313_v60 }
0x1729   : > { %3156 = vrot.lane.b32.xlu0 %v6592_v37, %s7047_s26  ;;  %s7053_s26 = smov 96  }
0x172d   : > { %v3147_v61 = vpop.xlane.xlu1 %3146  ;;  %3547 = vrot.lane.b32.xlu0 %v6602_v40, %s7048_s8 }
0x172e   : > { %v3148_v62 = vsub.f32 %v3144_v51, %v3147_v61 }
0x1730   : > { %v3149_v63 = vmul.f32 1.442695, %v3148_v62 }
0x1732   : > { %6025 = vpow2.f32 %v3149_v63 }
0x173c   : > { %v6026_v1 = vpop.eup %6025 }
0x173d   : > { %v3151_v0 = vsel %vm924_vm2, %v6026_v1, 0.0 }
0x173e   : > { %3152 = vadd.xlane.f32.xlu1 %v3151_v0 }
0x17a0   : > { %v3315_v2 = vpop.xlane.xlu0 %3314 }
0x17a1   : > { %v3316_v3 = vsub.f32 %v3312_v59, %v3315_v2 }
0x17a3   : > { %v3317_v4 = vmul.f32 1.442695, %v3316_v3 }
0x17a4   : > { %v3157_v5 = vpop.permute.xlu0 %3156 }
0x17a5   : > { %6027 = vpow2.f32 %v3317_v4  ;;  %5761 = vmatpush3.msra.mxu1 %v3157_v5 }
0x17a6   : > { %5770 = vmatprep.subr.mxu1 %v6071_v20 }
0x17a8   : > { %v3548_v23 = vpop.permute.xlu0 %3547 }
0x17af   : > { %v6028_v6 = vpop.eup %6027 }
0x17b0   : > { %v3319_v7 = vsel %vm924_vm2, %v6028_v6, 0.0 }
0x17b1   : > { %3320 = vadd.xlane.f32.xlu1 %v3319_v7 }
0x17c2   : > { %3324 = vrot.lane.b32.xlu1 %v6592_v37, %s7049_s1 }
0x17c6   : > { %3549 = vrot.lane.b32.xlu1 %v6592_v37, %s7048_s8 }
0x17cb   : > { %v3153_v8 = vpop.xlane.xlu1 %3152 }
0x17cc   : > { %6029 = vrcp.f32 %v3153_v8 }
0x17d6   : > { %v6030_v9 = vpop.eup %6029 }
0x17d7   : > { %v3155_v10 = vmul.f32 %v6030_v9, %v6026_v1 }
0x17d9   : > { %5763 = vmatmul.mubr.msk.f32.vlgmr.msra.gmra.mrb[26].mxu1 %vm924_vm2, %v3155_v10  ;;  %v3956_v10 = vld [vmem:[%s6994_s16 + $0x18] sm:$0xff] }
0x17da   : > { %5772 = vmatprep.mubr.msk.f32.mxu1 %vm6072_vm1, %v6071_v20 }
0x183e   : > { %v3321_v12 = vpop.xlane.xlu1 %3320 }
0x183f   : > { %6031 = vrcp.f32 %v3321_v12 }
0x1842   : > { %v3325_v13 = vpop.permute.xlu1 %3324 }
0x1843   : > { %5771 = vmatpush3.msra.mxu1 %v3325_v13 }
0x1844   : > { %5780 = vmatprep.subr.mxu1 %v6071_v20 }
0x1846   : > { %v3550_v21 = vpop.permute.xlu1 %3549 }
0x1849   : > { %v6032_v14 = vpop.eup %6031 }
0x184a   : > { %v3323_v15 = vmul.f32 %v6032_v14, %v6028_v6 }
0x184c   : > { %5773 = vmatmul.mubr.msk.f32.vlgmr.msra.gmra.mrb[28].mxu1 %vm924_vm2, %v3323_v15 }
0x184d   : > { %5781 = vmatpush3.msra.mxu1 %v3232_v16  ;;  %5782 = vmatprep.mubr.msk.f32.mxu1 %vm6072_vm1, %v6071_v20 }
0x184e   : > { %5790 = vmatprep.subr.mxu1 %v6071_v20 }
0x18ac   : > { %v3228_v17 = vpop.f32.mrb[26].mxu1 }
0x18ad   : > { %v5764_v18 = vpop.f32.mrb[27].mxu1  ;;  %5783 = vmatmul.mubr.msk.f32.vlgmr.msra.gmra.mrb[30].mxu1 %vm924_vm2, %v3228_v17 }
0x18ae   : > { %5792 = vmatprep.mubr.msk.f32.mxu1 %vm6072_vm1, %v6071_v20 }
0x191f   : > { %v3396_v19 = vpop.f32.mrb[28].mxu1 }
0x1920   : > { %v5774_v22 = vpop.f32.mrb[29].mxu1  ;;  %5778 = vmatmul.mubr.msk.f32.vlgmr.msra.gmra.mrb[32].mxu0 %vm924_vm2, %v3396_v19 }
0x1921   : > { %5786 = vmatpush3.xpose.msk.msra.mxu0 %vm924_vm2, %v3550_v21  ;;  %5787 = vmatprep.mubr.msk.f32.mxu0 %vm6072_vm1, %v6071_v20 }
0x1922   : > { %5795 = vmatprep.subr.mxu0 %v6071_v20 }
0x1924   : > { %5788 = vmatmul.mubr.msk.f32.vlgmr.msra.gmra.mrb[34].mxu0 %vm924_vm2, %v3548_v23 }
0x1925   : > { %5797 = vmatprep.mubr.msk.f32.mxu0 %vm6072_vm1, %v6071_v20  ;;  %5796 = vmatpush3.msra.mxu0 %v3714_v48 }
0x1926   : > { %5805 = vmatprep.subr.mxu0 %v6071_v20 }
0x1980   : > { %v3543_v24 = vpop.f32.mrb[30].mxu1 }
0x1981   : > { %v5784_v25 = vpop.f32.mrb[31].mxu1 }
0x19f3   : > { %v3470_v47 = vpop.f32.mrb[32].mxu0 }
0x19f4   : > { %v3544_v26 = vadd.f32 %v3543_v24, %v3470_v47  ;;  %v5779_v27 = vpop.f32.mrb[33].mxu0 }
0x19f7   : > { %v3621_v28 = vpop.f32.mrb[34].mxu0 }
0x19f8   : > { %v3625_v29 = vmul.f32 0.35355338, %v3621_v28  ;;  %v5789_v30 = vpop.f32.mrb[35].mxu0 }
0x19fa   : > { %v3626_v31 = vadd.f32 %v3625_v29, %v6619_v45 }
0x19fc   : > { %v3627_v32 = vsel %vm924_vm2, %v3626_v31, -inf }
0x19fd   : > { %3628 = vmax.xlane.f32.xlu1 %v3627_v32  ;;  %v4198_v32 = vld [vmem:[%s6994_s16 + $0x20] sm:$0xff] }
0x1a0e   : > { %3791 = vrot.lane.b32.xlu1 %v6592_v37, %s7050_s7 }
0x1a12   : > { %3789 = vrot.lane.b32.xlu1 %v6602_v40, %s7050_s7  ;;  %s7056_s7 = smov 24  }
0x1a8a   : > { %v3629_v33 = vpop.xlane.xlu1 %3628 }
0x1a8b   : > { %v3630_v34 = vsub.f32 %v3626_v31, %v3629_v33 }
0x1a8d   : > { %v3631_v35 = vmul.f32 1.442695, %v3630_v34 }
0x1a8e   : > { %v3792_v44 = vpop.permute.xlu1 %3791 }
0x1a8f   : > { %6033 = vpow2.f32 %v3631_v35 }
0x1a92   : > { %v3790_v46 = vpop.permute.xlu1 %3789 }
0x1a99   : > { %v6034_v36 = vpop.eup %6033 }
0x1a9a   : > { %v3633_v38 = vsel %vm924_vm2, %v6034_v36, 0.0 }
0x1a9b   : > { %3634 = vadd.xlane.f32.xlu0 %v3633_v38 }
0x1ab1   : > { %3638 = vrot.lane.b32.xlu0 %v6592_v37, %s7051_s3  ;;  %s7057_s3 = smov 80  }
0x1b28   : > { %v3635_v56 = vpop.xlane.xlu0 %3634 }
0x1b29   : > { %6035 = vrcp.f32 %v3635_v56 }
0x1b2c   : > { %v3639_v39 = vpop.permute.xlu0 %3638 }
0x1b2d   : > { %5791 = vmatpush3.msra.mxu1 %v3639_v39 }
0x1b2e   : > { %5800 = vmatprep.subr.mxu1 %v6071_v20 }
0x1b33   : > { %v6036_v41 = vpop.eup %6035 }
0x1b34   : > { %v3637_v53 = vmul.f32 %v6036_v41, %v6034_v36 }
0x1b36   : > { %5793 = vmatmul.mubr.msk.f32.vlgmr.msra.gmra.mrb[32].mxu1 %vm924_vm2, %v3637_v53 }
0x1b37   : > { %5801 = vmatpush3.xpose.msk.msra.mxu1 %vm924_vm2, %v3792_v44  ;;  %5802 = vmatprep.mubr.msk.f32.mxu1 %vm6072_vm1, %v6071_v20 }
0x1b38   : > { %5810 = vmatprep.subr.mxu1 %v6071_v20 }
0x1b3a   : > { %5803 = vmatmul.mubr.msk.f32.vlgmr.msra.gmra.mrb[34].mxu1 %vm924_vm2, %v3790_v46 }
0x1b3b   : > { %5812 = vmatprep.mubr.msk.f32.mxu1 %vm6072_vm1, %v6071_v20  ;;  %5811 = vmatpush3.msra.mxu1 %v3956_v10 }
0x1b3c   : > { %5820 = vmatprep.subr.mxu1 %v6071_v20 }
0x1c09   : > { %v3710_v50 = vpop.f32.mrb[32].mxu1 }
0x1c0a   : > { %v5794_v51 = vpop.f32.mrb[33].mxu1  ;;  %5798 = vmatmul.mubr.msk.f32.vlgmr.msra.gmra.mrb[36].mxu0 %vm924_vm2, %v3710_v50 }
0x1c0b   : > { %5807 = vmatprep.mubr.msk.f32.mxu0 %vm6072_vm1, %v6071_v20 }
0x1c0d   : > { %v3863_v52 = vpop.f32.mrb[34].mxu1 }
0x1c0e   : > { %v3867_v54 = vmul.f32 0.35355338, %v3863_v52  ;;  %v5804_v55 = vpop.f32.mrb[35].mxu1 }
0x1c10   : > { %v3868_v58 = vadd.f32 %v3867_v54, %v6619_v45 }
0x1c12   : > { %v3869_v59 = vsel %vm924_vm2, %v3868_v58, -inf }
0x1c13   : > { %3870 = vmax.xlane.f32.xlu0 %v3869_v59 }
0x1c29   : > { %3880 = vrot.lane.b32.xlu0 %v6592_v37, %s7052_s4  ;;  %s7058_s4 = smov 72  }
0x1c2d   : > { %4031 = vrot.lane.b32.xlu0 %v6602_v40, %s7053_s26 }
0x1ca0   : > { %v3871_v60 = vpop.xlane.xlu0 %3870 }
0x1ca1   : > { %v3872_v61 = vsub.f32 %v3868_v58, %v3871_v60 }
0x1ca3   : > { %v3873_v62 = vmul.f32 1.442695, %v3872_v61 }
0x1ca4   : > { %v3881_v63 = vpop.permute.xlu0 %3880 }
0x1ca5   : > { %6037 = vpow2.f32 %v3873_v62  ;;  %5806 = vmatpush3.msra.mxu0 %v3881_v63  ;;  %v4440_v62 = vld [vmem:[%s6994_s16 + $0x28] sm:$0xff] }
0x1ca6   : > { %5815 = vmatprep.subr.mxu0 %v6071_v20 }
0x1ca8   : > { %v4032_v9 = vpop.permute.xlu0 %4031 }
0x1caf   : > { %v6038_v1 = vpop.eup %6037 }
0x1cb0   : > { %v3875_v0 = vsel %vm924_vm2, %v6038_v1, 0.0 }
0x1cb1   : > { %3876 = vadd.xlane.f32.xlu1 %v3875_v0 }
0x1cc2   : > { %4033 = vrot.lane.b32.xlu1 %v6592_v37, %s7053_s26  ;;  %s7059_s26 = smov 16  }
0x1cdd   : > { %v3784_v2 = vpop.f32.mrb[36].mxu0 }
0x1cde   : > { %v3788_v3 = vadd.f32 %v3784_v2, %v3544_v26  ;;  %v5799_v4 = vpop.f32.mrb[37].mxu0 }
0x1d3e   : > { %v3877_v5 = vpop.xlane.xlu1 %3876 }
0x1d3f   : > { %6039 = vrcp.f32 %v3877_v5 }
0x1d42   : > { %v4034_v8 = vpop.permute.xlu1 %4033 }
0x1d49   : > { %v6040_v6 = vpop.eup %6039 }
0x1d4a   : > { %v3879_v7 = vmul.f32 %v6040_v6, %v6038_v1 }
0x1d4c   : > { %5808 = vmatmul.mubr.msk.f32.vlgmr.msra.gmra.mrb[38].mxu0 %vm924_vm2, %v3879_v7 }
0x1d4d   : > { %5816 = vmatpush3.xpose.msk.msra.mxu0 %vm924_vm2, %v4034_v8  ;;  %5817 = vmatprep.mubr.msk.f32.mxu0 %vm6072_vm1, %v6071_v20 }
0x1d4e   : > { %5825 = vmatprep.subr.mxu0 %v6071_v20 }
0x1d50   : > { %5818 = vmatmul.mubr.msk.f32.vlgmr.msra.gmra.mrb[40].mxu0 %vm924_vm2, %v4032_v9 }
0x1d51   : > { %5827 = vmatprep.mubr.msk.f32.mxu0 %vm6072_vm1, %v6071_v20  ;;  %5826 = vmatpush3.msra.mxu0 %v4198_v32 }
0x1d52   : > { %5835 = vmatprep.subr.mxu0 %v6071_v20 }
0x1e1f   : > { %v3952_v11 = vpop.f32.mrb[38].mxu0 }
0x1e20   : > { %v5809_v12 = vpop.f32.mrb[39].mxu0  ;;  %5813 = vmatmul.mubr.msk.f32.vlgmr.msra.gmra.mrb[36].mxu1 %vm924_vm2, %v3952_v11 }
0x1e21   : > { %5822 = vmatprep.mubr.msk.f32.mxu1 %vm6072_vm1, %v6071_v20 }
0x1e23   : > { %v4105_v13 = vpop.f32.mrb[40].mxu0 }
0x1e24   : > { %v4109_v14 = vmul.f32 0.35355338, %v4105_v13  ;;  %v5819_v15 = vpop.f32.mrb[41].mxu0 }
0x1e26   : > { %v4110_v16 = vadd.f32 %v4109_v14, %v6619_v45 }
0x1e28   : > { %v4111_v17 = vsel %vm924_vm2, %v4110_v16, -inf }
0x1e29   : > { %4112 = vmax.xlane.f32.xlu1 %v4111_v17 }
0x1e3a   : > { %4275 = vrot.lane.b32.xlu1 %v6592_v37, %s7054_s2 }
0x1e3e   : > { %4273 = vrot.lane.b32.xlu1 %v6602_v40, %s7054_s2  ;;  %s7060_s2 = smov 8  }
0x1eb6   : > { %v4113_v18 = vpop.xlane.xlu1 %4112 }
0x1eb7   : > { %v4114_v19 = vsub.f32 %v4110_v16, %v4113_v18 }
0x1eb9   : > { %v4115_v21 = vmul.f32 1.442695, %v4114_v19  ;;  %v4682_v19 = vld [vmem:[%s6994_s16 + $0x30] sm:$0xff] }
0x1eba   : > { %v4276_v29 = vpop.permute.xlu1 %4275 }
0x1ebb   : > { %6041 = vpow2.f32 %v4115_v21 }
0x1ebe   : > { %v4274_v31 = vpop.permute.xlu1 %4273 }
0x1ec5   : > { %v6042_v22 = vpop.eup %6041 }
0x1ec6   : > { %v4117_v23 = vsel %vm924_vm2, %v6042_v22, 0.0 }
0x1ec7   : > { %4118 = vadd.xlane.f32.xlu0 %v4117_v23 }
0x1edd   : > { %4122 = vrot.lane.b32.xlu0 %v6592_v37, %s7055_s6 }
0x1ef3   : > { %v4026_v24 = vpop.f32.mrb[36].mxu1 }
0x1ef4   : > { %v4030_v25 = vadd.f32 %v4026_v24, %v3788_v3  ;;  %v5814_v47 = vpop.f32.mrb[37].mxu1 }
0x1f54   : > { %v4119_v26 = vpop.xlane.xlu0 %4118 }
0x1f55   : > { %6043 = vrcp.f32 %v4119_v26 }
0x1f58   : > { %v4123_v27 = vpop.permute.xlu0 %4122 }
0x1f59   : > { %5821 = vmatpush3.msra.mxu1 %v4123_v27 }
0x1f5a   : > { %5830 = vmatprep.subr.mxu1 %v6071_v20 }
0x1f5f   : > { %v6044_v28 = vpop.eup %6043 }
0x1f60   : > { %v4121_v30 = vmul.f32 %v6044_v28, %v6042_v22 }
0x1f62   : > { %5823 = vmatmul.mubr.msk.f32.vlgmr.msra.gmra.mrb[38].mxu1 %vm924_vm2, %v4121_v30 }
0x1f63   : > { %5831 = vmatpush3.xpose.msk.msra.mxu1 %vm924_vm2, %v4276_v29  ;;  %5832 = vmatprep.mubr.msk.f32.mxu1 %vm6072_vm1, %v6071_v20 }
0x1f64   : > { %5840 = vmatprep.subr.mxu1 %v6071_v20 }
0x1f66   : > { %5833 = vmatmul.mubr.msk.f32.vlgmr.msra.gmra.mrb[40].mxu1 %vm924_vm2, %v4274_v31 }
0x1f67   : > { %5842 = vmatprep.mubr.msk.f32.mxu1 %vm6072_vm1, %v6071_v20  ;;  %5841 = vmatpush3.msra.mxu1 %v4440_v62  ;;  %v5039_v62 = vld [vmem:[%s6998_s20 + $0x10] sm:$0xff] }
0x1f68   : > { %5850 = vmatprep.subr.mxu1 %v6071_v20 }
0x2035   : > { %v4194_v33 = vpop.f32.mrb[38].mxu1 }
0x2036   : > { %v5824_v34 = vpop.f32.mrb[39].mxu1  ;;  %5828 = vmatmul.mubr.msk.f32.vlgmr.msra.gmra.mrb[42].mxu0 %vm924_vm2, %v4194_v33 }
0x2037   : > { %5837 = vmatprep.mubr.msk.f32.mxu0 %vm6072_vm1, %v6071_v20 }
0x2039   : > { %v4347_v35 = vpop.f32.mrb[40].mxu1 }
0x203a   : > { %v4351_v36 = vmul.f32 0.35355338, %v4347_v35  ;;  %v5834_v38 = vpop.f32.mrb[41].mxu1 }
0x203c   : > { %v4352_v56 = vadd.f32 %v4351_v36, %v6619_v45 }
0x203e   : > { %v4353_v39 = vsel %vm924_vm2, %v4352_v56, -inf }
0x203f   : > { %4354 = vmax.xlane.f32.xlu0 %v4353_v39 }
0x2055   : > { %4364 = vrot.lane.b32.xlu0 %v6592_v37, %s7056_s7 }
0x2059   : > { %4515 = vrot.lane.b32.xlu0 %v6602_v40, %s7057_s3 }
0x20cc   : > { %v4355_v41 = vpop.xlane.xlu0 %4354 }
0x20cd   : > { %v4356_v44 = vsub.f32 %v4352_v56, %v4355_v41 }
0x20cf   : > { %v4357_v53 = vmul.f32 1.442695, %v4356_v44  ;;  %v5441_v44 = vld [vmem:[%s6995_s17] ss:$0 sm:$0xff] }
0x20d0   : > { %v4365_v46 = vpop.permute.xlu0 %4364 }
0x20d1   : > { %6045 = vpow2.f32 %v4357_v53  ;;  %5836 = vmatpush3.msra.mxu0 %v4365_v46 }
0x20d2   : > { %5845 = vmatprep.subr.mxu0 %v6071_v20 }
0x20d4   : > { %v4516_v61 = vpop.permute.xlu0 %4515 }
0x20db   : > { %v6046_v48 = vpop.eup %6045 }
0x20dc   : > { %v4359_v50 = vsel %vm924_vm2, %v6046_v48, 0.0 }
0x20dd   : > { %4360 = vadd.xlane.f32.xlu1 %v4359_v50 }
0x20ee   : > { %4517 = vrot.lane.b32.xlu1 %v6592_v37, %s7057_s3 }
0x2109   : > { %v4268_v51 = vpop.f32.mrb[42].mxu0 }
0x210a   : > { %v4272_v52 = vadd.f32 %v4268_v51, %v4030_v25  ;;  %v5829_v54 = vpop.f32.mrb[43].mxu0 }
0x216a   : > { %v4361_v55 = vpop.xlane.xlu1 %4360 }
0x216b   : > { %6047 = vrcp.f32 %v4361_v55 }
0x216e   : > { %v4518_v60 = vpop.permute.xlu1 %4517 }
0x2175   : > { %v6048_v58 = vpop.eup %6047 }
0x2176   : > { %v4363_v59 = vmul.f32 %v6048_v58, %v6046_v48 }
0x2178   : > { %5838 = vmatmul.mubr.msk.f32.vlgmr.msra.gmra.mrb[44].mxu0 %vm924_vm2, %v4363_v59  ;;  %v5038_v59 = vld [vmem:[%s6998_s20 + $0x8] sm:$0xff] }
0x2179   : > { %5846 = vmatpush3.xpose.msk.msra.mxu0 %vm924_vm2, %v4518_v60  ;;  %5847 = vmatprep.mubr.msk.f32.mxu0 %vm6072_vm1, %v6071_v20 }
0x217a   : > { %5855 = vmatprep.subr.mxu0 %v6071_v20 }
0x217c   : > { %5848 = vmatmul.mubr.msk.f32.vlgmr.msra.gmra.mrb[46].mxu0 %vm924_vm2, %v4516_v61  ;;  %v5037_v61 = vld [vmem:[%s6998_s20] sm:$0xff] }
0x217d   : > { %5857 = vmatprep.mubr.msk.f32.mxu0 %vm6072_vm1, %v6071_v20  ;;  %5856 = vmatpush3.msra.mxu0 %v4682_v19  ;;  %v5157_v19 = vld [vmem:[%s7000_s22] sm:$0xff] }
0x217e   : > { %5865 = vmatprep.subr.mxu0 %v6071_v20 }
0x224b   : > { %v4436_v63 = vpop.f32.mrb[44].mxu0 }
0x224c   : > { %v5839_v1 = vpop.f32.mrb[45].mxu0  ;;  %5843 = vmatmul.mubr.msk.f32.vlgmr.msra.gmra.mrb[42].mxu1 %vm924_vm2, %v4436_v63  ;;  %v5917_v63 = vpack.c.bf16 %v5039_v62, %v5037_v61  ;;  %v5184_v61 = vld [vmem:[%s7000_s22 + $0xd8] sm:$0xff] }
0x224d   : > { %5852 = vmatprep.mubr.msk.f32.mxu1 %vm6072_vm1, %v6071_v20  ;;  %v5042_v1 = vld [vmem:[%s6998_s20 + $0x28] sm:$0xff] }
0x224f   : > { %v4589_v0 = vpop.f32.mrb[46].mxu0 }
0x2250   : > { %v4593_v2 = vmul.f32 0.35355338, %v4589_v0  ;;  %v5849_v3 = vpop.f32.mrb[47].mxu0  ;;  %v5044_v0 = vld [vmem:[%s6998_s20 + $0x38] sm:$0xff] }
0x2251   : > { %v5041_v3 = vld [vmem:[%s6998_s20 + $0x20] sm:$0xff] }
0x2252   : > { %v4594_v4 = vadd.f32 %v4593_v2, %v6619_v45  ;;  %v5919_v2 = vpack.c.bf16 %v5044_v0, %v5042_v1  ;;  %v5167_v1 = vld [vmem:[%s7000_s22 + $0x50] sm:$0xff]  ;;  %v5168_v0 = vld [vmem:[%s7000_s22 + $0x58] sm:$0xff] }
0x2254   : > { %v4595_v5 = vsel %vm924_vm2, %v4594_v4, -inf }
0x2255   : > { %4596 = vmax.xlane.f32.xlu1 %v4595_v5 }
0x2266   : > { %4759 = vrot.lane.b32.xlu1 %v6592_v37, %s7058_s4 }
0x226a   : > { %4757 = vrot.lane.b32.xlu1 %v6602_v40, %s7058_s4 }
0x22e2   : > { %v4597_v6 = vpop.xlane.xlu1 %4596 }
0x22e3   : > { %v4598_v7 = vsub.f32 %v4594_v4, %v4597_v6  ;;  %v5043_v4 = vld [vmem:[%s6998_s20 + $0x30] sm:$0xff]  ;;  %v5046_v6 = vld [vmem:[%s6998_s20 + $0x48] sm:$0xff] }
0x22e4   : > { %v5921_v5 = vpack.c.bf16 %v5043_v4, %v5041_v3  ;;  %v5186_v3 = vld [vmem:[%s7000_s22 + $0xe8] sm:$0xff]  ;;  %v5953_v4 = vpack.c.bf16 %v5168_v0, %v5167_v1 }
0x22e5   : > { %v4599_v8 = vmul.f32 1.442695, %v4598_v7  ;;  %v5048_v7 = vld [vmem:[%s6998_s20 + $0x58] sm:$0xff] }
0x22e6   : > { %v4760_v16 = vpop.permute.xlu1 %4759 }
0x22e7   : > { %6049 = vpow2.f32 %v4599_v8  ;;  %v5923_v8 = vpack.c.bf16 %v5048_v7, %v5046_v6  ;;  %v5169_v6 = vld [vmem:[%s7000_s22 + $0x60] sm:$0xff]  ;;  %v5170_v7 = vld [vmem:[%s7000_s22 + $0x68] sm:$0xff] }
0x22ea   : > { %v4758_v18 = vpop.permute.xlu1 %4757 }
0x22f1   : > { %v6050_v9 = vpop.eup %6049 }
0x22f2   : > { %v4601_v10 = vsel %vm924_vm2, %v6050_v9, 0.0 }
0x22f3   : > { %4602 = vadd.xlane.f32.xlu0 %v4601_v10  ;;  %v5047_v10 = vld [vmem:[%s6998_s20 + $0x50] sm:$0xff] }
0x2309   : > { %4606 = vrot.lane.b32.xlu0 %v6592_v37, %s7059_s26 }
0x231f   : > { %v4510_v11 = vpop.f32.mrb[42].mxu1 }
0x2320   : > { %v4514_v12 = vadd.f32 %v4510_v11, %v4272_v52  ;;  %v5844_v13 = vpop.f32.mrb[43].mxu1 }
0x2321   : > { %v5052_v13 = vld [vmem:[%s6998_s20 + $0x78] sm:$0xff] }
0x2380   : > { %v4603_v14 = vpop.xlane.xlu0 %4602 }
0x2381   : > { %6051 = vrcp.f32 %v4603_v14 }
0x2384   : > { %v4607_v15 = vpop.permute.xlu0 %4606 }
0x2385   : > { %5851 = vmatpush3.msra.mxu1 %v4607_v15  ;;  %v5049_v15 = vld [vmem:[%s6998_s20 + $0x60] sm:$0xff] }
0x2386   : > { %5860 = vmatprep.subr.mxu1 %v6071_v20 }
0x238b   : > { %v6052_v40 = vpop.eup %6051 }
0x238c   : > { %v4605_v17 = vmul.f32 %v6052_v40, %v6050_v9  ;;  %v5045_v9 = vld [vmem:[%s6998_s20 + $0x40] sm:$0xff]  ;;  %v5051_v40 = vld [vmem:[%s6998_s20 + $0x70] sm:$0xff] }
0x238d   : > { %v5925_v11 = vpack.c.bf16 %v5047_v10, %v5045_v9  ;;  %v5188_v9 = vld [vmem:[%s7000_s22 + $0xf8] sm:$0xff]  ;;  %v5957_v10 = vpack.c.bf16 %v5170_v7, %v5169_v6 }
0x238e   : > { %5853 = vmatmul.mubr.msk.f32.vlgmr.msra.gmra.mrb[44].mxu1 %vm924_vm2, %v4605_v17  ;;  %v5173_v17 = vld [vmem:[%s7000_s22 + $0x80] sm:$0xff] }
0x238f   : > { %5861 = vmatpush3.xpose.msk.msra.mxu1 %vm924_vm2, %v4760_v16  ;;  %5862 = vmatprep.mubr.msk.f32.mxu1 %vm6072_vm1, %v6071_v20  ;;  %v5929_v16 = vpack.c.bf16 %v5051_v40, %v5049_v15  ;;  %v5053_v15 = vld [vmem:[%s6999_s21] sm:$0x3] }
0x2390   : > { %5870 = vmatprep.subr.mxu1 %v6071_v20  ;;  %v5058_v40 = vrot.slane %v5053_v15, %v839_v43 }
0x2392   : > { %5863 = vmatmul.mubr.msk.f32.vlgmr.msra.gmra.mrb[46].mxu1 %vm924_vm2, %v4758_v18  ;;  %v5174_v18 = vld [vmem:[%s7000_s22 + $0x88] sm:$0xff] }
0x2393   : > { %5872 = vmatprep.mubr.msk.f32.mxu1 %vm6072_vm1, %v6071_v20 }
0x2461   : > { %v4678_v21 = vpop.f32.mrb[44].mxu1 }
0x2462   : > { %v5854_v22 = vpop.f32.mrb[45].mxu1  ;;  %5858 = vmatmul.mubr.msk.f32.vlgmr.msra.gmra.mrb[48].mxu0 %vm924_vm2, %v4678_v21  ;;  %v5931_v21 = vpack.c.bf16 %v5174_v18, %v5173_v17 }
0x2463   : > { %5867 = vmatprep.mubr.msk.f32.mxu0 %vm6072_vm1, %v6071_v20  ;;  %v5158_v22 = vld [vmem:[%s7000_s22 + $0x8] sm:$0xff] }
0x2465   : > { %v4831_v23 = vpop.f32.mrb[46].mxu1 }
0x2466   : > { %v4835_v24 = vmul.f32 0.35355338, %v4831_v23  ;;  %v5864_v25 = vpop.f32.mrb[47].mxu1  ;;  %v5933_v23 = vpack.c.bf16 %v5158_v22, %v5157_v19 }
0x2468   : > { %v4836_v47 = vadd.f32 %v4835_v24, %v6619_v45  ;;  %v4924_v45 = vld [vmem:[%s6994_s16 + $0x38] sm:$0xff] }
0x2469   : > { %5871 = vmatpush3.msra.mxu1 %v4924_v45  ;;  %v5176_v45 = vld [vmem:[%s7000_s22 + $0x98] sm:$0xff] }
0x246a   : > { %v4837_v26 = vsel %vm924_vm2, %v4836_v47, -inf  ;;  %5932 = vmatprep.subr.bf16.mxu1 %v5931_v21 }
0x246b   : > { %4838 = vmax.xlane.f32.xlu0 %v4837_v26 }
0x2481   : > { %4848 = vrot.lane.b32.xlu0 %v6592_v37, %s7060_s2 }
0x24f8   : > { %v4839_v27 = vpop.xlane.xlu0 %4838 }
0x24f9   : > { %v4840_v28 = vsub.f32 %v4836_v47, %v4839_v27  ;;  %v5442_v27 = vld [vmem:[%s6996_s18] ss:$0 sm:$0xff] }
0x24fb   : > { %v4841_v29 = vmul.f32 1.442695, %v4840_v28 }
0x24fc   : > { %v4849_v30 = vpop.permute.xlu0 %4848 }
0x24fd   : > { %6053 = vpow2.f32 %v4841_v29  ;;  %5866 = vmatpush3.msra.mxu0 %v4849_v30  ;;  %v5443_v29 = vld [vmem:[%s6997_s19] ss:$0 sm:$0xff] }
0x2507   : > { %v6054_v31 = vpop.eup %6053 }
0x2508   : > { %v4843_v32 = vsel %vm924_vm2, %v6054_v31, 0.0 }
0x2509   : > { %4844 = vadd.xlane.f32.xlu1 %v4843_v32  ;;  %v5175_v32 = vld [vmem:[%s7000_s22 + $0x90] sm:$0xff] }
0x2535   : > { %v4752_v33 = vpop.f32.mrb[48].mxu0 }
0x2536   : > { %v4756_v34 = vadd.f32 %v4752_v33, %v4514_v12  ;;  %v5859_v35 = vpop.f32.mrb[49].mxu0  ;;  %v5050_v12 = vld [vmem:[%s6998_s20 + $0x68] sm:$0xff]  ;;  %v5935_v33 = vpack.c.bf16 %v5176_v45, %v5175_v32 }
0x2537   : > { %v5927_v14 = vpack.c.bf16 %v5052_v13, %v5050_v12  ;;  %v5160_v35 = vld [vmem:[%s7000_s22 + $0x18] sm:$0xff]  ;;  %v5171_v12 = vld [vmem:[%s7000_s22 + $0x70] sm:$0xff] }
0x2538   : > { %v5172_v13 = vld [vmem:[%s7000_s22 + $0x78] sm:$0xff] }
0x2596   : > { %v4845_v36 = vpop.xlane.xlu1 %4844 }
0x2597   : > { %6055 = vrcp.f32 %v4845_v36 }
0x25a1   : > { %v6056_v37 = vpop.eup %6055 }
0x25a2   : > { %v4847_v38 = vmul.f32 %v6056_v37, %v6054_v31  ;;  %v5177_v37 = vld [vmem:[%s7000_s22 + $0xa0] sm:$0xff] }
0x25a4   : > { %5868 = vmatmul.mubr.msk.f32.vlgmr.msra.gmra.mrb[50].mxu0 %vm924_vm2, %v4847_v38  ;;  %v5178_v38 = vld [vmem:[%s7000_s22 + $0xa8] sm:$0xff] }
0x25a5   : > { %5132 = vmatprep.mubr.f32.mxu0 %v6071_v20 }
0x2677   : > { %v4920_v56 = vpop.f32.mrb[50].mxu0 }
0x2678   : > { %v5869_v39 = vpop.f32.mrb[51].mxu0  ;;  %5873 = vmatmul.mubr.msk.f32.vlgmr.msra.gmra.mrb[48].mxu1 %vm924_vm2, %v4920_v56  ;;  %v5939_v56 = vpack.c.bf16 %v5178_v38, %v5177_v37 }
0x2679   : > { %5934 = vmatpush3.bf16.msra.mxu1 %v5933_v23  ;;  %v5161_v39 = vld [vmem:[%s7000_s22 + $0x20] sm:$0xff] }
0x267a   : > { %5936 = vmatprep.subr.bf16.mxu1 %v5935_v33 }
0x274b   : > { %v4994_v41 = vpop.f32.mrb[48].mxu1 }
0x274c   : > { %v4998_v53 = vadd.f32 %v4994_v41, %v4756_v34  ;;  %v5874_v46 = vpop.f32.mrb[49].mxu1  ;;  %v5159_v34 = vld [vmem:[%s7000_s22 + $0x10] sm:$0xff]  ;;  %v5162_v41 = vld [vmem:[%s7000_s22 + $0x28] sm:$0xff] }
0x274d   : > { %v5937_v36 = vpack.c.bf16 %v5160_v35, %v5159_v34  ;;  %v5180_v46 = vld [vmem:[%s7000_s22 + $0xb8] sm:$0xff] }
0x274e   : > { %v5006_v48 = vadd.f32 %v5441_v44, %v4998_v53  ;;  %v5941_v44 = vpack.c.bf16 %v5162_v41, %v5161_v39  ;;  %v5179_v53 = vld [vmem:[%s7000_s22 + $0xb0] sm:$0xff] }
0x274f   : > { %5938 = vmatpush3.bf16.msra.mxu1 %v5937_v36  ;;  %v5445_v36 = vld [vmem:[%s7001_s23] ss:$0 sm:$0xff] }
0x2750   : > { %v6802_v50 = vadd.f32 %v5006_v48, %v6517_v57  ;;  %v5040_v57 = vld [vmem:[%s6998_s20 + $0x18] sm:$0xff]  ;;  %5940 = vmatprep.subr.bf16.mxu1 %v5939_v56  ;;  %v5943_v48 = vpack.c.bf16 %v5180_v46, %v5179_v53 }
0x2751   : > { %v5915_v60 = vpack.c.bf16 %v5040_v57, %v5038_v59  ;;  %v5166_v59 = vld [vmem:[%s7000_s22 + $0x48] sm:$0xff] }
0x2752   : > { %v5008_v51 = vsel %vm788_vm0, %v6802_v50, 0.0 }
0x2753   : > { %5009 = vadd.xlane.f32.xlu1 %v5008_v51  ;;  %5916 = vmatprep.subr.bf16.mxu0 %v5915_v60  ;;  %v5163_v51 = vld [vmem:[%s7000_s22 + $0x30] sm:$0xff] }
0x2754   : > { %5918 = vmatpush1.bf16.msra.mxu0 %v5917_v63  ;;  %5942 = vmatpush3.bf16.msra.mxu1 %v5941_v44  ;;  %v5183_v60 = vld [vmem:[%s7000_s22 + $0xd0] sm:$0xff] }
0x2755   : > { %5920 = vmatprep.subr.bf16.mxu0 %v5919_v2  ;;  %5944 = vmatprep.subr.bf16.mxu1 %v5943_v48  ;;  %v5951_v63 = vpack.c.bf16 %v5184_v61, %v5183_v60  ;;  %v5185_v2 = vld [vmem:[%s7000_s22 + $0xe0] sm:$0xff] }
0x2758   : > { %5922 = vmatpush1.bf16.msra.mxu0 %v5921_v5  ;;  %v5955_v5 = vpack.c.bf16 %v5186_v3, %v5185_v2 }
0x2759   : > { %5924 = vmatprep.subr.bf16.mxu0 %v5923_v8  ;;  %v5187_v8 = vld [vmem:[%s7000_s22 + $0xf0] sm:$0xff] }
0x275c   : > { %5926 = vmatpush1.bf16.msra.mxu0 %v5925_v11  ;;  %v5959_v11 = vpack.c.bf16 %v5188_v9, %v5187_v8 }
0x275d   : > { %5928 = vmatprep.subr.bf16.mxu0 %v5927_v14  ;;  %v5961_v14 = vpack.c.bf16 %v5172_v13, %v5171_v12 }
0x2760   : > { %5930 = vmatpush1.bf16.msra.mxu0 %v5929_v16  ;;  %v5062_v16 = vrot.slane %v5053_v15, %v843_v49 }
0x27e0   : > { %v5010_v20 = vpop.xlane.xlu1 %5009 }
0x27e1   : > { %v5011_v52 = vmul.f32 0.015625, %v5010_v20  ;;  %v5164_v20 = vld [vmem:[%s7000_s22 + $0x38] sm:$0xff] }
0x27e3   : > { %v5012_v54 = vsub.f32 %v6802_v50, %v5011_v52  ;;  %v5181_v52 = vld [vmem:[%s7000_s22 + $0xc0] sm:$0xff] }
0x27e5   : > { %v5013_v55 = vmul.f32 %v5012_v54, %v5012_v54 }
0x27e7   : > { %v5014_v58 = vsel %vm788_vm0, %v5013_v55, 0.0  ;;  %v5182_v55 = vld [vmem:[%s7000_s22 + $0xc8] sm:$0xff] }
0x27e8   : > { %5015 = vadd.xlane.f32.xlu1 %v5014_v58  ;;  %v5165_v58 = vld [vmem:[%s7000_s22 + $0x40] sm:$0xff]  ;;  %v5947_v57 = vpack.c.bf16 %v5182_v55, %v5181_v52 }
0x27e9   : > { %v5949_v62 = vpack.c.bf16 %v5166_v59, %v5165_v58 }
0x2875   : > { %v5016_v24 = vpop.xlane.xlu1 %5015 }
0x2876   : > { %v5017_v25 = vmul.f32 0.015625, %v5016_v24 }
0x2878   : > { %v5018_v47 = vadd.f32 1e-06, %v5017_v25 }
0x287a   : > { %6057 = vrsqrt.f32 %v5018_v47 }
0x2884   : > { %v6058_v26 = vpop.eup %6057 }
0x2885   : > { %v5020_v28 = vmul.f32 %v6058_v26, %v5012_v54  ;;  %v5945_v54 = vpack.c.bf16 %v5164_v20, %v5163_v51 }
0x2887   : > { %v5028_v30 = vmul.f32 %v5442_v27, %v5020_v28  ;;  %5946 = vmatpush3.bf16.msra.mxu1 %v5945_v54 }
0x2888   : > { %5948 = vmatprep.subr.bf16.mxu1 %v5947_v57 }
0x2889   : > { %v5036_v31 = vadd.f32 %v5443_v29, %v5028_v30 }
0x288b   : > { %5444 = vmatmul.mubr.msk.f32.vlgmr.msra.gmra.mrb[52].mxu0 %vm788_vm0, %v5036_v31  ;;  %5950 = vmatpush3.bf16.msra.mxu1 %v5949_v62 }
0x288c   : > { %5952 = vmatprep.subr.bf16.mxu1 %v5951_v63 }
0x288f   : > { %5954 = vmatpush3.bf16.msra.mxu1 %v5953_v4 }
0x2890   : > { %5956 = vmatprep.subr.bf16.mxu1 %v5955_v5 }
0x2893   : > { %5958 = vmatpush3.bf16.msra.mxu1 %v5957_v10 }
0x2894   : > { %5960 = vmatprep.subr.bf16.mxu1 %v5959_v11 }
0x2897   : > { %5962 = vmatpush3.bf16.msra.mxu1 %v5961_v14 }
0x295e   : > { %v5134_v17 = vpop.f32.mrb[52].mxu0 }
0x295f   : > { %v5135_v18 = vadd.f32 %v5134_v17, %v5058_v40  ;;  %v5136_v19 = vpop.f32.mrb[53].mxu0 }
0x2960   : > { %v5137_v21 = vadd.f32 %v5136_v19, %v5062_v16 }
0x2961   : > { %v5141_v22 = vmul.f32 0.044715, %v5135_v18  ;;  %v5139_v45 = vmul.f32 0.5, %v5135_v18 }
0x2962   : > { %v5142_v23 = vmul.f32 0.044715, %v5137_v21  ;;  %v5140_v31 = vmul.f32 0.5, %v5137_v21 }
0x2963   : > { %v5143_v24 = vmul.f32 %v5141_v22, %v5135_v18 }
0x2964   : > { %v5144_v25 = vmul.f32 %v5142_v23, %v5137_v21 }
0x2965   : > { %v5145_v47 = vmul.f32 %v5143_v24, %v5135_v18 }
0x2966   : > { %v5146_v26 = vmul.f32 %v5144_v25, %v5137_v21 }
0x2967   : > { %v5147_v27 = vadd.f32 %v5145_v47, %v5135_v18 }
0x2968   : > { %v5148_v28 = vadd.f32 %v5146_v26, %v5137_v21 }
0x2969   : > { %v5149_v29 = vmul.f32 0.7978846, %v5147_v27 }
0x296a   : > { %v5150_v30 = vmul.f32 0.7978846, %v5148_v28 }
0x296b   : > { %6059 = vtanh.f32 %v5149_v29 }
0x296c   : > { %6061 = vtanh.f32 %v5150_v30 }
0x2975   : > { %v6060_v43 = vpop.eup %6059 }
0x2976   : > { %v6062_v42 = vpop.eup %6061  ;;  %v5153_v49 = vadd.f32 1.0, %v6060_v43 }
0x2977   : > { %v5154_v32 = vadd.f32 1.0, %v6062_v42 }
0x2978   : > { %v5155_v34 = vmul.f32 %v5153_v49, %v5139_v45 }
0x2979   : > { %v5156_v33 = vmul.f32 %v5154_v32, %v5140_v31 }
0x297b   : > { %5260 = vmatprep.mubr.f32.mxu1 %v5156_v33 }
0x297c   : > { %5261 = vmatmul.mubr.f32.vlgmr.msra.gmra.mrb[50].mxu1 %v5155_v34 }
0x2a4f   : > { %v5594_v35 = vpop.f32.mrb[50].mxu1 }
0x2a50   : > { %v5595_v37 = vpop.f32.mrb[51].mxu1 }
0x2a51   : > { %v5596_v38 = vadd.f32 %v5595_v37, %v5594_v35 }
0x2a53   : > { %v5263_v56 = vadd.f32 %v5596_v38, %v5445_v36 }
0x2a55   : > { %v5266_v39 = vadd.f32 %v5263_v56, %v6802_v50 }
0x2a57   : > { %5267 = vst.msk [vmem:[%s783_s28] sm:$0xff] %vm788_vm0, %v5266_v39 }
0x2a58 PF: > { %s34_s5 = sadd.s32 1, %s6069_s5  }
0x2a59   : > { %p31_p4 = scmp.ge.s32.totalorder %s34_s5, 4  }
0x2a5b   :  { %33 = sbr.rel (!%p31_p4) target bundleno = 10 (0xa), region = 155 }

// kernel: decoder_layer_forward.3
= control target key start
LH: loop header
LB: loop body
LE: loop exit
PB: predicated region body
PF: predicated region fallthrough
CT: control target
= control target key end

     0   :  { %s8189_s0 = inlined_call_operand.hbm [shape: f32[2,8,64], index: 0, kind: input, shape index: {}]   ;;  %s8190_s1 = inlined_call_operand.vmem [shape: f32[2,8,64], index: 1, kind: input, shape index: {}]   ;;  %s8191_s2 = inlined_call_operand.vmem [shape: f32[2,8,8], index: 2, kind: input, shape index: {}]   ;;  %s8192_s3 = inlined_call_operand.vmem [shape: f32[2,8,8], index: 3, kind: input, shape index: {}]   ;;  %s8193_s4 = inlined_call_operand.vmem [shape: f32[1,64], index: 4, kind: input, shape index: {}]   ;;  %s8194_s5 = inlined_call_operand.hbm [shape: f32[1,64], index: 5, kind: input, shape index: {}]   ;;  %s8195_s6 = inlined_call_operand.vmem [shape: f32[64,192], index: 6, kind: input, shape index: {}]   ;;  %s8196_s7 = inlined_call_operand.vmem [shape: f32[1,192], index: 7, kind: input, shape index: {}]   ;;  %s8197_s8 = inlined_call_operand.vmem [shape: f32[64,64], index: 8, kind: input, shape index: {}]   ;;  %s8198_s9 = inlined_call_operand.hbm [shape: f32[1,64], index: 9, kind: input, shape index: {}]   ;;  %s8199_s10 = inlined_call_operand.hbm [shape: f32[1,64], index: 10, kind: input, shape index: {}]   ;;  %s8200_s11 = inlined_call_operand.hbm [shape: f32[1,64], index: 11, kind: input, shape index: {}]   ;;  %s8201_s12 = inlined_call_operand.vmem [shape: f32[64,64], index: 12, kind: input, shape index: {}]   ;;  %s8202_s13 = inlined_call_operand.hbm [shape: f32[1,64], index: 13, kind: input, shape index: {}]   ;;  %s8203_s14 = inlined_call_operand.hbm [shape: f32[64,128], index: 14, kind: input, shape index: {}]   ;;  %s8204_s15 = inlined_call_operand.hbm [shape: f32[1,128], index: 15, kind: input, shape index: {}]   ;;  %s8205_s16 = inlined_call_operand.hbm [shape: f32[64,64], index: 16, kind: input, shape index: {}]   ;;  %s8206_s17 = inlined_call_operand.hbm [shape: f32[1,64], index: 17, kind: input, shape index: {}]   ;;  %s8207_s18 = inlined_call_operand.hbm [shape: f32[1,64], index: 18, kind: input, shape index: {}]   ;;  %s8208_s19 = inlined_call_operand.hbm [shape: f32[1,64], index: 19, kind: input, shape index: {}]   ;;  %s8209_s20 = inlined_call_operand.vmem [shape: f32[64,256], index: 20, kind: input, shape index: {}]   ;;  %s8210_s21 = inlined_call_operand.vmem [shape: f32[1,256], index: 21, kind: input, shape index: {}]   ;;  %s8211_s22 = inlined_call_operand.vmem [shape: f32[256,64], index: 22, kind: input, shape index: {}]   ;;  %s8212_s23 = inlined_call_operand.hbm [shape: f32[1,64], index: 23, kind: input, shape index: {}]   ;;  %s8213_s24 = inlined_call_operand.vmem [shape: f32[2,8,64], index: 24, kind: output, shape index: {}]  }
   0x1   :  { %8246 = sst [smem:[#allocation31_spill]] %s8189_s0 }
   0x2   :  { %8247 = sst [smem:[#allocation32_spill]] %s8190_s1 }
   0x3   :  { %8248 = sst [smem:[#allocation33_spill]] %s8191_s2 }
   0x4   :  { %8249 = sst [smem:[#allocation34_spill]] %s8192_s3 }
   0x5   :  { %8250 = sst [smem:[#allocation35_spill]] %s8193_s4 }
   0x6   :  { %8251 = sst [smem:[#allocation36_spill]] %s8194_s5 }
   0x7   :  { %8252 = sst [smem:[#allocation37_spill]] %s8195_s6 }
   0x8   :  { %8253 = sst [smem:[#allocation38_spill]] %s8196_s7 }
   0x9   :  { %8254 = sst [smem:[#allocation39_spill]] %s8197_s8 }
   0xa   :  { %8255 = sst [smem:[#allocation40_spill]] %s8198_s9 }
   0xb   :  { %8256 = sst [smem:[#allocation41_spill]] %s8199_s10 }
   0xc   :  { %8257 = sst [smem:[#allocation42_spill]] %s8200_s11 }
   0xd   :  { %8258 = sst [smem:[#allocation43_spill]] %s8201_s12 }
   0xe   :  { %8259 = sst [smem:[#allocation44_spill]] %s8209_s20 }
   0xf   :  { %8260 = sst [smem:[#allocation45_spill]] %s8210_s21 }
  0x10   :  { %8261 = sst [smem:[#allocation46_spill]] %s8211_s22 }
  0x11   :  { %8262 = sst [smem:[#allocation47_spill]] %s8213_s24 }
  0x12   :  { %29 = vsyncpa [#allocation3], 0 }
  0x13   :  { %31 = vsyncpa [#allocation3 + $0x1], 0 }
  0x14   :  { %32 = vsyncpa [#allocation5], 0 }
  0x15   :  { %33 = vsyncpa [#allocation8], 0 }
  0x16   :  { %34 = vsyncpa [#allocation11], 0 }
  0x17   :  { %35 = vsyncpa [#allocation14], 0 }
  0x18   :  { %36 = vsyncpa [#allocation17], 0 }
  0x19   :  { %37 = vsyncpa [#allocation20], 0  ;;  %s7126_s5 = smov 0   ;;  %s7128_s26 = smov 0  }
  0x1a   :  { %s7130_s27 = smov 0   ;;  %s7132_s28 = smov 0  }
  0x1b LB: > { %s6968_s6 = smov [#allocation4]   ;;  %s7147_s29 = sadd.s32 4294967295, %s6966_s28   ;;  %s6966_s28 = sphi %s7132_s28, %s8321_s28   ;;  %s6962_s27 = sphi %s7130_s27, %s8320_s27   ;;  %s6958_s26 = sphi %s7128_s26, %s8319_s26   ;;  %s6954_s5 = sphi %s7126_s5, %s8318_s5  }
  0x1c   : > { %s614_s2 = sshll.u32 %s6968_s6, 4  ;;  %8263 = sst [smem:[#allocation29_spill]] %s7147_s29  ;;  %s7152_s2 = int_to_ptr.vmem [resolvable:$true] %s614_s2 }
  0x1d   : > { %p5658_p0 = scmp.ge.s32.totalorder %s6966_s28, 1  ;;  %p8224_p1 = scmp.eq.s32.totalorder %s7147_s29, 0 }
  0x1e   : > { %p598_p2 = scmp.lt.s32.totalorder %s6966_s28, 3  ;;  %s6969_s7 = smov [#allocation7]  }
  0x1f   : > { %s645_s30 = sshll.u32 %s6969_s7, 4  ;;  %s6970_s3 = smov [#allocation10]   ;;  %s7160_s30 = int_to_ptr.vmem [resolvable:$true] %s645_s30 }
  0x20   : > { %p7154_p3 = pnand %p5658_p0, %p598_p2  ;;  %s670_s25 = sshll.u32 %s6970_s3, 4  ;;  %s7168_s25 = int_to_ptr.vmem [resolvable:$true] %s670_s25 }
  0x21   : > { %s6971_s4 = smov [#allocation13]   ;;  %s8267_s21 = sld [smem:[#allocation36_spill]] }
  0x22   : > { %s8264_s0 = scalar_select %p7154_p3, 1, 0 }
  0x23   : > { %p6338_p4 = pneg %p7154_p3  ;;  %s7170_s1 = sshll.u32 %s6971_s4, 4  ;;  %s695_s1 = int_to_ptr.vmem [resolvable:$true] %s7170_s1 }
  0x24   : > { %8265 = sst [smem:[#allocation30_spill]] %s8264_s0 }
  0x25   : > { %p7164_p5 = pnand %p6338_p4, %p8224_p1 }
  0x27   : > { %s6542_s22 = scalar_lea.hbm %s8267_s21, 16  ;;  %p7180_p7 = pneg %p7164_p5 }
  0x28   : > { %p6543_p6 = scmp.ne.s32.totalorder %s8267_s21, %s6542_s22  ;;  %p6549_p10 = scmp.lt.u32.totalorder %s6542_s22, %s8267_s21 }
  0x2a   : > { %p6545_p8 = pnand %p7180_p7, %p6543_p6 }
  0x2c   : > { %p6546_p9 = pneg %p6545_p8 }
  0x2e   : > { %p6551_p11 = pnand %p6549_p10, %p6546_p9 }
  0x30   : > { %6554 = shalt.err (!%p6551_p11)
}
  0x31   : > { %s6555_s20 = scalar_lea.vmem %s7152_s2, 16  ;;  %s6562_s24 = scalar_lea.vmem %s7152_s2, 32 }
  0x32   : > { %p6556_p12 = scmp.ne.s32.totalorder %s7152_s2, %s6555_s20  ;;  %p6563_p2 = scmp.lt.s32.totalorder %s7152_s2, %s7152_s2 }
  0x33   : > { %p6564_p4 = scmp.lt.s32.totalorder %s6562_s24, %s6555_s20 }
  0x34   : > { %p6558_p13 = pnand %p6556_p12, %p7180_p7 }
  0x35   : > { %p6565_p6 = por %p6564_p4, %p6563_p2 }
  0x36   : > { %p6559_p0 = pneg %p6558_p13 }
  0x38   : > { %p6566_p8 = pnand %p6565_p6, %p6559_p0 }
  0x3a   : > { %6569 = shalt.err (!%p6566_p8)
}
  0x3b   : > { %6341 = dma.hbm_to_vmem [thread:$0]  (!%p7164_p5), %s8267_s21, 16, %s7152_s2, [#allocation5]  }
  0x3c   : > { %s8269_s10 = sld [smem:[#allocation41_spill]] }
  0x42   : > { %s6570_s4 = scalar_lea.hbm %s8269_s10, 16 }
  0x43   : > { %p6571_p9 = scmp.ne.s32.totalorder %s8269_s10, %s6570_s4  ;;  %p6577_p12 = scmp.lt.u32.totalorder %s6570_s4, %s8269_s10 }
  0x45   : > { %p6573_p10 = pnand %p6571_p9, %p7180_p7 }
  0x47   : > { %p6574_p11 = pneg %p6573_p10 }
  0x49   : > { %p6579_p13 = pnand %p6577_p12, %p6574_p11 }
  0x4b   : > { %6582 = shalt.err (!%p6579_p13)
}
  0x4c   : > { %s6583_s2 = scalar_lea.vmem %s7160_s30, 16  ;;  %s6590_s29 = scalar_lea.vmem %s7160_s30, 32 }
  0x4d   : > { %p6584_p0 = scmp.ne.s32.totalorder %s7160_s30, %s6583_s2  ;;  %p6591_p6 = scmp.lt.s32.totalorder %s7160_s30, %s7160_s30 }
  0x4e   : > { %p6592_p8 = scmp.lt.s32.totalorder %s6590_s29, %s6583_s2 }
  0x4f   : > { %p6586_p2 = pnand %p6584_p0, %p7180_p7 }
  0x50   : > { %p6593_p9 = por %p6592_p8, %p6591_p6 }
  0x51   : > { %p6587_p4 = pneg %p6586_p2 }
  0x53   : > { %p6594_p10 = pnand %p6593_p9, %p6587_p4 }
  0x55   : > { %6597 = shalt.err (!%p6594_p10)
}
  0x56   : > { %6347 = dma.hbm_to_vmem [thread:$0]  (!%p7164_p5), %s8269_s10, 16, %s7160_s30, [#allocation8]  }
  0x57   : > { %s6598_s7 = scalar_lea.hbm %s8202_s13, 16 }
  0x58   : > { %p6599_p11 = scmp.ne.s32.totalorder %s8202_s13, %s6598_s7  ;;  %p6605_p0 = scmp.lt.u32.totalorder %s6598_s7, %s8202_s13 }
  0x5a   : > { %p6601_p12 = pnand %p6599_p11, %p7180_p7 }
  0x5c   : > { %p6602_p13 = pneg %p6601_p12 }
  0x5e   : > { %p6607_p2 = pnand %p6605_p0, %p6602_p13 }
  0x60   : > { %6610 = shalt.err (!%p6607_p2)
}
  0x61   : > { %s6611_s30 = scalar_lea.vmem %s7168_s25, 16  ;;  %s6618_s29 = scalar_lea.vmem %s7168_s25, 32 }
  0x62   : > { %p6612_p4 = scmp.ne.s32.totalorder %s7168_s25, %s6611_s30  ;;  %p6619_p9 = scmp.lt.s32.totalorder %s7168_s25, %s7168_s25 }
  0x63   : > { %p6620_p10 = scmp.lt.s32.totalorder %s6618_s29, %s6611_s30 }
  0x64   : > { %p6614_p6 = pnand %p6612_p4, %p7180_p7 }
  0x65   : > { %p6621_p11 = por %p6620_p10, %p6619_p9 }
  0x66   : > { %p6615_p8 = pneg %p6614_p6 }
  0x68   : > { %p6622_p12 = pnand %p6621_p11, %p6615_p8 }
  0x6a   : > { %6625 = shalt.err (!%p6622_p12)
}
  0x6b   : > { %6353 = dma.hbm_to_vmem [thread:$0]  (!%p7164_p5), %s8202_s13, 16, %s7168_s25, [#allocation11]  }
  0x6c   : > { %s6972_s22 = smov [#allocation16]   ;;  %s6626_s20 = scalar_lea.hbm %s8204_s15, 16 }
  0x6d   : > { %s718_s6 = sshll.u32 %s6972_s22, 4  ;;  %p6627_p13 = scmp.ne.s32.totalorder %s8204_s15, %s6626_s20  ;;  %s719_s6 = int_to_ptr.vmem [resolvable:$true] %s718_s6 }
  0x6e   : > { %p6633_p4 = scmp.lt.u32.totalorder %s6626_s20, %s8204_s15 }
  0x6f   : > { %p6629_p0 = pnand %p6627_p13, %p7180_p7 }
  0x71   : > { %p6630_p2 = pneg %p6629_p0 }
  0x73   : > { %p6635_p6 = pnand %p6633_p4, %p6630_p2 }
  0x75   : > { %6638 = shalt.err (!%p6635_p6)
}
  0x76   : > { %s6639_s25 = scalar_lea.vmem %s695_s1, 16  ;;  %s6646_s0 = scalar_lea.vmem %s695_s1, 32 }
  0x77   : > { %p6640_p8 = scmp.ne.s32.totalorder %s695_s1, %s6639_s25  ;;  %p6647_p11 = scmp.lt.s32.totalorder %s695_s1, %s695_s1 }
  0x78   : > { %p6648_p12 = scmp.lt.s32.totalorder %s6646_s0, %s6639_s25 }
  0x79   : > { %p6642_p9 = pnand %p6640_p8, %p7180_p7 }
  0x7a   : > { %p6649_p1 = por %p6648_p12, %p6647_p11 }
  0x7b   : > { %p6643_p10 = pneg %p6642_p9 }
  0x7d   : > { %p6650_p3 = pnand %p6649_p1, %p6643_p10 }
  0x7f   : > { %6653 = shalt.err (!%p6650_p3)
}
  0x80   : > { %6359 = dma.hbm_to_vmem [thread:$0]  (!%p7164_p5), %s8204_s15, 16, %s695_s1, [#allocation14]  }
  0x81   : > { %s6654_s20 = scalar_lea.hbm %s8206_s17, 16 }
  0x82   : > { %p6655_p13 = scmp.ne.s32.totalorder %s8206_s17, %s6654_s20  ;;  %p6661_p3 = scmp.lt.u32.totalorder %s6654_s20, %s8206_s17 }
  0x84   : > { %p6657_p0 = pnand %p6655_p13, %p7180_p7 }
  0x86   : > { %p6658_p1 = pneg %p6657_p0 }
  0x88   : > { %p6663_p2 = pnand %p6661_p3, %p6658_p1 }
  0x8a   : > { %6666 = shalt.err (!%p6663_p2)
}
  0x8b   : > { %s6667_s25 = scalar_lea.vmem %s719_s6, 16  ;;  %s6674_s1 = scalar_lea.vmem %s719_s6, 32 }
  0x8c   : > { %p6668_p4 = scmp.ne.s32.totalorder %s719_s6, %s6667_s25  ;;  %p6675_p9 = scmp.lt.s32.totalorder %s719_s6, %s719_s6 }
  0x8d   : > { %p6676_p10 = scmp.lt.s32.totalorder %s6674_s1, %s6667_s25 }
  0x8e   : > { %p6670_p6 = pnand %p6668_p4, %p7180_p7 }
  0x8f   : > { %p6677_p11 = por %p6676_p10, %p6675_p9 }
  0x90   : > { %p6671_p8 = pneg %p6670_p6 }
  0x92   : > { %p6678_p12 = pnand %p6677_p11, %p6671_p8 }
  0x94   : > { %6681 = shalt.err (!%p6678_p12)
}
  0x95   : > { %6365 = dma.hbm_to_vmem [thread:$0]  (!%p7164_p5), %s8206_s17, 16, %s719_s6, [#allocation17]  }
  0x96   : > { %s6973_s22 = smov [#allocation19]   ;;  %s6974_s4 = smov [#allocation6]  }
  0x97   : > { %s740_s7 = sshll.u32 %s6973_s22, 4  ;;  %s634_s20 = sshll.u32 %s6974_s4, 4  ;;  %s741_s7 = int_to_ptr.vmem [resolvable:$true] %s740_s7  ;;  %s635_s20 = int_to_ptr.vmem [resolvable:$true] %s634_s20 }
  0x98   : > { %s6682_s30 = scalar_lea.hbm %s8208_s19, 16 }
  0x99   : > { %p6683_p13 = scmp.ne.s32.totalorder %s8208_s19, %s6682_s30  ;;  %p6689_p3 = scmp.lt.u32.totalorder %s6682_s30, %s8208_s19 }
  0x9b   : > { %p6685_p0 = pnand %p6683_p13, %p7180_p7 }
  0x9d   : > { %p6686_p1 = pneg %p6685_p0 }
  0x9f   : > { %p6691_p2 = pnand %p6689_p3, %p6686_p1 }
  0xa1   : > { %6694 = shalt.err (!%p6691_p2)
}
  0xa2   : > { %s6695_s6 = scalar_lea.vmem %s741_s7, 16  ;;  %s6702_s12 = scalar_lea.vmem %s741_s7, 32 }
  0xa3   : > { %p6696_p4 = scmp.ne.s32.totalorder %s741_s7, %s6695_s6  ;;  %p6703_p9 = scmp.lt.s32.totalorder %s741_s7, %s741_s7 }
  0xa4   : > { %p6704_p10 = scmp.lt.s32.totalorder %s6702_s12, %s6695_s6 }
  0xa5   : > { %p6698_p6 = pnand %p6696_p4, %p7180_p7 }
  0xa6   : > { %p6705_p11 = por %p6704_p10, %p6703_p9 }
  0xa7   : > { %p6699_p8 = pneg %p6698_p6 }
  0xa9   : > { %p6706_p12 = pnand %p6705_p11, %p6699_p8 }
  0xab   : > { %6709 = shalt.err (!%p6706_p12)
}
  0xac   : > { %6371 = dma.hbm_to_vmem [thread:$0]  (!%p7164_p5), %s8208_s19, 16, %s741_s7, [#allocation20]  }
  0xad   : > { %s8270_s9 = sld [smem:[#allocation40_spill]] }
  0xb3   : > { %s6710_s30 = scalar_lea.hbm %s8270_s9, 16 }
  0xb4   : > { %p6711_p13 = scmp.ne.s32.totalorder %s8270_s9, %s6710_s30  ;;  %p6717_p3 = scmp.lt.u32.totalorder %s6710_s30, %s8270_s9 }
  0xb6   : > { %p6713_p0 = pnand %p6711_p13, %p7180_p7 }
  0xb8   : > { %p6714_p1 = pneg %p6713_p0 }
  0xba   : > { %p6719_p2 = pnand %p6717_p3, %p6714_p1 }
  0xbc   : > { %6722 = shalt.err (!%p6719_p2)
}
  0xbd   : > { %s6723_s6 = scalar_lea.vmem %s635_s20, 16  ;;  %s6730_s7 = scalar_lea.vmem %s635_s20, 32 }
  0xbe   : > { %p6724_p4 = scmp.ne.s32.totalorder %s635_s20, %s6723_s6  ;;  %p6731_p9 = scmp.lt.s32.totalorder %s635_s20, %s635_s20 }
  0xbf   : > { %p6732_p10 = scmp.lt.s32.totalorder %s6730_s7, %s6723_s6 }
  0xc0   : > { %p6726_p6 = pnand %p6724_p4, %p7180_p7 }
  0xc1   : > { %p6733_p11 = por %p6732_p10, %p6731_p9 }
  0xc2   : > { %p6727_p8 = pneg %p6726_p6 }
  0xc4   : > { %p6734_p12 = pnand %p6733_p11, %p6727_p8 }
  0xc6   : > { %6737 = shalt.err (!%p6734_p12)
}
  0xc7   : > { %6344 = dma.hbm_to_vmem [thread:$0]  (!%p7164_p5), %s8270_s9, 16, %s635_s20, [#allocation5]  }
  0xc8   : > { %s6975_s4 = smov [#allocation9]   ;;  %s6976_s2 = smov [#allocation12]  }
  0xc9   : > { %s656_s24 = sshll.u32 %s6975_s4, 4  ;;  %s680_s30 = sshll.u32 %s6976_s2, 4  ;;  %s657_s24 = int_to_ptr.vmem [resolvable:$true] %s656_s24  ;;  %s681_s30 = int_to_ptr.vmem [resolvable:$true] %s680_s30 }
  0xca   : > { %s8271_s11 = sld [smem:[#allocation42_spill]] }
  0xd0   : > { %s6738_s1 = scalar_lea.hbm %s8271_s11, 16 }
  0xd1   : > { %p6739_p13 = scmp.ne.s32.totalorder %s8271_s11, %s6738_s1  ;;  %p6745_p3 = scmp.lt.u32.totalorder %s6738_s1, %s8271_s11 }
  0xd3   : > { %p6741_p0 = pnand %p6739_p13, %p7180_p7 }
  0xd5   : > { %p6742_p1 = pneg %p6741_p0 }
  0xd7   : > { %p6747_p2 = pnand %p6745_p3, %p6742_p1 }
  0xd9   : > { %6750 = shalt.err (!%p6747_p2)
}
  0xda   : > { %s6751_s20 = scalar_lea.vmem %s657_s24, 16  ;;  %s6758_s22 = scalar_lea.vmem %s657_s24, 32 }
  0xdb   : > { %p6752_p4 = scmp.ne.s32.totalorder %s657_s24, %s6751_s20  ;;  %p6759_p9 = scmp.lt.s32.totalorder %s657_s24, %s657_s24 }
  0xdc   : > { %p6760_p10 = scmp.lt.s32.totalorder %s6758_s22, %s6751_s20 }
  0xdd   : > { %p6754_p6 = pnand %p6752_p4, %p7180_p7 }
  0xde   : > { %p6761_p11 = por %p6760_p10, %p6759_p9 }
  0xdf   : > { %p6755_p8 = pneg %p6754_p6 }
  0xe1   : > { %p6762_p12 = pnand %p6761_p11, %p6755_p8 }
  0xe3   : > { %6765 = shalt.err (!%p6762_p12)
}
  0xe4   : > { %6350 = dma.hbm_to_vmem [thread:$0]  (!%p7164_p5), %s8271_s11, 16, %s657_s24, [#allocation8]  }
  0xe5   : > { %s6766_s1 = scalar_lea.hbm %s8203_s14, 1024 }
  0xe6   : > { %p6767_p13 = scmp.ne.s32.totalorder %s8203_s14, %s6766_s1  ;;  %p6773_p3 = scmp.lt.u32.totalorder %s6766_s1, %s8203_s14 }
  0xe8   : > { %p6769_p0 = pnand %p6767_p13, %p7180_p7 }
  0xea   : > { %p6770_p1 = pneg %p6769_p0 }
  0xec   : > { %p6775_p2 = pnand %p6773_p3, %p6770_p1 }
  0xee   : > { %6778 = shalt.err (!%p6775_p2)
}
  0xef   : > { %s6779_s20 = scalar_lea.vmem %s681_s30, 1024  ;;  %p6787_p9 = scmp.lt.s32.totalorder %s681_s30, %s681_s30 }
  0xf0   : > { %p6780_p4 = scmp.ne.s32.totalorder %s681_s30, %s6779_s20  ;;  %p6788_p10 = scmp.lt.s32.totalorder %s6779_s20, %s6779_s20 }
  0xf2   : > { %p6782_p6 = pnand %p6780_p4, %p7180_p7  ;;  %p6789_p11 = por %p6788_p10, %p6787_p9 }
  0xf4   : > { %p6783_p8 = pneg %p6782_p6 }
  0xf6   : > { %p6790_p12 = pnand %p6789_p11, %p6783_p8 }
  0xf8   : > { %6793 = shalt.err (!%p6790_p12)
}
  0xf9   : > { %s6977_s24 = smov 128   ;;  %s6978_s22 = smov 8  }
  0xfa   : > { %6356 = dma.hbm_to_vmem [thread:$0]  (!%p7164_p5), %s8203_s14, 1024, %s681_s30, [#allocation11], %s6977_s24, %s6977_s24, %s6978_s22  }
  0xfb   : > { %s6979_s29 = smov [#allocation15]   ;;  %s6980_s1 = smov [#allocation18]  }
  0xfc   : > { %s704_s25 = sshll.u32 %s6979_s29, 4  ;;  %s729_s0 = sshll.u32 %s6980_s1, 4  ;;  %s705_s25 = int_to_ptr.vmem [resolvable:$true] %s704_s25  ;;  %s730_s0 = int_to_ptr.vmem [resolvable:$true] %s729_s0 }
  0xfd   : > { %s6794_s12 = scalar_lea.hbm %s8205_s16, 1024 }
  0xfe   : > { %p6795_p13 = scmp.ne.s32.totalorder %s8205_s16, %s6794_s12  ;;  %p6801_p3 = scmp.lt.u32.totalorder %s6794_s12, %s8205_s16 }
 0x100   : > { %p6797_p0 = pnand %p6795_p13, %p7180_p7 }
 0x102   : > { %p6798_p1 = pneg %p6797_p0 }
 0x104   : > { %p6803_p2 = pnand %p6801_p3, %p6798_p1 }
 0x106   : > { %6806 = shalt.err (!%p6803_p2)
}
 0x107   : > { %s6807_s30 = scalar_lea.vmem %s705_s25, 1024  ;;  %p6815_p9 = scmp.lt.s32.totalorder %s705_s25, %s705_s25 }
 0x108   : > { %p6808_p4 = scmp.ne.s32.totalorder %s705_s25, %s6807_s30  ;;  %p6816_p10 = scmp.lt.s32.totalorder %s6807_s30, %s6807_s30 }
 0x10a   : > { %p6810_p6 = pnand %p6808_p4, %p7180_p7  ;;  %p6817_p11 = por %p6816_p10, %p6815_p9 }
 0x10c   : > { %p6811_p8 = pneg %p6810_p6 }
 0x10e   : > { %p6818_p12 = pnand %p6817_p11, %p6811_p8 }
 0x110   : > { %6821 = shalt.err (!%p6818_p12)
}
 0x111   : > { %6362 = dma.hbm_to_vmem [thread:$0]  (!%p7164_p5), %s8205_s16, 1024, %s705_s25, [#allocation14], %s6977_s24, %s6977_s24, %s6978_s22  }
 0x112   : > { %s6822_s2 = scalar_lea.hbm %s8207_s18, 16 }
 0x113   : > { %p6823_p13 = scmp.ne.s32.totalorder %s8207_s18, %s6822_s2  ;;  %p6829_p3 = scmp.lt.u32.totalorder %s6822_s2, %s8207_s18 }
 0x115   : > { %p6825_p0 = pnand %p6823_p13, %p7180_p7 }
 0x117   : > { %p6826_p1 = pneg %p6825_p0 }
 0x119   : > { %p6831_p2 = pnand %p6829_p3, %p6826_p1 }
 0x11b   : > { %6834 = shalt.err (!%p6831_p2)
}
 0x11c   : > { %s6835_s12 = scalar_lea.vmem %s730_s0, 16  ;;  %s6842_s24 = scalar_lea.vmem %s730_s0, 32 }
 0x11d   : > { %p6836_p4 = scmp.ne.s32.totalorder %s730_s0, %s6835_s12  ;;  %p6843_p9 = scmp.lt.s32.totalorder %s730_s0, %s730_s0 }
 0x11e   : > { %p6844_p10 = scmp.lt.s32.totalorder %s6842_s24, %s6835_s12 }
 0x11f   : > { %p6838_p6 = pnand %p6836_p4, %p7180_p7 }
 0x120   : > { %p6845_p11 = por %p6844_p10, %p6843_p9 }
 0x121   : > { %p6839_p8 = pneg %p6838_p6 }
 0x123   : > { %p6846_p12 = pnand %p6845_p11, %p6839_p8 }
 0x125   : > { %6849 = shalt.err (!%p6846_p12)
}
 0x126   : > { %6368 = dma.hbm_to_vmem [thread:$0]  (!%p7164_p5), %s8207_s18, 16, %s730_s0, [#allocation17]  }
 0x127   : > { %s6981_s20 = smov [#allocation21]   ;;  %s6850_s10 = scalar_lea.hbm %s8212_s23, 16 }
 0x128   : > { %s760_s30 = sshll.u32 %s6981_s20, 4  ;;  %p6851_p13 = scmp.ne.s32.totalorder %s8212_s23, %s6850_s10  ;;  %s761_s30 = int_to_ptr.vmem [resolvable:$true] %s760_s30 }
 0x129   : > { %p6857_p3 = scmp.lt.u32.totalorder %s6850_s10, %s8212_s23 }
 0x12a   : > { %p6853_p0 = pnand %p6851_p13, %p7180_p7 }
 0x12c   : > { %p6854_p1 = pneg %p6853_p0 }
 0x12e   : > { %p6859_p2 = pnand %p6857_p3, %p6854_p1 }
 0x130   : > { %6862 = shalt.err (!%p6859_p2)
}
 0x131   : > { %s6863_s0 = scalar_lea.vmem %s761_s30, 16  ;;  %s6870_s6 = scalar_lea.vmem %s761_s30, 32 }
 0x132   : > { %p6864_p4 = scmp.ne.s32.totalorder %s761_s30, %s6863_s0  ;;  %p6871_p9 = scmp.lt.s32.totalorder %s761_s30, %s761_s30 }
 0x133   : > { %p6872_p10 = scmp.lt.s32.totalorder %s6870_s6, %s6863_s0 }
 0x134   : > { %p6866_p6 = pnand %p6864_p4, %p7180_p7 }
 0x135   : > { %p6873_p11 = por %p6872_p10, %p6871_p9 }
 0x136   : > { %p6867_p8 = pneg %p6866_p6 }
 0x138   : > { %p6874_p12 = pnand %p6873_p11, %p6867_p8 }
 0x13a   : > { %6877 = shalt.err (!%p6874_p12)
}
 0x13b   : > { %s8272_s3 = sld [smem:[#allocation29_spill]]  ;;  %s7414_s24 = sadd.s32 1, %s6966_s28  }
 0x13c   : > { %6374 = dma.hbm_to_vmem [thread:$0]  (!%p7164_p5), %s8212_s23, 16, %s761_s30, [#allocation20]  }
 0x13d   : > { %s50_s8 = sadd.s32 1, %s6962_s27  ;;  %s47_s22 = ssub.s32 %s6966_s28, %s7414_s24 }
 0x13e   : > { %p57_p7 = scmp.ne.s32.totalorder %s6962_s27, %s6958_s26  ;;  %p48_p13 = scmp.eq.s32.totalorder %s47_s22, 0 }
 0x13f   : > { %p58_p0 = scmp.eq.s32.totalorder %s6966_s28, 0  ;;  %p63_p1 = scmp.ne.s32.totalorder %s6958_s26, %s6954_s5 }
 0x140   : > { %p6391_p3 = scmp.lt.s32.totalorder %s6966_s28, 2  ;;  %s771_s9 = sand.u32 1, %s6962_s27  }
 0x141   : > { %s7426_s25 = scalar_select %p48_p13, %s6962_s27, %s50_s8  }
 0x142   : > { %p59_p2 = por %p58_p0, %p57_p7  ;;  %p8273_p4 = scmp.eq.s32.totalorder %s8272_s3, 0 }
 0x143   : > { %s5673_s30 = sshll.u32 %s6966_s28, 7  ;;  %s5672_s4 = sshll.u32 %s771_s9, 3 }
 0x144   : > { %p7430_p6 = por %p8273_p4, %p63_p1  ;;  %s8275_s2 = sld [smem:[#allocation31_spill]] }
 0x145   : > { %s775_s5 = scalar_lea.vmem [#allocation2], %s5672_s4  ;;  %p7441_p5 = pnand %p6391_p3, %p59_p2 }
 0x146   : > { %s782_s1 = sshll.u32 %s775_s5, 4  ;;  %s772_s28 = scalar_lea.sflag [#allocation3], %s771_s9  ;;  %s7445_s1 = int_to_ptr.vmem [resolvable:$true] %s782_s1 }
 0x147   : > { %p6880_p9 = pneg %p7441_p5 }
 0x14a   : > { %s7439_s29 = scalar_lea.hbm %s8275_s2, %s5673_s30  ;;  %s6883_s3 = scalar_lea.hbm %s8275_s2, 256 }
 0x14b   : > { %s6878_s6 = scalar_lea.hbm %s7439_s29, 128  ;;  %p6884_p12 = scmp.lt.u32.totalorder %s7439_s29, %s8275_s2 }
 0x14c   : > { %p6879_p8 = scmp.ne.s32.totalorder %s7439_s29, %s6878_s6  ;;  %p6885_p7 = scmp.lt.u32.totalorder %s6883_s3, %s6878_s6 }
 0x14d   : > { %p6887_p0 = scmp.lt.u32.totalorder %s6878_s6, %s7439_s29 }
 0x14e   : > { %p6881_p10 = pnand %p6880_p9, %p6879_p8  ;;  %p6886_p13 = por %p6885_p7, %p6884_p12 }
 0x150   : > { %p6882_p11 = pneg %p6881_p10  ;;  %p6888_p1 = por %p6887_p0, %p6886_p13 }
 0x152   : > { %p6889_p3 = pnand %p6888_p1, %p6882_p11 }
 0x154   : > { %6892 = shalt.err (!%p6889_p3)
}
 0x155   : > { %s6893_s9 = scalar_lea.vmem %s7445_s1, 128  ;;  %s6982_s30 = smov [#allocation2]  }
 0x156   : > { %p6894_p2 = scmp.ne.s32.totalorder %s7445_s1, %s6893_s9  ;;  %s6898_s4 = sshll.u32 %s6982_s30, 4  ;;  %s6899_s4 = int_to_ptr.vmem [resolvable:$false] %s6898_s4 }
 0x157   : > { %s6900_s10 = scalar_lea.vmem %s6899_s4, 256  ;;  %p6901_p10 = scmp.lt.s32.totalorder %s7445_s1, %s6899_s4 }
 0x158   : > { %p6896_p4 = pnand %p6894_p2, %p6880_p9  ;;  %p6902_p12 = scmp.lt.s32.totalorder %s6900_s10, %s6893_s9 }
 0x15a   : > { %p6897_p8 = pneg %p6896_p4  ;;  %p6903_p7 = por %p6902_p12, %p6901_p10 }
 0x15c   : > { %p6904_p13 = pnand %p6903_p7, %p6897_p8 }
 0x15e   : > { %6907 = shalt.err (!%p6904_p13)
}
 0x15f   : > { %6378 = dma.hbm_to_vmem [thread:$0]  (!%p7441_p5), %s7439_s29, 128, %s7445_s1, %s772_s28  }
 0x160   : > { %s8277_s11 = sld [smem:[#allocation30_spill]] }
 0x166   : > { %p8278_p11 = scmp.ne.s32.totalorder %s8277_s11, 0 }
 0x167   : > { %s814_s5 = sand.u32 (!%p8278_p11), 1, %s6958_s26  }
 0x168   : > { %812 = sbr.rel (%p8278_p11) target bundleno = 11208 (0x2bc8), region = 116  ;;  %s5675_s6 = sshll.u32 (!%p8278_p11), %s814_s5, 3 }
 0x169   : > { %s815_s7 = scalar_lea.sflag (!%p8278_p11), [#allocation3], %s814_s5  ;;  %s818_s12 = scalar_lea.vmem (!%p8278_p11), [#allocation2], %s5675_s6 }
 0x16f   : > { %6925 = dma.done.wait (%p7430_p6), %s815_s7, 128  }
 0x170   : > { %6927 = vsyncadd (%p7430_p6), %s815_s7, 4294967168  ;;  %s8279_s3 = sld [smem:[#allocation29_spill]] }
 0x176   : > { %p8280_p9 = scmp.eq.s32.totalorder %s8279_s3, 0 }
 0x178   : > { %6929 = dma.done.wait (%p8280_p9), [#allocation5], 32   ;;  %p8281_p0 = pmov %p8280_p9 }
 0x17a   : > { %6931 = vsyncadd (%p8281_p0), [#allocation5], 4294967264  ;;  %p8282_p5 = pmov %p8281_p0 }
 0x17b   : > { %p8283_p1 = pmov %p8281_p0 }
 0x17c   : > { %6933 = dma.done.wait (%p8282_p5), [#allocation8], 32  }
 0x17d   : > { %6935 = vsyncadd (%p8283_p1), [#allocation8], 4294967264  ;;  %p8284_p3 = pmov %p8281_p0 }
 0x17e   : > { %p8285_p2 = pmov %p8281_p0 }
 0x17f   : > { %6937 = dma.done.wait (%p8284_p3), [#allocation11], 1040  }
 0x180   : > { %6939 = vsyncadd (%p8285_p2), [#allocation11], 4294966256  ;;  %p8286_p6 = pmov %p8281_p0 }
 0x181   : > { %p8287_p4 = pmov %p8281_p0 }
 0x182   : > { %6941 = dma.done.wait (%p8286_p6), [#allocation14], 1040  }
 0x183   : > { %6943 = vsyncadd (%p8287_p4), [#allocation14], 4294966256  ;;  %p8288_p8 = pmov %p8281_p0 }
 0x184   : > { %p8289_p10 = pmov %p8281_p0 }
 0x185   : > { %6945 = dma.done.wait (%p8288_p8), [#allocation17], 32  }
 0x186   : > { %6947 = vsyncadd (%p8289_p10), [#allocation17], 4294967264  ;;  %p8290_p12 = pmov %p8281_p0 }
 0x187   : > { %p8291_p7 = pmov %p8281_p0 }
 0x188   : > { %6949 = dma.done.wait (%p8290_p12), [#allocation20], 32  }
 0x189   : > { %6951 = vsyncadd (%p8291_p7), [#allocation20], 4294967264  ;;  %vm962_vm0 = vcmask 523264   ;;  %v7503_v0 = vld [vmem:[%s818_s12] sm:$0xff]  ;;  %s8292_s1 = sld [smem:[#allocation37_spill]]  ;;  %v6983_v20 = vmov 0.0   ;;  %v1011_v41 = vlaneseq }
 0x18a   : > { %v963_v1 = vsel %vm962_vm0, %v7503_v0, 0.0  ;;  %1088 = vmatprep.mubr.f32.mxu0 %v6983_v20  ;;  %5932 = vmatprep.subr.mxu1 %v6983_v20  ;;  %s8293_s8 = sld [smem:[#allocation35_spill]]  ;;  %v5693_v38 = vld [vmem:[#allocation4] ss:$0 sm:$0xff]  ;;  %vm6984_vm1 = vmmov 0   ;;  %s8294_s30 = sld [smem:[#allocation38_spill]] }
 0x18b   : > { %964 = vadd.xlane.f32.xlu0 %v963_v1  ;;  %v7564_v42 = vshrl.u32 %v1011_v41, 7  ;;  %5934 = vmatprep.mubr.msk.f32.mxu1 %vm6984_vm1, %v6983_v20  ;;  %s8245_s4 = smov 64   ;;  %s8242_s10 = smov 56   ;;  %vm1098_vm2 = vcmask 64512  }
 0x18c   : > { %s6987_s11 = smov 120   ;;  %p942_p13 = scmp.lt.s32.totalorder %s8279_s3, 1 }
 0x18d   : > { %v1013_v43 = vsub.s32 0, %v7564_v42  ;;  %v1017_v49 = vsub.s32 1, %v7564_v42  ;;  %s8295_s12 = sld [smem:[#allocation33_spill]]  ;;  %s8243_s29 = smov 112  }
 0x18e   : > { %s8323_s3 = smov (!%p942_p13, %s8279_s3), 1  ;;  %s8238_s6 = smov 40  }
 0x18f   : > { %v994_v7 = vld [vmem:[%s8292_s1 + $0x8] sm:$0xff]  ;;  %v996_v8 = vld [vmem:[%s8292_s1 + $0x18] sm:$0xff]  ;;  %v993_v10 = vld [vmem:[%s8292_s1] sm:$0xff]  ;;  %s7604_s5 = sshll.u32 %s8323_s3, 3  ;;  %s8239_s3 = smov 48  }
 0x190   : > { %v6200_v9 = vpack.c.bf16 %v996_v8, %v994_v7  ;;  %v995_v11 = vld [vmem:[%s8292_s1 + $0x10] sm:$0xff]  ;;  %v998_v13 = vld [vmem:[%s8292_s1 + $0x28] sm:$0xff]  ;;  %v1000_v14 = vld [vmem:[%s8292_s1 + $0x38] sm:$0xff]  ;;  %s8233_s0 = smov 32   ;;  %s8234_s9 = smov 88  }
 0x191   : > { %v6202_v12 = vpack.c.bf16 %v995_v11, %v993_v10  ;;  %v997_v15 = vld [vmem:[%s8292_s1 + $0x20] sm:$0xff]  ;;  %v6204_v16 = vpack.c.bf16 %v1000_v14, %v998_v13  ;;  %v999_v17 = vld [vmem:[%s8292_s1 + $0x30] sm:$0xff]  ;;  %v1002_v18 = vld [vmem:[%s8292_s1 + $0x48] sm:$0xff]  ;;  %s8232_s7 = smov 24   ;;  %s8228_s22 = smov 80  }
 0x192   : > { %6201 = vmatprep.subr.bf16.mxu0 %v6200_v9  ;;  %v1004_v19 = vld [vmem:[%s8292_s1 + $0x58] sm:$0xff]  ;;  %v6206_v21 = vpack.c.bf16 %v999_v17, %v997_v15  ;;  %v1001_v23 = vld [vmem:[%s8292_s1 + $0x40] sm:$0xff]  ;;  %v1003_v24 = vld [vmem:[%s8292_s1 + $0x50] sm:$0xff]  ;;  %s8227_s28 = smov 8  }
 0x193   : > { %6203 = vmatpush1.bf16.msra.mxu0 %v6202_v12  ;;  %v6208_v22 = vpack.c.bf16 %v1004_v19, %v1002_v18  ;;  %v1006_v25 = vld [vmem:[%s8292_s1 + $0x68] sm:$0xff]  ;;  %v1008_v26 = vld [vmem:[%s8292_s1 + $0x78] sm:$0xff]  ;;  %v6210_v27 = vpack.c.bf16 %v1003_v24, %v1001_v23  ;;  %v1005_v29 = vld [vmem:[%s8292_s1 + $0x60] sm:$0xff]  ;;  %s949_s20 = scalar_lea.vmem %s8295_s12, %s7604_s5  ;;  %s8226_s12 = smov 16  }
 0x194   : > { %6205 = vmatprep.subr.bf16.mxu0 %v6204_v16  ;;  %v6212_v28 = vpack.c.bf16 %v1008_v26, %v1006_v25  ;;  %v1007_v30 = vld [vmem:[%s8292_s1 + $0x70] sm:$0xff]  ;;  %v5692_v36 = vld [vmem:[%s8293_s8] ss:$0 sm:$0xff]  ;;  %s8296_s8 = sld [smem:[#allocation39_spill]] }
 0x195   : > { %v6214_v31 = vpack.c.bf16 %v1007_v30, %v1005_v29  ;;  %v1009_v44 = vld [vmem:[%s8294_s30] sm:$0x3]  ;;  %s8240_s30 = smov 104  }
 0x196   : > { %v1014_v45 = vrot.slane %v1009_v44, %v1013_v43  ;;  %v1018_v50 = vrot.slane %v1009_v44, %v1017_v49  ;;  %v7610_v58 = vld [vmem:[%s949_s20] sm:$0xff]  ;;  %s8236_s20 = smov 96  }
 0x197   : > { %6207 = vmatpush1.bf16.msra.mxu0 %v6206_v21 }
 0x198   : > { %6209 = vmatprep.subr.bf16.mxu0 %v6208_v22 }
 0x19a   : > { %v1259_v17 = vld [vmem:[%s8296_s8] sm:$0xff]  ;;  %v1428_v22 = vld [vmem:[%s8296_s8 + $0x8] sm:$0xff] }
 0x19b   : > { %6211 = vmatpush1.bf16.msra.mxu0 %v6210_v27 }
 0x19c   : > { %6213 = vmatprep.subr.bf16.mxu0 %v6212_v28 }
 0x19f   : > { %6215 = vmatpush1.bf16.msra.mxu0 %v6214_v31 }
 0x1a0   : > { %5922 = vmatprep.subr.mxu0 %v6983_v20 }
 0x218   : > { %v965_v2 = vpop.xlane.xlu0 %964 }
 0x219   : > { %v967_v3 = vmul.f32 0.015625, %v965_v2 }
 0x21b   : > { %v968_v4 = vsub.f32 %v7503_v0, %v967_v3 }
 0x21d   : > { %v969_v5 = vmul.f32 %v968_v4, %v968_v4 }
 0x21f   : > { %v970_v6 = vsel %vm962_vm0, %v969_v5, 0.0 }
 0x220   : > { %971 = vadd.xlane.f32.xlu0 %v970_v6 }
 0x2ad   : > { %v972_v32 = vpop.xlane.xlu0 %971 }
 0x2ae   : > { %v973_v33 = vmul.f32 0.015625, %v972_v32 }
 0x2b0   : > { %v974_v34 = vadd.f32 1e-06, %v973_v33 }
 0x2b2   : > { %6468 = vrsqrt.f32 %v974_v34 }
 0x2bc   : > { %v6469_v35 = vpop.eup %6468 }
 0x2bd   : > { %v976_v37 = vmul.f32 %v6469_v35, %v968_v4 }
 0x2bf   : > { %v984_v39 = vmul.f32 %v5692_v36, %v976_v37 }
 0x2c1   : > { %v992_v40 = vadd.f32 %v5693_v38, %v984_v39 }
 0x2c3   : > { %5694 = vmatmul.mubr.msk.f32.vlgmr.msra.gmra.mrb[0].mxu0 %vm962_vm0, %v992_v40 }
 0x2c4   : > { %5924 = vmatprep.mubr.msk.f32.mxu0 %vm6984_vm1, %v6983_v20 }
 0x396   : > { %v1090_v46 = vpop.f32.mrb[0].mxu0 }
 0x397   : > { %v7576_v47 = vadd.f32 %v1090_v46, %v1014_v45  ;;  %v1092_v48 = vpop.f32.mrb[1].mxu0 }
 0x398   : > { %v7591_v53 = vadd.f32 %v1092_v48, %v1018_v50 }
 0x399   : > { %1096 = vrot.lane.b32.xlu0 %v7576_v47, %s8245_s4  ;;  %1262 = vrot.lane.b32.xlu1 %v7576_v47, %s8242_s10  ;;  %s8309_s4 = smov 24   ;;  %s8310_s10 = smov 80  }
 0x39d   : > { %1260 = vrot.lane.b32.xlu1 %v7576_v47, %s6987_s11 }
 0x40b   : > { %v1097_v51 = vpop.permute.xlu0 %1096  ;;  %v1263_v52 = vpop.permute.xlu1 %1262 }
 0x40c   : > { %5923 = vmatpush3.xpose.msk.msra.mxu0 %vm1098_vm2, %v1097_v51  ;;  %5933 = vmatpush3.xpose.msk.msra.mxu1 %vm1098_vm2, %v1263_v52 }
 0x40d   : > { %5927 = vmatprep.subr.mxu0 %v6983_v20  ;;  %5937 = vmatprep.subr.mxu1 %v6983_v20 }
 0x40f   : > { %5925 = vmatmul.mubr.msk.f32.vlgmr.msra.gmra.mrb[2].mxu0 %vm1098_vm2, %v7576_v47  ;;  %v1261_v54 = vpop.permute.xlu1 %1260 }
 0x410   : > { %5928 = vmatpush3.msra.mxu0 %v7591_v53  ;;  %5935 = vmatmul.mubr.msk.f32.vlgmr.msra.gmra.mrb[0].mxu1 %vm1098_vm2, %v1261_v54 }
 0x411   : > { %5939 = vmatprep.mubr.msk.f32.mxu1 %vm6984_vm1, %v6983_v20  ;;  %5929 = vmatprep.mubr.msk.f32.mxu0 %vm6984_vm1, %v6983_v20 }
 0x412   : > { %5942 = vmatprep.subr.mxu0 %v6983_v20 }
 0x4e2   : > { %v1169_v55 = vpop.f32.mrb[2].mxu0 }
 0x4e3   : > { %v5926_v56 = vpop.f32.mrb[3].mxu0  ;;  %v1334_v57 = vpop.f32.mrb[0].mxu1  ;;  %v1173_v4 = vmul.f32 0.35355338, %v1169_v55  ;;  %v1742_v55 = vld [vmem:[%s8296_s8 + $0x10] sm:$0xff] }
 0x4e4   : > { %v1338_v59 = vmul.f32 0.35355338, %v1334_v57  ;;  %v5936_v60 = vpop.f32.mrb[1].mxu1 }
 0x4e5   : > { %v1174_v7 = vadd.f32 %v1173_v4, %v7610_v58 }
 0x4e6   : > { %v1339_v61 = vadd.f32 %v1338_v59, %v7610_v58 }
 0x4e7   : > { %v1175_v8 = vsel %vm1098_vm2, %v1174_v7, -inf }
 0x4e8   : > { %v1340_v62 = vsel %vm1098_vm2, %v1339_v61, -inf }
 0x4e9   : > { %1341 = vmax.xlane.f32.xlu1 %v1340_v62 }
 0x4fa   : > { %1352 = vrot.lane.b32.xlu1 %v7591_v53, %s6987_s11 }
 0x576   : > { %v1342_v63 = vpop.xlane.xlu1 %1341 }
 0x577   : > { %v1343_v1 = vsub.f32 %v1339_v61, %v1342_v63 }
 0x579   : > { %v1344_v2 = vmul.f32 1.442695, %v1343_v1 }
 0x57a   : > { %v1353_v3 = vpop.permute.xlu1 %1352 }
 0x57b   : > { %6470 = vpow2.f32 %v1344_v2  ;;  %5938 = vmatpush3.msra.mxu1 %v1353_v3 }
 0x57c   : > { %5947 = vmatprep.subr.mxu1 %v6983_v20 }
 0x585   : > { %v6471_v5 = vpop.eup %6470 }
 0x586   : > { %v1346_v6 = vsel %vm1098_vm2, %v6471_v5, 0.0 }
 0x587   : > { %1347 = vadd.xlane.f32.xlu0 %v1346_v6 }
 0x58b   : > { %1176 = vmax.xlane.f32.xlu0 %v1175_v8 }
 0x5a1   : > { %1577 = vrot.lane.b32.xlu0 %v7576_v47, %s8239_s3 }
 0x5a5   : > { %1575 = vrot.lane.b32.xlu0 %v7576_v47, %s8243_s29 }
 0x614   : > { %v1348_v9 = vpop.xlane.xlu0 %1347 }
 0x615   : > { %6472 = vrcp.f32 %v1348_v9 }
 0x618   : > { %v1177_v10 = vpop.xlane.xlu0 %1176 }
 0x619   : > { %v1178_v11 = vsub.f32 %v1174_v7, %v1177_v10 }
 0x61b   : > { %v1179_v12 = vmul.f32 1.442695, %v1178_v11 }
 0x61c   : > { %v1578_v23 = vpop.permute.xlu0 %1577 }
 0x61d   : > { %6474 = vpow2.f32 %v1179_v12 }
 0x61f   : > { %v6473_v13 = vpop.eup %6472 }
 0x620   : > { %v1350_v14 = vmul.f32 %v6473_v13, %v6471_v5  ;;  %v1576_v26 = vpop.permute.xlu0 %1575 }
 0x622   : > { %5940 = vmatmul.mubr.msk.f32.vlgmr.msra.gmra.mrb[2].mxu1 %vm1098_vm2, %v1350_v14 }
 0x623   : > { %5949 = vmatprep.mubr.msk.f32.mxu1 %vm6984_vm1, %v6983_v20  ;;  %5948 = vmatpush3.msra.mxu1 %v1259_v17 }
 0x624   : > { %5957 = vmatprep.subr.mxu1 %v6983_v20 }
 0x627   : > { %v6475_v15 = vpop.eup %6474 }
 0x628   : > { %v1181_v16 = vsel %vm1098_vm2, %v6475_v15, 0.0 }
 0x629   : > { %1182 = vadd.xlane.f32.xlu1 %v1181_v16 }
 0x63a   : > { %1666 = vrot.lane.b32.xlu1 %v7591_v53, %s8243_s29  ;;  %s8300_s29 = smov 64  }
 0x6b6   : > { %v1183_v18 = vpop.xlane.xlu1 %1182 }
 0x6b7   : > { %6476 = vrcp.f32 %v1183_v18 }
 0x6ba   : > { %v1667_v28 = vpop.permute.xlu1 %1666 }
 0x6c1   : > { %v6477_v19 = vpop.eup %6476 }
 0x6c2   : > { %v1185_v21 = vmul.f32 %v6477_v19, %v6475_v15  ;;  %v1984_v15 = vld [vmem:[%s8296_s8 + $0x18] sm:$0xff] }
 0x6c4   : > { %5930 = vmatmul.mubr.msk.f32.vlgmr.msra.gmra.mrb[4].mxu0 %vm1098_vm2, %v1185_v21 }
 0x6c5   : > { %5943 = vmatpush3.msra.mxu0 %v1428_v22  ;;  %5944 = vmatprep.mubr.msk.f32.mxu0 %vm6984_vm1, %v6983_v20 }
 0x6c6   : > { %5952 = vmatprep.subr.mxu0 %v6983_v20 }
 0x6f5   : > { %v1424_v24 = vpop.f32.mrb[2].mxu1 }
 0x6f6   : > { %v5941_v25 = vpop.f32.mrb[3].mxu1  ;;  %5945 = vmatmul.mubr.msk.f32.vlgmr.msra.gmra.mrb[6].mxu0 %vm1098_vm2, %v1424_v24 }
 0x6f7   : > { %5953 = vmatpush3.xpose.msk.msra.mxu0 %vm1098_vm2, %v1578_v23  ;;  %5954 = vmatprep.mubr.msk.f32.mxu0 %vm6984_vm1, %v6983_v20 }
 0x6f8   : > { %5962 = vmatprep.subr.mxu0 %v6983_v20 }
 0x6fa   : > { %5955 = vmatmul.mubr.msk.f32.vlgmr.msra.gmra.mrb[8].mxu0 %vm1098_vm2, %v1576_v26 }
 0x6fb   : > { %5964 = vmatprep.mubr.msk.f32.mxu0 %vm6984_vm1, %v6983_v20  ;;  %5963 = vmatpush3.msra.mxu0 %v1742_v55 }
 0x6fc   : > { %5972 = vmatprep.subr.mxu0 %v6983_v20 }
 0x797   : > { %v1255_v27 = vpop.f32.mrb[4].mxu0 }
 0x798   : > { %v5931_v29 = vpop.f32.mrb[5].mxu0  ;;  %5950 = vmatmul.mubr.msk.f32.vlgmr.msra.gmra.mrb[4].mxu1 %vm1098_vm2, %v1255_v27 }
 0x799   : > { %5958 = vmatpush3.msra.mxu1 %v1667_v28  ;;  %5959 = vmatprep.mubr.msk.f32.mxu1 %vm6984_vm1, %v6983_v20 }
 0x79a   : > { %5967 = vmatprep.subr.mxu1 %v6983_v20 }
 0x7c9   : > { %v1498_v30 = vpop.f32.mrb[6].mxu0 }
 0x7ca   : > { %v5946_v31 = vpop.f32.mrb[7].mxu0 }
 0x7cd   : > { %v1649_v32 = vpop.f32.mrb[8].mxu0 }
 0x7ce   : > { %v1653_v33 = vmul.f32 0.35355338, %v1649_v32  ;;  %v5956_v34 = vpop.f32.mrb[9].mxu0 }
 0x7d0   : > { %v1654_v35 = vadd.f32 %v1653_v33, %v7610_v58 }
 0x7d2   : > { %v1655_v36 = vsel %vm1098_vm2, %v1654_v35, -inf }
 0x7d3   : > { %1656 = vmax.xlane.f32.xlu0 %v1655_v36 }
 0x7e9   : > { %1817 = vrot.lane.b32.xlu0 %v7576_v47, %s8240_s30 }
 0x860   : > { %v1657_v37 = vpop.xlane.xlu0 %1656 }
 0x861   : > { %v1658_v38 = vsub.f32 %v1654_v35, %v1657_v37 }
 0x863   : > { %v1659_v39 = vmul.f32 1.442695, %v1658_v38  ;;  %v2226_v38 = vld [vmem:[%s8296_s8 + $0x20] sm:$0xff] }
 0x864   : > { %v1818_v54 = vpop.permute.xlu0 %1817 }
 0x865   : > { %6478 = vpow2.f32 %v1659_v39 }
 0x86b   : > { %v1571_v40 = vpop.f32.mrb[4].mxu1 }
 0x86c   : > { %v1572_v41 = vadd.f32 %v1571_v40, %v1498_v30  ;;  %v5951_v44 = vpop.f32.mrb[5].mxu1 }
 0x86f   : > { %v6479_v45 = vpop.eup %6478 }
 0x870   : > { %v1661_v46 = vsel %vm1098_vm2, %v6479_v45, 0.0 }
 0x871   : > { %1662 = vadd.xlane.f32.xlu1 %v1661_v46 }
 0x882   : > { %1819 = vrot.lane.b32.xlu1 %v7576_v47, %s8238_s6  ;;  %s8298_s6 = sld [smem:[#allocation32_spill]] }
 0x888   : > { %s945_s3 = scalar_lea.vmem %s8298_s6, %s7604_s5  ;;  %s8302_s6 = smov 56  }
 0x8fe   : > { %v1663_v48 = vpop.xlane.xlu1 %1662 }
 0x8ff   : > { %6480 = vrcp.f32 %v1663_v48 }
 0x902   : > { %v1820_v52 = vpop.permute.xlu1 %1819 }
 0x909   : > { %v6481_v50 = vpop.eup %6480 }
 0x90a   : > { %v1665_v51 = vmul.f32 %v6481_v50, %v6479_v45 }
 0x90c   : > { %5960 = vmatmul.mubr.msk.f32.vlgmr.msra.gmra.mrb[6].mxu1 %vm1098_vm2, %v1665_v51 }
 0x90d   : > { %5968 = vmatpush3.xpose.msk.msra.mxu1 %vm1098_vm2, %v1820_v52  ;;  %5969 = vmatprep.mubr.msk.f32.mxu1 %vm6984_vm1, %v6983_v20 }
 0x90e   : > { %5977 = vmatprep.subr.mxu1 %v6983_v20 }
 0x910   : > { %5970 = vmatmul.mubr.msk.f32.vlgmr.msra.gmra.mrb[8].mxu1 %vm1098_vm2, %v1818_v54 }
 0x911   : > { %5979 = vmatprep.mubr.msk.f32.mxu1 %vm6984_vm1, %v6983_v20  ;;  %5978 = vmatpush3.msra.mxu1 %v1984_v15 }
 0x912   : > { %5987 = vmatprep.subr.mxu1 %v6983_v20 }
 0x9df   : > { %v1738_v56 = vpop.f32.mrb[6].mxu1 }
 0x9e0   : > { %v5961_v57 = vpop.f32.mrb[7].mxu1  ;;  %5965 = vmatmul.mubr.msk.f32.vlgmr.msra.gmra.mrb[10].mxu0 %vm1098_vm2, %v1738_v56 }
 0x9e1   : > { %5974 = vmatprep.mubr.msk.f32.mxu0 %vm6984_vm1, %v6983_v20 }
 0x9e3   : > { %v1891_v59 = vpop.f32.mrb[8].mxu1 }
 0x9e4   : > { %v1895_v60 = vmul.f32 0.35355338, %v1891_v59  ;;  %v5971_v61 = vpop.f32.mrb[9].mxu1 }
 0x9e6   : > { %v1896_v62 = vadd.f32 %v1895_v60, %v7610_v58 }
 0x9e8   : > { %v1897_v63 = vsel %vm1098_vm2, %v1896_v62, -inf }
 0x9e9   : > { %1898 = vmax.xlane.f32.xlu1 %v1897_v63 }
 0x9fa   : > { %1908 = vrot.lane.b32.xlu1 %v7591_v53, %s8240_s30  ;;  %s8301_s30 = smov 112  }
 0x9fe   : > { %2059 = vrot.lane.b32.xlu1 %v7576_v47, %s8236_s20 }
 0xa76   : > { %v1899_v1 = vpop.xlane.xlu1 %1898 }
 0xa77   : > { %v1900_v2 = vsub.f32 %v1896_v62, %v1899_v1 }
 0xa79   : > { %v1901_v3 = vmul.f32 1.442695, %v1900_v2 }
 0xa7a   : > { %v1909_v4 = vpop.permute.xlu1 %1908 }
 0xa7b   : > { %6482 = vpow2.f32 %v1901_v3  ;;  %5973 = vmatpush3.msra.mxu0 %v1909_v4  ;;  %v2468_v3 = vld [vmem:[%s8296_s8 + $0x28] sm:$0xff] }
 0xa7c   : > { %5982 = vmatprep.subr.mxu0 %v6983_v20 }
 0xa7e   : > { %v2060_v14 = vpop.permute.xlu1 %2059 }
 0xa85   : > { %v6483_v5 = vpop.eup %6482 }
 0xa86   : > { %v1903_v6 = vsel %vm1098_vm2, %v6483_v5, 0.0 }
 0xa87   : > { %1904 = vadd.xlane.f32.xlu0 %v1903_v6 }
 0xa9d   : > { %2061 = vrot.lane.b32.xlu0 %v7576_v47, %s8233_s0  ;;  %s8303_s0 = smov 104  }
 0xab3   : > { %v1812_v7 = vpop.f32.mrb[10].mxu0 }
 0xab4   : > { %v1816_v8 = vadd.f32 %v1812_v7, %v1572_v41  ;;  %v5966_v9 = vpop.f32.mrb[11].mxu0 }
 0xb14   : > { %v1905_v10 = vpop.xlane.xlu0 %1904 }
 0xb15   : > { %6484 = vrcp.f32 %v1905_v10 }
 0xb18   : > { %v2062_v13 = vpop.permute.xlu0 %2061 }
 0xb1f   : > { %v6485_v11 = vpop.eup %6484 }
 0xb20   : > { %v1907_v12 = vmul.f32 %v6485_v11, %v6483_v5 }
 0xb22   : > { %5975 = vmatmul.mubr.msk.f32.vlgmr.msra.gmra.mrb[12].mxu0 %vm1098_vm2, %v1907_v12 }
 0xb23   : > { %5983 = vmatpush3.xpose.msk.msra.mxu0 %vm1098_vm2, %v2062_v13  ;;  %5984 = vmatprep.mubr.msk.f32.mxu0 %vm6984_vm1, %v6983_v20 }
 0xb24   : > { %5992 = vmatprep.subr.mxu0 %v6983_v20 }
 0xb26   : > { %5985 = vmatmul.mubr.msk.f32.vlgmr.msra.gmra.mrb[14].mxu0 %vm1098_vm2, %v2060_v14 }
 0xb27   : > { %5994 = vmatprep.mubr.msk.f32.mxu0 %vm6984_vm1, %v6983_v20  ;;  %5993 = vmatpush3.msra.mxu0 %v2226_v38 }
 0xb28   : > { %6002 = vmatprep.subr.mxu0 %v6983_v20 }
 0xbf5   : > { %v1980_v16 = vpop.f32.mrb[12].mxu0 }
 0xbf6   : > { %v5976_v17 = vpop.f32.mrb[13].mxu0  ;;  %5980 = vmatmul.mubr.msk.f32.vlgmr.msra.gmra.mrb[10].mxu1 %vm1098_vm2, %v1980_v16 }
 0xbf7   : > { %5989 = vmatprep.mubr.msk.f32.mxu1 %vm6984_vm1, %v6983_v20 }
 0xbf9   : > { %v2133_v18 = vpop.f32.mrb[14].mxu0 }
 0xbfa   : > { %v2137_v19 = vmul.f32 0.35355338, %v2133_v18  ;;  %v5986_v21 = vpop.f32.mrb[15].mxu0 }
 0xbfc   : > { %v2138_v22 = vadd.f32 %v2137_v19, %v7610_v58 }
 0xbfe   : > { %v2139_v23 = vsel %vm1098_vm2, %v2138_v22, -inf }
 0xbff   : > { %2140 = vmax.xlane.f32.xlu1 %v2139_v23 }
 0xc10   : > { %2150 = vrot.lane.b32.xlu1 %v7591_v53, %s8236_s20  ;;  %s8305_s20 = smov 40  }
 0xc14   : > { %2301 = vrot.lane.b32.xlu1 %v7576_v47, %s8234_s9 }
 0xc8c   : > { %v2141_v24 = vpop.xlane.xlu1 %2140 }
 0xc8d   : > { %v2142_v25 = vsub.f32 %v2138_v22, %v2141_v24 }
 0xc8f   : > { %v2143_v26 = vmul.f32 1.442695, %v2142_v25 }
 0xc90   : > { %v2151_v27 = vpop.permute.xlu1 %2150 }
 0xc91   : > { %6486 = vpow2.f32 %v2143_v26  ;;  %5988 = vmatpush3.msra.mxu1 %v2151_v27 }
 0xc92   : > { %5997 = vmatprep.subr.mxu1 %v6983_v20 }
 0xc94   : > { %v2302_v37 = vpop.permute.xlu1 %2301 }
 0xc9b   : > { %v6487_v28 = vpop.eup %6486 }
 0xc9c   : > { %v2145_v29 = vsel %vm1098_vm2, %v6487_v28, 0.0 }
 0xc9d   : > { %2146 = vadd.xlane.f32.xlu0 %v2145_v29 }
 0xcb3   : > { %2303 = vrot.lane.b32.xlu0 %v7576_v47, %s8232_s7  ;;  %s8304_s7 = smov 48  }
 0xcc9   : > { %v2054_v30 = vpop.f32.mrb[10].mxu1 }
 0xcca   : > { %v2058_v31 = vadd.f32 %v2054_v30, %v1816_v8  ;;  %v5981_v32 = vpop.f32.mrb[11].mxu1 }
 0xd2a   : > { %v2147_v33 = vpop.xlane.xlu0 %2146 }
 0xd2b   : > { %6488 = vrcp.f32 %v2147_v33 }
 0xd2e   : > { %v2304_v36 = vpop.permute.xlu0 %2303 }
 0xd35   : > { %v6489_v34 = vpop.eup %6488 }
 0xd36   : > { %v2149_v35 = vmul.f32 %v6489_v34, %v6487_v28 }
 0xd38   : > { %5990 = vmatmul.mubr.msk.f32.vlgmr.msra.gmra.mrb[12].mxu1 %vm1098_vm2, %v2149_v35 }
 0xd39   : > { %5998 = vmatpush3.xpose.msk.msra.mxu1 %vm1098_vm2, %v2304_v36  ;;  %5999 = vmatprep.mubr.msk.f32.mxu1 %vm6984_vm1, %v6983_v20 }
 0xd3a   : > { %6007 = vmatprep.subr.mxu1 %v6983_v20 }
 0xd3c   : > { %6000 = vmatmul.mubr.msk.f32.vlgmr.msra.gmra.mrb[14].mxu1 %vm1098_vm2, %v2302_v37 }
 0xd3d   : > { %6009 = vmatprep.mubr.msk.f32.mxu1 %vm6984_vm1, %v6983_v20  ;;  %6008 = vmatpush3.msra.mxu1 %v2468_v3 }
 0xd3e   : > { %6017 = vmatprep.subr.mxu1 %v6983_v20 }
 0xe0b   : > { %v2222_v39 = vpop.f32.mrb[12].mxu1 }
 0xe0c   : > { %v5991_v40 = vpop.f32.mrb[13].mxu1  ;;  %5995 = vmatmul.mubr.msk.f32.vlgmr.msra.gmra.mrb[16].mxu0 %vm1098_vm2, %v2222_v39 }
 0xe0d   : > { %6004 = vmatprep.mubr.msk.f32.mxu0 %vm6984_vm1, %v6983_v20 }
 0xe0f   : > { %v2375_v41 = vpop.f32.mrb[14].mxu1 }
 0xe10   : > { %v2379_v44 = vmul.f32 0.35355338, %v2375_v41  ;;  %v6001_v45 = vpop.f32.mrb[15].mxu1 }
 0xe12   : > { %v2380_v46 = vadd.f32 %v2379_v44, %v7610_v58 }
 0xe14   : > { %v2381_v48 = vsel %vm1098_vm2, %v2380_v46, -inf }
 0xe15   : > { %2382 = vmax.xlane.f32.xlu1 %v2381_v48 }
 0xe26   : > { %2392 = vrot.lane.b32.xlu1 %v7591_v53, %s8234_s9  ;;  %s8306_s9 = smov 96  }
 0xe2a   : > { %2543 = vrot.lane.b32.xlu1 %v7576_v47, %s8228_s22 }
 0xea2   : > { %v2383_v50 = vpop.xlane.xlu1 %2382 }
 0xea3   : > { %v2384_v51 = vsub.f32 %v2380_v46, %v2383_v50 }
 0xea5   : > { %v2385_v52 = vmul.f32 1.442695, %v2384_v51  ;;  %v5727_v51 = vld [vmem:[#allocation6] ss:$0 sm:$0xff] }
 0xea6   : > { %v2393_v54 = vpop.permute.xlu1 %2392 }
 0xea7   : > { %6490 = vpow2.f32 %v2385_v52  ;;  %6003 = vmatpush3.msra.mxu0 %v2393_v54 }
 0xea8   : > { %6012 = vmatprep.subr.mxu0 %v6983_v20 }
 0xeaa   : > { %v2544_v2 = vpop.permute.xlu1 %2543 }
 0xeb1   : > { %v6491_v55 = vpop.eup %6490 }
 0xeb2   : > { %v2387_v56 = vsel %vm1098_vm2, %v6491_v55, 0.0 }
 0xeb3   : > { %2388 = vadd.xlane.f32.xlu0 %v2387_v56 }
 0xec9   : > { %2545 = vrot.lane.b32.xlu0 %v7576_v47, %s8226_s12  ;;  %s8230_s12 = smov 72  }
 0xedf   : > { %v2296_v57 = vpop.f32.mrb[16].mxu0 }
 0xee0   : > { %v2300_v59 = vadd.f32 %v2296_v57, %v2058_v31  ;;  %v5996_v60 = vpop.f32.mrb[17].mxu0 }
 0xf40   : > { %v2389_v61 = vpop.xlane.xlu0 %2388 }
 0xf41   : > { %6492 = vrcp.f32 %v2389_v61 }
 0xf44   : > { %v2546_v1 = vpop.permute.xlu0 %2545 }
 0xf4b   : > { %v6493_v62 = vpop.eup %6492 }
 0xf4c   : > { %v2391_v63 = vmul.f32 %v6493_v62, %v6491_v55 }
 0xf4e   : > { %6005 = vmatmul.mubr.msk.f32.vlgmr.msra.gmra.mrb[18].mxu0 %vm1098_vm2, %v2391_v63 }
 0xf4f   : > { %6013 = vmatpush3.xpose.msk.msra.mxu0 %vm1098_vm2, %v2546_v1  ;;  %6014 = vmatprep.mubr.msk.f32.mxu0 %vm6984_vm1, %v6983_v20  ;;  %v3153_v1 = vld [vmem:[#allocation12] sm:$0xff] }
 0xf50   : > { %6022 = vmatprep.subr.mxu0 %v6983_v20 }
 0xf52   : > { %6015 = vmatmul.mubr.msk.f32.vlgmr.msra.gmra.mrb[20].mxu0 %vm1098_vm2, %v2544_v2  ;;  %v3154_v2 = vld [vmem:[#allocation12 + $0x8] sm:$0xff] }
 0xf53   : > { %6024 = vmatprep.mubr.msk.f32.mxu0 %vm6984_vm1, %v6983_v20  ;;  %v6229_v3 = vpack.c.bf16 %v3154_v2, %v3153_v1 }
0x1021   : > { %v2464_v4 = vpop.f32.mrb[18].mxu0 }
0x1022   : > { %v6006_v5 = vpop.f32.mrb[19].mxu0  ;;  %6010 = vmatmul.mubr.msk.f32.vlgmr.msra.gmra.mrb[16].mxu1 %vm1098_vm2, %v2464_v4  ;;  %v7000_v4 = vmov 0.0|0.0  }
0x1023   : > { %6019 = vmatprep.mubr.msk.f32.mxu1 %vm6984_vm1, %v6983_v20  ;;  %v3156_v5 = vld [vmem:[#allocation12 + $0x18] sm:$0xff] }
0x1025   : > { %v2617_v6 = vpop.f32.mrb[20].mxu0 }
0x1026   : > { %v2621_v7 = vmul.f32 0.35355338, %v2617_v6  ;;  %v6016_v8 = vpop.f32.mrb[21].mxu0 }
0x1028   : > { %v2622_v9 = vadd.f32 %v2621_v7, %v7610_v58 }
0x102a   : > { %v2623_v10 = vsel %vm1098_vm2, %v2622_v9, -inf }
0x102b   : > { %2624 = vmax.xlane.f32.xlu1 %v2623_v10  ;;  %v3157_v10 = vld [vmem:[#allocation12 + $0x20] sm:$0xff] }
0x103c   : > { %2634 = vrot.lane.b32.xlu1 %v7591_v53, %s8228_s22  ;;  %s8307_s22 = smov 88  }
0x1040   : > { %2785 = vrot.lane.b32.xlu1 %v7576_v47, %s8230_s12 }
0x10b8   : > { %v2625_v11 = vpop.xlane.xlu1 %2624 }
0x10b9   : > { %v2626_v12 = vsub.f32 %v2622_v9, %v2625_v11  ;;  %v3158_v11 = vld [vmem:[#allocation12 + $0x28] sm:$0xff] }
0x10bb   : > { %v2627_v13 = vmul.f32 1.442695, %v2626_v12 }
0x10bc   : > { %v2635_v14 = vpop.permute.xlu1 %2634 }
0x10bd   : > { %6494 = vpow2.f32 %v2627_v13  ;;  %6018 = vmatpush3.msra.mxu1 %v2635_v14  ;;  %v6235_v13 = vpack.c.bf16 %v3158_v11, %v3157_v10  ;;  %v3574_v11 = vld [vmem:[#allocation15 + $0x8] sm:$0xff] }
0x10be   : > { %6027 = vmatprep.subr.mxu1 %v6983_v20 }
0x10c0   : > { %v2786_v25 = vpop.permute.xlu1 %2785 }
0x10c7   : > { %v6495_v15 = vpop.eup %6494 }
0x10c8   : > { %v2629_v16 = vsel %vm1098_vm2, %v6495_v15, 0.0 }
0x10c9   : > { %2630 = vadd.xlane.f32.xlu0 %v2629_v16  ;;  %v3159_v16 = vld [vmem:[#allocation12 + $0x30] sm:$0xff] }
0x10df   : > { %2787 = vrot.lane.b32.xlu0 %v7576_v47, %s8227_s28  ;;  %v2710_v47 = vld [vmem:[%s8296_s8 + $0x30] sm:$0xff]  ;;  %s8308_s28 = smov 32  }
0x10e0   : > { %6023 = vmatpush3.msra.mxu0 %v2710_v47 }
0x10e1   : > { %6032 = vmatprep.subr.mxu0 %v6983_v20 }
0x10f5   : > { %v2538_v17 = vpop.f32.mrb[16].mxu1 }
0x10f6   : > { %v2542_v18 = vadd.f32 %v2538_v17, %v2300_v59  ;;  %v6011_v19 = vpop.f32.mrb[17].mxu1  ;;  %v3160_v17 = vld [vmem:[#allocation12 + $0x38] sm:$0xff] }
0x10f7   : > { %v6238_v19 = vpack.c.bf16 %v3160_v17, %v3159_v16  ;;  %v3406_v16 = vld [vmem:[#allocation15] sm:$0xff] }
0x1156   : > { %v2631_v21 = vpop.xlane.xlu0 %2630 }
0x1157   : > { %6496 = vrcp.f32 %v2631_v21 }
0x115a   : > { %v2788_v24 = vpop.permute.xlu0 %2787 }
0x1161   : > { %v6497_v22 = vpop.eup %6496 }
0x1162   : > { %v2633_v23 = vmul.f32 %v6497_v22, %v6495_v15 }
0x1164   : > { %6020 = vmatmul.mubr.msk.f32.vlgmr.msra.gmra.mrb[18].mxu1 %vm1098_vm2, %v2633_v23 }
0x1165   : > { %6028 = vmatpush3.xpose.msk.msra.mxu1 %vm1098_vm2, %v2788_v24  ;;  %6029 = vmatprep.mubr.msk.f32.mxu1 %vm6984_vm1, %v6983_v20 }
0x1166   : > { %6037 = vmatprep.subr.mxu1 %v6983_v20 }
0x1168   : > { %6030 = vmatmul.mubr.msk.f32.vlgmr.msra.gmra.mrb[20].mxu1 %vm1098_vm2, %v2786_v25  ;;  %v959_v25 = vld [vmem:[%s945_s3] sm:$0xff]  ;;  %s8299_s3 = sld [smem:[#allocation34_spill]] }
0x1169   : > { %6039 = vmatprep.mubr.msk.f32.mxu1 %vm6984_vm1, %v6983_v20 }
0x1237   : > { %v2706_v26 = vpop.f32.mrb[18].mxu1 }
0x1238   : > { %v6021_v27 = vpop.f32.mrb[19].mxu1  ;;  %6025 = vmatmul.mubr.msk.f32.vlgmr.msra.gmra.mrb[22].mxu0 %vm1098_vm2, %v2706_v26 }
0x1239   : > { %6034 = vmatprep.mubr.msk.f32.mxu0 %vm6984_vm1, %v6983_v20 }
0x123b   : > { %v2859_v28 = vpop.f32.mrb[20].mxu1 }
0x123c   : > { %v2863_v29 = vmul.f32 0.35355338, %v2859_v28  ;;  %v6031_v30 = vpop.f32.mrb[21].mxu1 }
0x123d   : > { %v5728_v30 = vld [vmem:[#allocation7] ss:$0 sm:$0xff] }
0x123e   : > { %v2864_v31 = vadd.f32 %v2863_v29, %v7610_v58  ;;  %v2952_v58 = vld [vmem:[%s8296_s8 + $0x38] sm:$0xff] }
0x123f   : > { %6038 = vmatpush3.msra.mxu1 %v2952_v58  ;;  %v5730_v58 = vld [vmem:[#allocation10] ss:$0 sm:$0xff] }
0x1240   : > { %v2865_v32 = vsel %vm1098_vm2, %v2864_v31, -inf  ;;  %6228 = vmatprep.subr.bf16.mxu1 %v7000_v4 }
0x1241   : > { %2866 = vmax.xlane.f32.xlu1 %v2865_v32  ;;  %v5729_v32 = vld [vmem:[#allocation9] ss:$0 sm:$0xff] }
0x1252   : > { %2876 = vrot.lane.b32.xlu1 %v7591_v53, %s8230_s12  ;;  %s8297_s12 = sld [smem:[#allocation43_spill]] }
0x1258   : > { %v3065_v6 = vld [vmem:[%s8297_s12] sm:$0xff]  ;;  %v3066_v8 = vld [vmem:[%s8297_s12 + $0x8] sm:$0xff]  ;;  %v3067_v12 = vld [vmem:[%s8297_s12 + $0x10] sm:$0xff] }
0x1259   : > { %v6217_v9 = vpack.c.bf16 %v3066_v8, %v3065_v6  ;;  %v3068_v14 = vld [vmem:[%s8297_s12 + $0x18] sm:$0xff]  ;;  %v3070_v21 = vld [vmem:[%s8297_s12 + $0x28] sm:$0xff]  ;;  %v3071_v23 = vld [vmem:[%s8297_s12 + $0x30] sm:$0xff] }
0x125a   : > { %v6220_v15 = vpack.c.bf16 %v3068_v14, %v3067_v12  ;;  %v3072_v24 = vld [vmem:[%s8297_s12 + $0x38] sm:$0xff] }
0x125b   : > { %v6226_v47 = vpack.c.bf16 %v3072_v24, %v3071_v23 }
0x12ce   : > { %v2867_v33 = vpop.xlane.xlu1 %2866 }
0x12cf   : > { %v2868_v34 = vsub.f32 %v2864_v31, %v2867_v33 }
0x12d1   : > { %v2869_v35 = vmul.f32 1.442695, %v2868_v34 }
0x12d2   : > { %v2877_v36 = vpop.permute.xlu1 %2876 }
0x12d3   : > { %6498 = vpow2.f32 %v2869_v35  ;;  %6033 = vmatpush3.msra.mxu0 %v2877_v36  ;;  %v5732_v35 = vld [vmem:[#allocation13] ss:$0 sm:$0xff] }
0x12d4   : > { %6216 = vmatprep.subr.bf16.mxu0 %v7000_v4 }
0x12dd   : > { %v6499_v37 = vpop.eup %6498 }
0x12de   : > { %v2871_v38 = vsel %vm1098_vm2, %v6499_v37, 0.0 }
0x12df   : > { %2872 = vadd.xlane.f32.xlu0 %v2871_v38 }
0x130b   : > { %v2780_v39 = vpop.f32.mrb[22].mxu0 }
0x130c   : > { %v2784_v40 = vadd.f32 %v2780_v39, %v2542_v18  ;;  %v6026_v41 = vpop.f32.mrb[23].mxu0  ;;  %v3069_v18 = vld [vmem:[%s8297_s12 + $0x20] sm:$0xff] }
0x130d   : > { %v6223_v22 = vpack.c.bf16 %v3070_v21, %v3069_v18 }
0x136c   : > { %v2873_v44 = vpop.xlane.xlu0 %2872 }
0x136d   : > { %6500 = vrcp.f32 %v2873_v44 }
0x1377   : > { %v6501_v53 = vpop.eup %6500 }
0x1378   : > { %v2875_v45 = vmul.f32 %v6501_v53, %v6499_v37 }
0x137a   : > { %6035 = vmatmul.mubr.msk.f32.vlgmr.msra.gmra.mrb[24].mxu0 %vm1098_vm2, %v2875_v45 }
0x137b   : > { %6058 = vmatprep.mubr.msk.f32.mxu0 %vm6984_vm1, %v6983_v20  ;;  %6218 = vmatpush3.bf16.msra.mxu0 %v6217_v9 }
0x137c   : > { %6219 = vmatprep.subr.bf16.mxu0 %v7000_v4 }
0x137f   : > { %6221 = vmatpush3.bf16.msra.mxu0 %v6220_v15 }
0x1380   : > { %6222 = vmatprep.subr.bf16.mxu0 %v7000_v4 }
0x1383   : > { %6224 = vmatpush3.bf16.msra.mxu0 %v6223_v22 }
0x1384   : > { %6225 = vmatprep.subr.bf16.mxu0 %v7000_v4 }
0x1387   : > { %6227 = vmatpush3.bf16.msra.mxu0 %v6226_v47 }
0x1388   : > { %6080 = vmatprep.subr.mxu0 %v6983_v20 }
0x144d   : > { %v2948_v46 = vpop.f32.mrb[24].mxu0 }
0x144e   : > { %v6036_v48 = vpop.f32.mrb[25].mxu0  ;;  %6040 = vmatmul.mubr.msk.f32.vlgmr.msra.gmra.mrb[22].mxu1 %vm1098_vm2, %v2948_v46 }
0x144f   : > { %6077 = vmatprep.mubr.msk.f32.mxu1 %vm6984_vm1, %v6983_v20  ;;  %6230 = vmatpush3.bf16.msra.mxu1 %v6229_v3 }
0x1450   : > { %6231 = vmatprep.subr.bf16.mxu1 %v7000_v4 }
0x1521   : > { %v3022_v50 = vpop.f32.mrb[22].mxu1 }
0x1522   : > { %v3026_v52 = vadd.f32 %v3022_v50, %v2784_v40  ;;  %v6041_v54 = vpop.f32.mrb[23].mxu1 }
0x1524   : > { %v3034_v55 = vadd.f32 %v5727_v51, %v3026_v52 }
0x1526   : > { %v7790_v56 = vadd.f32 %v3034_v55, %v7503_v0  ;;  %v3155_v0 = vld [vmem:[#allocation12 + $0x10] sm:$0xff] }
0x1527   : > { %v6232_v7 = vpack.c.bf16 %v3156_v5, %v3155_v0 }
0x1528   : > { %v3036_v57 = vsel %vm962_vm0, %v7790_v56, 0.0 }
0x1529   : > { %3037 = vadd.xlane.f32.xlu0 %v3036_v57  ;;  %6233 = vmatpush3.bf16.msra.mxu1 %v6232_v7 }
0x152a   : > { %6234 = vmatprep.subr.bf16.mxu1 %v7000_v4 }
0x152d   : > { %6236 = vmatpush3.bf16.msra.mxu1 %v6235_v13 }
0x152e   : > { %6237 = vmatprep.subr.bf16.mxu1 %v7000_v4 }
0x1531   : > { %6239 = vmatpush3.bf16.msra.mxu1 %v6238_v19 }
0x1532   : > { %6085 = vmatprep.subr.mxu1 %v6983_v20 }
0x1534   : > { %6078 = vmatmul.mubr.msk.f32.vlgmr.msra.gmra.mrb[24].mxu1 %vm962_vm0, %v959_v25 }
0x1535   : > { %6087 = vmatprep.mubr.msk.f32.mxu1 %vm6984_vm1, %v6983_v20 }
0x15b6   : > { %v3038_v59 = vpop.xlane.xlu0 %3037 }
0x15b7   : > { %v3039_v60 = vmul.f32 0.015625, %v3038_v59 }
0x15b9   : > { %v3040_v61 = vsub.f32 %v7790_v56, %v3039_v60 }
0x15bb   : > { %v3041_v62 = vmul.f32 %v3040_v61, %v3040_v61 }
0x15bd   : > { %v3042_v63 = vsel %vm962_vm0, %v3041_v62, 0.0 }
0x15be   : > { %3043 = vadd.xlane.f32.xlu0 %v3042_v63 }
0x1607   : > { %v3237_v36 = vpop.f32.mrb[24].mxu1 }
0x1608   : > { %v7832_v37 = vadd.f32 %v5732_v35, %v3237_v36  ;;  %v6079_v38 = vpop.f32.mrb[25].mxu1 }
0x160a   : > { %3409 = vrot.lane.b32.xlu0 %v7832_v37, %s6987_s11 }
0x164b   : > { %v3044_v26 = vpop.xlane.xlu0 %3043 }
0x164c   : > { %v3045_v27 = vmul.f32 0.015625, %v3044_v26 }
0x164e   : > { %v3046_v28 = vadd.f32 1e-06, %v3045_v27 }
0x1650   : > { %6502 = vrsqrt.f32 %v3046_v28 }
0x165a   : > { %v6503_v29 = vpop.eup %6502 }
0x165b   : > { %v3048_v31 = vmul.f32 %v6503_v29, %v3040_v61 }
0x165d   : > { %v3056_v33 = vmul.f32 %v5728_v30, %v3048_v31 }
0x165f   : > { %v3064_v34 = vadd.f32 %v5729_v32, %v3056_v33 }
0x1661   : > { %6059 = vmatmul.mubr.msk.f32.vlgmr.msra.gmra.mrb[26].mxu0 %vm962_vm0, %v3064_v34 }
0x1662   : > { %6082 = vmatprep.mubr.msk.f32.mxu0 %vm6984_vm1, %v6983_v20  ;;  %6081 = vmatpush3.xpose.msk.msra.mxu0 %vm1098_vm2, %v7832_v37 }
0x1663   : > { %6090 = vmatprep.subr.mxu0 %v6983_v20 }
0x167c   : > { %v3410_v44 = vpop.permute.xlu0 %3409 }
0x1734   : > { %v3149_v39 = vpop.f32.mrb[26].mxu0 }
0x1735   : > { %v7839_v40 = vadd.f32 %v5730_v58, %v3149_v39  ;;  %v6060_v41 = vpop.f32.mrb[27].mxu0 }
0x1737   : > { %3407 = vrot.lane.b32.xlu1 %v7839_v40, %s6987_s11  ;;  %6083 = vmatmul.mubr.msk.f32.vlgmr.msra.gmra.mrb[28].mxu0 %vm1098_vm2, %v7839_v40  ;;  %s953_s11 = scalar_lea.vmem %s8299_s3, %s7604_s5  ;;  %s8311_s3 = smov 72  }
0x1738   : > { %6091 = vmatpush3.xpose.msk.msra.mxu0 %vm1098_vm2, %v3410_v44  ;;  %6092 = vmatprep.mubr.msk.f32.mxu0 %vm6984_vm1, %v6983_v20  ;;  %v7856_v46 = vld [vmem:[%s953_s11] sm:$0xff]  ;;  %s8312_s11 = smov 16  }
0x1739   : > { %6100 = vmatprep.subr.mxu0 %v6983_v20 }
0x17a9   : > { %v3408_v53 = vpop.permute.xlu1 %3407 }
0x17aa   : > { %6093 = vmatmul.mubr.msk.f32.vlgmr.msra.gmra.mrb[30].mxu0 %vm1098_vm2, %v3408_v53 }
0x17ab   : > { %6102 = vmatprep.mubr.msk.f32.mxu0 %vm6984_vm1, %v6983_v20  ;;  %6101 = vmatpush3.msra.mxu0 %v3574_v11 }
0x17ac   : > { %6110 = vmatprep.subr.mxu0 %v6983_v20 }
0x180a   : > { %v3313_v45 = vpop.f32.mrb[28].mxu0 }
0x180b   : > { %v3317_v48 = vmul.f32 0.35355338, %v3313_v45  ;;  %v6084_v50 = vpop.f32.mrb[29].mxu0 }
0x180d   : > { %v3318_v51 = vadd.f32 %v3317_v48, %v7856_v46  ;;  %v3888_v48 = vld [vmem:[#allocation15 + $0x10] sm:$0xff] }
0x180f   : > { %v3319_v52 = vsel %vm1098_vm2, %v3318_v51, -inf }
0x1810   : > { %3320 = vmax.xlane.f32.xlu1 %v3319_v52 }
0x187d   : > { %v3481_v54 = vpop.f32.mrb[30].mxu0 }
0x187e   : > { %v3485_v55 = vmul.f32 0.35355338, %v3481_v54  ;;  %v6094_v57 = vpop.f32.mrb[31].mxu0 }
0x1880   : > { %v3486_v59 = vadd.f32 %v3485_v55, %v7856_v46 }
0x1882   : > { %v3487_v60 = vsel %vm1098_vm2, %v3486_v59, -inf }
0x1883   : > { %3488 = vmax.xlane.f32.xlu0 %v3487_v60 }
0x1899   : > { %3330 = vrot.lane.b32.xlu0 %v7832_v37, %s8300_s29  ;;  %s8313_s29 = smov 8  }
0x189d   : > { %v3321_v61 = vpop.xlane.xlu1 %3320  ;;  %3721 = vrot.lane.b32.xlu0 %v7839_v40, %s8301_s30 }
0x189e   : > { %v3322_v62 = vsub.f32 %v3318_v51, %v3321_v61 }
0x18a0   : > { %v3323_v63 = vmul.f32 1.442695, %v3322_v62 }
0x18a2   : > { %6504 = vpow2.f32 %v3323_v63 }
0x18ac   : > { %v6505_v1 = vpop.eup %6504 }
0x18ad   : > { %v3325_v2 = vsel %vm1098_vm2, %v6505_v1, 0.0 }
0x18ae   : > { %3326 = vadd.xlane.f32.xlu1 %v3325_v2 }
0x1910   : > { %v3489_v3 = vpop.xlane.xlu0 %3488 }
0x1911   : > { %v3490_v4 = vsub.f32 %v3486_v59, %v3489_v3 }
0x1913   : > { %v3491_v0 = vmul.f32 1.442695, %v3490_v4 }
0x1914   : > { %v3331_v5 = vpop.permute.xlu0 %3330 }
0x1915   : > { %6506 = vpow2.f32 %v3491_v0  ;;  %6086 = vmatpush3.msra.mxu1 %v3331_v5 }
0x1916   : > { %6095 = vmatprep.subr.mxu1 %v6983_v20 }
0x1918   : > { %v3722_v23 = vpop.permute.xlu0 %3721 }
0x191f   : > { %v6507_v6 = vpop.eup %6506 }
0x1920   : > { %v3493_v7 = vsel %vm1098_vm2, %v6507_v6, 0.0 }
0x1921   : > { %3494 = vadd.xlane.f32.xlu1 %v3493_v7 }
0x1932   : > { %3498 = vrot.lane.b32.xlu1 %v7832_v37, %s8302_s6 }
0x1936   : > { %3723 = vrot.lane.b32.xlu1 %v7832_v37, %s8301_s30  ;;  %s8317_s30 = sld [smem:[#allocation47_spill]] }
0x193b   : > { %v3327_v8 = vpop.xlane.xlu1 %3326 }
0x193c   : > { %6508 = vrcp.f32 %v3327_v8  ;;  %s957_s6 = scalar_lea.vmem %s8317_s30, %s7604_s5 }
0x1946   : > { %v6509_v9 = vpop.eup %6508 }
0x1947   : > { %v3329_v10 = vmul.f32 %v6509_v9, %v6505_v1 }
0x1949   : > { %6088 = vmatmul.mubr.msk.f32.vlgmr.msra.gmra.mrb[26].mxu1 %vm1098_vm2, %v3329_v10  ;;  %v4130_v10 = vld [vmem:[#allocation15 + $0x18] sm:$0xff] }
0x194a   : > { %6097 = vmatprep.mubr.msk.f32.mxu1 %vm6984_vm1, %v6983_v20 }
0x19ae   : > { %v3495_v12 = vpop.xlane.xlu1 %3494 }
0x19af   : > { %6510 = vrcp.f32 %v3495_v12 }
0x19b2   : > { %v3499_v13 = vpop.permute.xlu1 %3498 }
0x19b3   : > { %6096 = vmatpush3.msra.mxu1 %v3499_v13 }
0x19b4   : > { %6105 = vmatprep.subr.mxu1 %v6983_v20 }
0x19b6   : > { %v3724_v21 = vpop.permute.xlu1 %3723 }
0x19b9   : > { %v6511_v14 = vpop.eup %6510 }
0x19ba   : > { %v3497_v15 = vmul.f32 %v6511_v14, %v6507_v6 }
0x19bc   : > { %6098 = vmatmul.mubr.msk.f32.vlgmr.msra.gmra.mrb[28].mxu1 %vm1098_vm2, %v3497_v15 }
0x19bd   : > { %6106 = vmatpush3.msra.mxu1 %v3406_v16  ;;  %6107 = vmatprep.mubr.msk.f32.mxu1 %vm6984_vm1, %v6983_v20 }
0x19be   : > { %6115 = vmatprep.subr.mxu1 %v6983_v20 }
0x1a1c   : > { %v3402_v17 = vpop.f32.mrb[26].mxu1 }
0x1a1d   : > { %v6089_v18 = vpop.f32.mrb[27].mxu1  ;;  %6108 = vmatmul.mubr.msk.f32.vlgmr.msra.gmra.mrb[30].mxu1 %vm1098_vm2, %v3402_v17 }
0x1a1e   : > { %6117 = vmatprep.mubr.msk.f32.mxu1 %vm6984_vm1, %v6983_v20 }
0x1a8f   : > { %v3570_v19 = vpop.f32.mrb[28].mxu1 }
0x1a90   : > { %v6099_v22 = vpop.f32.mrb[29].mxu1  ;;  %6103 = vmatmul.mubr.msk.f32.vlgmr.msra.gmra.mrb[32].mxu0 %vm1098_vm2, %v3570_v19 }
0x1a91   : > { %6111 = vmatpush3.xpose.msk.msra.mxu0 %vm1098_vm2, %v3724_v21  ;;  %6112 = vmatprep.mubr.msk.f32.mxu0 %vm6984_vm1, %v6983_v20 }
0x1a92   : > { %6120 = vmatprep.subr.mxu0 %v6983_v20 }
0x1a94   : > { %6113 = vmatmul.mubr.msk.f32.vlgmr.msra.gmra.mrb[34].mxu0 %vm1098_vm2, %v3722_v23 }
0x1a95   : > { %6122 = vmatprep.mubr.msk.f32.mxu0 %vm6984_vm1, %v6983_v20  ;;  %6121 = vmatpush3.msra.mxu0 %v3888_v48 }
0x1a96   : > { %6130 = vmatprep.subr.mxu0 %v6983_v20 }
0x1af0   : > { %v3717_v24 = vpop.f32.mrb[30].mxu1 }
0x1af1   : > { %v6109_v25 = vpop.f32.mrb[31].mxu1 }
0x1b63   : > { %v3644_v47 = vpop.f32.mrb[32].mxu0 }
0x1b64   : > { %v3718_v26 = vadd.f32 %v3717_v24, %v3644_v47  ;;  %v6104_v27 = vpop.f32.mrb[33].mxu0 }
0x1b67   : > { %v3795_v28 = vpop.f32.mrb[34].mxu0 }
0x1b68   : > { %v3799_v29 = vmul.f32 0.35355338, %v3795_v28  ;;  %v6114_v30 = vpop.f32.mrb[35].mxu0 }
0x1b6a   : > { %v3800_v31 = vadd.f32 %v3799_v29, %v7856_v46 }
0x1b6c   : > { %v3801_v32 = vsel %vm1098_vm2, %v3800_v31, -inf }
0x1b6d   : > { %3802 = vmax.xlane.f32.xlu1 %v3801_v32  ;;  %v4372_v32 = vld [vmem:[#allocation15 + $0x20] sm:$0xff] }
0x1b7e   : > { %3965 = vrot.lane.b32.xlu1 %v7832_v37, %s8303_s0 }
0x1b82   : > { %3963 = vrot.lane.b32.xlu1 %v7839_v40, %s8303_s0  ;;  %s8314_s0 = sld [smem:[#allocation44_spill]] }
0x1bfa   : > { %v3803_v33 = vpop.xlane.xlu1 %3802 }
0x1bfb   : > { %v3804_v34 = vsub.f32 %v3800_v31, %v3803_v33 }
0x1bfd   : > { %v3805_v35 = vmul.f32 1.442695, %v3804_v34 }
0x1bfe   : > { %v3966_v44 = vpop.permute.xlu1 %3965 }
0x1bff   : > { %6512 = vpow2.f32 %v3805_v35 }
0x1c02   : > { %v3964_v45 = vpop.permute.xlu1 %3963 }
0x1c09   : > { %v6513_v36 = vpop.eup %6512 }
0x1c0a   : > { %v3807_v38 = vsel %vm1098_vm2, %v6513_v36, 0.0 }
0x1c0b   : > { %3808 = vadd.xlane.f32.xlu0 %v3807_v38 }
0x1c21   : > { %3812 = vrot.lane.b32.xlu0 %v7832_v37, %s8304_s7 }
0x1c98   : > { %v3809_v58 = vpop.xlane.xlu0 %3808 }
0x1c99   : > { %6514 = vrcp.f32 %v3809_v58 }
0x1c9c   : > { %v3813_v39 = vpop.permute.xlu0 %3812 }
0x1c9d   : > { %6116 = vmatpush3.msra.mxu1 %v3813_v39 }
0x1c9e   : > { %6125 = vmatprep.subr.mxu1 %v6983_v20 }
0x1ca3   : > { %v6515_v41 = vpop.eup %6514 }
0x1ca4   : > { %v3811_v53 = vmul.f32 %v6515_v41, %v6513_v36 }
0x1ca6   : > { %6118 = vmatmul.mubr.msk.f32.vlgmr.msra.gmra.mrb[32].mxu1 %vm1098_vm2, %v3811_v53 }
0x1ca7   : > { %6126 = vmatpush3.xpose.msk.msra.mxu1 %vm1098_vm2, %v3966_v44  ;;  %6127 = vmatprep.mubr.msk.f32.mxu1 %vm6984_vm1, %v6983_v20 }
0x1ca8   : > { %6135 = vmatprep.subr.mxu1 %v6983_v20 }
0x1caa   : > { %6128 = vmatmul.mubr.msk.f32.vlgmr.msra.gmra.mrb[34].mxu1 %vm1098_vm2, %v3964_v45 }
0x1cab   : > { %6137 = vmatprep.mubr.msk.f32.mxu1 %vm6984_vm1, %v6983_v20  ;;  %6136 = vmatpush3.msra.mxu1 %v4130_v10 }
0x1cac   : > { %6145 = vmatprep.subr.mxu1 %v6983_v20 }
0x1d79   : > { %v3884_v50 = vpop.f32.mrb[32].mxu1 }
0x1d7a   : > { %v6119_v51 = vpop.f32.mrb[33].mxu1  ;;  %6123 = vmatmul.mubr.msk.f32.vlgmr.msra.gmra.mrb[36].mxu0 %vm1098_vm2, %v3884_v50 }
0x1d7b   : > { %6132 = vmatprep.mubr.msk.f32.mxu0 %vm6984_vm1, %v6983_v20 }
0x1d7d   : > { %v4037_v52 = vpop.f32.mrb[34].mxu1 }
0x1d7e   : > { %v4041_v54 = vmul.f32 0.35355338, %v4037_v52  ;;  %v6129_v55 = vpop.f32.mrb[35].mxu1 }
0x1d80   : > { %v4042_v57 = vadd.f32 %v4041_v54, %v7856_v46 }
0x1d82   : > { %v4043_v59 = vsel %vm1098_vm2, %v4042_v57, -inf }
0x1d83   : > { %4044 = vmax.xlane.f32.xlu0 %v4043_v59 }
0x1d99   : > { %4054 = vrot.lane.b32.xlu0 %v7832_v37, %s8305_s20 }
0x1d9d   : > { %4205 = vrot.lane.b32.xlu0 %v7839_v40, %s8306_s9 }
0x1e10   : > { %v4045_v60 = vpop.xlane.xlu0 %4044 }
0x1e11   : > { %v4046_v61 = vsub.f32 %v4042_v57, %v4045_v60 }
0x1e13   : > { %v4047_v62 = vmul.f32 1.442695, %v4046_v61 }
0x1e14   : > { %v4055_v63 = vpop.permute.xlu0 %4054 }
0x1e15   : > { %6516 = vpow2.f32 %v4047_v62  ;;  %6131 = vmatpush3.msra.mxu0 %v4055_v63  ;;  %v4614_v62 = vld [vmem:[#allocation15 + $0x28] sm:$0xff] }
0x1e16   : > { %6140 = vmatprep.subr.mxu0 %v6983_v20 }
0x1e18   : > { %v4206_v9 = vpop.permute.xlu0 %4205 }
0x1e1f   : > { %v6517_v1 = vpop.eup %6516 }
0x1e20   : > { %v4049_v2 = vsel %vm1098_vm2, %v6517_v1, 0.0 }
0x1e21   : > { %4050 = vadd.xlane.f32.xlu1 %v4049_v2 }
0x1e32   : > { %4207 = vrot.lane.b32.xlu1 %v7832_v37, %s8306_s9 }
0x1e4d   : > { %v3958_v3 = vpop.f32.mrb[36].mxu0 }
0x1e4e   : > { %v3962_v4 = vadd.f32 %v3958_v3, %v3718_v26  ;;  %v6124_v0 = vpop.f32.mrb[37].mxu0 }
0x1eae   : > { %v4051_v5 = vpop.xlane.xlu1 %4050 }
0x1eaf   : > { %6518 = vrcp.f32 %v4051_v5 }
0x1eb2   : > { %v4208_v8 = vpop.permute.xlu1 %4207 }
0x1eb9   : > { %v6519_v6 = vpop.eup %6518 }
0x1eba   : > { %v4053_v7 = vmul.f32 %v6519_v6, %v6517_v1 }
0x1ebc   : > { %6133 = vmatmul.mubr.msk.f32.vlgmr.msra.gmra.mrb[38].mxu0 %vm1098_vm2, %v4053_v7 }
0x1ebd   : > { %6141 = vmatpush3.xpose.msk.msra.mxu0 %vm1098_vm2, %v4208_v8  ;;  %6142 = vmatprep.mubr.msk.f32.mxu0 %vm6984_vm1, %v6983_v20 }
0x1ebe   : > { %6150 = vmatprep.subr.mxu0 %v6983_v20 }
0x1ec0   : > { %6143 = vmatmul.mubr.msk.f32.vlgmr.msra.gmra.mrb[40].mxu0 %vm1098_vm2, %v4206_v9 }
0x1ec1   : > { %6152 = vmatprep.mubr.msk.f32.mxu0 %vm6984_vm1, %v6983_v20  ;;  %6151 = vmatpush3.msra.mxu0 %v4372_v32 }
0x1ec2   : > { %6160 = vmatprep.subr.mxu0 %v6983_v20 }
0x1f8f   : > { %v4126_v11 = vpop.f32.mrb[38].mxu0 }
0x1f90   : > { %v6134_v12 = vpop.f32.mrb[39].mxu0  ;;  %6138 = vmatmul.mubr.msk.f32.vlgmr.msra.gmra.mrb[36].mxu1 %vm1098_vm2, %v4126_v11 }
0x1f91   : > { %6147 = vmatprep.mubr.msk.f32.mxu1 %vm6984_vm1, %v6983_v20 }
0x1f93   : > { %v4279_v13 = vpop.f32.mrb[40].mxu0 }
0x1f94   : > { %v4283_v14 = vmul.f32 0.35355338, %v4279_v13  ;;  %v6144_v15 = vpop.f32.mrb[41].mxu0 }
0x1f96   : > { %v4284_v16 = vadd.f32 %v4283_v14, %v7856_v46 }
0x1f98   : > { %v4285_v17 = vsel %vm1098_vm2, %v4284_v16, -inf }
0x1f99   : > { %4286 = vmax.xlane.f32.xlu1 %v4285_v17 }
0x1faa   : > { %4449 = vrot.lane.b32.xlu1 %v7832_v37, %s8307_s22 }
0x1fae   : > { %4447 = vrot.lane.b32.xlu1 %v7839_v40, %s8307_s22 }
0x2026   : > { %v4287_v18 = vpop.xlane.xlu1 %4286 }
0x2027   : > { %v4288_v19 = vsub.f32 %v4284_v16, %v4287_v18 }
0x2029   : > { %v4289_v21 = vmul.f32 1.442695, %v4288_v19  ;;  %v4856_v19 = vld [vmem:[#allocation15 + $0x30] sm:$0xff] }
0x202a   : > { %v4450_v29 = vpop.permute.xlu1 %4449 }
0x202b   : > { %6520 = vpow2.f32 %v4289_v21 }
0x202e   : > { %v4448_v31 = vpop.permute.xlu1 %4447 }
0x2035   : > { %v6521_v22 = vpop.eup %6520 }
0x2036   : > { %v4291_v23 = vsel %vm1098_vm2, %v6521_v22, 0.0 }
0x2037   : > { %4292 = vadd.xlane.f32.xlu0 %v4291_v23 }
0x204d   : > { %4296 = vrot.lane.b32.xlu0 %v7832_v37, %s8308_s28 }
0x2063   : > { %v4200_v24 = vpop.f32.mrb[36].mxu1 }
0x2064   : > { %v4204_v25 = vadd.f32 %v4200_v24, %v3962_v4  ;;  %v6139_v47 = vpop.f32.mrb[37].mxu1 }
0x20c4   : > { %v4293_v26 = vpop.xlane.xlu0 %4292 }
0x20c5   : > { %6522 = vrcp.f32 %v4293_v26 }
0x20c8   : > { %v4297_v27 = vpop.permute.xlu0 %4296 }
0x20c9   : > { %6146 = vmatpush3.msra.mxu1 %v4297_v27 }
0x20ca   : > { %6155 = vmatprep.subr.mxu1 %v6983_v20 }
0x20cf   : > { %v6523_v28 = vpop.eup %6522 }
0x20d0   : > { %v4295_v30 = vmul.f32 %v6523_v28, %v6521_v22 }
0x20d2   : > { %6148 = vmatmul.mubr.msk.f32.vlgmr.msra.gmra.mrb[38].mxu1 %vm1098_vm2, %v4295_v30 }
0x20d3   : > { %6156 = vmatpush3.xpose.msk.msra.mxu1 %vm1098_vm2, %v4450_v29  ;;  %6157 = vmatprep.mubr.msk.f32.mxu1 %vm6984_vm1, %v6983_v20 }
0x20d4   : > { %6165 = vmatprep.subr.mxu1 %v6983_v20 }
0x20d6   : > { %6158 = vmatmul.mubr.msk.f32.vlgmr.msra.gmra.mrb[40].mxu1 %vm1098_vm2, %v4448_v31 }
0x20d7   : > { %6167 = vmatprep.mubr.msk.f32.mxu1 %vm6984_vm1, %v6983_v20  ;;  %6166 = vmatpush3.msra.mxu1 %v4614_v62  ;;  %v5213_v62 = vld [vmem:[%s8314_s0 + $0x10] sm:$0xff] }
0x20d8   : > { %6175 = vmatprep.subr.mxu1 %v6983_v20 }
0x21a5   : > { %v4368_v33 = vpop.f32.mrb[38].mxu1 }
0x21a6   : > { %v6149_v34 = vpop.f32.mrb[39].mxu1  ;;  %6153 = vmatmul.mubr.msk.f32.vlgmr.msra.gmra.mrb[42].mxu0 %vm1098_vm2, %v4368_v33  ;;  %v5098_v33 = vld [vmem:[#allocation15 + $0x38] sm:$0xff] }
0x21a7   : > { %6162 = vmatprep.mubr.msk.f32.mxu0 %vm6984_vm1, %v6983_v20 }
0x21a9   : > { %v4521_v35 = vpop.f32.mrb[40].mxu1 }
0x21aa   : > { %v4525_v36 = vmul.f32 0.35355338, %v4521_v35  ;;  %v6159_v38 = vpop.f32.mrb[41].mxu1 }
0x21ac   : > { %v4526_v58 = vadd.f32 %v4525_v36, %v7856_v46 }
0x21ae   : > { %v4527_v39 = vsel %vm1098_vm2, %v4526_v58, -inf }
0x21af   : > { %4528 = vmax.xlane.f32.xlu0 %v4527_v39 }
0x21c5   : > { %4538 = vrot.lane.b32.xlu0 %v7832_v37, %s8309_s4 }
0x21c9   : > { %4689 = vrot.lane.b32.xlu0 %v7839_v40, %s8310_s10 }
0x223c   : > { %v4529_v41 = vpop.xlane.xlu0 %4528 }
0x223d   : > { %v4530_v44 = vsub.f32 %v4526_v58, %v4529_v41 }
0x223f   : > { %v4531_v53 = vmul.f32 1.442695, %v4530_v44  ;;  %v5766_v44 = vld [vmem:[#allocation16] ss:$0 sm:$0xff] }
0x2240   : > { %v4539_v45 = vpop.permute.xlu0 %4538 }
0x2241   : > { %6524 = vpow2.f32 %v4531_v53  ;;  %6161 = vmatpush3.msra.mxu0 %v4539_v45 }
0x2242   : > { %6170 = vmatprep.subr.mxu0 %v6983_v20 }
0x2244   : > { %v4690_v61 = vpop.permute.xlu0 %4689 }
0x224b   : > { %v6525_v48 = vpop.eup %6524 }
0x224c   : > { %v4533_v50 = vsel %vm1098_vm2, %v6525_v48, 0.0 }
0x224d   : > { %4534 = vadd.xlane.f32.xlu1 %v4533_v50 }
0x225e   : > { %4691 = vrot.lane.b32.xlu1 %v7832_v37, %s8310_s10  ;;  %s8316_s10 = sld [smem:[#allocation45_spill]] }
0x2279   : > { %v4442_v51 = vpop.f32.mrb[42].mxu0 }
0x227a   : > { %v4446_v52 = vadd.f32 %v4442_v51, %v4204_v25  ;;  %v6154_v54 = vpop.f32.mrb[43].mxu0 }
0x22da   : > { %v4535_v55 = vpop.xlane.xlu1 %4534 }
0x22db   : > { %6526 = vrcp.f32 %v4535_v55 }
0x22de   : > { %v4692_v60 = vpop.permute.xlu1 %4691 }
0x22e5   : > { %v6527_v57 = vpop.eup %6526 }
0x22e6   : > { %v4537_v59 = vmul.f32 %v6527_v57, %v6525_v48 }
0x22e8   : > { %6163 = vmatmul.mubr.msk.f32.vlgmr.msra.gmra.mrb[44].mxu0 %vm1098_vm2, %v4537_v59  ;;  %v5212_v59 = vld [vmem:[%s8314_s0 + $0x8] sm:$0xff] }
0x22e9   : > { %6171 = vmatpush3.xpose.msk.msra.mxu0 %vm1098_vm2, %v4692_v60  ;;  %6172 = vmatprep.mubr.msk.f32.mxu0 %vm6984_vm1, %v6983_v20 }
0x22ea   : > { %6180 = vmatprep.subr.mxu0 %v6983_v20 }
0x22ec   : > { %6173 = vmatmul.mubr.msk.f32.vlgmr.msra.gmra.mrb[46].mxu0 %vm1098_vm2, %v4690_v61  ;;  %v5211_v61 = vld [vmem:[%s8314_s0] sm:$0xff] }
0x22ed   : > { %6182 = vmatprep.mubr.msk.f32.mxu0 %vm6984_vm1, %v6983_v20  ;;  %6181 = vmatpush3.msra.mxu0 %v4856_v19 }
0x22ee   : > { %6190 = vmatprep.subr.mxu0 %v6983_v20 }
0x23bb   : > { %v4610_v63 = vpop.f32.mrb[44].mxu0 }
0x23bc   : > { %v6164_v1 = vpop.f32.mrb[45].mxu0  ;;  %6168 = vmatmul.mubr.msk.f32.vlgmr.msra.gmra.mrb[42].mxu1 %vm1098_vm2, %v4610_v63  ;;  %v6242_v63 = vpack.c.bf16 %v5213_v62, %v5211_v61 }
0x23bd   : > { %6177 = vmatprep.mubr.msk.f32.mxu1 %vm6984_vm1, %v6983_v20  ;;  %v5216_v1 = vld [vmem:[%s8314_s0 + $0x28] sm:$0xff] }
0x23bf   : > { %v4763_v2 = vpop.f32.mrb[46].mxu0 }
0x23c0   : > { %v4767_v3 = vmul.f32 0.35355338, %v4763_v2  ;;  %v6174_v4 = vpop.f32.mrb[47].mxu0  ;;  %v5218_v2 = vld [vmem:[%s8314_s0 + $0x38] sm:$0xff] }
0x23c1   : > { %v5215_v4 = vld [vmem:[%s8314_s0 + $0x20] sm:$0xff] }
0x23c2   : > { %v4768_v0 = vadd.f32 %v4767_v3, %v7856_v46  ;;  %v6244_v3 = vpack.c.bf16 %v5218_v2, %v5216_v1 }
0x23c4   : > { %v4769_v5 = vsel %vm1098_vm2, %v4768_v0, -inf }
0x23c5   : > { %4770 = vmax.xlane.f32.xlu1 %v4769_v5 }
0x23d6   : > { %4933 = vrot.lane.b32.xlu1 %v7832_v37, %s8311_s3 }
0x23da   : > { %4931 = vrot.lane.b32.xlu1 %v7839_v40, %s8311_s3 }
0x2452   : > { %v4771_v6 = vpop.xlane.xlu1 %4770 }
0x2453   : > { %v4772_v7 = vsub.f32 %v4768_v0, %v4771_v6  ;;  %v5217_v0 = vld [vmem:[%s8314_s0 + $0x30] sm:$0xff]  ;;  %v5220_v6 = vld [vmem:[%s8314_s0 + $0x48] sm:$0xff] }
0x2454   : > { %v6246_v5 = vpack.c.bf16 %v5217_v0, %v5215_v4 }
0x2455   : > { %v4773_v8 = vmul.f32 1.442695, %v4772_v7  ;;  %v5222_v7 = vld [vmem:[%s8314_s0 + $0x58] sm:$0xff] }
0x2456   : > { %v4934_v16 = vpop.permute.xlu1 %4933 }
0x2457   : > { %6528 = vpow2.f32 %v4773_v8  ;;  %v6248_v8 = vpack.c.bf16 %v5222_v7, %v5220_v6 }
0x245a   : > { %v4932_v18 = vpop.permute.xlu1 %4931 }
0x2461   : > { %v6529_v9 = vpop.eup %6528 }
0x2462   : > { %v4775_v10 = vsel %vm1098_vm2, %v6529_v9, 0.0 }
0x2463   : > { %4776 = vadd.xlane.f32.xlu0 %v4775_v10  ;;  %v5221_v10 = vld [vmem:[%s8314_s0 + $0x50] sm:$0xff] }
0x2479   : > { %4780 = vrot.lane.b32.xlu0 %v7832_v37, %s8312_s11  ;;  %s8315_s11 = sld [smem:[#allocation46_spill]] }
0x247f   : > { %v5331_v19 = vld [vmem:[%s8315_s11] sm:$0xff]  ;;  %v5358_v61 = vld [vmem:[%s8315_s11 + $0xd8] sm:$0xff]  ;;  %v5341_v1 = vld [vmem:[%s8315_s11 + $0x50] sm:$0xff] }
0x2480   : > { %v5342_v2 = vld [vmem:[%s8315_s11 + $0x58] sm:$0xff]  ;;  %v5360_v4 = vld [vmem:[%s8315_s11 + $0xe8] sm:$0xff]  ;;  %v5343_v6 = vld [vmem:[%s8315_s11 + $0x60] sm:$0xff] }
0x2481   : > { %v6278_v0 = vpack.c.bf16 %v5342_v2, %v5341_v1  ;;  %v5344_v7 = vld [vmem:[%s8315_s11 + $0x68] sm:$0xff] }
0x248f   : > { %v4684_v11 = vpop.f32.mrb[42].mxu1 }
0x2490   : > { %v4688_v12 = vadd.f32 %v4684_v11, %v4446_v52  ;;  %v6169_v13 = vpop.f32.mrb[43].mxu1 }
0x2491   : > { %v5226_v13 = vld [vmem:[%s8314_s0 + $0x78] sm:$0xff] }
0x24f0   : > { %v4777_v14 = vpop.xlane.xlu0 %4776 }
0x24f1   : > { %6530 = vrcp.f32 %v4777_v14 }
0x24f4   : > { %v4781_v15 = vpop.permute.xlu0 %4780 }
0x24f5   : > { %6176 = vmatpush3.msra.mxu1 %v4781_v15  ;;  %v5223_v15 = vld [vmem:[%s8314_s0 + $0x60] sm:$0xff] }
0x24f6   : > { %6185 = vmatprep.subr.mxu1 %v6983_v20 }
0x24fb   : > { %v6531_v40 = vpop.eup %6530 }
0x24fc   : > { %v4779_v17 = vmul.f32 %v6531_v40, %v6529_v9  ;;  %v5219_v9 = vld [vmem:[%s8314_s0 + $0x40] sm:$0xff]  ;;  %v5225_v40 = vld [vmem:[%s8314_s0 + $0x70] sm:$0xff] }
0x24fd   : > { %v6250_v11 = vpack.c.bf16 %v5221_v10, %v5219_v9  ;;  %v5362_v9 = vld [vmem:[%s8315_s11 + $0xf8] sm:$0xff]  ;;  %v6282_v10 = vpack.c.bf16 %v5344_v7, %v5343_v6 }
0x24fe   : > { %6178 = vmatmul.mubr.msk.f32.vlgmr.msra.gmra.mrb[44].mxu1 %vm1098_vm2, %v4779_v17  ;;  %v5347_v17 = vld [vmem:[%s8315_s11 + $0x80] sm:$0xff] }
0x24ff   : > { %6186 = vmatpush3.xpose.msk.msra.mxu1 %vm1098_vm2, %v4934_v16  ;;  %6187 = vmatprep.mubr.msk.f32.mxu1 %vm6984_vm1, %v6983_v20  ;;  %v6254_v16 = vpack.c.bf16 %v5225_v40, %v5223_v15  ;;  %v5227_v15 = vld [vmem:[%s8316_s10] sm:$0x3] }
0x2500   : > { %6195 = vmatprep.subr.mxu1 %v6983_v20  ;;  %v5232_v40 = vrot.slane %v5227_v15, %v1013_v43 }
0x2502   : > { %6188 = vmatmul.mubr.msk.f32.vlgmr.msra.gmra.mrb[46].mxu1 %vm1098_vm2, %v4932_v18  ;;  %v5348_v18 = vld [vmem:[%s8315_s11 + $0x88] sm:$0xff] }
0x2503   : > { %6197 = vmatprep.mubr.msk.f32.mxu1 %vm6984_vm1, %v6983_v20  ;;  %6196 = vmatpush3.msra.mxu1 %v5098_v33  ;;  %v5350_v33 = vld [vmem:[%s8315_s11 + $0x98] sm:$0xff] }
0x25d1   : > { %v4852_v21 = vpop.f32.mrb[44].mxu1 }
0x25d2   : > { %v6179_v22 = vpop.f32.mrb[45].mxu1  ;;  %6183 = vmatmul.mubr.msk.f32.vlgmr.msra.gmra.mrb[48].mxu0 %vm1098_vm2, %v4852_v21  ;;  %v6256_v21 = vpack.c.bf16 %v5348_v18, %v5347_v17 }
0x25d3   : > { %6192 = vmatprep.mubr.msk.f32.mxu0 %vm6984_vm1, %v6983_v20  ;;  %v5332_v22 = vld [vmem:[%s8315_s11 + $0x8] sm:$0xff] }
0x25d4   : > { %6257 = vmatprep.subr.bf16.mxu1 %v6256_v21 }
0x25d5   : > { %v5005_v23 = vpop.f32.mrb[46].mxu1 }
0x25d6   : > { %v5009_v24 = vmul.f32 0.35355338, %v5005_v23  ;;  %v6189_v25 = vpop.f32.mrb[47].mxu1  ;;  %v6258_v23 = vpack.c.bf16 %v5332_v22, %v5331_v19 }
0x25d8   : > { %v5010_v47 = vadd.f32 %v5009_v24, %v7856_v46 }
0x25da   : > { %v5011_v26 = vsel %vm1098_vm2, %v5010_v47, -inf }
0x25db   : > { %5012 = vmax.xlane.f32.xlu0 %v5011_v26 }
0x25f1   : > { %5022 = vrot.lane.b32.xlu0 %v7832_v37, %s8313_s29 }
0x2668   : > { %v5013_v27 = vpop.xlane.xlu0 %5012 }
0x2669   : > { %v5014_v28 = vsub.f32 %v5010_v47, %v5013_v27  ;;  %v5767_v27 = vld [vmem:[#allocation18] ss:$0 sm:$0xff] }
0x266b   : > { %v5015_v29 = vmul.f32 1.442695, %v5014_v28 }
0x266c   : > { %v5023_v30 = vpop.permute.xlu0 %5022 }
0x266d   : > { %6532 = vpow2.f32 %v5015_v29  ;;  %6191 = vmatpush3.msra.mxu0 %v5023_v30  ;;  %v5768_v29 = vld [vmem:[#allocation19] ss:$0 sm:$0xff] }
0x2677   : > { %v6533_v31 = vpop.eup %6532 }
0x2678   : > { %v5017_v32 = vsel %vm1098_vm2, %v6533_v31, 0.0 }
0x2679   : > { %5018 = vadd.xlane.f32.xlu1 %v5017_v32  ;;  %v5349_v32 = vld [vmem:[%s8315_s11 + $0x90] sm:$0xff] }
0x26a5   : > { %v4926_v34 = vpop.f32.mrb[48].mxu0 }
0x26a6   : > { %v4930_v46 = vadd.f32 %v4926_v34, %v4688_v12  ;;  %v6184_v35 = vpop.f32.mrb[49].mxu0  ;;  %v5224_v12 = vld [vmem:[%s8314_s0 + $0x68] sm:$0xff]  ;;  %v6260_v34 = vpack.c.bf16 %v5350_v33, %v5349_v32 }
0x26a7   : > { %v6252_v14 = vpack.c.bf16 %v5226_v13, %v5224_v12  ;;  %v5334_v35 = vld [vmem:[%s8315_s11 + $0x18] sm:$0xff]  ;;  %v5345_v12 = vld [vmem:[%s8315_s11 + $0x70] sm:$0xff] }
0x26a8   : > { %v5346_v13 = vld [vmem:[%s8315_s11 + $0x78] sm:$0xff] }
0x2706   : > { %v5019_v36 = vpop.xlane.xlu1 %5018 }
0x2707   : > { %6534 = vrcp.f32 %v5019_v36 }
0x2711   : > { %v6535_v38 = vpop.eup %6534 }
0x2712   : > { %v5021_v58 = vmul.f32 %v6535_v38, %v6533_v31  ;;  %v5351_v38 = vld [vmem:[%s8315_s11 + $0xa0] sm:$0xff] }
0x2714   : > { %6193 = vmatmul.mubr.msk.f32.vlgmr.msra.gmra.mrb[50].mxu0 %vm1098_vm2, %v5021_v58  ;;  %v5352_v58 = vld [vmem:[%s8315_s11 + $0xa8] sm:$0xff] }
0x2715   : > { %5306 = vmatprep.mubr.f32.mxu0 %v6983_v20 }
0x27e7   : > { %v5094_v37 = vpop.f32.mrb[50].mxu0 }
0x27e8   : > { %v6194_v39 = vpop.f32.mrb[51].mxu0  ;;  %6198 = vmatmul.mubr.msk.f32.vlgmr.msra.gmra.mrb[48].mxu1 %vm1098_vm2, %v5094_v37  ;;  %v6264_v37 = vpack.c.bf16 %v5352_v58, %v5351_v38 }
0x27e9   : > { %6259 = vmatpush3.bf16.msra.mxu1 %v6258_v23  ;;  %v5335_v39 = vld [vmem:[%s8315_s11 + $0x20] sm:$0xff] }
0x27ea   : > { %6261 = vmatprep.subr.bf16.mxu1 %v6260_v34 }
0x28bb   : > { %v5168_v41 = vpop.f32.mrb[48].mxu1 }
0x28bc   : > { %v5172_v53 = vadd.f32 %v5168_v41, %v4930_v46  ;;  %v6199_v45 = vpop.f32.mrb[49].mxu1  ;;  %v5333_v46 = vld [vmem:[%s8315_s11 + $0x10] sm:$0xff]  ;;  %v5336_v41 = vld [vmem:[%s8315_s11 + $0x28] sm:$0xff] }
0x28bd   : > { %v6262_v36 = vpack.c.bf16 %v5334_v35, %v5333_v46  ;;  %v5354_v45 = vld [vmem:[%s8315_s11 + $0xb8] sm:$0xff] }
0x28be   : > { %v5180_v48 = vadd.f32 %v5766_v44, %v5172_v53  ;;  %v6266_v44 = vpack.c.bf16 %v5336_v41, %v5335_v39  ;;  %v5353_v53 = vld [vmem:[%s8315_s11 + $0xb0] sm:$0xff] }
0x28bf   : > { %6263 = vmatpush3.bf16.msra.mxu1 %v6262_v36  ;;  %v5770_v36 = vld [vmem:[#allocation21] ss:$0 sm:$0xff] }
0x28c0   : > { %v8012_v50 = vadd.f32 %v5180_v48, %v7790_v56  ;;  %v5214_v56 = vld [vmem:[%s8314_s0 + $0x18] sm:$0xff]  ;;  %6265 = vmatprep.subr.bf16.mxu1 %v6264_v37  ;;  %v6268_v48 = vpack.c.bf16 %v5354_v45, %v5353_v53 }
0x28c1   : > { %v6240_v60 = vpack.c.bf16 %v5214_v56, %v5212_v59  ;;  %v5340_v59 = vld [vmem:[%s8315_s11 + $0x48] sm:$0xff] }
0x28c2   : > { %v5182_v51 = vsel %vm962_vm0, %v8012_v50, 0.0 }
0x28c3   : > { %5183 = vadd.xlane.f32.xlu1 %v5182_v51  ;;  %6241 = vmatprep.subr.bf16.mxu0 %v6240_v60  ;;  %v5337_v51 = vld [vmem:[%s8315_s11 + $0x30] sm:$0xff] }
0x28c4   : > { %6243 = vmatpush1.bf16.msra.mxu0 %v6242_v63  ;;  %6267 = vmatpush3.bf16.msra.mxu1 %v6266_v44  ;;  %v5357_v60 = vld [vmem:[%s8315_s11 + $0xd0] sm:$0xff] }
0x28c5   : > { %6245 = vmatprep.subr.bf16.mxu0 %v6244_v3  ;;  %6269 = vmatprep.subr.bf16.mxu1 %v6268_v48  ;;  %v6276_v63 = vpack.c.bf16 %v5358_v61, %v5357_v60  ;;  %v5359_v3 = vld [vmem:[%s8315_s11 + $0xe0] sm:$0xff] }
0x28c8   : > { %6247 = vmatpush1.bf16.msra.mxu0 %v6246_v5  ;;  %v6280_v5 = vpack.c.bf16 %v5360_v4, %v5359_v3 }
0x28c9   : > { %6249 = vmatprep.subr.bf16.mxu0 %v6248_v8  ;;  %v5361_v8 = vld [vmem:[%s8315_s11 + $0xf0] sm:$0xff] }
0x28cc   : > { %6251 = vmatpush1.bf16.msra.mxu0 %v6250_v11  ;;  %v6284_v11 = vpack.c.bf16 %v5362_v9, %v5361_v8 }
0x28cd   : > { %6253 = vmatprep.subr.bf16.mxu0 %v6252_v14  ;;  %v6286_v14 = vpack.c.bf16 %v5346_v13, %v5345_v12 }
0x28d0   : > { %6255 = vmatpush1.bf16.msra.mxu0 %v6254_v16  ;;  %v5236_v16 = vrot.slane %v5227_v15, %v1017_v49 }
0x2950   : > { %v5184_v52 = vpop.xlane.xlu1 %5183 }
0x2951   : > { %v5185_v54 = vmul.f32 0.015625, %v5184_v52  ;;  %v5338_v52 = vld [vmem:[%s8315_s11 + $0x38] sm:$0xff] }
0x2953   : > { %v5186_v20 = vsub.f32 %v8012_v50, %v5185_v54  ;;  %v5355_v54 = vld [vmem:[%s8315_s11 + $0xc0] sm:$0xff] }
0x2955   : > { %v5187_v55 = vmul.f32 %v5186_v20, %v5186_v20 }
0x2957   : > { %v5188_v57 = vsel %vm962_vm0, %v5187_v55, 0.0  ;;  %v5356_v55 = vld [vmem:[%s8315_s11 + $0xc8] sm:$0xff] }
0x2958   : > { %5189 = vadd.xlane.f32.xlu1 %v5188_v57  ;;  %v5339_v57 = vld [vmem:[%s8315_s11 + $0x40] sm:$0xff]  ;;  %v6272_v56 = vpack.c.bf16 %v5356_v55, %v5355_v54 }
0x2959   : > { %v6274_v62 = vpack.c.bf16 %v5340_v59, %v5339_v57 }
0x29e5   : > { %v5190_v24 = vpop.xlane.xlu1 %5189 }
0x29e6   : > { %v5191_v25 = vmul.f32 0.015625, %v5190_v24 }
0x29e8   : > { %v5192_v47 = vadd.f32 1e-06, %v5191_v25 }
0x29ea   : > { %6536 = vrsqrt.f32 %v5192_v47 }
0x29f4   : > { %v6537_v26 = vpop.eup %6536 }
0x29f5   : > { %v5194_v28 = vmul.f32 %v6537_v26, %v5186_v20  ;;  %v6270_v20 = vpack.c.bf16 %v5338_v52, %v5337_v51 }
0x29f7   : > { %v5202_v30 = vmul.f32 %v5767_v27, %v5194_v28  ;;  %6271 = vmatpush3.bf16.msra.mxu1 %v6270_v20 }
0x29f8   : > { %6273 = vmatprep.subr.bf16.mxu1 %v6272_v56 }
0x29f9   : > { %v5210_v31 = vadd.f32 %v5768_v29, %v5202_v30 }
0x29fb   : > { %5769 = vmatmul.mubr.msk.f32.vlgmr.msra.gmra.mrb[52].mxu0 %vm962_vm0, %v5210_v31  ;;  %6275 = vmatpush3.bf16.msra.mxu1 %v6274_v62 }
0x29fc   : > { %6277 = vmatprep.subr.bf16.mxu1 %v6276_v63 }
0x29ff   : > { %6279 = vmatpush3.bf16.msra.mxu1 %v6278_v0 }
0x2a00   : > { %6281 = vmatprep.subr.bf16.mxu1 %v6280_v5 }
0x2a03   : > { %6283 = vmatpush3.bf16.msra.mxu1 %v6282_v10 }
0x2a04   : > { %6285 = vmatprep.subr.bf16.mxu1 %v6284_v11 }
0x2a07   : > { %6287 = vmatpush3.bf16.msra.mxu1 %v6286_v14 }
0x2ace   : > { %v5308_v17 = vpop.f32.mrb[52].mxu0 }
0x2acf   : > { %v5309_v18 = vadd.f32 %v5308_v17, %v5232_v40  ;;  %v5310_v19 = vpop.f32.mrb[53].mxu0 }
0x2ad0   : > { %v5311_v21 = vadd.f32 %v5310_v19, %v5236_v16 }
0x2ad1   : > { %v5315_v22 = vmul.f32 0.044715, %v5309_v18  ;;  %v5313_v33 = vmul.f32 0.5, %v5309_v18 }
0x2ad2   : > { %v5316_v23 = vmul.f32 0.044715, %v5311_v21  ;;  %v5314_v31 = vmul.f32 0.5, %v5311_v21 }
0x2ad3   : > { %v5317_v24 = vmul.f32 %v5315_v22, %v5309_v18 }
0x2ad4   : > { %v5318_v25 = vmul.f32 %v5316_v23, %v5311_v21 }
0x2ad5   : > { %v5319_v47 = vmul.f32 %v5317_v24, %v5309_v18 }
0x2ad6   : > { %v5320_v26 = vmul.f32 %v5318_v25, %v5311_v21 }
0x2ad7   : > { %v5321_v27 = vadd.f32 %v5319_v47, %v5309_v18 }
0x2ad8   : > { %v5322_v28 = vadd.f32 %v5320_v26, %v5311_v21 }
0x2ad9   : > { %v5323_v29 = vmul.f32 0.7978846, %v5321_v27 }
0x2ada   : > { %v5324_v30 = vmul.f32 0.7978846, %v5322_v28 }
0x2adb   : > { %6538 = vtanh.f32 %v5323_v29 }
0x2adc   : > { %6540 = vtanh.f32 %v5324_v30 }
0x2ae5   : > { %v6539_v43 = vpop.eup %6538 }
0x2ae6   : > { %v6541_v42 = vpop.eup %6540  ;;  %v5327_v49 = vadd.f32 1.0, %v6539_v43 }
0x2ae7   : > { %v5328_v32 = vadd.f32 1.0, %v6541_v42 }
0x2ae8   : > { %v5329_v46 = vmul.f32 %v5327_v49, %v5313_v33 }
0x2ae9   : > { %v5330_v34 = vmul.f32 %v5328_v32, %v5314_v31 }
0x2aeb   : > { %5434 = vmatprep.mubr.f32.mxu1 %v5330_v34 }
0x2aec   : > { %5435 = vmatmul.mubr.f32.vlgmr.msra.gmra.mrb[50].mxu1 %v5329_v46 }
0x2bbf   : > { %v5919_v35 = vpop.f32.mrb[50].mxu1 }
0x2bc0   : > { %v5920_v38 = vpop.f32.mrb[51].mxu1 }
0x2bc1   : > { %v5921_v58 = vadd.f32 %v5920_v38, %v5919_v35 }
0x2bc3   : > { %v5437_v37 = vadd.f32 %v5921_v58, %v5770_v36 }
0x2bc5   : > { %v5440_v39 = vadd.f32 %v5437_v37, %v8012_v50 }
0x2bc7   : > { %5441 = vst.msk [vmem:[%s957_s6] sm:$0xff] %vm962_vm0, %v5440_v39 }
0x2bc8 PF: > { %p40_p11 = scmp.ge.s32.totalorder %s7414_s24, 4   ;;  %s8318_s5 = smov %s6958_s26 }
0x2bc9   : > { %s8319_s26 = smov %s6962_s27  ;;  %s8320_s27 = smov %s7426_s25 }
0x2bca   : > { %s8321_s28 = smov %s7414_s24  ;;  %42 = sbr.rel (!%p40_p11) target bundleno = 27 (0x1b), region = 213 }
0x2bd1   :  { %5461 = vsyncpa [#allocation3], 1 }
0x2bd2   :  { %5463 = vsyncpa [#allocation3 + $0x1], 1 }
0x2bd3   :  { %5464 = vsyncpa [#allocation5], 1 }
0x2bd4   :  { %5465 = vsyncpa [#allocation8], 1 }
0x2bd5   :  { %5466 = vsyncpa [#allocation11], 1 }
0x2bd6   :  { %5467 = vsyncpa [#allocation14], 1 }
0x2bd7   :  { %5468 = vsyncpa [#allocation17], 1 }
0x2bd8   :  { %5469 = vsyncpa [#allocation20], 1 }

</bundles_post_ra>
